<compile_context>
chip_gen: v6e
topology: v6e:2x2x1
jax: 0.10.0
libtpu: 0.0.40
codegen_flags: <defaults>
</compile_context>

<pallas_src>
import jax
import jax.numpy as jnp
from jax.experimental import pallas as pl
from jax.experimental.pallas import tpu as pltpu

_VMEM_BUDGET = 12 * 1024 * 1024      # per-step working-set target (estimate)
_VMEM_LIMIT = 32 * 1024 * 1024       # scoped VMEM requested from Mosaic (safe on v5e/v6e/v7x)


def _round_up(v, m):
    return ((v + m - 1) // m) * m


# ----------------------------------------------------------------------------
# Generic valid KxK stride-1 conv: patch matrix + one MXU matmul per row tile.
# ----------------------------------------------------------------------------
def _make_conv_kernel(K, Wp, TR, relu):
    """x_ref: (1,1,Lw,Cin) flattened window covering TR output rows + halo,
    w_ref: (K*K*Cin, Cout), b_ref: (1, Cout), o_ref: (1,1,TR*Wp,Cout)."""
    L = TR * Wp

    def kernel(x_ref, w_ref, b_ref, o_ref):
        x = x_ref[0, 0]                                        # (Lw, Cin)
        parts = [x[ky * Wp + kx: ky * Wp + kx + L, :]
                 for ky in range(K) for kx in range(K)]
        patches = parts[0] if len(parts) == 1 else jnp.concatenate(parts, axis=-1)
        acc = jnp.dot(patches, w_ref[...],
                      preferred_element_type=jnp.float32)      # (L, Cout)
        acc = acc + b_ref[...]
        if relu:
            acc = jnp.maximum(acc, 0.0)
        o_ref[0, 0] = acc

    return kernel


def _pick_tile_rows(Ho, Wp, Cin, Cout, K, budget):
    """Largest divisor of Ho whose per-step VMEM working set fits `budget`."""
    kkc = K * K * Cin
    cin_p = _round_up(Cin, 128)
    cout_p = _round_up(Cout, 128)
    kkc_p = _round_up(kkc, 128)
    w_b = _round_up(kkc, 8) * cout_p * 4

    def est(tr):
        L = tr * Wp
        Lw = L + (K - 1) * (Wp + 1)
        in_b = _round_up(Lw, 8) * cin_p * 4
        out_b = _round_up(L, 8) * cout_p * 4
        patch = _round_up(L, 8) * kkc_p * 4
        # pipeline buffers + loaded value + parts/patch copies (conservative)
        return 3 * in_b + 3 * out_b + 2 * patch + w_b

    for tr in range(Ho, 0, -1):
        if Ho % tr == 0 and est(tr) <= budget:
            return tr
    return 1


def _valid_conv(x, w_kkcc, bias, relu, out_rows):
    """Valid KxK stride-1 NHWC conv (fused bias + optional ReLU).

    x        : (B, Hp, Wp, Cin)  spatially padded input; callers provide at
               least `out_rows + K - 1` rows (one extra slack row avoids any
               extra padding copy for the flattened-spatial trick).
    w_kkcc   : (K, K, Cin, Cout)
    bias     : (Cout,)
    out_rows : number of output rows to compute (Ho).
    Returns (B, out_rows, Wp-K+1, Cout).
    """
    B, Hp, Wp, Cin = x.shape
    K = w_kkcc.shape[0]
    Cout = w_kkcc.shape[-1]
    Ho = out_rows
    Wo = Wp - K + 1
    assert Hp >= Ho + K - 1 and Wo >= 1

    TR = _pick_tile_rows(Ho, Wp, Cin, Cout, K, _VMEM_BUDGET)
    n_tiles = Ho // TR
    L = TR * Wp                       # flattened outputs per tile (incl. wrap cols)
    halo = (K - 1) * (Wp + 1)         # extra flattened elements needed past a tile
    need = (n_tiles - 1) * TR * Wp + L + halo

    xf = x.reshape(B, Hp * Wp, Cin)   # contiguous reshape: no copy
    if need > Hp * Wp:                # only if the caller gave no slack row
        xf = jnp.pad(xf, ((0, 0), (0, need - Hp * Wp), (0, 0)))

    if n_tiles == 1:
        # Zero-copy path: the kernel reads the activation where it lives.
        Lw = xf.shape[1]
        x_tiles = xf[:, None]                                  # (B,1,Lw,Cin)
    else:
        # Multi-tile path: materialize minimally overlapping row windows.
        Lw = L + halo
        x_tiles = jnp.stack(
            [xf[:, t * TR * Wp: t * TR * Wp + Lw] for t in range(n_tiles)],
            axis=1)                                            # (B,T,Lw,Cin)

    wf = w_kkcc.reshape(K * K * Cin, Cout)
    bf = bias.reshape(1, Cout)

    out = pl.pallas_call(
        _make_conv_kernel(K, Wp, TR, relu),
        out_shape=jax.ShapeDtypeStruct((B, n_tiles, L, Cout), jnp.float32),
        grid=(B, n_tiles),
        in_specs=[
            pl.BlockSpec((1, 1, Lw, Cin), lambda b, t: (b, t, 0, 0)),
            pl.BlockSpec((K * K * Cin, Cout), lambda b, t: (0, 0)),
            pl.BlockSpec((1, Cout), lambda b, t: (0, 0)),
        ],
        out_specs=pl.BlockSpec((1, 1, L, Cout), lambda b, t: (b, t, 0, 0)),
        compiler_params=pltpu.CompilerParams(
            dimension_semantics=("parallel", "parallel"),
            vmem_limit_bytes=_VMEM_LIMIT),
    )(x_tiles, wf, bf)

    # drop the K-1 wrap-around columns produced by the flattened-spatial trick
    return out.reshape(B, Ho, Wp, Cout)[:, :, :Wo, :]


# ----------------------------------------------------------------------------
# Fused concat + 1x1 conv + ReLU in channels-first layout (lane-dense output).
# ----------------------------------------------------------------------------
def _fused_concat_pointwise_kernel(x1_ref, x2_ref, w1_ref, w2_ref, b_ref, o_ref):
    acc = jnp.dot(w1_ref[...], x1_ref[0], preferred_element_type=jnp.float32)
    acc = acc + jnp.dot(w2_ref[...], x2_ref[0], preferred_element_type=jnp.float32)
    acc = acc + b_ref[...]
    o_ref[0] = jnp.maximum(acc, 0.0)


def _pick_lane_tile(total, cap):
    if total <= cap:
        return total
    d = (cap // 128) * 128
    while d >= 128:
        if total % d == 0:
            return d
        d -= 128
    return total


def _fused_concat_pointwise(x1, x2, w1, w2, bias):
    """relu(w1 @ x1 + w2 @ x2 + b) with spatial on lanes.

    x1, x2 : (B, C, N)   w1, w2 : (Cout, C)   bias : (Cout,)
    Returns (B, Cout, N).
    """
    B, C, N = x1.shape
    Cout = w1.shape[0]
    bytes_per_lane = (3 * 2 * _round_up(C, 8) + 3 * _round_up(Cout, 8)) * 4
    TN = _pick_lane_tile(N, max(128, _VMEM_BUDGET // bytes_per_lane))
    n_t = N // TN

    out = pl.pallas_call(
        _fused_concat_pointwise_kernel,
        out_shape=jax.ShapeDtypeStruct((B, Cout, N), jnp.float32),
        grid=(B, n_t),
        in_specs=[
            pl.BlockSpec((1, C, TN), lambda b, t: (b, 0, t)),
            pl.BlockSpec((1, C, TN), lambda b, t: (b, 0, t)),
            pl.BlockSpec((Cout, C), lambda b, t: (0, 0)),
            pl.BlockSpec((Cout, C), lambda b, t: (0, 0)),
            pl.BlockSpec((Cout, 1), lambda b, t: (0, 0)),
        ],
        out_specs=pl.BlockSpec((1, Cout, TN), lambda b, t: (b, 0, t)),
        compiler_params=pltpu.CompilerParams(
            dimension_semantics=("parallel", "parallel"),
            vmem_limit_bytes=_VMEM_LIMIT),
    )(x1, x2, w1, w2, bias.reshape(Cout, 1))
    return out


# ----------------------------------------------------------------------------
# Glue rearrangements (pure data movement).
# ----------------------------------------------------------------------------
def _space_to_depth(x, pad, extra_rows=0):
    """Zero-pad (top `pad`, bottom `pad + 2*extra_rows`, left/right `pad`) and
    fold 2x2 spatial blocks into channels.  `extra_rows` zero rows at the
    bottom provide the flattened-spatial slack for _valid_conv."""
    B, H, W, C = x.shape
    xp = jnp.pad(x, ((0, 0), (pad, pad + 2 * extra_rows), (pad, pad), (0, 0)))
    Hp, Wp = H + 2 * pad + 2 * extra_rows, W + 2 * pad
    assert Hp % 2 == 0 and Wp % 2 == 0
    xs = xp.reshape(B, Hp // 2, 2, Wp // 2, 2, C)
    xs = jnp.transpose(xs, (0, 1, 3, 2, 4, 5))
    return xs.reshape(B, Hp // 2, Wp // 2, 4 * C)


def _depth_to_space_nchw(z, s):
    """Polyphase unpack straight to NCHW: (B,Hl,Wl,s*s*C) -> (B,C,Hl*s,Wl*s)."""
    B, Hl, Wl, Cs = z.shape
    C = Cs // (s * s)
    z = z.reshape(B, Hl, Wl, s, s, C)
    z = jnp.transpose(z, (0, 5, 1, 3, 2, 4))           # (B, C, Hl, s, Wl, s)
    return z.reshape(B, C, Hl * s, Wl * s)


# ----------------------------------------------------------------------------
# One-time weight preprocessing (hoisted out of the forward pass).
# ----------------------------------------------------------------------------
def _prep_conv_s2d(w_pt, b, K):
    """Conv2d weight (Cout,Cin,K,K), stride 2 -> stride-1 weight over the
    space-to-depth input: (Ks, Ks, 4*Cin, Cout) with Ks = ceil(K/2)."""
    Cout, Cin = w_pt.shape[0], w_pt.shape[1]
    Ks = (K + 1) // 2
    wt = jnp.transpose(w_pt, (2, 3, 1, 0))                     # (K,K,Cin,Cout)
    w = jnp.zeros((Ks, Ks, 2, 2, Cin, Cout), jnp.float32)
    for u in range(Ks):
        for a in range(2):
            ky = 2 * u + a
            if ky >= K:
                continue
            for v in range(Ks):
                for c in range(2):
                    kx = 2 * v + c
                    if kx >= K:
                        continue
                    w = w.at[u, v, a, c].set(wt[ky, kx])
    return w.reshape(Ks, Ks, 4 * Cin, Cout), b


def _prep_deconv_poly(w_pt, b, K, s):
    """ConvTranspose2d weight (Cin,Cout,K,K) with K==2*s, pad==s//2, stride s
    -> polyphase 3x3 stride-1 weight over the 1-padded low-res input:
    (3, 3, Cin, s*s*Cout); phase (ry,rx) lives at channel (ry*s+rx)*Cout+co."""
    p = s // 2
    Cin, Cout = w_pt.shape[0], w_pt.shape[1]
    wt = jnp.transpose(w_pt, (2, 3, 0, 1))                     # (K,K,Cin,Cout)
    w = jnp.zeros((3, 3, Cin, s, s, Cout), jnp.float32)
    for ry in range(s):
        ay = ry + p
        ytaps = [(1, ay)] + ([(0, s + ay)] if ay < s else [(2, ay - s)])
        for rx in range(s):
            ax = rx + p
            xtaps = [(1, ax)] + ([(0, s + ax)] if ax < s else [(2, ax - s)])
            for dy, ky in ytaps:
                for dx, kx in xtaps:
                    w = w.at[dy, dx, :, ry, rx, :].set(wt[ky, kx])
    return w.reshape(3, 3, Cin, s * s * Cout), jnp.tile(b, s * s)


def prepare_params(params):
    """PyTorch-layout params -> kernel-ready layouts (called once)."""
    w1, b1 = _prep_conv_s2d(*params['conv1'], K=7)       # 4x4 conv, Cin 12
    w2, b2 = _prep_conv_s2d(*params['conv2'], K=5)       # 3x3 conv, Cin 256
    wu1, bu1 = _prep_deconv_poly(*params['up_1'], K=4, s=2)   # 3x3, Cout 128
    wu2, bu2 = _prep_deconv_poly(*params['up_2'], K=8, s=4)   # 3x3, Cout 512
    w12 = params['up_12'][0][:, :, 0, 0]                 # (32, 64) = (out, in)
    b12 = params['up_12'][1]
    return dict(conv1=(w1, b1), conv2=(w2, b2),
                up_1=(wu1, bu1), up_2=(wu2, bu2),
                up_12=(w12[:, :32], w12[:, 32:], b12))


def init_params(key):
    """Deterministic synthetic parameters in PyTorch layouts."""
    ks = iter(jax.random.split(key, 16))

    def conv_p(cout, cin, k):
        w = jax.random.normal(next(ks), (cout, cin, k, k), jnp.float32) * 0.05
        b = jax.random.normal(next(ks), (cout,), jnp.float32) * 0.05
        return (w, b)

    def deconv_p(cin, cout, k):
        w = jax.random.normal(next(ks), (cin, cout, k, k), jnp.float32) * 0.05
        b = jax.random.normal(next(ks), (cout,), jnp.float32) * 0.05
        return (w, b)

    return dict(conv1=conv_p(64, 3, 7), up_1=deconv_p(64, 32, 4),
                conv2=conv_p(128, 64, 5), up_2=deconv_p(128, 32, 8),
                up_12=conv_p(32, 64, 1))


# ----------------------------------------------------------------------------
# Full forward pass (matches stem_block.forward).
# ----------------------------------------------------------------------------
@jax.jit
def stem_block_forward(prepared, x):
    """x: (B, 3, H, W) NCHW float32. Returns (conv1, conv2, up_12) in NCHW."""
    xh = jnp.transpose(x, (0, 2, 3, 1)).astype(jnp.float32)    # NHWC
    B, H, W, _ = xh.shape

    # conv1: Conv2d(3,64,k=7,s=2,p=3)+ReLU  via space-to-depth + 4x4 conv
    conv1 = _valid_conv(_space_to_depth(xh, pad=3, extra_rows=1),
                        *prepared['conv1'], relu=True,
                        out_rows=H // 2)                        # (B,H/2,W/2,64)

    # up_1: ConvTranspose2d(64,32,k=4,s=2,p=1)+ReLU  via polyphase 3x3 + d2s
    z1 = _valid_conv(jnp.pad(conv1, ((0, 0), (1, 2), (1, 1), (0, 0))),
                     *prepared['up_1'], relu=True,
                     out_rows=H // 2)                           # (B,H/2,W/2,128)
    up1_chw = _depth_to_space_nchw(z1, 2).reshape(B, 32, H * W)

    # conv2: Conv2d(64,128,k=5,s=2,p=2)+ReLU  via space-to-depth + 3x3 conv
    conv2 = _valid_conv(_space_to_depth(conv1, pad=2, extra_rows=1),
                        *prepared['conv2'], relu=True,
                        out_rows=H // 4)                        # (B,H/4,W/4,128)

    # up_2: ConvTranspose2d(128,32,k=8,s=4,p=2)+ReLU  via polyphase 3x3 + d2s
    z2 = _valid_conv(jnp.pad(conv2, ((0, 0), (1, 2), (1, 1), (0, 0))),
                     *prepared['up_2'], relu=True,
                     out_rows=H // 4)                           # (B,H/4,W/4,512)
    up2_chw = _depth_to_space_nchw(z2, 4).reshape(B, 32, H * W)

    # concat[:, :32]=up_1, concat[:, 32:]=up_2 ; up_12 = 1x1 conv + ReLU
    # -> fused, channels-first, emits NCHW directly (no concat materialized).
    up_12 = _fused_concat_pointwise(up1_chw, up2_chw,
                                    *prepared['up_12']).reshape(B, 32, H, W)

    to_nchw = lambda t: jnp.transpose(t, (0, 3, 1, 2))
    return to_nchw(conv1), to_nchw(conv2), up_12


# ----------------------------------------------------------------------------
# Pure-XLA reference of the original PyTorch module (for self-check).
# ----------------------------------------------------------------------------
def _ref_forward(params, x):
    relu = lambda t: jnp.maximum(t, 0.0)
    hp = jax.lax.Precision.HIGHEST

    def conv(inp, w, b, stride, pad):
        y = jax.lax.conv_general_dilated(
            inp, w, window_strides=(stride, stride),
            padding=[(pad, pad), (pad, pad)],
            dimension_numbers=('NCHW', 'OIHW', 'NCHW'), precision=hp)
        return y + b[None, :, None, None]

    def deconv(inp, w, b, stride, pad):
        k = w.shape[-1]
        wf = jnp.transpose(jnp.flip(w, (-2, -1)), (1, 0, 2, 3))
        y = jax.lax.conv_general_dilated(
            inp, wf, window_strides=(1, 1),
            padding=[(k - 1 - pad, k - 1 - pad)] * 2,
            lhs_dilation=(stride, stride),
            dimension_numbers=('NCHW', 'OIHW', 'NCHW'), precision=hp)
        return y + b[None, :, None, None]

    conv1 = relu(conv(x, *params['conv1'], 2, 3))
    up_1 = relu(deconv(conv1, *params['up_1'], 2, 1))
    conv2 = relu(conv(conv1, *params['conv2'], 2, 2))
    up_2 = relu(deconv(conv2, *params['up_2'], 4, 2))
    concat = jnp.concatenate([up_1, up_2], axis=1)
    up_12 = relu(conv(concat, *params['up_12'], 1, 0))
    return conv1, conv2, up_12


if __name__ == "__main__":
    key = jax.random.PRNGKey(0)
    kx, kp = jax.random.split(key)
    B, H, W = 2, 16, 16
    x = jax.random.normal(kx, (B, 3, H, W), jnp.float32)

    params = init_params(kp)
    prepared = prepare_params(params)

    conv1, conv2, up_12 = stem_block_forward(prepared, x)
    jax.block_until_ready((conv1, conv2, up_12))

    assert conv1.shape == (B, 64, H // 2, W // 2), conv1.shape
    assert conv2.shape == (B, 128, H // 4, W // 4), conv2.shape
    assert up_12.shape == (B, 32, H, W), up_12.shape

    # numerical self-check against an XLA reference of the original module
    r1, r2, r12 = _ref_forward(params, x)
    for got, ref, name in ((conv1, r1, "conv1"), (conv2, r2, "conv2"),
                           (up_12, r12, "up_12")):
        assert bool(jnp.all(jnp.isfinite(got))), name
        err = float(jnp.max(jnp.abs(got - ref)))
        assert err < 3e-2, (name, err)

    print("KERNEL_OK")
</pallas_src>

<mosaic_0001>
module attributes {stable_mosaic.version = 11 : i64} {
  func.func @kernel(%arg0: i32, %arg1: i32, %arg2: memref<1x1x132x12xf32, #tpu.memory_space<vmem>>, %arg3: memref<192x64xf32, #tpu.memory_space<vmem>>, %arg4: memref<1x64xf32, #tpu.memory_space<vmem>>, %arg5: memref<1x1x88x64xf32, #tpu.memory_space<vmem>>) attributes {dimension_semantics = [#tpu.dimension_semantics<parallel>, #tpu.dimension_semantics<parallel>], iteration_bounds = array<i64: 2, 1>, scalar_prefetch = 0 : i64, scratch_operands = 0 : i64, tpu.core_type = #tpu.core_type<tc>, window_params = [{transform_indices = @transform_0, window_bounds = array<i64: 1, 1, 132, 12>}, {pipeline_mode = #tpu.pipeline_mode<synchronous>, transform_indices = @transform_1, window_bounds = array<i64: 192, 64>}, {pipeline_mode = #tpu.pipeline_mode<synchronous>, transform_indices = @transform_2, window_bounds = array<i64: 1, 64>}, {transform_indices = @transform_3, window_bounds = array<i64: 1, 1, 88, 64>}]} {
    %c0 = arith.constant 0 : index
    %c0_0 = arith.constant 0 : index
    %c0_1 = arith.constant 0 : index
    %c0_2 = arith.constant 0 : index
    %0 = vector.load %arg2[%c0, %c0_0, %c0_1, %c0_2] : memref<1x1x132x12xf32, #tpu.memory_space<vmem>>, vector<1x1x132x12xf32>
    %1 = vector.shape_cast %0 : vector<1x1x132x12xf32> to vector<132x12xf32>
    %2 = vector.extract_strided_slice %1 {offsets = [0, 0], sizes = [88, 12], strides = [1, 1]} : vector<132x12xf32> to vector<88x12xf32>
    %3 = vector.extract_strided_slice %1 {offsets = [1, 0], sizes = [88, 12], strides = [1, 1]} : vector<132x12xf32> to vector<88x12xf32>
    %4 = vector.extract_strided_slice %1 {offsets = [2, 0], sizes = [88, 12], strides = [1, 1]} : vector<132x12xf32> to vector<88x12xf32>
    %5 = vector.extract_strided_slice %1 {offsets = [3, 0], sizes = [88, 12], strides = [1, 1]} : vector<132x12xf32> to vector<88x12xf32>
    %6 = vector.extract_strided_slice %1 {offsets = [11, 0], sizes = [88, 12], strides = [1, 1]} : vector<132x12xf32> to vector<88x12xf32>
    %7 = vector.extract_strided_slice %1 {offsets = [12, 0], sizes = [88, 12], strides = [1, 1]} : vector<132x12xf32> to vector<88x12xf32>
    %8 = vector.extract_strided_slice %1 {offsets = [13, 0], sizes = [88, 12], strides = [1, 1]} : vector<132x12xf32> to vector<88x12xf32>
    %9 = vector.extract_strided_slice %1 {offsets = [14, 0], sizes = [88, 12], strides = [1, 1]} : vector<132x12xf32> to vector<88x12xf32>
    %10 = vector.extract_strided_slice %1 {offsets = [22, 0], sizes = [88, 12], strides = [1, 1]} : vector<132x12xf32> to vector<88x12xf32>
    %11 = vector.extract_strided_slice %1 {offsets = [23, 0], sizes = [88, 12], strides = [1, 1]} : vector<132x12xf32> to vector<88x12xf32>
    %12 = vector.extract_strided_slice %1 {offsets = [24, 0], sizes = [88, 12], strides = [1, 1]} : vector<132x12xf32> to vector<88x12xf32>
    %13 = vector.extract_strided_slice %1 {offsets = [25, 0], sizes = [88, 12], strides = [1, 1]} : vector<132x12xf32> to vector<88x12xf32>
    %14 = vector.extract_strided_slice %1 {offsets = [33, 0], sizes = [88, 12], strides = [1, 1]} : vector<132x12xf32> to vector<88x12xf32>
    %15 = vector.extract_strided_slice %1 {offsets = [34, 0], sizes = [88, 12], strides = [1, 1]} : vector<132x12xf32> to vector<88x12xf32>
    %16 = vector.extract_strided_slice %1 {offsets = [35, 0], sizes = [88, 12], strides = [1, 1]} : vector<132x12xf32> to vector<88x12xf32>
    %17 = vector.extract_strided_slice %1 {offsets = [36, 0], sizes = [88, 12], strides = [1, 1]} : vector<132x12xf32> to vector<88x12xf32>
    %18 = tpu.concatenate %2, %3, %4, %5, %6, %7, %8, %9, %10, %11, %12, %13, %14, %15, %16, %17 in 1 : vector<88x12xf32>, vector<88x12xf32>, vector<88x12xf32>, vector<88x12xf32>, vector<88x12xf32>, vector<88x12xf32>, vector<88x12xf32>, vector<88x12xf32>, vector<88x12xf32>, vector<88x12xf32>, vector<88x12xf32>, vector<88x12xf32>, vector<88x12xf32>, vector<88x12xf32>, vector<88x12xf32>, vector<88x12xf32> -> vector<88x192xf32>
    %c0_3 = arith.constant 0 : index
    %c0_4 = arith.constant 0 : index
    %19 = vector.load %arg3[%c0_3, %c0_4] : memref<192x64xf32, #tpu.memory_space<vmem>>, vector<192x64xf32>
    %cst = arith.constant dense<0.000000e+00> : vector<88x64xf32>
    %20 = tpu.matmul %18, %19, %cst {dimension_numbers = #tpu.dot_dimension_numbers<[1], [0], [0], [1], [0, 0, 1, 1], [], []>} : vector<88x192xf32>, vector<192x64xf32>, vector<88x64xf32> -> vector<88x64xf32>
    %c0_5 = arith.constant 0 : index
    %c0_6 = arith.constant 0 : index
    %21 = vector.load %arg4[%c0_5, %c0_6] : memref<1x64xf32, #tpu.memory_space<vmem>>, vector<1x64xf32>
    %22 = vector.broadcast %21 : vector<1x64xf32> to vector<88x64xf32>
    %23 = arith.addf %20, %22 : vector<88x64xf32>
    %cst_7 = arith.constant 0.000000e+00 : f32
    %24 = vector.broadcast %cst_7 : f32 to vector<88x64xf32>
    %25 = arith.maximumf %23, %24 : vector<88x64xf32>
    %c0_8 = arith.constant 0 : index
    %c0_9 = arith.constant 0 : index
    %c0_10 = arith.constant 0 : index
    %c0_11 = arith.constant 0 : index
    %26 = vector.load %arg5[%c0_8, %c0_9, %c0_10, %c0_11] : memref<1x1x88x64xf32, #tpu.memory_space<vmem>>, vector<1x1x88x64xf32>
    %27 = vector.shape_cast %26 : vector<1x1x88x64xf32> to vector<88x64xf32>
    %28 = vector.shape_cast %25 : vector<88x64xf32> to vector<1x1x88x64xf32>
    tpu.vector_store %arg5[%c0_8, %c0_9, %c0_10, %c0_11], %28 {strides = array<i32>} : memref<1x1x88x64xf32, #tpu.memory_space<vmem>>, vector<1x1x88x64xf32>,
    return
  }
  func.func @transform_0(%arg0: i32, %arg1: i32) -> (i32, i32, i32, i32) {
    %c0_i32 = arith.constant 0 : i32
    %c0_i32_0 = arith.constant 0 : i32
    %c0_i32_1 = arith.constant 0 : i32
    return %arg0, %arg1, %c0_i32, %c0_i32_0 : i32, i32, i32, i32
  }
  func.func @transform_1(%arg0: i32, %arg1: i32) -> (i32, i32) {
    %c0_i32 = arith.constant 0 : i32
    %c0_i32_0 = arith.constant 0 : i32
    %c0_i32_1 = arith.constant 0 : i32
    return %c0_i32, %c0_i32_0 : i32, i32
  }
  func.func @transform_2(%arg0: i32, %arg1: i32) -> (i32, i32) {
    %c0_i32 = arith.constant 0 : i32
    %c0_i32_0 = arith.constant 0 : i32
    %c0_i32_1 = arith.constant 0 : i32
    return %c0_i32, %c0_i32_0 : i32, i32
  }
  func.func @transform_3(%arg0: i32, %arg1: i32) -> (i32, i32, i32, i32) {
    %c0_i32 = arith.constant 0 : i32
    %c0_i32_0 = arith.constant 0 : i32
    %c0_i32_1 = arith.constant 0 : i32
    return %arg0, %arg1, %c0_i32, %c0_i32_0 : i32, i32, i32, i32
  }
}

module attributes {stable_mosaic.version = 11 : i64} {
  func.func @kernel(%arg0: i32, %arg1: i32, %arg2: memref<1x1x42x256xf32, #tpu.memory_space<vmem>>, %arg3: memref<2304x128xf32, #tpu.memory_space<vmem>>, %arg4: memref<1x128xf32, #tpu.memory_space<vmem>>, %arg5: memref<1x1x24x128xf32, #tpu.memory_space<vmem>>) attributes {dimension_semantics = [#tpu.dimension_semantics<parallel>, #tpu.dimension_semantics<parallel>], iteration_bounds = array<i64: 2, 1>, scalar_prefetch = 0 : i64, scratch_operands = 0 : i64, tpu.core_type = #tpu.core_type<tc>, window_params = [{transform_indices = @transform_0, window_bounds = array<i64: 1, 1, 42, 256>}, {pipeline_mode = #tpu.pipeline_mode<synchronous>, transform_indices = @transform_1, window_bounds = array<i64: 2304, 128>}, {pipeline_mode = #tpu.pipeline_mode<synchronous>, transform_indices = @transform_2, window_bounds = array<i64: 1, 128>}, {transform_indices = @transform_3, window_bounds = array<i64: 1, 1, 24, 128>}]} {
    %c0 = arith.constant 0 : index
    %c0_0 = arith.constant 0 : index
    %c0_1 = arith.constant 0 : index
    %c0_2 = arith.constant 0 : index
    %0 = vector.load %arg2[%c0, %c0_0, %c0_1, %c0_2] : memref<1x1x42x256xf32, #tpu.memory_space<vmem>>, vector<1x1x42x256xf32>
    %1 = vector.shape_cast %0 : vector<1x1x42x256xf32> to vector<42x256xf32>
    %2 = vector.extract_strided_slice %1 {offsets = [0, 0], sizes = [24, 256], strides = [1, 1]} : vector<42x256xf32> to vector<24x256xf32>
    %3 = vector.extract_strided_slice %1 {offsets = [1, 0], sizes = [24, 256], strides = [1, 1]} : vector<42x256xf32> to vector<24x256xf32>
    %4 = vector.extract_strided_slice %1 {offsets = [2, 0], sizes = [24, 256], strides = [1, 1]} : vector<42x256xf32> to vector<24x256xf32>
    %5 = vector.extract_strided_slice %1 {offsets = [6, 0], sizes = [24, 256], strides = [1, 1]} : vector<42x256xf32> to vector<24x256xf32>
    %6 = vector.extract_strided_slice %1 {offsets = [7, 0], sizes = [24, 256], strides = [1, 1]} : vector<42x256xf32> to vector<24x256xf32>
    %7 = vector.extract_strided_slice %1 {offsets = [8, 0], sizes = [24, 256], strides = [1, 1]} : vector<42x256xf32> to vector<24x256xf32>
    %8 = vector.extract_strided_slice %1 {offsets = [12, 0], sizes = [24, 256], strides = [1, 1]} : vector<42x256xf32> to vector<24x256xf32>
    %9 = vector.extract_strided_slice %1 {offsets = [13, 0], sizes = [24, 256], strides = [1, 1]} : vector<42x256xf32> to vector<24x256xf32>
    %10 = vector.extract_strided_slice %1 {offsets = [14, 0], sizes = [24, 256], strides = [1, 1]} : vector<42x256xf32> to vector<24x256xf32>
    %11 = tpu.concatenate %2, %3, %4, %5, %6, %7, %8, %9, %10 in 1 : vector<24x256xf32>, vector<24x256xf32>, vector<24x256xf32>, vector<24x256xf32>, vector<24x256xf32>, vector<24x256xf32>, vector<24x256xf32>, vector<24x256xf32>, vector<24x256xf32> -> vector<24x2304xf32>
    %c0_3 = arith.constant 0 : index
    %c0_4 = arith.constant 0 : index
    %12 = vector.load %arg3[%c0_3, %c0_4] : memref<2304x128xf32, #tpu.memory_space<vmem>>, vector<2304x128xf32>
    %cst = arith.constant dense<0.000000e+00> : vector<24x128xf32>
    %13 = tpu.matmul %11, %12, %cst {dimension_numbers = #tpu.dot_dimension_numbers<[1], [0], [0], [1], [0, 0, 1, 1], [], []>} : vector<24x2304xf32>, vector<2304x128xf32>, vector<24x128xf32> -> vector<24x128xf32>
    %c0_5 = arith.constant 0 : index
    %c0_6 = arith.constant 0 : index
    %14 = vector.load %arg4[%c0_5, %c0_6] : memref<1x128xf32, #tpu.memory_space<vmem>>, vector<1x128xf32>
    %15 = vector.broadcast %14 : vector<1x128xf32> to vector<24x128xf32>
    %16 = arith.addf %13, %15 : vector<24x128xf32>
    %cst_7 = arith.constant 0.000000e+00 : f32
    %17 = vector.broadcast %cst_7 : f32 to vector<24x128xf32>
    %18 = arith.maximumf %16, %17 : vector<24x128xf32>
    %c0_8 = arith.constant 0 : index
    %c0_9 = arith.constant 0 : index
    %c0_10 = arith.constant 0 : index
    %c0_11 = arith.constant 0 : index
    %19 = vector.load %arg5[%c0_8, %c0_9, %c0_10, %c0_11] : memref<1x1x24x128xf32, #tpu.memory_space<vmem>>, vector<1x1x24x128xf32>
    %20 = vector.shape_cast %19 : vector<1x1x24x128xf32> to vector<24x128xf32>
    %21 = vector.shape_cast %18 : vector<24x128xf32> to vector<1x1x24x128xf32>
    tpu.vector_store %arg5[%c0_8, %c0_9, %c0_10, %c0_11], %21 {strides = array<i32>} : memref<1x1x24x128xf32, #tpu.memory_space<vmem>>, vector<1x1x24x128xf32>,
    return
  }
  func.func @transform_0(%arg0: i32, %arg1: i32) -> (i32, i32, i32, i32) {
    %c0_i32 = arith.constant 0 : i32
    %c0_i32_0 = arith.constant 0 : i32
    %c0_i32_1 = arith.constant 0 : i32
    return %arg0, %arg1, %c0_i32, %c0_i32_0 : i32, i32, i32, i32
  }
  func.func @transform_1(%arg0: i32, %arg1: i32) -> (i32, i32) {
    %c0_i32 = arith.constant 0 : i32
    %c0_i32_0 = arith.constant 0 : i32
    %c0_i32_1 = arith.constant 0 : i32
    return %c0_i32, %c0_i32_0 : i32, i32
  }
  func.func @transform_2(%arg0: i32, %arg1: i32) -> (i32, i32) {
    %c0_i32 = arith.constant 0 : i32
    %c0_i32_0 = arith.constant 0 : i32
    %c0_i32_1 = arith.constant 0 : i32
    return %c0_i32, %c0_i32_0 : i32, i32
  }
  func.func @transform_3(%arg0: i32, %arg1: i32) -> (i32, i32, i32, i32) {
    %c0_i32 = arith.constant 0 : i32
    %c0_i32_0 = arith.constant 0 : i32
    %c0_i32_1 = arith.constant 0 : i32
    return %arg0, %arg1, %c0_i32, %c0_i32_0 : i32, i32, i32, i32
  }
}

module attributes {stable_mosaic.version = 11 : i64} {
  func.func @kernel(%arg0: i32, %arg1: i32, %arg2: memref<1x1x42x128xf32, #tpu.memory_space<vmem>>, %arg3: memref<1152x512xf32, #tpu.memory_space<vmem>>, %arg4: memref<1x512xf32, #tpu.memory_space<vmem>>, %arg5: memref<1x1x24x512xf32, #tpu.memory_space<vmem>>) attributes {dimension_semantics = [#tpu.dimension_semantics<parallel>, #tpu.dimension_semantics<parallel>], iteration_bounds = array<i64: 2, 1>, scalar_prefetch = 0 : i64, scratch_operands = 0 : i64, tpu.core_type = #tpu.core_type<tc>, window_params = [{transform_indices = @transform_0, window_bounds = array<i64: 1, 1, 42, 128>}, {pipeline_mode = #tpu.pipeline_mode<synchronous>, transform_indices = @transform_1, window_bounds = array<i64: 1152, 512>}, {pipeline_mode = #tpu.pipeline_mode<synchronous>, transform_indices = @transform_2, window_bounds = array<i64: 1, 512>}, {transform_indices = @transform_3, window_bounds = array<i64: 1, 1, 24, 512>}]} {
    %c0 = arith.constant 0 : index
    %c0_0 = arith.constant 0 : index
    %c0_1 = arith.constant 0 : index
    %c0_2 = arith.constant 0 : index
    %0 = vector.load %arg2[%c0, %c0_0, %c0_1, %c0_2] : memref<1x1x42x128xf32, #tpu.memory_space<vmem>>, vector<1x1x42x128xf32>
    %1 = vector.shape_cast %0 : vector<1x1x42x128xf32> to vector<42x128xf32>
    %2 = vector.extract_strided_slice %1 {offsets = [0, 0], sizes = [24, 128], strides = [1, 1]} : vector<42x128xf32> to vector<24x128xf32>
    %3 = vector.extract_strided_slice %1 {offsets = [1, 0], sizes = [24, 128], strides = [1, 1]} : vector<42x128xf32> to vector<24x128xf32>
    %4 = vector.extract_strided_slice %1 {offsets = [2, 0], sizes = [24, 128], strides = [1, 1]} : vector<42x128xf32> to vector<24x128xf32>
    %5 = vector.extract_strided_slice %1 {offsets = [6, 0], sizes = [24, 128], strides = [1, 1]} : vector<42x128xf32> to vector<24x128xf32>
    %6 = vector.extract_strided_slice %1 {offsets = [7, 0], sizes = [24, 128], strides = [1, 1]} : vector<42x128xf32> to vector<24x128xf32>
    %7 = vector.extract_strided_slice %1 {offsets = [8, 0], sizes = [24, 128], strides = [1, 1]} : vector<42x128xf32> to vector<24x128xf32>
    %8 = vector.extract_strided_slice %1 {offsets = [12, 0], sizes = [24, 128], strides = [1, 1]} : vector<42x128xf32> to vector<24x128xf32>
    %9 = vector.extract_strided_slice %1 {offsets = [13, 0], sizes = [24, 128], strides = [1, 1]} : vector<42x128xf32> to vector<24x128xf32>
    %10 = vector.extract_strided_slice %1 {offsets = [14, 0], sizes = [24, 128], strides = [1, 1]} : vector<42x128xf32> to vector<24x128xf32>
    %11 = tpu.concatenate %2, %3, %4, %5, %6, %7, %8, %9, %10 in 1 : vector<24x128xf32>, vector<24x128xf32>, vector<24x128xf32>, vector<24x128xf32>, vector<24x128xf32>, vector<24x128xf32>, vector<24x128xf32>, vector<24x128xf32>, vector<24x128xf32> -> vector<24x1152xf32>
    %c0_3 = arith.constant 0 : index
    %c0_4 = arith.constant 0 : index
    %12 = vector.load %arg3[%c0_3, %c0_4] : memref<1152x512xf32, #tpu.memory_space<vmem>>, vector<1152x512xf32>
    %cst = arith.constant dense<0.000000e+00> : vector<24x512xf32>
    %13 = tpu.matmul %11, %12, %cst {dimension_numbers = #tpu.dot_dimension_numbers<[1], [0], [0], [1], [0, 0, 1, 1], [], []>} : vector<24x1152xf32>, vector<1152x512xf32>, vector<24x512xf32> -> vector<24x512xf32>
    %c0_5 = arith.constant 0 : index
    %c0_6 = arith.constant 0 : index
    %14 = vector.load %arg4[%c0_5, %c0_6] : memref<1x512xf32, #tpu.memory_space<vmem>>, vector<1x512xf32>
    %15 = vector.broadcast %14 : vector<1x512xf32> to vector<24x512xf32>
    %16 = arith.addf %13, %15 : vector<24x512xf32>
    %cst_7 = arith.constant 0.000000e+00 : f32
    %17 = vector.broadcast %cst_7 : f32 to vector<24x512xf32>
    %18 = arith.maximumf %16, %17 : vector<24x512xf32>
    %c0_8 = arith.constant 0 : index
    %c0_9 = arith.constant 0 : index
    %c0_10 = arith.constant 0 : index
    %c0_11 = arith.constant 0 : index
    %19 = vector.load %arg5[%c0_8, %c0_9, %c0_10, %c0_11] : memref<1x1x24x512xf32, #tpu.memory_space<vmem>>, vector<1x1x24x512xf32>
    %20 = vector.shape_cast %19 : vector<1x1x24x512xf32> to vector<24x512xf32>
    %21 = vector.shape_cast %18 : vector<24x512xf32> to vector<1x1x24x512xf32>
    tpu.vector_store %arg5[%c0_8, %c0_9, %c0_10, %c0_11], %21 {strides = array<i32>} : memref<1x1x24x512xf32, #tpu.memory_space<vmem>>, vector<1x1x24x512xf32>,
    return
  }
  func.func @transform_0(%arg0: i32, %arg1: i32) -> (i32, i32, i32, i32) {
    %c0_i32 = arith.constant 0 : i32
    %c0_i32_0 = arith.constant 0 : i32
    %c0_i32_1 = arith.constant 0 : i32
    return %arg0, %arg1, %c0_i32, %c0_i32_0 : i32, i32, i32, i32
  }
  func.func @transform_1(%arg0: i32, %arg1: i32) -> (i32, i32) {
    %c0_i32 = arith.constant 0 : i32
    %c0_i32_0 = arith.constant 0 : i32
    %c0_i32_1 = arith.constant 0 : i32
    return %c0_i32, %c0_i32_0 : i32, i32
  }
  func.func @transform_2(%arg0: i32, %arg1: i32) -> (i32, i32) {
    %c0_i32 = arith.constant 0 : i32
    %c0_i32_0 = arith.constant 0 : i32
    %c0_i32_1 = arith.constant 0 : i32
    return %c0_i32, %c0_i32_0 : i32, i32
  }
  func.func @transform_3(%arg0: i32, %arg1: i32) -> (i32, i32, i32, i32) {
    %c0_i32 = arith.constant 0 : i32
    %c0_i32_0 = arith.constant 0 : i32
    %c0_i32_1 = arith.constant 0 : i32
    return %arg0, %arg1, %c0_i32, %c0_i32_0 : i32, i32, i32, i32
  }
}

module attributes {stable_mosaic.version = 11 : i64} {
  func.func @kernel(%arg0: i32, %arg1: i32, %arg2: memref<1x1x110x64xf32, #tpu.memory_space<vmem>>, %arg3: memref<576x128xf32, #tpu.memory_space<vmem>>, %arg4: memref<1x128xf32, #tpu.memory_space<vmem>>, %arg5: memref<1x1x80x128xf32, #tpu.memory_space<vmem>>) attributes {dimension_semantics = [#tpu.dimension_semantics<parallel>, #tpu.dimension_semantics<parallel>], iteration_bounds = array<i64: 2, 1>, scalar_prefetch = 0 : i64, scratch_operands = 0 : i64, tpu.core_type = #tpu.core_type<tc>, window_params = [{transform_indices = @transform_0, window_bounds = array<i64: 1, 1, 110, 64>}, {pipeline_mode = #tpu.pipeline_mode<synchronous>, transform_indices = @transform_1, window_bounds = array<i64: 576, 128>}, {pipeline_mode = #tpu.pipeline_mode<synchronous>, transform_indices = @transform_2, window_bounds = array<i64: 1, 128>}, {transform_indices = @transform_3, window_bounds = array<i64: 1, 1, 80, 128>}]} {
    %c0 = arith.constant 0 : index
    %c0_0 = arith.constant 0 : index
    %c0_1 = arith.constant 0 : index
    %c0_2 = arith.constant 0 : index
    %0 = vector.load %arg2[%c0, %c0_0, %c0_1, %c0_2] : memref<1x1x110x64xf32, #tpu.memory_space<vmem>>, vector<1x1x110x64xf32>
    %1 = vector.shape_cast %0 : vector<1x1x110x64xf32> to vector<110x64xf32>
    %2 = vector.extract_strided_slice %1 {offsets = [0, 0], sizes = [80, 64], strides = [1, 1]} : vector<110x64xf32> to vector<80x64xf32>
    %3 = vector.extract_strided_slice %1 {offsets = [1, 0], sizes = [80, 64], strides = [1, 1]} : vector<110x64xf32> to vector<80x64xf32>
    %4 = vector.extract_strided_slice %1 {offsets = [2, 0], sizes = [80, 64], strides = [1, 1]} : vector<110x64xf32> to vector<80x64xf32>
    %5 = vector.extract_strided_slice %1 {offsets = [10, 0], sizes = [80, 64], strides = [1, 1]} : vector<110x64xf32> to vector<80x64xf32>
    %6 = vector.extract_strided_slice %1 {offsets = [11, 0], sizes = [80, 64], strides = [1, 1]} : vector<110x64xf32> to vector<80x64xf32>
    %7 = vector.extract_strided_slice %1 {offsets = [12, 0], sizes = [80, 64], strides = [1, 1]} : vector<110x64xf32> to vector<80x64xf32>
    %8 = vector.extract_strided_slice %1 {offsets = [20, 0], sizes = [80, 64], strides = [1, 1]} : vector<110x64xf32> to vector<80x64xf32>
    %9 = vector.extract_strided_slice %1 {offsets = [21, 0], sizes = [80, 64], strides = [1, 1]} : vector<110x64xf32> to vector<80x64xf32>
    %10 = vector.extract_strided_slice %1 {offsets = [22, 0], sizes = [80, 64], strides = [1, 1]} : vector<110x64xf32> to vector<80x64xf32>
    %11 = tpu.concatenate %2, %3, %4, %5, %6, %7, %8, %9, %10 in 1 : vector<80x64xf32>, vector<80x64xf32>, vector<80x64xf32>, vector<80x64xf32>, vector<80x64xf32>, vector<80x64xf32>, vector<80x64xf32>, vector<80x64xf32>, vector<80x64xf32> -> vector<80x576xf32>
    %c0_3 = arith.constant 0 : index
    %c0_4 = arith.constant 0 : index
    %12 = vector.load %arg3[%c0_3, %c0_4] : memref<576x128xf32, #tpu.memory_space<vmem>>, vector<576x128xf32>
    %cst = arith.constant dense<0.000000e+00> : vector<80x128xf32>
    %13 = tpu.matmul %11, %12, %cst {dimension_numbers = #tpu.dot_dimension_numbers<[1], [0], [0], [1], [0, 0, 1, 1], [], []>} : vector<80x576xf32>, vector<576x128xf32>, vector<80x128xf32> -> vector<80x128xf32>
    %c0_5 = arith.constant 0 : index
    %c0_6 = arith.constant 0 : index
    %14 = vector.load %arg4[%c0_5, %c0_6] : memref<1x128xf32, #tpu.memory_space<vmem>>, vector<1x128xf32>
    %15 = vector.broadcast %14 : vector<1x128xf32> to vector<80x128xf32>
    %16 = arith.addf %13, %15 : vector<80x128xf32>
    %cst_7 = arith.constant 0.000000e+00 : f32
    %17 = vector.broadcast %cst_7 : f32 to vector<80x128xf32>
    %18 = arith.maximumf %16, %17 : vector<80x128xf32>
    %c0_8 = arith.constant 0 : index
    %c0_9 = arith.constant 0 : index
    %c0_10 = arith.constant 0 : index
    %c0_11 = arith.constant 0 : index
    %19 = vector.load %arg5[%c0_8, %c0_9, %c0_10, %c0_11] : memref<1x1x80x128xf32, #tpu.memory_space<vmem>>, vector<1x1x80x128xf32>
    %20 = vector.shape_cast %19 : vector<1x1x80x128xf32> to vector<80x128xf32>
    %21 = vector.shape_cast %18 : vector<80x128xf32> to vector<1x1x80x128xf32>
    tpu.vector_store %arg5[%c0_8, %c0_9, %c0_10, %c0_11], %21 {strides = array<i32>} : memref<1x1x80x128xf32, #tpu.memory_space<vmem>>, vector<1x1x80x128xf32>,
    return
  }
  func.func @transform_0(%arg0: i32, %arg1: i32) -> (i32, i32, i32, i32) {
    %c0_i32 = arith.constant 0 : i32
    %c0_i32_0 = arith.constant 0 : i32
    %c0_i32_1 = arith.constant 0 : i32
    return %arg0, %arg1, %c0_i32, %c0_i32_0 : i32, i32, i32, i32
  }
  func.func @transform_1(%arg0: i32, %arg1: i32) -> (i32, i32) {
    %c0_i32 = arith.constant 0 : i32
    %c0_i32_0 = arith.constant 0 : i32
    %c0_i32_1 = arith.constant 0 : i32
    return %c0_i32, %c0_i32_0 : i32, i32
  }
  func.func @transform_2(%arg0: i32, %arg1: i32) -> (i32, i32) {
    %c0_i32 = arith.constant 0 : i32
    %c0_i32_0 = arith.constant 0 : i32
    %c0_i32_1 = arith.constant 0 : i32
    return %c0_i32, %c0_i32_0 : i32, i32
  }
  func.func @transform_3(%arg0: i32, %arg1: i32) -> (i32, i32, i32, i32) {
    %c0_i32 = arith.constant 0 : i32
    %c0_i32_0 = arith.constant 0 : i32
    %c0_i32_1 = arith.constant 0 : i32
    return %arg0, %arg1, %c0_i32, %c0_i32_0 : i32, i32, i32, i32
  }
}

module attributes {stable_mosaic.version = 11 : i64} {
  func.func @_fused_concat_pointwise_kernel(%arg0: i32, %arg1: i32, %arg2: memref<1x32x256xf32, #tpu.memory_space<vmem>>, %arg3: memref<1x32x256xf32, #tpu.memory_space<vmem>>, %arg4: memref<32x32xf32, #tpu.memory_space<vmem>>, %arg5: memref<32x32xf32, #tpu.memory_space<vmem>>, %arg6: memref<32x1xf32, #tpu.memory_space<vmem>>, %arg7: memref<1x32x256xf32, #tpu.memory_space<vmem>>) attributes {dimension_semantics = [#tpu.dimension_semantics<parallel>, #tpu.dimension_semantics<parallel>], iteration_bounds = array<i64: 2, 1>, scalar_prefetch = 0 : i64, scratch_operands = 0 : i64, tpu.core_type = #tpu.core_type<tc>, window_params = [{transform_indices = @transform_0, window_bounds = array<i64: 1, 32, 256>}, {transform_indices = @transform_1, window_bounds = array<i64: 1, 32, 256>}, {pipeline_mode = #tpu.pipeline_mode<synchronous>, transform_indices = @transform_2, window_bounds = array<i64: 32, 32>}, {pipeline_mode = #tpu.pipeline_mode<synchronous>, transform_indices = @transform_3, window_bounds = array<i64: 32, 32>}, {pipeline_mode = #tpu.pipeline_mode<synchronous>, transform_indices = @transform_4, window_bounds = array<i64: 32, 1>}, {transform_indices = @transform_5, window_bounds = array<i64: 1, 32, 256>}]} {
    %c0 = arith.constant 0 : index
    %c0_0 = arith.constant 0 : index
    %0 = vector.load %arg4[%c0, %c0_0] : memref<32x32xf32, #tpu.memory_space<vmem>>, vector<32x32xf32>
    %c0_1 = arith.constant 0 : index
    %c0_2 = arith.constant 0 : index
    %c0_3 = arith.constant 0 : index
    %1 = vector.load %arg2[%c0_1, %c0_2, %c0_3] : memref<1x32x256xf32, #tpu.memory_space<vmem>>, vector<1x32x256xf32>
    %2 = vector.shape_cast %1 : vector<1x32x256xf32> to vector<32x256xf32>
    %cst = arith.constant dense<0.000000e+00> : vector<32x256xf32>
    %3 = tpu.matmul %0, %2, %cst {dimension_numbers = #tpu.dot_dimension_numbers<[1], [0], [0], [1], [0, 0, 1, 1], [], []>} : vector<32x32xf32>, vector<32x256xf32>, vector<32x256xf32> -> vector<32x256xf32>
    %c0_4 = arith.constant 0 : index
    %c0_5 = arith.constant 0 : index
    %4 = vector.load %arg5[%c0_4, %c0_5] : memref<32x32xf32, #tpu.memory_space<vmem>>, vector<32x32xf32>
    %c0_6 = arith.constant 0 : index
    %c0_7 = arith.constant 0 : index
    %c0_8 = arith.constant 0 : index
    %5 = vector.load %arg3[%c0_6, %c0_7, %c0_8] : memref<1x32x256xf32, #tpu.memory_space<vmem>>, vector<1x32x256xf32>
    %6 = vector.shape_cast %5 : vector<1x32x256xf32> to vector<32x256xf32>
    %cst_9 = arith.constant dense<0.000000e+00> : vector<32x256xf32>
    %7 = tpu.matmul %4, %6, %cst_9 {dimension_numbers = #tpu.dot_dimension_numbers<[1], [0], [0], [1], [0, 0, 1, 1], [], []>} : vector<32x32xf32>, vector<32x256xf32>, vector<32x256xf32> -> vector<32x256xf32>
    %8 = arith.addf %3, %7 : vector<32x256xf32>
    %c0_10 = arith.constant 0 : index
    %c0_11 = arith.constant 0 : index
    %9 = vector.load %arg6[%c0_10, %c0_11] : memref<32x1xf32, #tpu.memory_space<vmem>>, vector<32x1xf32>
    %10 = vector.broadcast %9 : vector<32x1xf32> to vector<32x256xf32>
    %11 = arith.addf %8, %10 : vector<32x256xf32>
    %cst_12 = arith.constant 0.000000e+00 : f32
    %12 = vector.broadcast %cst_12 : f32 to vector<32x256xf32>
    %13 = arith.maximumf %11, %12 : vector<32x256xf32>
    %c0_13 = arith.constant 0 : index
    %c0_14 = arith.constant 0 : index
    %c0_15 = arith.constant 0 : index
    %14 = vector.load %arg7[%c0_13, %c0_14, %c0_15] : memref<1x32x256xf32, #tpu.memory_space<vmem>>, vector<1x32x256xf32>
    %15 = vector.shape_cast %14 : vector<1x32x256xf32> to vector<32x256xf32>
    %16 = vector.shape_cast %13 : vector<32x256xf32> to vector<1x32x256xf32>
    tpu.vector_store %arg7[%c0_13, %c0_14, %c0_15], %16 {strides = array<i32>} : memref<1x32x256xf32, #tpu.memory_space<vmem>>, vector<1x32x256xf32>,
    return
  }
  func.func @transform_0(%arg0: i32, %arg1: i32) -> (i32, i32, i32) {
    %c0_i32 = arith.constant 0 : i32
    %c0_i32_0 = arith.constant 0 : i32
    return %arg0, %c0_i32, %arg1 : i32, i32, i32
  }
  func.func @transform_1(%arg0: i32, %arg1: i32) -> (i32, i32, i32) {
    %c0_i32 = arith.constant 0 : i32
    %c0_i32_0 = arith.constant 0 : i32
    return %arg0, %c0_i32, %arg1 : i32, i32, i32
  }
  func.func @transform_2(%arg0: i32, %arg1: i32) -> (i32, i32) {
    %c0_i32 = arith.constant 0 : i32
    %c0_i32_0 = arith.constant 0 : i32
    %c0_i32_1 = arith.constant 0 : i32
    return %c0_i32, %c0_i32_0 : i32, i32
  }
  func.func @transform_3(%arg0: i32, %arg1: i32) -> (i32, i32) {
    %c0_i32 = arith.constant 0 : i32
    %c0_i32_0 = arith.constant 0 : i32
    %c0_i32_1 = arith.constant 0 : i32
    return %c0_i32, %c0_i32_0 : i32, i32
  }
  func.func @transform_4(%arg0: i32, %arg1: i32) -> (i32, i32) {
    %c0_i32 = arith.constant 0 : i32
    %c0_i32_0 = arith.constant 0 : i32
    %c0_i32_1 = arith.constant 0 : i32
    return %c0_i32, %c0_i32_0 : i32, i32
  }
  func.func @transform_5(%arg0: i32, %arg1: i32) -> (i32, i32, i32) {
    %c0_i32 = arith.constant 0 : i32
    %c0_i32_0 = arith.constant 0 : i32
    return %arg0, %c0_i32, %arg1 : i32, i32, i32
  }
}

</mosaic_0001>

<bundles_post_ra>
// kernel: stem_block_forward.5
= control target key start
LH: loop header
LB: loop body
LE: loop exit
PB: predicated region body
PF: predicated region fallthrough
CT: control target
= control target key end

     0   :  { %s1812_s12 = smov 0   ;;  %s1814_s13 = smov 0   ;;  %s3281_s0 = inlined_call_operand.vmem [shape: f32[2,1,132,12], index: 0, kind: input, shape index: {}]   ;;  %s3282_s1 = inlined_call_operand.vmem [shape: f32[192,64], index: 1, kind: input, shape index: {}]   ;;  %s3283_s2 = inlined_call_operand.vmem [shape: f32[1,64], index: 2, kind: input, shape index: {}]   ;;  %s3284_s3 = inlined_call_operand.vmem [shape: f32[2,1,88,64], index: 3, kind: output, shape index: {}]  }
   0x1   :  { %s1816_s14 = smov 0  }
   0x2 LB: > { %s25_s15 = sadd.s32 1, %s1770_s13  ;;  %p1417_p0 = scmp.ge.s32.totalorder %s1774_s14, 1  ;;  %s1774_s14 = sphi %s1816_s14, %s13_s14   ;;  %s1770_s13 = sphi %s1814_s13, %s3365_s13   ;;  %s1766_s12 = sphi %s1812_s12, %s3364_s12  }
   0x3   : > { %p27_p1 = scmp.ge.s32.totalorder %s25_s15, 2  ;;  %p157_p2 = scmp.lt.s32.totalorder %s1774_s14, 3 }
   0x5   : > { %s3367_s15 = smov (%p27_p1, %s25_s15), 0  ;;  %p158_p3 = pnand %p1417_p0, %p157_p2 }
   0x7   : > { %161 = sbr.rel (%p158_p3) target bundleno = 576 (0x240), region = 32 }
   0xc   : > { %p189_p4 = scmp.lt.s32.totalorder %s1766_s12, 1  ;;  %vm3309_vm0 = vcmask 1046528   ;;  %vm3307_vm1 = vcmask 1045504   ;;  %s1776_s20 = smov 12   ;;  %vm3304_vm2 = vcmask 1044480   ;;  %vm442_vm3 = vcmask 1043456  }
   0xd   : > { %s1777_s21 = smov 24   ;;  %vm3303_vm4 = vcmask 1042432   ;;  %s1778_s22 = smov 48   ;;  %vm3306_vm5 = vcmask 1041408   ;;  %vm3302_vm6 = vcmask 1040384   ;;  %vm3300_vm7 = vcmask 97280  }
   0xe   : > { %s3369_s12 = smov (!%p189_p4, %s1766_s12), 1  ;;  %s1779_s23 = smov 36   ;;  %vm3299_vm8 = vcmask 195584   ;;  %vm958_vm9 = vcmask 293888   ;;  %vm970_vm10 = vcmask 392192   ;;  %vm3301_vm11 = vcmask 490496  }
   0xf   : > { %s1482_s16 = smul.u32 136, %s3369_s12  ;;  %s1780_s24 = smov 120   ;;  %vm994_vm12 = vcmask 588800   ;;  %vm3305_vm13 = vcmask 31744   ;;  %vm1066_vm14 = vcmask 130048   ;;  %vm1006_vm15 = vcmask 687104  }
  0x10   : > { %s1781_s25 = smov 60   ;;  %s1782_s26 = smov 72  }
  0x11   : > { %s1836_s19 = scalar_lea.vmem %s3281_s0, %s1482_s16  ;;  %s1783_s27 = smov 4  }
  0x12   : > { %v1839_v0 = vld [vmem:[%s1836_s19 + $0x20] sm:$0xff]  ;;  %v1842_v1 = vld [vmem:[%s1836_s19 + $0x28] sm:$0xff]  ;;  %v1845_v2 = vld [vmem:[%s1836_s19 + $0x30] sm:$0xff]  ;;  %s1784_s28 = smov 16   ;;  %s1785_s4 = smov 28  }
  0x13   : > { %v243_v3 = vrot.slane %v1839_v0, 1  ;;  %v245_v4 = vrot.slane %v1842_v1, 1  ;;  %v247_v5 = vrot.slane %v1845_v2, 1  ;;  %v1851_v6 = vld [vmem:[%s1836_s19] sm:$0xff]  ;;  %v1854_v7 = vld [vmem:[%s1836_s19 + $0x8] sm:$0xff]  ;;  %v1857_v8 = vld [vmem:[%s1836_s19 + $0x10] sm:$0xff] }
  0x14   : > { %v236_v9 = vrot.slane %v1851_v6, 1  ;;  %v237_v10 = vrot.slane %v1854_v7, 1  ;;  %v239_v11 = vrot.slane %v1857_v8, 1  ;;  %v1863_v12 = vld [vmem:[%s1836_s19 + $0x38] sm:$0xff]  ;;  %v1866_v13 = vld [vmem:[%s1836_s19 + $0x40] sm:$0xff]  ;;  %v1880_v19 = vld [vmem:[%s1836_s19 + $0x50] sm:$0xff] }
  0x15   : > { %v1869_v14 = vld [vmem:[%s1836_s19 + $0x18] sm:$0xff]  ;;  %v1872_v15 = vsel %vm3309_vm0, %v243_v3, %v245_v4  ;;  %v1875_v16 = vsel %vm3309_vm0, %v245_v4, %v247_v5  ;;  %v249_v17 = vrot.slane %v1863_v12, 1  ;;  %v251_v18 = vrot.slane %v1866_v13, 1  ;;  %v1891_v25 = vld [vmem:[%s1836_s19 + $0x48] sm:$0xff]  ;;  %s1787_s7 = smov 84   ;;  %s1788_s10 = smov 96  }
  0x16   : > { %v1883_v20 = vld [vmem:[%s1836_s19 + $0x58] sm:$0xff]  ;;  %v1534_v21 = vpack.i.bf16 %v1875_v16, %v1872_v15  ;;  %v238_v22 = vsel %vm3309_vm0, %v236_v9, %v237_v10  ;;  %v240_v23 = vsel %vm3309_vm0, %v237_v10, %v239_v11  ;;  %v241_v24 = vrot.slane %v1869_v14, 1  ;;  %s1789_s29 = smov 40   ;;  %s1790_s9 = smov 108  }
  0x17   : > { %v1524_v26 = vpack.i.bf16 %v240_v23, %v238_v22  ;;  %v1894_v27 = vsel %vm3309_vm0, %v247_v5, %v249_v17  ;;  %v1897_v28 = vsel %vm3309_vm0, %v249_v17, %v251_v18  ;;  %v255_v29 = vrot.slane %v1880_v19, 1  ;;  %s1791_s30 = smov 52  }
  0x18   : > { %1535 = vrot.lane.b32.xlu1 %v1534_v21, %s1776_s20  ;;  %v1539_v30 = vpack.i.bf16 %v1897_v28, %v1894_v27  ;;  %v242_v31 = vsel %vm3309_vm0, %v239_v11, %v241_v24  ;;  %v1904_v32 = vsel %vm3309_vm0, %v241_v24, %v243_v3  ;;  %v257_v33 = vrot.slane %v1883_v20, 1 }
  0x19   : > { %1525 = vrot.lane.b32.xlu0 %v1524_v26, %s1776_s20  ;;  %v1529_v34 = vpack.i.bf16 %v1904_v32, %v242_v31  ;;  %v253_v35 = vrot.slane %v1891_v25, 1  ;;  %v296_v36 = vrot.slane %v1857_v8, 2  ;;  %v298_v37 = vrot.slane %v1869_v14, 2 }
  0x1a   : > { %v300_v38 = vrot.slane %v1839_v0, 2  ;;  %v293_v39 = vrot.slane %v1851_v6, 2  ;;  %v294_v40 = vrot.slane %v1854_v7, 2  ;;  %v1923_v43 = vsel %vm3309_vm0, %v255_v29, %v257_v33 }
  0x1b   : > { %v1915_v41 = vsel %vm3309_vm0, %v251_v18, %v253_v35  ;;  %v1918_v42 = vsel %vm3309_vm0, %v253_v35, %v255_v29  ;;  %v299_v44 = vsel %vm3307_vm1, %v296_v36, %v298_v37  ;;  %v304_v45 = vrot.slane %v1845_v2, 2 }
  0x1c   : > { %1540 = vrot.lane.b32.xlu1 %v1539_v30, %s1776_s20  ;;  %v1544_v46 = vpack.i.bf16 %v1918_v42, %v1915_v41  ;;  %v301_v47 = vsel %vm3307_vm1, %v298_v37, %v300_v38  ;;  %v306_v48 = vrot.slane %v1863_v12, 2  ;;  %v308_v49 = vrot.slane %v1866_v13, 2 }
  0x1d   : > { %1530 = vrot.lane.b32.xlu0 %v1529_v34, %s1776_s20  ;;  %v295_v50 = vsel %vm3307_vm1, %v293_v39, %v294_v40  ;;  %v297_v51 = vsel %vm3307_vm1, %v294_v40, %v296_v36  ;;  %v302_v52 = vrot.slane %v1842_v1, 2  ;;  %v1554_v53 = vpack.i.bf16 %v301_v47, %v299_v44 }
  0x1e   : > { %v1549_v54 = vpack.i.bf16 %v297_v51, %v295_v50  ;;  %v1937_v55 = vsel %vm3307_vm1, %v304_v45, %v306_v48  ;;  %v1940_v56 = vsel %vm3307_vm1, %v306_v48, %v308_v49  ;;  %v312_v59 = vrot.slane %v1880_v19, 2 }
  0x1f   : > { %v1943_v57 = vsel %vm3307_vm1, %v300_v38, %v302_v52  ;;  %v1946_v58 = vsel %vm3307_vm1, %v302_v52, %v304_v45  ;;  %v310_v60 = vrot.slane %v1891_v25, 2  ;;  %v1564_v61 = vpack.i.bf16 %v1940_v56, %v1937_v55 }
  0x20   : > { %279 = vrot.lane.b32.xlu1 %v1923_v43, %s1776_s20  ;;  %v314_v62 = vrot.slane %v1883_v20, 2  ;;  %v1559_v63 = vpack.i.bf16 %v1946_v58, %v1943_v57  ;;  %v351_v3 = vrot.slane %v1854_v7, 3  ;;  %v353_v4 = vrot.slane %v1857_v8, 3 }
  0x21   : > { %1545 = vrot.lane.b32.xlu0 %v1544_v46, %s1776_s20  ;;  %v355_v5 = vrot.slane %v1869_v14, 3  ;;  %v1959_v9 = vsel %vm3307_vm1, %v308_v49, %v310_v60  ;;  %v1962_v10 = vsel %vm3307_vm1, %v310_v60, %v312_v59  ;;  %v350_v11 = vrot.slane %v1851_v6, 3 }
  0x22   : > { %v1968_v17 = vsel %vm3307_vm1, %v312_v59, %v314_v62  ;;  %v1569_v18 = vpack.i.bf16 %v1962_v10, %v1959_v9  ;;  %v354_v21 = vsel %vm3304_vm2, %v351_v3, %v353_v4  ;;  %v443_v24 = vrot.slane %v1854_v7, 4 }
  0x23   : > { %v356_v22 = vsel %vm3304_vm2, %v353_v4, %v355_v5  ;;  %v352_v23 = vsel %vm3304_vm2, %v350_v11, %v351_v3  ;;  %v444_v26 = vrot.slane %v1857_v8, 4  ;;  %v446_v29 = vrot.slane %v1869_v14, 4 }
  0x24   : > { %1555 = vrot.lane.b32.xlu1 %v1554_v53, %s1777_s21  ;;  %v1579_v30 = vpack.i.bf16 %v356_v22, %v354_v21  ;;  %v1574_v31 = vpack.i.bf16 %v354_v21, %v352_v23  ;;  %v500_v34 = vrot.slane %v1854_v7, 5  ;;  %v501_v35 = vrot.slane %v1857_v8, 5  ;;  %v1129_v21 = vld [vmem:[%s3282_s1 + $0x78] sm:$0xff] }
  0x25   : > { %1550 = vrot.lane.b32.xlu0 %v1549_v54, %s1777_s21  ;;  %v503_v36 = vrot.slane %v1869_v14, 5  ;;  %v445_v37 = vsel %vm442_vm3, %v443_v24, %v444_v26  ;;  %v447_v38 = vsel %vm442_vm3, %v444_v26, %v446_v29  ;;  %v361_v39 = vrot.slane %v1845_v2, 3 }
  0x26   : > { %v1584_v40 = vpack.i.bf16 %v447_v38, %v445_v37  ;;  %v502_v44 = vsel %vm3303_vm4, %v500_v34, %v501_v35  ;;  %v363_v46 = vrot.slane %v1863_v12, 3  ;;  %v557_v49 = vrot.slane %v1854_v7, 6  ;;  %v1126_v38 = vld [vmem:[%s3282_s1 + $0x60] sm:$0xff] }
  0x27   : > { %v504_v45 = vsel %vm3303_vm4, %v501_v35, %v503_v36  ;;  %v558_v50 = vrot.slane %v1857_v8, 6  ;;  %v560_v51 = vrot.slane %v1869_v14, 6  ;;  %v562_v53 = vrot.slane %v1839_v0, 6 }
  0x28   : > { %1565 = vrot.lane.b32.xlu1 %v1564_v61, %s1777_s21  ;;  %v1589_v47 = vpack.i.bf16 %v504_v45, %v502_v44  ;;  %v2000_v48 = vsel %vm3304_vm2, %v361_v39, %v363_v46  ;;  %v357_v59 = vrot.slane %v1839_v0, 3  ;;  %v365_v60 = vrot.slane %v1866_v13, 3 }
  0x29   : > { %1560 = vrot.lane.b32.xlu0 %v1559_v63, %s1777_s21  ;;  %v1594_v52 = vpack.i.bf16 %v356_v22, %v2000_v48  ;;  %v559_v54 = vsel %vm3306_vm5, %v557_v49, %v558_v50  ;;  %v561_v7 = vsel %vm3306_vm5, %v558_v50, %v560_v51  ;;  %v448_v61 = vrot.slane %v1839_v0, 4  ;;  %v1123_v50 = vld [vmem:[%s3282_s1 + $0x48] sm:$0xff] }
  0x2a   : > { %v1599_v63 = vpack.i.bf16 %v561_v7, %v559_v54  ;;  %v454_v3 = vrot.slane %v1863_v12, 4  ;;  %v456_v4 = vrot.slane %v1866_v13, 4  ;;  %v358_v11 = vsel %vm3304_vm2, %v355_v5, %v357_v59  ;;  %v1128_v5 = vld [vmem:[%s3282_s1 + $0x70] sm:$0xff] }
  0x2b   : > { %v1786_v23 = vmov 0.0   ;;  %v449_v26 = vsel %vm442_vm3, %v446_v29, %v448_v61  ;;  %v651_v34 = vrot.slane %v1869_v14, 7  ;;  %v653_v35 = vrot.slane %v1839_v0, 7  ;;  %v1127_v29 = vld [vmem:[%s3282_s1 + $0x68] sm:$0xff] }
  0x2c   : > { %336 = vrot.lane.b32.xlu1 %v1968_v17, %s1777_s21  ;;  %1179 = vmatprep.subr.mxu0 %v1786_v23  ;;  %v505_v54 = vrot.slane %v1839_v0, 5 }
  0x2d   : > { %1570 = vrot.lane.b32.xlu0 %v1569_v18, %s1777_s21  ;;  %v2031_v18 = vsel %vm3304_vm2, %v363_v46, %v365_v60  ;;  %1180 = vmatpush1.msra.mxu0 %v1129_v21  ;;  %v654_v45 = vsel %vm3302_vm6, %v651_v34, %v653_v35  ;;  %v1125_v46 = vld [vmem:[%s3282_s1 + $0x58] sm:$0xff] }
  0x2e   : > { %v2045_v24 = vpack.i.bf16 %v358_v11, %v2031_v18  ;;  %1181 = vmatprep.subr.mxu0 %v1786_v23  ;;  %1434 = vmatprep.subr.mxu1 %v1786_v23  ;;  %v2127_v11 = vld [vmem:[%s3282_s1 + $0x30] sm:$0xff] }
  0x2f   : > { %1182 = vmatpush1.msra.mxu0 %v1128_v5  ;;  %1458 = vmatpush1.msra.mxu1 %v1129_v21 }
  0x30   : > { %1580 = vrot.lane.b32.xlu1 %v1579_v30, %s1778_s22  ;;  %v359_v30 = vrot.slane %v1842_v1, 3  ;;  %1183 = vmatprep.subr.mxu0 %v1786_v23 }
  0x31   : > { %1575 = vrot.lane.b32.xlu0 %v1574_v31, %s1779_s23  ;;  %v650_v31 = vrot.slane %v1857_v8, 7  ;;  %1184 = vmatpush1.msra.mxu0 %v1127_v29 }
  0x32   : > { %1185 = vmatprep.subr.mxu0 %v1786_v23  ;;  %1435 = vmatprep.subr.mxu1 %v1786_v23 }
  0x33   : > { %v652_v44 = vsel %vm3302_vm6, %v650_v31, %v651_v34  ;;  %1186 = vmatpush1.msra.mxu0 %v1126_v38  ;;  %1459 = vmatpush1.msra.mxu1 %v1128_v5  ;;  %v570_v31 = vrot.slane %v1866_v13, 6  ;;  %v2174_v34 = vld [vmem:[%s3282_s1 + $0x18] sm:$0xff] }
  0x34   : > { %706 = vrot.lane.b32.xlu1 %v1869_v14, %s1780_s24  ;;  %1187 = vmatprep.subr.mxu0 %v1786_v23  ;;  %v1619_v49 = vpack.i.bf16 %v654_v45, %v652_v44  ;;  %v2198_v44 = vld [vmem:[%s3282_s1 + $0x8] sm:$0xff]  ;;  %v2208_v45 = vld [vmem:[%s3282_s1] sm:$0xff] }
  0x35   : > { %1585 = vrot.lane.b32.xlu0 %v1584_v40, %s1781_s25  ;;  %v2077_v40 = vsel %vm3304_vm2, %v357_v59, %v359_v30  ;;  %1188 = vmatpush1.msra.mxu0 %v1125_v46  ;;  %v513_v59 = vrot.slane %v1866_v13, 5 }
  0x36   : > { %1189 = vmatprep.subr.mxu0 %v1786_v23  ;;  %1436 = vmatprep.subr.mxu1 %v1786_v23 }
  0x37   : > { %1460 = vmatpush1.msra.mxu1 %v1127_v29  ;;  %v2184_v29 = vld [vmem:[%s3282_s1 + $0x10] sm:$0xff] }
  0x38   : > { %1590 = vrot.lane.b32.xlu1 %v1589_v47, %s1782_s26  ;;  %v1124_v47 = vld [vmem:[%s3282_s1 + $0x50] sm:$0xff]  ;;  %1437 = vmatprep.subr.mxu1 %v1786_v23 }
  0x39   : > { %746 = vrot.lane.b32.xlu0 %v1904_v32, %s1783_s27  ;;  %v2021_v32 = vsel %vm3306_vm5, %v560_v51, %v562_v53  ;;  %1190 = vmatpush1.msra.mxu0 %v1124_v47  ;;  %v2106_v51 = vld [vmem:[%s3282_s1 + $0x40] sm:$0xff] }
  0x3a   : > { %v1609_v22 = vpack.i.bf16 %v2021_v32, %v561_v7  ;;  %1191 = vmatprep.subr.mxu0 %v1786_v23  ;;  %v3285_v7 = vrot.slane %v1863_v12, 5  ;;  %1461 = vmatpush1.msra.mxu1 %v1126_v38 }
  0x3b   : > { %1192 = vmatpush1.msra.mxu0 %v1123_v50  ;;  %1438 = vmatprep.subr.mxu1 %v1786_v23 }
  0x3c   : > { %1595 = vrot.lane.b32.xlu1 %v1594_v52, %s1779_s23  ;;  %v450_v52 = vrot.slane %v1842_v1, 4  ;;  %1193 = vmatprep.subr.mxu0 %v1786_v23 }
  0x3d   : > { %782 = vrot.lane.b32.xlu0 %v1872_v15, %s1784_s28  ;;  %1194 = vmatpush1.msra.mxu0 %v2106_v51 }
  0x3e   : > { %1195 = vmatprep.subr.mxu0 %v1786_v23  ;;  %v2136_v21 = vsel %vm442_vm3, %v448_v61, %v450_v52  ;;  %v2153_v61 = vld [vmem:[%s3282_s1 + $0x28] sm:$0xff]  ;;  %1462 = vmatpush1.msra.mxu1 %v1125_v46 }
  0x3f   : > { %1439 = vmatprep.subr.mxu1 %v1786_v23 }
  0x40   : > { %823 = vrot.lane.b32.xlu1 %v1943_v57, %s1785_s4  ;;  %v2055_v57 = vsel %vm442_vm3, %v454_v3, %v456_v4  ;;  %1463 = vmatpush1.msra.mxu1 %v1124_v47 }
  0x41   : > { %1600 = vrot.lane.b32.xlu0 %v1599_v63, %s1787_s7  ;;  %v1614_v37 = vpack.i.bf16 %v449_v26, %v2055_v57  ;;  %v2117_v63 = vld [vmem:[%s3282_s1 + $0x38] sm:$0xff]  ;;  %v3286_v26 = vrot.slane %v1863_v12, 6  ;;  %1440 = vmatprep.subr.mxu1 %v1786_v23 }
  0x42   : > { %1196 = vmatpush1.msra.mxu0 %v2117_v63  ;;  %1464 = vmatpush1.msra.mxu1 %v1123_v50  ;;  %v2228_v50 = vld [vmem:[%s3282_s1 + $0xb8] sm:$0xff] }
  0x43   : > { %1197 = vmatprep.subr.mxu0 %v1786_v23  ;;  %v2192_v38 = vsel %vm3306_vm5, %v3286_v26, %v570_v31  ;;  %1441 = vmatprep.subr.mxu1 %v1786_v23  ;;  %v2340_v26 = vld [vmem:[%s3282_s1 + $0x88] sm:$0xff] }
  0x44   : > { %1610 = vrot.lane.b32.xlu1 %v1609_v22, %s1788_s10  ;;  %v514_v22 = vsel %vm3303_vm4, %v3285_v7, %v513_v59  ;;  %1198 = vmatpush1.msra.mxu0 %v2127_v11  ;;  %v1634_v46 = vpack.i.bf16 %v2021_v32, %v2192_v38  ;;  %v2243_v32 = vld [vmem:[%s3282_s1 + $0xb0] sm:$0xff]  ;;  %v3287_v7 = vrot.slane %v1866_v13, 7 }
  0x45   : > { %1605 = vrot.lane.b32.xlu0 %v2045_v24, %s1778_s22  ;;  %1199 = vmatprep.subr.mxu0 %v1786_v23 }
  0x46   : > { %1200 = vmatpush1.msra.mxu0 %v2153_v61  ;;  %1465 = vmatpush1.msra.mxu1 %v2106_v51  ;;  %v2260_v51 = vld [vmem:[%s3282_s1 + $0xa8] sm:$0xff] }
  0x47   : > { %1201 = vmatprep.subr.mxu0 %v1786_v23  ;;  %1442 = vmatprep.subr.mxu1 %v1786_v23 }
  0x48   : > { %1615 = vrot.lane.b32.xlu1 %v1614_v37, %s1781_s25  ;;  %v367_v37 = vrot.slane %v1891_v25, 3  ;;  %1466 = vmatpush1.msra.mxu1 %v2117_v63  ;;  %v2287_v63 = vsel %vm3304_vm2, %v359_v30, %v361_v39  ;;  %v2301_v39 = vld [vmem:[%s3282_s1 + $0x98] sm:$0xff] }
  0x49   : > { %862 = vrot.lane.b32.xlu0 %v2077_v40, %s1789_s29  ;;  %1443 = vmatprep.subr.mxu1 %v1786_v23 }
  0x4a   : > { %v2219_v47 = vsel %vm3304_vm2, %v365_v60, %v367_v37  ;;  %1467 = vmatpush1.msra.mxu1 %v2127_v11 }
  0x4b   : > { %v2237_v60 = vpack.i.bf16 %v2077_v40, %v2219_v47  ;;  %1444 = vmatprep.subr.mxu1 %v1786_v23 }
  0x4c   : > { %708 = vrot.lane.b32.xlu1 %v1839_v0, %s1780_s24  ;;  %1468 = vmatpush1.msra.mxu1 %v2153_v61  ;;  %v452_v61 = vrot.slane %v1845_v2, 4 }
  0x4d   : > { %1620 = vrot.lane.b32.xlu0 %v1619_v49, %s1790_s9  ;;  %v572_v49 = vrot.slane %v1891_v25, 6  ;;  %1445 = vmatprep.subr.mxu1 %v1786_v23 }
  0x4f   : > { %v573_v40 = vsel %vm3306_vm5, %v570_v31, %v572_v49  ;;  %v369_v31 = vrot.slane %v1880_v19, 3 }
  0x50   : > { %748 = vrot.lane.b32.xlu1 %v1872_v15, %s1783_s27  ;;  %v506_v15 = vsel %vm3303_vm4, %v503_v36, %v505_v54  ;;  %v2163_v36 = vld [vmem:[%s3282_s1 + $0x20] sm:$0xff] }
  0x51   : > { %718 = vrot.lane.b32.xlu0 %v1891_v25, %s1780_s24  ;;  %v1624_v5 = vpack.i.bf16 %v506_v15, %v514_v22  ;;  %1202 = vmatpush1.msra.mxu0 %v2163_v36  ;;  %v458_v15 = vrot.slane %v1891_v25, 4 }
  0x52   : > { %1203 = vmatprep.subr.mxu0 %v1786_v23  ;;  %1469 = vmatpush1.msra.mxu1 %v2163_v36 }
  0x53   : > { %1204 = vmatpush1.msra.mxu0 %v2174_v34  ;;  %v2278_v22 = vsel %vm442_vm3, %v456_v4, %v458_v15  ;;  %v655_v4 = vrot.slane %v1842_v1, 7  ;;  %1446 = vmatprep.subr.mxu1 %v1786_v23 }
  0x54   : > { %901 = vrot.lane.b32.xlu1 %v2136_v21, %s1791_s30  ;;  %1205 = vmatprep.subr.mxu0 %v1786_v23  ;;  %v1649_v30 = vpack.i.bf16 %v2136_v21, %v2278_v22 }
  0x55   : > { %758 = vrot.lane.b32.xlu0 %v1918_v42, %s1783_s27  ;;  %1206 = vmatpush1.msra.mxu0 %v2184_v29  ;;  %v656_v21 = vsel %vm3302_vm6, %v653_v35, %v655_v4  ;;  %v2350_v35 = vld [vmem:[%s3282_s1 + $0x80] sm:$0xff] }
  0x56   : > { %1207 = vmatprep.subr.mxu0 %v1786_v23  ;;  %1470 = vmatpush1.msra.mxu1 %v2174_v34  ;;  %v460_v34 = vrot.slane %v1880_v19, 4 }
  0x57   : > { %1208 = vmatpush1.msra.mxu0 %v2198_v44  ;;  %1447 = vmatprep.subr.mxu1 %v1786_v23 }
  0x58   : > { %784 = vrot.lane.b32.xlu1 %v1875_v16, %s1784_s28  ;;  %1209 = vmatprep.subr.mxu0 %v1786_v23 }
  0x59   : > { %1625 = vrot.lane.b32.xlu0 %v1624_v5, %s1782_s26  ;;  %1210 = vmatpush1.msra.mxu0 %v2208_v45 }
  0x5a   : > { %1227 = vmatprep.subr.mxu0 %v1786_v23  ;;  %1471 = vmatpush1.msra.mxu1 %v2184_v29  ;;  %v462_v29 = vrot.slane %v1883_v20, 4 }
  0x5b   : > { %1228 = vmatpush2.msra.mxu0 %v2228_v50  ;;  %1448 = vmatprep.subr.mxu1 %v1786_v23 }
  0x5c   : > { %1630 = vrot.lane.b32.xlu1 %v2045_v24, %s1779_s23  ;;  %v564_v24 = vrot.slane %v1842_v1, 6  ;;  %1229 = vmatprep.subr.mxu0 %v1786_v23 }
  0x5d   : > { %794 = vrot.lane.b32.xlu0 %v1923_v43, %s1784_s28  ;;  %1230 = vmatpush2.msra.mxu0 %v2243_v32 }
  0x5e   : > { %1231 = vmatprep.subr.mxu0 %v1786_v23  ;;  %1472 = vmatpush1.msra.mxu1 %v2198_v44  ;;  %v2409_v44 = vsel %vm442_vm3, %v460_v34, %v462_v29 }
  0x5f   : > { %1232 = vmatpush2.msra.mxu0 %v2260_v51  ;;  %1449 = vmatprep.subr.mxu1 %v1786_v23 }
  0x60   : > { %825 = vrot.lane.b32.xlu1 %v1946_v58, %s1785_s4  ;;  %v565_v58 = vsel %vm3306_vm5, %v562_v53, %v564_v24  ;;  %v2271_v53 = vld [vmem:[%s3282_s1 + $0xa0] sm:$0xff]  ;;  %1233 = vmatprep.subr.mxu0 %v1786_v23 }
  0x61   : > { %1635 = vrot.lane.b32.xlu0 %v1634_v46, %s1787_s7  ;;  %v2289_v5 = vpack.i.bf16 %v565_v58, %v573_v40  ;;  %v371_v46 = vrot.slane %v1883_v20, 3  ;;  %1234 = vmatpush2.msra.mxu0 %v2271_v53  ;;  %v2314_v58 = vld [vmem:[%s3282_s1 + $0x90] sm:$0xff] }
  0x62   : > { %1235 = vmatprep.subr.mxu0 %v1786_v23  ;;  %1473 = vmatpush1.msra.mxu1 %v2208_v45 }
  0x63   : > { %1236 = vmatpush2.msra.mxu0 %v2301_v39  ;;  %v2324_v11 = vsel %vm3304_vm2, %v369_v31, %v371_v46  ;;  %1450 = vmatprep.subr.mxu1 %v1786_v23 }
  0x64   : > { %1640 = vrot.lane.b32.xlu1 %v2237_v60, %s1778_s22  ;;  %1237 = vmatprep.subr.mxu0 %v1786_v23 }
  0x65   : > { %835 = vrot.lane.b32.xlu0 %v1968_v17, %s1785_s4  ;;  %v663_v17 = vrot.slane %v1891_v25, 7  ;;  %1238 = vmatpush2.msra.mxu0 %v2314_v58 }
  0x66   : > { %1239 = vmatprep.subr.mxu0 %v1786_v23  ;;  %1474 = vmatpush2.msra.mxu1 %v2228_v50  ;;  %v566_v50 = vrot.slane %v1845_v2, 6 }
  0x67   : > { %v664_v40 = vsel %vm3302_vm6, %v3287_v7, %v663_v17  ;;  %1240 = vmatpush2.msra.mxu0 %v2340_v26  ;;  %1451 = vmatprep.subr.mxu1 %v1786_v23 }
  0x68   : > { %864 = vrot.lane.b32.xlu1 %v2287_v63, %s1789_s29  ;;  %v1654_v7 = vpack.i.bf16 %v656_v21, %v664_v40  ;;  %1241 = vmatprep.subr.mxu0 %v1786_v23  ;;  %v515_v21 = vrot.slane %v1891_v25, 5 }
  0x69   : > { %1645 = vrot.lane.b32.xlu0 %v2289_v5, %s1788_s10  ;;  %1242 = vmatpush2.msra.mxu0 %v2350_v35 }
  0x6a   : > { %1475 = vmatpush2.msra.mxu1 %v2243_v32 }
  0x6b   : > { %1452 = vmatprep.subr.mxu1 %v1786_v23 }
  0x6c   : > { %1650 = vrot.lane.b32.xlu1 %v1649_v30, %s1781_s25  ;;  %v507_v30 = vrot.slane %v1842_v1, 5  ;;  %1476 = vmatpush2.msra.mxu1 %v2260_v51  ;;  %v567_v51 = vsel %vm3306_vm5, %v564_v24, %v566_v50 }
  0x6d   : > { %874 = vrot.lane.b32.xlu0 %v2324_v11, %s1789_s29  ;;  %1453 = vmatprep.subr.mxu1 %v1786_v23 }
  0x6e   : > { %v508_v36 = vsel %vm3303_vm4, %v505_v54, %v507_v30  ;;  %1477 = vmatpush2.msra.mxu1 %v2271_v53 }
  0x6f   : > { %1454 = vmatprep.subr.mxu1 %v1786_v23 }
  0x70   : > { %710 = vrot.lane.b32.xlu1 %v1842_v1, %s1780_s24  ;;  %1478 = vmatpush2.msra.mxu1 %v2301_v39  ;;  %v2506_v39 = vsel %vm442_vm3, %v458_v15, %v460_v34 }
  0x71   : > { %1655 = vrot.lane.b32.xlu0 %v1654_v7, %s1790_s9  ;;  %v2379_v7 = vsel %vm442_vm3, %v450_v52, %v452_v61  ;;  %v2395_v52 = vld [vmem:[%s1836_s19 + $0x60] sm:$0xff]  ;;  %1455 = vmatprep.subr.mxu1 %v1786_v23 }
  0x72   : > { %v815_v45 = vrot.slane %v2395_v52, 2  ;;  %1479 = vmatpush2.msra.mxu1 %v2314_v58 }
  0x73   : > { %1456 = vmatprep.subr.mxu1 %v1786_v23 }
  0x74   : > { %750 = vrot.lane.b32.xlu1 %v1875_v16, %s1783_s27  ;;  %v516_v16 = vsel %vm3303_vm4, %v513_v59, %v515_v21  ;;  %v740_v59 = vrot.slane %v2395_v52, 1  ;;  %v816_v32 = vsel %vm3307_vm1, %v314_v62, %v815_v45  ;;  %1480 = vmatpush2.msra.mxu1 %v2340_v26  ;;  %v2464_v62 = vsel %vm3304_vm2, %v367_v37, %v369_v31 }
  0x75   : > { %720 = vrot.lane.b32.xlu0 %v1880_v19, %s1780_s24  ;;  %v1659_v54 = vpack.i.bf16 %v508_v36, %v516_v16  ;;  %1457 = vmatprep.subr.mxu1 %v1786_v23  ;;  %v2475_v26 = vpack.i.bf16 %v2287_v63, %v2464_v62  ;;  %v3290_v37 = vrot.slane %v1845_v2, 7 }
  0x76   : > { %1481 = vmatpush2.msra.mxu1 %v2350_v35 }
  0x77   : > { %v658_v63 = vsel %vm3302_vm6, %v655_v4, %v3290_v37  ;;  %v1684_v4 = vpack.i.bf16 %v2379_v7, %v2506_v39 }
  0x78   : > { %903 = vrot.lane.b32.xlu1 %v2379_v7, %s1791_s30  ;;  %v3289_v7 = vrot.slane %v2395_v52, 4 }
  0x79   : > { %760 = vrot.lane.b32.xlu0 %v1923_v43, %s1783_s27  ;;  %v2422_v43 = vsel %vm3309_vm0, %v257_v33, %v740_v59  ;;  %v574_v33 = vrot.slane %v1880_v19, 6 }
  0x7b   : > { %v575_v53 = vsel %vm3306_vm5, %v572_v49, %v574_v33  ;;  %v407_v49 = vrot.slane %v2395_v52, 3 }
  0x7c   : > { %1660 = vrot.lane.b32.xlu1 %v1659_v54, %s1782_s26  ;;  %v2469_v24 = vpack.i.bf16 %v567_v51, %v575_v53  ;;  %v3298_v51 = vrot.slane %v1845_v2, 5 }
  0x7d   : > { %913 = vrot.lane.b32.xlu0 %v2409_v44, %s1791_s30 }
  0x80   : > { %796 = vrot.lane.b32.xlu1 %v2422_v43, %s1784_s28 }
  0x81   : > { %786 = vrot.lane.b32.xlu0 %v1894_v27, %s1784_s28 }
  0x84   : > { %1670 = vrot.lane.b32.xlu1 %v2289_v5, %s1787_s7 }
  0x85   : > { %1665 = vrot.lane.b32.xlu0 %v2237_v60, %s1779_s23  ;;  %v3288_v60 = vrot.slane %v1880_v19, 7 }
  0x87   : > { %v666_v31 = vsel %vm3302_vm6, %v663_v17, %v3288_v60 }
  0x88   : > { %837 = vrot.lane.b32.xlu1 %v816_v32, %s1785_s4  ;;  %v1689_v40 = vpack.i.bf16 %v658_v63, %v666_v31 }
  0x89   : > { %827 = vrot.lane.b32.xlu0 %v1937_v55, %s1785_s4  ;;  %v2491_v55 = vsel %vm3304_vm2, %v371_v46, %v407_v49 }
  0x8a   : > { %v1536_v23 = vpop.permute.xlu1 %1535 }
  0x8b   : > { %v2480_v5 = vpop.permute.xlu0 %1525  ;;  %v1538_v53 = vunpack.i.h.bf16 %v1536_v23 }
  0x8c   : > { %1680 = vrot.lane.b32.xlu1 %v2469_v24, %s1788_s10 }
  0x8d   : > { %1675 = vrot.lane.b32.xlu0 %v2475_v26, %s1778_s22 }
  0x8e   : > { %v2508_v58 = vpop.permute.xlu1 %1540 }
  0x8f   : > { %v1531_v46 = vpop.permute.xlu0 %1530  ;;  %v1543_v63 = vunpack.i.h.bf16 %v2508_v58 }
  0x90   : > { %876 = vrot.lane.b32.xlu1 %v2491_v55, %s1789_s29  ;;  %v1533_v36 = vunpack.i.h.bf16 %v1531_v46  ;;  %v1532_v16 = vunpack.i.l.bf16 %v1531_v46 }
  0x91   : > { %866 = vrot.lane.b32.xlu0 %v2000_v48, %s1789_s29 }
  0x92   : > { %v280_v35 = vpop.permute.xlu1 %279  ;;  %v938_v31 = vsel %vm3300_vm7, %v1869_v14, %v1533_v36  ;;  %v937_v46 = vsel %vm3300_vm7, %v1857_v8, %v1532_v16  ;;  %v3297_v14 = vrot.slane %v1880_v19, 5  ;;  %v2553_v16 = vsel %vm442_vm3, %v452_v61, %v454_v3 }
  0x93   : > { %v1546_v17 = vpop.permute.xlu0 %1545 }
  0x94   : > { %1690 = vrot.lane.b32.xlu1 %v1689_v40, %s1790_s9  ;;  %v1537_v40 = vunpack.i.l.bf16 %v1536_v23  ;;  %v2546_v23 = vsel %vm442_vm3, %v462_v29, %v3289_v7  ;;  %v942_v29 = vsel %vm3300_vm7, %v1863_v12, %v1543_v63  ;;  %v1548_v61 = vunpack.i.h.bf16 %v1546_v17  ;;  %v2590_v63 = vld [vmem:[%s1836_s19 + $0x68] sm:$0xff] }
  0x95   : > { %1685 = vrot.lane.b32.xlu0 %v1684_v4, %s1781_s25  ;;  %v1547_v7 = vunpack.i.l.bf16 %v1546_v17 }
  0x96   : > { %v1556_v15 = vpop.permute.xlu1 %1555  ;;  %v939_v3 = vsel %vm3300_vm7, %v1839_v0, %v1537_v40  ;;  %v518_v0 = vsel %vm3303_vm4, %v515_v21, %v3297_v14 }
  0x97   : > { %v1558_v34 = vunpack.i.h.bf16 %v1556_v15  ;;  %v1557_v54 = vunpack.i.l.bf16 %v1556_v15  ;;  %v2518_v32 = vpop.permute.xlu0 %1550 }
  0x98   : > { %722 = vrot.lane.b32.xlu1 %v1883_v20, %s1780_s24 }
  0x99   : > { %v2530_v4 = vsel %vm3299_vm8, %v937_v46, %v1557_v54  ;;  %v2533_v15 = vsel %vm3299_vm8, %v938_v31, %v1558_v34  ;;  %712 = vrot.lane.b32.xlu0 %v1845_v2, %s1780_s24  ;;  %v510_v34 = vsel %vm3303_vm4, %v507_v30, %v3298_v51  ;;  %v940_v54 = vsel %vm3300_vm7, %v1842_v1, %v1538_v53 }
  0x9a   : > { %v2537_v60 = vpop.permute.xlu1 %1565  ;;  %v945_v1 = vsel %vm3300_vm7, %v1880_v19, %v280_v35  ;;  %v1694_v21 = vpack.i.bf16 %v510_v34, %v518_v0 }
  0x9b   : > { %v1568_v36 = vunpack.i.h.bf16 %v2537_v60  ;;  %v1561_v8 = vpop.permute.xlu0 %1560 }
  0x9c   : > { %v1563_v31 = vunpack.i.h.bf16 %v1561_v8  ;;  %v1562_v46 = vunpack.i.l.bf16 %v1561_v8  ;;  %762 = vrot.lane.b32.xlu1 %v2422_v43, %s1783_s27  ;;  %v943_v8 = vsel %vm3300_vm7, %v1866_v13, %v1547_v7 }
  0x9d   : > { %v2569_v37 = vsel %vm3299_vm8, %v942_v29, %v1568_v36  ;;  %752 = vrot.lane.b32.xlu0 %v1894_v27, %s1783_s27  ;;  %v944_v36 = vsel %vm3300_vm7, %v1891_v25, %v1548_v61 }
  0x9e   : > { %v2576_v30 = vsel %vm3299_vm8, %v940_v54, %v1563_v31  ;;  %v2579_v53 = vsel %vm3299_vm8, %v939_v3, %v1562_v46  ;;  %v337_v43 = vpop.permute.xlu1 %336  ;;  %v3296_v46 = vrot.slane %v2590_v63, 1 }
  0x9f   : > { %v2587_v17 = vsel %vm3299_vm8, %v945_v1, %v337_v43  ;;  %v1571_v27 = vpop.permute.xlu0 %1570  ;;  %v3292_v1 = vrot.slane %v2590_v63, 2  ;;  %v3291_v43 = vrot.slane %v1883_v20, 6 }
  0xa0   : > { %3313 = vst [vmem:[#allocation2_spill] sm:$0xff] %v2587_v17  ;;  %v1573_v35 = vunpack.i.h.bf16 %v1571_v27  ;;  %v1572_v40 = vunpack.i.l.bf16 %v1571_v27  ;;  %915 = vrot.lane.b32.xlu1 %v2546_v23, %s1791_s30  ;;  %v2621_v7 = vsel %vm3309_vm0, %v740_v59, %v3296_v46  ;;  %v1709_v59 = vpack.i.bf16 %v2000_v48, %v2324_v11 }
  0xa1   : > { %905 = vrot.lane.b32.xlu0 %v2553_v16, %s1791_s30  ;;  %v818_v27 = vsel %vm3307_vm1, %v815_v45, %v3292_v1  ;;  %v577_v48 = vsel %vm3306_vm5, %v574_v33, %v3291_v43  ;;  %v1719_v33 = vpack.i.bf16 %v2553_v16, %v2409_v44  ;;  %v3315_v44 = vrot.slane %v1845_v2, 7 }
  0xa2   : > { %v2601_v54 = vsel %vm3299_vm8, %v943_v8, %v1572_v40  ;;  %v2604_v29 = vsel %vm3299_vm8, %v944_v36, %v1573_v35  ;;  %v2606_v31 = vpop.permute.xlu1 %1580  ;;  %v3314_v35 = vrot.slane %v1863_v12, 6  ;;  %v3293_v36 = vrot.slane %v2590_v63, 3 }
  0xa3   : > { %v2609_v3 = vpop.permute.xlu0 %1575  ;;  %v3294_v8 = vrot.slane %v1883_v20, 7  ;;  %v1552_v1 = vunpack.i.l.bf16 %v2518_v32  ;;  %v1582_v17 = vunpack.i.l.bf16 %v2606_v31 }
  0xa4   : > { %788 = vrot.lane.b32.xlu1 %v1897_v28, %s1784_s28 }
  0xa5   : > { %1695 = vrot.lane.b32.xlu0 %v1694_v21, %s1782_s26 }
  0xa6   : > { %v2614_v25 = vpop.permute.xlu1 %706 }
  0xa7   : > { %v2623_v34 = vpop.permute.xlu0 %1585 }
  0xa8   : > { %1700 = vrot.lane.b32.xlu1 %v2475_v26, %s1779_s23 }
  0xa9   : > { %798 = vrot.lane.b32.xlu0 %v2621_v7, %s1784_s28 }
  0xaa   : > { %v2629_v61 = vpop.permute.xlu1 %1590 }
  0xab   : > { %v2633_v0 = vpop.permute.xlu0 %746 }
  0xac   : > { %829 = vrot.lane.b32.xlu1 %v1940_v56, %s1785_s4  ;;  %v569_v56 = vsel %vm3306_vm5, %v566_v50, %v3314_v35  ;;  %v3295_v50 = vrot.slane %v1863_v12, 7  ;;  %v857_v35 = vsel %vm3304_vm2, %v407_v49, %v3293_v36  ;;  %v1577_v36 = vunpack.i.l.bf16 %v2609_v3 }
  0xad   : > { %1705 = vrot.lane.b32.xlu0 %v2469_v24, %s1787_s7  ;;  %v2662_v40 = vpack.i.bf16 %v569_v56, %v577_v48  ;;  %v1527_v48 = vunpack.i.l.bf16 %v2480_v5  ;;  %vm1145_vm2 = vcmask 523264  }
  0xae   : > { %v2641_v26 = vpop.permute.xlu1 %1595  ;;  %v660_v16 = vsel %vm3302_vm6, %v3315_v44, %v3295_v50 }
  0xaf   : > { %v2658_v24 = vpop.permute.xlu0 %782  ;;  %v935_v46 = vsel %vm3300_vm7, %v1851_v6, %v1527_v48  ;;  %v519_v6 = vrot.slane %v1883_v20, 5  ;;  %v3318_v48 = vrot.slane %v1845_v2, 5  ;;  %vm1078_vm7 = vcmask 228352  }
  0xb0   : > { %1710 = vrot.lane.b32.xlu1 %v1709_v59, %s1778_s22  ;;  %v1598_v59 = vunpack.i.h.bf16 %v2641_v26 }
  0xb1   : > { %839 = vrot.lane.b32.xlu0 %v818_v27, %s1785_s4 }
  0xb2   : > { %v2664_v45 = vpop.permute.xlu1 %823  ;;  %v961_v44 = vsel %vm958_vm9, %v2530_v4, %v1598_v59  ;;  %v1587_v59 = vunpack.i.l.bf16 %v2623_v34 }
  0xb3   : > { %v2669_v21 = vpop.permute.xlu0 %1600 }
  0xb4   : > { %868 = vrot.lane.b32.xlu1 %v2031_v18, %s1789_s29  ;;  %v3316_v18 = vrot.slane %v1880_v19, 7 }
  0xb5   : > { %1715 = vrot.lane.b32.xlu0 %v2662_v40, %s1788_s10 }
  0xb6   : > { %v2678_v27 = vpop.permute.xlu1 %1610  ;;  %v668_v56 = vsel %vm3302_vm6, %v3316_v18, %v3294_v8  ;;  %vm1090_vm6 = vcmask 326656  }
  0xb7   : > { %v2696_v43 = vpop.permute.xlu0 %1605  ;;  %v1724_v18 = vpack.i.bf16 %v660_v16, %v668_v56  ;;  %v1592_v16 = vunpack.i.l.bf16 %v2629_v61 }
  0xb8   : > { %v1608_v49 = vunpack.i.h.bf16 %v2696_v43  ;;  %1720 = vrot.lane.b32.xlu1 %v1719_v33, %s1781_s25  ;;  %v947_v33 = vsel %vm3299_vm8, %v935_v46, %v1552_v1  ;;  %v1602_v46 = vunpack.i.l.bf16 %v2669_v21  ;;  %vm1018_vm8 = vcmask 785408  }
  0xb9   : > { %878 = vrot.lane.b32.xlu0 %v857_v35, %s1789_s29  ;;  %v959_v4 = vsel %vm958_vm9, %v947_v33, %v1577_v36 }
  0xba   : > { %v973_v8 = vsel %vm970_vm10, %v961_v44, %v1608_v49  ;;  %v2706_v50 = vpop.permute.xlu1 %1615  ;;  %v971_v36 = vsel %vm970_vm10, %v959_v4, %v1582_v17  ;;  %v3319_v17 = vrot.slane %v1880_v19, 5  ;;  %v895_v4 = vrot.slane %v2590_v63, 4 }
  0xbb   : > { %v1618_v14 = vunpack.i.h.bf16 %v2706_v50  ;;  %v863_v51 = vpop.permute.xlu0 %862  ;;  %v983_v44 = vsel %vm3301_vm11, %v971_v36, %v1587_v59  ;;  %v2749_v59 = vld [vmem:[%s1836_s19 + $0x70] sm:$0xff]  ;;  %v1055_v36 = vsel %vm3305_vm13, %v2614_v25, %v2633_v0  ;;  %vm1042_vm13 = vcmask 982016  }
  0xbc   : > { %714 = vrot.lane.b32.xlu1 %v1863_v12, %s1780_s24  ;;  %v520_v33 = vsel %vm3303_vm4, %v3319_v17, %v519_v6 }
  0xbd   : > { %v985_v35 = vsel %vm3301_vm11, %v973_v8, %v1618_v14  ;;  %1725 = vrot.lane.b32.xlu0 %v1724_v18, %s1790_s9  ;;  %v1612_v14 = vunpack.i.l.bf16 %v2678_v27  ;;  %v3317_v8 = vrot.slane %v1863_v12, 5  ;;  %vm1030_vm11 = vcmask 883712  }
  0xbe   : > { %v2721_v56 = vpop.permute.xlu1 %708 }
  0xbf   : > { %v2724_v1 = vpop.permute.xlu0 %1620  ;;  %v512_v49 = vsel %vm3303_vm4, %v3318_v48, %v3317_v8  ;;  %vm1102_vm4 = vcmask 424960  }
  0xc0   : > { %754 = vrot.lane.b32.xlu1 %v1897_v28, %s1783_s27  ;;  %v1622_v18 = vunpack.i.l.bf16 %v2724_v1  ;;  %v995_v28 = vsel %vm994_vm12, %v983_v44, %v1592_v16  ;;  %v1067_v16 = vsel %vm1066_vm14, %v1055_v36, %v2658_v24  ;;  %v1729_v48 = vpack.i.bf16 %v512_v49, %v520_v33 }
  0xc1   : > { %724 = vrot.lane.b32.xlu0 %v2395_v52, %s1780_s24  ;;  %v1007_v8 = vsel %vm1006_vm15, %v995_v28, %v1602_v46  ;;  %v1079_v17 = vsel %vm1078_vm7, %v1067_v16, %v2664_v45  ;;  %v3311_v46 = vrot.slane %v2749_v59, 1  ;;  %v3308_v16 = vrot.slane %v2395_v52, 6 }
  0xc2   : > { %v2745_v2 = vpop.permute.xlu1 %748  ;;  %v1019_v44 = vsel %vm1018_vm8, %v1007_v8, %v1612_v14  ;;  %v1091_v24 = vsel %vm1090_vm6, %v1079_v17, %v863_v51  ;;  %v3321_v51 = vrot.slane %v2590_v63, 1 }
  0xc3   : > { %v2755_v19 = vpop.permute.xlu0 %718  ;;  %v1031_v0 = vsel %vm1030_vm11, %v1019_v44, %v1622_v18 }
  0xc4   : > { %907 = vrot.lane.b32.xlu1 %v2055_v57, %s1791_s30  ;;  %v3320_v57 = vrot.slane %v2395_v52, 4  ;;  %v2787_v18 = vsel %vm3309_vm0, %v3321_v51, %v3311_v46  ;;  %v1553_v46 = vunpack.i.h.bf16 %v2518_v32  ;;  %v1583_v32 = vunpack.i.h.bf16 %v2606_v31 }
  0xc5   : > { %764 = vrot.lane.b32.xlu0 %v2621_v7, %s1783_s27  ;;  %v1043_v7 = vsel %vm1042_vm13, %v1031_v0, %v2614_v25  ;;  %v3310_v25 = vrot.slane %v2749_v59, 2  ;;  %v897_v31 = vrot.slane %v2749_v59, 4 }
  0xc6   : > { %v902_v28 = vpop.permute.xlu1 %901  ;;  %v896_v14 = vsel %vm442_vm3, %v3320_v57, %v895_v4  ;;  %v3323_v57 = vrot.slane %v1883_v20, 6 }
  0xc7   : > { %v2774_v49 = vpop.permute.xlu0 %758  ;;  %v1103_v45 = vsel %vm1102_vm4, %v1091_v24, %v902_v28 }
  0xc8   : > { %1730 = vrot.lane.b32.xlu1 %v1729_v48, %s1782_s26  ;;  %1421 = vmatprep.mubr.msk.f32.mxu0 %vm1145_vm2, %v1103_v45 }
  0xc9   : > { %917 = vrot.lane.b32.xlu0 %v896_v14, %s1791_s30  ;;  %1244 = vmatmul.mubr.f32.vlgmr.msra.gmra.mxu0 %v1043_v7  ;;  %v2824_v14 = vsel %vm3306_vm5, %v3323_v57, %v3308_v16  ;;  %v669_v7 = vrot.slane %v2395_v52, 7  ;;  %vm3325_vm5 = vcmask 1044480   ;;  %v3327_v57 = vrot.slane %v1863_v12, 7 }
  0xca   : > { %v2789_v33 = vpop.permute.xlu1 %784  ;;  %v1578_v12 = vunpack.i.h.bf16 %v2609_v3 }
  0xcb   : > { %v2791_v36 = vpop.permute.xlu0 %1625 }
  0xcc   : > { %v1628_v8 = vunpack.i.h.bf16 %v2791_v36  ;;  %800 = vrot.lane.b32.xlu1 %v2787_v18, %s1784_s28 }
  0xcd   : > { %790 = vrot.lane.b32.xlu0 %v1915_v41, %s1784_s28 }
  0xce   : > { %v2801_v48 = vsel %vm994_vm12, %v985_v35, %v1628_v8  ;;  %v2803_v44 = vpop.permute.xlu1 %1630  ;;  %v3322_v35 = vrot.slane %v2590_v63, 2 }
  0xcf   : > { %v1633_v17 = vunpack.i.h.bf16 %v2803_v44  ;;  %v2806_v0 = vpop.permute.xlu0 %794 }
  0xd0   : > { %1735 = vrot.lane.b32.xlu1 %v2662_v40, %s1787_s7  ;;  %v820_v28 = vsel %vm3307_vm1, %v3322_v35, %v3310_v25  ;;  %vm3328_vm1 = vcmask 1040384  }
  0xd1   : > { %v962_v24 = vsel %vm958_vm9, %v2533_v15, %v1633_v17  ;;  %393 = vrot.lane.b32.xlu0 %v2324_v11, %s1779_s23  ;;  %v1739_v11 = vpack.i.bf16 %v2192_v38, %v2824_v14  ;;  %v3312_v15 = vrot.slane %v2749_v59, 3  ;;  %vm3330_vm0 = vmmov %vm3328_vm1 }
  0xd2   : > { %v2826_v40 = vpop.permute.xlu1 %825 }
  0xd3   : > { %v2828_v45 = vpop.permute.xlu0 %1635 }
  0xd4   : > { %841 = vrot.lane.b32.xlu1 %v820_v28, %s1785_s4  ;;  %v3326_v28 = vrot.slane %v1866_v13, 7 }
  0xd5   : > { %831 = vrot.lane.b32.xlu0 %v1959_v9, %s1785_s4  ;;  %v3324_v9 = vrot.slane %v2590_v63, 3 }
  0xd6   : > { %v2837_v51 = vpop.permute.xlu1 %1640  ;;  %v662_v16 = vsel %vm3328_vm1, %v3327_v57, %v3326_v28  ;;  %v1749_v28 = vld [vmem:[%s1836_s19 + $0x8] sm:$0xff]  ;;  %vm3331_vm1 = vcmask 97280  }
  0xd7   : > { %v1643_v8 = vunpack.i.h.bf16 %v2837_v51  ;;  %v2840_v17 = vpop.permute.xlu0 %835  ;;  %v859_v38 = vsel %vm3325_vm5, %v3324_v9, %v3312_v15  ;;  %vm3333_vm5 = vcmask 490496  }
  0xd8   : > { %1740 = vrot.lane.b32.xlu1 %v1739_v11, %s1788_s10  ;;  %v3329_v11 = vrot.slane %v1883_v20, 7 }
  0xd9   : > { %v974_v35 = vsel %vm970_vm10, %v962_v24, %v1643_v8  ;;  %429 = vrot.lane.b32.xlu0 %v2491_v55, %s1778_s22  ;;  %v1528_v55 = vunpack.i.h.bf16 %v2480_v5 }
  0xda   : > { %v670_v24 = vsel %vm3330_vm0, %v3329_v11, %v669_v7  ;;  %v865_v8 = vpop.permute.xlu1 %864  ;;  %vm3332_vm0 = vcmask 195584  }
  0xdb   : > { %v2862_v25 = vpop.permute.xlu0 %1645  ;;  %v1744_v13 = vpack.i.bf16 %v662_v16, %v670_v24  ;;  %v936_v57 = vsel %vm3331_vm1, %v1749_v28, %v1528_v55  ;;  %v1588_v16 = vunpack.i.h.bf16 %v2623_v34  ;;  %v1603_v34 = vunpack.i.h.bf16 %v2669_v21  ;;  %vm3334_vm1 = vmmov %vm3333_vm5  ;;  %v1751_v21 = vld [vmem:[%s1836_s19 + $0x30] sm:$0xff] }
  0xdc   : > { %880 = vrot.lane.b32.xlu1 %v859_v38, %s1789_s29  ;;  %v948_v15 = vsel %vm3332_vm0, %v936_v57, %v1553_v46  ;;  %v1542_v38 = vunpack.i.l.bf16 %v2508_v58  ;;  %v1593_v46 = vunpack.i.h.bf16 %v2629_v61  ;;  %v1607_v61 = vunpack.i.l.bf16 %v2696_v43 }
  0xdd   : > { %870 = vrot.lane.b32.xlu0 %v2219_v47, %s1789_s29  ;;  %v960_v3 = vsel %vm958_vm9, %v948_v15, %v1578_v12  ;;  %v1567_v15 = vunpack.i.l.bf16 %v2537_v60  ;;  %v1623_v12 = vunpack.i.h.bf16 %v2724_v1  ;;  %v1750_v60 = vld [vmem:[%s1836_s19 + $0x40] sm:$0xff]  ;;  %vm3335_vm0 = vcmask 97280  }
  0xde   : > { %v2869_v9 = vpop.permute.xlu1 %1650  ;;  %v941_v28 = vsel %vm3335_vm0, %v1751_v21, %v1542_v38  ;;  %v898_v43 = vsel %vm442_vm3, %v895_v4, %v897_v31  ;;  %vm3338_vm0 = vcmask 490496  }
  0xdf   : > { %v1653_v11 = vunpack.i.h.bf16 %v2869_v9  ;;  %v2874_v5 = vpop.permute.xlu0 %874 }
  0xe0   : > { %1745 = vrot.lane.b32.xlu1 %v1744_v13, %s1790_s9  ;;  %v1597_v13 = vunpack.i.l.bf16 %v2641_v26  ;;  %v1617_v26 = vunpack.i.l.bf16 %v2706_v50 }
  0xe1   : > { %v2882_v47 = vsel %vm3333_vm5, %v974_v35, %v1653_v11  ;;  %486 = vrot.lane.b32.xlu0 %v2546_v23, %s1781_s25  ;;  %v972_v35 = vsel %vm970_vm10, %v960_v3, %v1583_v32  ;;  %v1613_v23 = vunpack.i.h.bf16 %v2678_v27  ;;  %vm3336_vm5 = vcmask 195584  }
  0xe2   : > { %v2888_v24 = vpop.permute.xlu1 %710  ;;  %v984_v58 = vsel %vm3334_vm1, %v972_v35, %v1588_v16  ;;  %v953_v1 = vsel %vm3336_vm5, %v941_v28, %v1567_v15  ;;  %vm3337_vm1 = vcmask 31744   ;;  %v1627_v3 = vunpack.i.l.bf16 %v2791_v36 }
  0xe3   : > { %v2893_v55 = vpop.permute.xlu0 %1655  ;;  %v996_v57 = vsel %vm994_vm12, %v984_v58, %v1593_v46  ;;  %v1056_v32 = vsel %vm3337_vm1, %v2721_v56, %v2745_v2  ;;  %v965_v50 = vsel %vm958_vm9, %v953_v1, %v1597_v13  ;;  %v1637_v46 = vunpack.i.l.bf16 %v2828_v45  ;;  %vm3339_vm5 = vmmov %vm3337_vm1 }
  0xe4   : > { %726 = vrot.lane.b32.xlu1 %v2590_v63, %s1780_s24  ;;  %v1008_v11 = vsel %vm1006_vm15, %v996_v57, %v1603_v34  ;;  %v1068_v38 = vsel %vm1066_vm14, %v1056_v32, %v2789_v33  ;;  %v977_v15 = vsel %vm970_vm10, %v965_v50, %v1607_v61  ;;  %v1647_v36 = vunpack.i.l.bf16 %v2862_v25 }
  0xe5   : > { %716 = vrot.lane.b32.xlu0 %v1750_v60, %s1780_s24  ;;  %v1020_v4 = vsel %vm1018_vm8, %v1008_v11, %v1613_v23  ;;  %v1080_v2 = vsel %vm1078_vm7, %v1068_v38, %v2826_v40  ;;  %v989_v34 = vsel %vm3338_vm0, %v977_v15, %v1617_v26  ;;  %v521_v23 = vrot.slane %v2395_v52, 5  ;;  %v222_v60 = vld [vmem:[%s1836_s19 + $0x78] sm:$0xff]  ;;  %s1483_s19 = smul.u32 88, %s3369_s12 }
  0xe6   : > { %v2909_v27 = vpop.permute.xlu1 %750  ;;  %v1032_v33 = vsel %vm1030_vm11, %v1020_v4, %v1623_v12  ;;  %v1092_v35 = vsel %vm1090_vm6, %v1080_v2, %v865_v8  ;;  %v1001_v58 = vsel %vm994_vm12, %v989_v34, %v1627_v3  ;;  %vm3340_vm1 = vcmask 1042432  }
  0xe7   : > { %v2922_v16 = vpop.permute.xlu0 %720  ;;  %v1013_v12 = vsel %vm1006_vm15, %v1001_v58, %v1637_v46  ;;  %v1044_v8 = vsel %vm1042_vm13, %v1032_v33, %v2721_v56  ;;  %v522_v26 = vsel %vm3340_vm1, %v519_v6, %v521_v23  ;;  %v821_v6 = vrot.slane %v222_v60, 2 }
  0xe8   : > { %766 = vrot.lane.b32.xlu1 %v2787_v18, %s1783_s27  ;;  %v1657_v18 = vunpack.i.l.bf16 %v2893_v55  ;;  %v1025_v28 = vsel %vm1018_vm8, %v1013_v12, %v1647_v36  ;;  %v3341_v32 = vrot.slane %v2749_v59, 1  ;;  %vm3342_vm0 = vcmask 1046528  }
  0xe9   : > { %756 = vrot.lane.b32.xlu0 %v1915_v41, %s1783_s27  ;;  %v1061_v41 = vsel %vm3339_vm5, %v2755_v19, %v2774_v49  ;;  %vm3344_vm5 = vcmask 1045504   ;;  %v3345_v36 = vrot.slane %v2395_v52, 6  ;;  %vm3346_vm1 = vcmask 1041408  }
  0xea   : > { %v904_v13 = vpop.permute.xlu1 %903  ;;  %v1073_v21 = vsel %vm1066_vm14, %v1061_v41, %v2806_v0  ;;  %v1037_v56 = vsel %vm1030_vm11, %v1025_v28, %v1657_v18  ;;  %v860_v34 = vrot.slane %v222_v60, 3  ;;  %v1632_v41 = vunpack.i.l.bf16 %v2803_v44 }
  0xeb   : > { %v1104_v40 = vsel %vm1102_vm4, %v1092_v35, %v904_v13  ;;  %v2944_v61 = vpop.permute.xlu0 %760  ;;  %v1085_v49 = vsel %vm1078_vm7, %v1073_v21, %v2840_v17  ;;  %v1049_v20 = vsel %vm1042_vm13, %v1037_v56, %v2755_v19  ;;  %v614_v19 = vrot.slane %v2590_v63, 6 }
  0xec   : > { %919 = vrot.lane.b32.xlu1 %v898_v43, %s1791_s30  ;;  %1422 = vmatprep.mubr.msk.f32.mxu0 %vm1145_vm2, %v1104_v40  ;;  %v780_v43 = vrot.slane %v222_v60, 1  ;;  %v1097_v0 = vsel %vm1090_vm6, %v1085_v49, %v2874_v5  ;;  %v1638_v56 = vunpack.i.h.bf16 %v2828_v45 }
  0xed   : > { %909 = vrot.lane.b32.xlu0 %v2278_v22, %s1791_s30  ;;  %1249 = vmatmul.mubr.f32.gmra.mxu0 %v1044_v8  ;;  %v615_v33 = vsel %vm3346_vm1, %v3345_v36, %v614_v19  ;;  %v1642_v8 = vunpack.i.l.bf16 %v2837_v51 }
  0xee   : > { %v2962_v57 = vpop.permute.xlu1 %1660 }
  0xef   : > { %v1663_v22 = vunpack.i.h.bf16 %v2962_v57  ;;  %v914_v1 = vpop.permute.xlu0 %913  ;;  %v1662_v21 = vunpack.i.l.bf16 %v2962_v57 }
  0xf0   : > { %792 = vrot.lane.b32.xlu1 %v1918_v42, %s1784_s28  ;;  %v1109_v17 = vsel %vm1102_vm4, %v1097_v0, %v914_v1  ;;  %v781_v42 = vsel %vm3342_vm0, %v3341_v32, %v780_v43  ;;  %vm3347_vm0 = vcmask 1040384  }
  0xf1   : > { %v2976_v11 = vsel %vm994_vm12, %v2882_v47, %v1663_v22  ;;  %543 = vrot.lane.b32.xlu0 %v522_v26, %s1782_s26  ;;  %1427 = vmatprep.mubr.msk.f32.mxu1 %vm1145_vm2, %v1109_v17  ;;  %v3343_v47 = vrot.slane %v2749_v59, 2  ;;  %v1658_v22 = vunpack.i.h.bf16 %v2893_v55  ;;  %s3248_s26 = scalar_lea.vmem %s3284_s3, %s1483_s19 }
  0xf2   : > { %1274 = vmatmul.mubr.f32.vlgmr.msra.gmra.mxu1 %v1049_v20  ;;  %v797_v5 = vpop.permute.xlu1 %796 }
  0xf3   : > { %v787_v3 = vpop.permute.xlu0 %786  ;;  %v822_v50 = vsel %vm3344_vm5, %v3343_v47, %v821_v6  ;;  %vm3349_vm5 = vcmask 1044480  }
  0xf4   : > { %600 = vrot.lane.b32.xlu1 %v2824_v14, %s1787_s7  ;;  %v671_v14 = vrot.slane %v2590_v63, 7  ;;  %v899_v63 = vrot.slane %v222_v60, 4 }
  0xf5   : > { %802 = vrot.lane.b32.xlu0 %v781_v42, %s1784_s28 }
  0xf6   : > { %v2991_v38 = vpop.permute.xlu1 %1670  ;;  %v900_v52 = vsel %vm442_vm3, %v897_v31, %v899_v63  ;;  %v1652_v31 = vunpack.i.l.bf16 %v2869_v9  ;;  %vm3350_vm3 = vcmask 490496   ;;  %v1648_v9 = vunpack.i.h.bf16 %v2862_v25 }
  0xf7   : > { %v2994_v46 = vpop.permute.xlu0 %1665  ;;  %v1672_v26 = vunpack.i.l.bf16 %v2991_v38  ;;  %vm3351_vm1 = vmmov %vm3350_vm3  ;;  %v1009_v25 = vsel %vm1006_vm15, %v2801_v48, %v1638_v56 }
  0xf8   : > { %v1668_v4 = vunpack.i.h.bf16 %v2994_v46  ;;  %843 = vrot.lane.b32.xlu1 %v822_v50, %s1785_s4  ;;  %v1667_v56 = vunpack.i.l.bf16 %v2994_v46 }
  0xf9   : > { %833 = vrot.lane.b32.xlu0 %v1962_v10, %s1785_s4  ;;  %v672_v10 = vsel %vm3347_vm0, %v669_v7, %v671_v14  ;;  %vm3352_vm0 = vcmask 31744  }
  0xfa   : > { %v963_v15 = vsel %vm958_vm9, %v2579_v53, %v1668_v4  ;;  %v838_v2 = vpop.permute.xlu1 %837  ;;  %v3348_v53 = vrot.slane %v2749_v59, 3  ;;  %v1062_v45 = vsel %vm3352_vm0, %v2922_v16, %v2944_v61  ;;  %v1021_v61 = vsel %vm1018_vm8, %v1009_v25, %v1648_v9 }
  0xfb   : > { %v828_v35 = vpop.permute.xlu0 %827  ;;  %v1074_v55 = vsel %vm1066_vm14, %v1062_v45, %v797_v5  ;;  %v1033_v14 = vsel %vm1030_vm11, %v1021_v61, %v1658_v22  ;;  %v967_v46 = vsel %vm958_vm9, %v2601_v54, %v1667_v56 }
  0xfc   : > { %872 = vrot.lane.b32.xlu1 %v2464_v62, %s1789_s29  ;;  %v861_v13 = vsel %vm3349_vm5, %v3348_v53, %v860_v34  ;;  %vm3353_vm5 = vmmov %vm3352_vm0  ;;  %v1086_v47 = vsel %vm1078_vm7, %v1074_v55, %v838_v2  ;;  %v1045_v36 = vsel %vm1042_vm13, %v1033_v14, %v2888_v24 }
  0xfd   : > { %636 = vrot.lane.b32.xlu0 %v615_v33, %s1788_s10  ;;  %v1057_v6 = vsel %vm3353_vm5, %v2888_v24, %v2909_v27 }
  0xfe   : > { %v3012_v18 = vpop.permute.xlu1 %1680  ;;  %v1069_v42 = vsel %vm1066_vm14, %v1057_v6, %v787_v3 }
  0xff   : > { %v3017_v23 = vpop.permute.xlu0 %1675  ;;  %v1682_v43 = vunpack.i.l.bf16 %v3012_v18  ;;  %v1081_v19 = vsel %vm1078_vm7, %v1069_v42, %v828_v35 }
 0x100   : > { %v1678_v58 = vunpack.i.h.bf16 %v3017_v23  ;;  %693 = vrot.lane.b32.xlu1 %v672_v10, %s1790_s9 }
 0x101   : > { %882 = vrot.lane.b32.xlu0 %v861_v13, %s1789_s29 }
 0x102   : > { %v975_v62 = vsel %vm970_vm10, %v963_v15, %v1678_v58  ;;  %v877_v7 = vpop.permute.xlu1 %876 }
 0x103   : > { %v867_v40 = vpop.permute.xlu0 %866  ;;  %v1098_v48 = vsel %vm1090_vm6, %v1086_v47, %v877_v7 }
 0x104   : > { %921 = vrot.lane.b32.xlu1 %v900_v52, %s1791_s30  ;;  %v1093_v27 = vsel %vm1090_vm6, %v1081_v19, %v867_v40 }
 0x105   : > { %911 = vrot.lane.b32.xlu0 %v2506_v39, %s1791_s30  ;;  %v966_v39 = vsel %vm958_vm9, %v2569_v37, %v1632_v41 }
 0x106   : > { %v3029_v60 = vpop.permute.xlu1 %1690  ;;  %v978_v51 = vsel %vm970_vm10, %v966_v39, %v1642_v8  ;;  %v1673_v39 = vunpack.i.h.bf16 %v2991_v38 }
 0x107   : > { %v3032_v12 = vpop.permute.xlu0 %1685  ;;  %v990_v57 = vsel %vm3351_vm1, %v978_v51, %v1652_v31  ;;  %v1692_v0 = vunpack.i.l.bf16 %v3029_v60  ;;  %v1683_v51 = vunpack.i.h.bf16 %v3012_v18  ;;  %v1693_v9 = vunpack.i.h.bf16 %v3029_v60 }
 0x108   : > { %v1688_v59 = vunpack.i.h.bf16 %v3032_v12  ;;  %v1002_v37 = vsel %vm994_vm12, %v990_v57, %v1662_v21  ;;  %v1687_v57 = vunpack.i.l.bf16 %v3032_v12  ;;  %v1010_v22 = vsel %vm1006_vm15, %v2976_v11, %v1673_v39 }
 0x109   : > { %v1014_v17 = vsel %vm1006_vm15, %v1002_v37, %v1672_v26  ;;  %v1022_v60 = vsel %vm1018_vm8, %v1010_v22, %v1683_v51 }
 0x10a   : > { %v987_v28 = vsel %vm3350_vm3, %v975_v62, %v1688_v59  ;;  %v3039_v49 = vpop.permute.xlu1 %722  ;;  %v1026_v32 = vsel %vm1018_vm8, %v1014_v17, %v1682_v43  ;;  %vm3354_vm3 = vmmov %vm3351_vm1  ;;  %v1677_v43 = vunpack.i.l.bf16 %v3017_v23 }
 0x10b   : > { %v3044_v44 = vpop.permute.xlu0 %712  ;;  %v1038_v50 = vsel %vm1030_vm11, %v1026_v32, %v1692_v0  ;;  %vm3355_vm1 = vmmov %vm3352_vm0 }
 0x10c   : > { %v1050_v2 = vsel %vm1042_vm13, %v1038_v50, %v2922_v16  ;;  %v979_v12 = vsel %vm970_vm10, %v967_v46, %v1677_v43  ;;  %vm3356_vm0 = vmmov %vm3354_vm3 }
 0x10d   : > { %v991_v25 = vsel %vm3356_vm0, %v979_v12, %v1687_v57  ;;  %vm3357_vm5 = vmmov %vm3355_vm1 }
 0x10e   : > { %v3054_v1 = vpop.permute.xlu1 %762 }
 0x10f   : > { %v753_v20 = vpop.permute.xlu0 %752  ;;  %v1063_v61 = vsel %vm3357_vm5, %v3039_v49, %v3054_v1 }
 0x110   : > { %v1058_v38 = vsel %vm3355_vm1, %v3044_v44, %v753_v20  ;;  %v1034_v20 = vsel %vm1030_vm11, %v1022_v60, %v1693_v9 }
 0x111   : > { %v1046_v19 = vsel %vm1042_vm13, %v1034_v20, %v3044_v44 }
 0x112   : > { %v916_v4 = vpop.permute.xlu1 %915 }
 0x113   : > { %v1110_v5 = vsel %vm1102_vm4, %v1098_v48, %v916_v4  ;;  %v906_v15 = vpop.permute.xlu0 %905 }
 0x114   : > { %v1105_v3 = vsel %vm1102_vm4, %v1093_v27, %v906_v15  ;;  %1428 = vmatprep.mubr.msk.f32.mxu1 %vm1145_vm2, %v1110_v5 }
 0x115   : > { %1423 = vmatprep.mubr.msk.f32.mxu0 %vm1145_vm2, %v1105_v3  ;;  %1279 = vmatmul.mubr.f32.gmra.mxu1 %v1050_v2 }
 0x116   : > { %1254 = vmatmul.mubr.f32.gmra.mxu0 %v1045_v36  ;;  %v789_v33 = vpop.permute.xlu1 %788 }
 0x117   : > { %v1696_v34 = vpop.permute.xlu0 %1695  ;;  %v1070_v18 = vsel %vm1066_vm14, %v1058_v38, %v789_v33 }
 0x118   : > { %v1698_v35 = vunpack.i.h.bf16 %v1696_v34  ;;  %v1697_v37 = vunpack.i.l.bf16 %v1696_v34 }
 0x11a   : > { %v3084_v10 = vsel %vm994_vm12, %v987_v28, %v1698_v35  ;;  %v3086_v63 = vpop.permute.xlu1 %1700  ;;  %v1003_v32 = vsel %vm994_vm12, %v991_v25, %v1697_v37 }
 0x11b   : > { %v1703_v53 = vunpack.i.h.bf16 %v3086_v63  ;;  %v799_v13 = vpop.permute.xlu0 %798 }
 0x11c   : > { %v1075_v48 = vsel %vm1066_vm14, %v1063_v61, %v799_v13 }
 0x11d   : > { %v964_v16 = vsel %vm958_vm9, %v2576_v30, %v1703_v53 }
 0x11e   : > { %v830_v58 = vpop.permute.xlu1 %829 }
 0x11f   : > { %v3091_v52 = vpop.permute.xlu0 %1705  ;;  %v1082_v17 = vsel %vm1078_vm7, %v1070_v18, %v830_v58 }
 0x120   : > { %v1707_v23 = vunpack.i.l.bf16 %v3091_v52  ;;  %v1708_v9 = vunpack.i.h.bf16 %v3091_v52 }
 0x122   : > { %v3093_v24 = vpop.permute.xlu1 %1710  ;;  %v1015_v50 = vsel %vm1006_vm15, %v1003_v32, %v1707_v23  ;;  %v1011_v23 = vsel %vm1006_vm15, %v3084_v10, %v1708_v9 }
 0x123   : > { %v1713_v62 = vunpack.i.h.bf16 %v3093_v24  ;;  %v840_v7 = vpop.permute.xlu0 %839 }
 0x124   : > { %v1087_v14 = vsel %vm1078_vm7, %v1075_v48, %v840_v7 }
 0x125   : > { %v976_v40 = vsel %vm970_vm10, %v964_v16, %v1713_v62 }
 0x126   : > { %v869_v41 = vpop.permute.xlu1 %868 }
 0x127   : > { %v3097_v8 = vpop.permute.xlu0 %1715  ;;  %v1094_v6 = vsel %vm1090_vm6, %v1082_v17, %v869_v41 }
 0x128   : > { %v1717_v11 = vunpack.i.l.bf16 %v3097_v8 }
 0x12a   : > { %v3099_v59 = vpop.permute.xlu1 %1720  ;;  %v1027_v4 = vsel %vm1018_vm8, %v1015_v50, %v1717_v11 }
 0x12b   : > { %v1723_v31 = vunpack.i.h.bf16 %v3099_v59  ;;  %v879_v21 = vpop.permute.xlu0 %878 }
 0x12c   : > { %v1099_v1 = vsel %vm1090_vm6, %v1087_v14, %v879_v21 }
 0x12d   : > { %v3103_v30 = vsel %vm3354_vm3, %v976_v40, %v1723_v31  ;;  %v1702_v40 = vunpack.i.l.bf16 %v3086_v63  ;;  %v1722_v31 = vunpack.i.l.bf16 %v3099_v59  ;;  %vm3358_vm3 = vmmov %vm3356_vm0 }
 0x12e   : > { %v3105_v28 = vpop.permute.xlu1 %714  ;;  %vm3359_vm0 = vmmov %vm3355_vm1 }
 0x12f   : > { %v3108_v26 = vpop.permute.xlu0 %1725  ;;  %v968_v56 = vsel %vm958_vm9, %v2604_v29, %v1702_v40  ;;  %vm3361_vm5 = vmmov %vm3358_vm3 }
 0x130   : > { %v1727_v54 = vunpack.i.l.bf16 %v3108_v26  ;;  %v1728_v38 = vunpack.i.h.bf16 %v3108_v26 }
 0x132   : > { %v3115_v0 = vpop.permute.xlu1 %754  ;;  %v1039_v5 = vsel %vm1030_vm11, %v1027_v4, %v1727_v54 }
 0x133   : > { %v3121_v45 = vpop.permute.xlu0 %724  ;;  %v1051_v44 = vsel %vm1042_vm13, %v1039_v5, %v3039_v49  ;;  %v1712_v49 = vunpack.i.l.bf16 %v3093_v24  ;;  %v1718_v24 = vunpack.i.h.bf16 %v3097_v8  ;;  %v1059_v8 = vsel %vm3359_vm0, %v3105_v28, %v3115_v0 }
 0x135   : > { %v980_v63 = vsel %vm970_vm10, %v968_v56, %v1712_v49  ;;  %v1023_v11 = vsel %vm1018_vm8, %v1011_v23, %v1718_v24 }
 0x136   : > { %v908_v55 = vpop.permute.xlu1 %907  ;;  %v992_v59 = vsel %vm3358_vm3, %v980_v63, %v1722_v31  ;;  %v1035_v54 = vsel %vm1030_vm11, %v1023_v11, %v1728_v38  ;;  %vm3362_vm3 = vmmov %vm3359_vm0 }
 0x137   : > { %v1106_v42 = vsel %vm1102_vm4, %v1094_v6, %v908_v55  ;;  %v765_v47 = vpop.permute.xlu0 %764  ;;  %v1047_v61 = vsel %vm1042_vm13, %v1035_v54, %v3105_v28 }
 0x138   : > { %1424 = vmatprep.mubr.msk.f32.mxu0 %vm1145_vm2, %v1106_v42  ;;  %v1064_v46 = vsel %vm3355_vm1, %v3121_v45, %v765_v47 }
 0x139   : > { %1259 = vmatmul.mubr.f32.gmra.mxu0 %v1046_v19 }
 0x13a   : > { %v3147_v27 = vpop.permute.xlu1 %1730 }
 0x13b   : > { %v918_v15 = vpop.permute.xlu0 %917  ;;  %v1732_v21 = vunpack.i.l.bf16 %v3147_v27 }
 0x13c   : > { %v1111_v3 = vsel %vm1102_vm4, %v1099_v1, %v918_v15  ;;  %v1733_v15 = vunpack.i.h.bf16 %v3147_v27 }
 0x13d   : > { %1429 = vmatprep.mubr.msk.f32.mxu1 %vm1145_vm2, %v1111_v3  ;;  %v1004_v29 = vsel %vm994_vm12, %v992_v59, %v1732_v21  ;;  %v3360_v3 = vld [vmem:[#allocation2_spill] sm:$0xff] }
 0x13e   : > { %1284 = vmatmul.mubr.f32.gmra.mxu1 %v1051_v44  ;;  %v801_v2 = vpop.permute.xlu1 %800  ;;  %v1000_v27 = vsel %vm994_vm12, %v3103_v30, %v1733_v15 }
 0x13f   : > { %v791_v36 = vpop.permute.xlu0 %790  ;;  %v1076_v60 = vsel %vm1066_vm14, %v1064_v46, %v801_v2 }
 0x140   : > { %v1071_v12 = vsel %vm1066_vm14, %v1059_v8, %v791_v36 }
 0x142   : > { %v3155_v33 = vpop.permute.xlu1 %1735 }
 0x143   : > { %v394_v34 = vpop.permute.xlu0 %393  ;;  %v1737_v51 = vunpack.i.l.bf16 %v3155_v33  ;;  %v1738_v2 = vunpack.i.h.bf16 %v3155_v33 }
 0x144   : > { %v969_v44 = vsel %vm958_vm9, %v3360_v3, %v394_v34  ;;  %vm3363_vm9 = vmmov %vm3359_vm0 }
 0x145   : > { %v1016_v52 = vsel %vm1006_vm15, %v1004_v29, %v1737_v51 }
 0x146   : > { %v842_v35 = vpop.permute.xlu1 %841 }
 0x147   : > { %v832_v53 = vpop.permute.xlu0 %831  ;;  %v1088_v17 = vsel %vm1078_vm7, %v1076_v60, %v842_v35 }
 0x148   : > { %v1083_v25 = vsel %vm1078_vm7, %v1071_v12, %v832_v53 }
 0x14a   : > { %v3157_v13 = vpop.permute.xlu1 %1740 }
 0x14b   : > { %v430_v16 = vpop.permute.xlu0 %429  ;;  %v1742_v57 = vunpack.i.l.bf16 %v3157_v13  ;;  %v1743_v28 = vunpack.i.h.bf16 %v3157_v13 }
 0x14c   : > { %v981_v36 = vsel %vm970_vm10, %v969_v44, %v430_v16  ;;  %v1012_v16 = vsel %vm1006_vm15, %v1000_v27, %v1738_v2 }
 0x14d   : > { %v1028_v26 = vsel %vm1018_vm8, %v1016_v52, %v1742_v57  ;;  %v1024_v21 = vsel %vm1018_vm8, %v1012_v16, %v1743_v28 }
 0x14e   : > { %v881_v58 = vpop.permute.xlu1 %880 }
 0x14f   : > { %v871_v62 = vpop.permute.xlu0 %870  ;;  %v1100_v10 = vsel %vm1090_vm6, %v1088_v17, %v881_v58 }
 0x150   : > { %v1095_v0 = vsel %vm1090_vm6, %v1083_v25, %v871_v62 }
 0x152   : > { %v3159_v7 = vpop.permute.xlu1 %1745 }
 0x153   : > { %v487_v41 = vpop.permute.xlu0 %486  ;;  %v1747_v22 = vunpack.i.l.bf16 %v3159_v7  ;;  %v1748_v53 = vunpack.i.h.bf16 %v3159_v7 }
 0x154   : > { %v993_v35 = vsel %vm3361_vm5, %v981_v36, %v487_v41 }
 0x155   : > { %v1040_v20 = vsel %vm1030_vm11, %v1028_v26, %v1747_v22  ;;  %v1036_v63 = vsel %vm1030_vm11, %v1024_v21, %v1748_v53 }
 0x156   : > { %v3165_v39 = vpop.permute.xlu1 %726  ;;  %v1052_v47 = vsel %vm1042_vm13, %v1040_v20, %v3121_v45 }
 0x157   : > { %v3170_v43 = vpop.permute.xlu0 %716 }
 0x158   : > { %v1048_v29 = vsel %vm1042_vm13, %v1036_v63, %v3170_v43 }
 0x15a   : > { %v767_v37 = vpop.permute.xlu1 %766 }
 0x15b   : > { %v757_v18 = vpop.permute.xlu0 %756  ;;  %v1065_v34 = vsel %vm3362_vm3, %v3165_v39, %v767_v37  ;;  %v1420_v37 = vld [vmem:[%s3283_s2] ss:$0 sm:$0xff] }
 0x15c   : > { %v1060_v13 = vsel %vm3363_vm9, %v3170_v43, %v757_v18 }
 0x15e   : > { %v920_v6 = vpop.permute.xlu1 %919 }
 0x15f   : > { %v1112_v55 = vsel %vm1102_vm4, %v1100_v10, %v920_v6  ;;  %v910_v32 = vpop.permute.xlu0 %909 }
 0x160   : > { %v1107_v42 = vsel %vm1102_vm4, %v1095_v0, %v910_v32  ;;  %1430 = vmatprep.mubr.msk.f32.mxu1 %vm1145_vm2, %v1112_v55 }
 0x161   : > { %1425 = vmatprep.mubr.msk.f32.mxu0 %vm1145_vm2, %v1107_v42  ;;  %1289 = vmatmul.mubr.f32.gmra.mxu1 %v1052_v47 }
 0x162   : > { %1264 = vmatmul.mubr.f32.gmra.mxu0 %v1047_v61  ;;  %v793_v50 = vpop.permute.xlu1 %792 }
 0x163   : > { %v544_v19 = vpop.permute.xlu0 %543  ;;  %v1072_v49 = vsel %vm1066_vm14, %v1060_v13, %v793_v50 }
 0x164   : > { %v1005_v58 = vsel %vm994_vm12, %v993_v35, %v544_v19 }
 0x166   : > { %v601_v48 = vpop.permute.xlu1 %600 }
 0x167   : > { %v803_v4 = vpop.permute.xlu0 %802  ;;  %v1017_v40 = vsel %vm1006_vm15, %v1005_v58, %v601_v48 }
 0x168   : > { %v1077_v41 = vsel %vm1066_vm14, %v1065_v34, %v803_v4 }
 0x16a   : > { %v844_v14 = vpop.permute.xlu1 %843 }
 0x16b   : > { %v834_v5 = vpop.permute.xlu0 %833  ;;  %v1089_v31 = vsel %vm1078_vm7, %v1077_v41, %v844_v14 }
 0x16c   : > { %v1084_v56 = vsel %vm1078_vm7, %v1072_v49, %v834_v5 }
 0x16e   : > { %v873_v1 = vpop.permute.xlu1 %872 }
 0x16f   : > { %v637_v45 = vpop.permute.xlu0 %636  ;;  %v1096_v57 = vsel %vm1090_vm6, %v1084_v56, %v873_v1 }
 0x170   : > { %v1029_v7 = vsel %vm1018_vm8, %v1017_v40, %v637_v45 }
 0x172   : > { %v694_v62 = vpop.permute.xlu1 %693 }
 0x173   : > { %v883_v33 = vpop.permute.xlu0 %882  ;;  %v1041_v30 = vsel %vm1030_vm11, %v1029_v7, %v694_v62 }
 0x174   : > { %v1101_v51 = vsel %vm1090_vm6, %v1089_v31, %v883_v33  ;;  %v1053_v38 = vsel %vm1042_vm13, %v1041_v30, %v3165_v39 }
 0x176   : > { %v922_v9 = vpop.permute.xlu1 %921 }
 0x177   : > { %v1113_v24 = vsel %vm1102_vm4, %v1101_v51, %v922_v9  ;;  %v912_v59 = vpop.permute.xlu0 %911 }
 0x178   : > { %v1108_v22 = vsel %vm1102_vm4, %v1096_v57, %v912_v59  ;;  %1431 = vmatprep.mubr.msk.f32.mxu1 %vm1145_vm2, %v1113_v24 }
 0x179   : > { %1426 = vmatprep.mubr.msk.f32.mxu0 %vm1145_vm2, %v1108_v22  ;;  %1294 = vmatmul.mubr.f32.gmra.mxu1 %v1053_v38 }
 0x17a   : > { %1269 = vmatmul.mubr.f32.gmra.mxu0 %v1048_v29 }
 0x189   : > { %v1245_v46 = vpop.f32.mrf.mxu0 }
 0x18a   : > { %v1246_v52 = vadd.f32 %v1420_v37, %v1245_v46 }
 0x18b   : > { %v1247_v39 = vpop.f32.mrf.mxu0 }
 0x18c   : > { %v1299_v18 = vmax.f32 %v1246_v52, 0.0 }
 0x18e   : > { %1310 = vst.msk [vmem:[%s3248_s26] sm:$0xff] %vm1145_vm2, %v1299_v18 }
 0x1ad   : > { %v1250_v43 = vpop.f32.mrf.mxu0 }
 0x1ae   : > { %v1251_v23 = vadd.f32 %v1420_v37, %v1250_v43 }
 0x1af   : > { %v1252_v8 = vpop.f32.mrf.mxu0 }
 0x1b0   : > { %v1300_v60 = vmax.f32 %v1251_v23, 0.0 }
 0x1b2   : > { %1311 = vst.msk [vmem:[%s3248_s26 + $0x8] sm:$0xff] %vm1145_vm2, %v1300_v60  ;;  %v1275_v26 = vpop.f32.mrf.mxu1 }
 0x1b3   : > { %v1276_v12 = vadd.f32 %v1420_v37, %v1275_v26 }
 0x1b4   : > { %v1277_v17 = vpop.f32.mrf.mxu1 }
 0x1b5   : > { %v1305_v11 = vmax.f32 %v1276_v12, 0.0 }
 0x1b7   : > { %1316 = vst.msk [vmem:[%s3248_s26 + $0x30] sm:$0xff] %vm1145_vm2, %v1305_v11 }
 0x1d5   : > { %v1280_v20 = vpop.f32.mrf.mxu1 }
 0x1d6   : > { %v1255_v25 = vpop.f32.mrf.mxu0  ;;  %v1281_v10 = vadd.f32 %v1420_v37, %v1280_v20 }
 0x1d7   : > { %v1256_v6 = vadd.f32 %v1420_v37, %v1255_v25  ;;  %v1282_v54 = vpop.f32.mrf.mxu1 }
 0x1d8   : > { %v1306_v0 = vmax.f32 %v1281_v10, 0.0  ;;  %v1257_v55 = vpop.f32.mrf.mxu0 }
 0x1d9   : > { %v1301_v32 = vmax.f32 %v1256_v6, 0.0 }
 0x1da   : > { %1317 = vst.msk [vmem:[%s3248_s26 + $0x38] sm:$0xff] %vm1145_vm2, %v1306_v0 }
 0x1db   : > { %1312 = vst.msk [vmem:[%s3248_s26 + $0x10] sm:$0xff] %vm1145_vm2, %v1301_v32 }
 0x1f9   : > { %v1260_v42 = vpop.f32.mrf.mxu0 }
 0x1fa   : > { %v1261_v47 = vadd.f32 %v1420_v37, %v1260_v42 }
 0x1fb   : > { %v1262_v61 = vpop.f32.mrf.mxu0 }
 0x1fc   : > { %v1302_v50 = vmax.f32 %v1261_v47, 0.0 }
 0x1fe   : > { %1313 = vst.msk [vmem:[%s3248_s26 + $0x18] sm:$0xff] %vm1145_vm2, %v1302_v50  ;;  %v1285_v19 = vpop.f32.mrf.mxu1 }
 0x1ff   : > { %v1286_v48 = vadd.f32 %v1420_v37, %v1285_v19 }
 0x200   : > { %v1287_v4 = vpop.f32.mrf.mxu1 }
 0x201   : > { %v1307_v14 = vmax.f32 %v1286_v48, 0.0 }
 0x203   : > { %1318 = vst.msk [vmem:[%s3248_s26 + $0x40] sm:$0xff] %vm1145_vm2, %v1307_v14 }
 0x221   : > { %v1290_v5 = vpop.f32.mrf.mxu1 }
 0x222   : > { %v1265_v1 = vpop.f32.mrf.mxu0  ;;  %v1291_v15 = vadd.f32 %v1420_v37, %v1290_v5 }
 0x223   : > { %v1266_v3 = vadd.f32 %v1420_v37, %v1265_v1  ;;  %v1292_v44 = vpop.f32.mrf.mxu1 }
 0x224   : > { %v1308_v45 = vmax.f32 %v1291_v15, 0.0  ;;  %v1267_v2 = vpop.f32.mrf.mxu0 }
 0x225   : > { %v1303_v36 = vmax.f32 %v1266_v3, 0.0 }
 0x226   : > { %1319 = vst.msk [vmem:[%s3248_s26 + $0x48] sm:$0xff] %vm1145_vm2, %v1308_v45 }
 0x227   : > { %1314 = vst.msk [vmem:[%s3248_s26 + $0x20] sm:$0xff] %vm1145_vm2, %v1303_v36 }
 0x239   : > { %v1295_v28 = vpop.f32.mrf.mxu1 }
 0x23a   : > { %v1270_v35 = vpop.f32.mrf.mxu0  ;;  %v1296_v53 = vadd.f32 %v1420_v37, %v1295_v28 }
 0x23b   : > { %v1271_v58 = vadd.f32 %v1420_v37, %v1270_v35  ;;  %v1297_v62 = vpop.f32.mrf.mxu1 }
 0x23c   : > { %v1309_v27 = vmax.f32 %v1296_v53, 0.0  ;;  %v1272_v34 = vpop.f32.mrf.mxu0 }
 0x23d   : > { %v1304_v40 = vmax.f32 %v1271_v58, 0.0 }
 0x23e   : > { %1320 = vst.msk [vmem:[%s3248_s26 + $0x50] sm:$0xff] %vm1145_vm2, %v1309_v27 }
 0x23f   : > { %1315 = vst.msk [vmem:[%s3248_s26 + $0x28] sm:$0xff] %vm1145_vm2, %v1304_v40 }
 0x240 PF: > { %s13_s14 = sadd.s32 1, %s1774_s14   ;;  %s3364_s12 = smov %s1770_s13 }
 0x241   : > { %p10_p5 = scmp.ge.s32.totalorder %s13_s14, 4   ;;  %s3365_s13 = smov %s3367_s15 }
 0x243   :  { %12 = sbr.rel (!%p10_p5) target bundleno = 2 (0x2), region = 62 }

// kernel: stem_block_forward.7
= control target key start
LH: loop header
LB: loop body
LE: loop exit
PB: predicated region body
PF: predicated region fallthrough
CT: control target
= control target key end

     0   :  { %s1953_s12 = smov 0   ;;  %s1955_s13 = smov 0   ;;  %s3027_s0 = inlined_call_operand.vmem [shape: f32[2,1,42,256], index: 0, kind: input, shape index: {}]   ;;  %s3028_s1 = inlined_call_operand.vmem [shape: f32[2304,128], index: 1, kind: input, shape index: {}]   ;;  %s3029_s2 = inlined_call_operand.vmem [shape: f32[1,128], index: 2, kind: input, shape index: {}]   ;;  %s3030_s3 = inlined_call_operand.vmem [shape: f32[2,1,24,128], index: 3, kind: output, shape index: {}]  }
   0x1   :  { %s1957_s14 = smov 0  }
   0x2 LB: > { %s25_s15 = sadd.s32 1, %s1927_s13  ;;  %p1476_p0 = scmp.ge.s32.totalorder %s1931_s14, 1  ;;  %s1931_s14 = sphi %s1957_s14, %s13_s14   ;;  %s1927_s13 = sphi %s1955_s13, %s3032_s13   ;;  %s1923_s12 = sphi %s1953_s12, %s3031_s12  }
   0x3   : > { %p27_p1 = scmp.ge.s32.totalorder %s25_s15, 2  ;;  %p157_p2 = scmp.lt.s32.totalorder %s1931_s14, 3 }
   0x5   : > { %s3034_s15 = smov (%p27_p1, %s25_s15), 0  ;;  %p158_p3 = pnand %p1476_p0, %p157_p2 }
   0x6   : > { %p189_p4 = scmp.lt.s32.totalorder (!%p158_p3), %s1923_s12, 1 }
   0x7   : > { %161 = sbr.rel (%p158_p3) target bundleno = 406 (0x196), region = 32 }
   0xc   : > { %v390_v0 = vld [vmem:[%s3028_s1 + $0xf8] sm:$0xff]  ;;  %v389_v4 = vld [vmem:[%s3028_s1 + $0xf0] sm:$0xff]  ;;  %v388_v8 = vld [vmem:[%s3028_s1 + $0xe8] sm:$0xff]  ;;  %s3036_s12 = smov (!%p189_p4, %s1923_s12), 1  ;;  %vm225_vm0 = vcmask 1046528   ;;  %vm246_vm1 = vcmask 1045504  }
   0xd   : > { %v422_v1 = vld [vmem:[%s3028_s1 + $0x1f8] sm:$0xff]  ;;  %1482 = vmatprep.subr.mxu0 %v390_v0  ;;  %v421_v5 = vld [vmem:[%s3028_s1 + $0x1f0] sm:$0xff]  ;;  %v420_v9 = vld [vmem:[%s3028_s1 + $0x1e8] sm:$0xff]  ;;  %s1883_s23 = smul.u32 96, %s3036_s12  ;;  %vm267_vm2 = vcmask 1041408   ;;  %vm288_vm3 = vcmask 1040384  }
   0xe   : > { %v374_v2 = vld [vmem:[%s3028_s1 + $0x78] sm:$0xff]  ;;  %1523 = vmatprep.subr.mxu1 %v422_v1  ;;  %v373_v6 = vld [vmem:[%s3028_s1 + $0x70] sm:$0xff]  ;;  %v372_v10 = vld [vmem:[%s3028_s1 + $0x68] sm:$0xff]  ;;  %vm311_vm4 = vcmask 1043456   ;;  %vm332_vm5 = vcmask 1042432   ;;  %s1884_s18 = smul.u32 24, %s3036_s12 }
   0xf   : > { %v406_v3 = vld [vmem:[%s3028_s1 + $0x178] sm:$0xff]  ;;  %1483 = vmatpush3.msra.mxu0 %v374_v2  ;;  %v405_v7 = vld [vmem:[%s3028_s1 + $0x170] sm:$0xff]  ;;  %v404_v11 = vld [vmem:[%s3028_s1 + $0x168] sm:$0xff]  ;;  %s2121_s19 = scalar_lea.vmem %s3027_s0, %s1883_s23 }
  0x10   : > { %1524 = vmatpush3.msra.mxu1 %v406_v3  ;;  %1484 = vmatprep.subr.mxu0 %v389_v4  ;;  %v387_v12 = vld [vmem:[%s3028_s1 + $0xe0] sm:$0xff]  ;;  %v386_v16 = vld [vmem:[%s3028_s1 + $0xd8] sm:$0xff]  ;;  %v385_v20 = vld [vmem:[%s3028_s1 + $0xd0] sm:$0xff]  ;;  %s206_s22 = scalar_lea.vmem %s3030_s3, %s1884_s18 }
  0x11   : > { %1525 = vmatprep.subr.mxu1 %v421_v5  ;;  %1485 = vmatpush3.msra.mxu0 %v373_v6  ;;  %v419_v13 = vld [vmem:[%s3028_s1 + $0x1e0] sm:$0xff]  ;;  %v418_v17 = vld [vmem:[%s3028_s1 + $0x1d8] sm:$0xff]  ;;  %v417_v21 = vld [vmem:[%s3028_s1 + $0x1d0] sm:$0xff] }
  0x12   : > { %1526 = vmatpush3.msra.mxu1 %v405_v7  ;;  %1486 = vmatprep.subr.mxu0 %v388_v8  ;;  %v371_v14 = vld [vmem:[%s3028_s1 + $0x60] sm:$0xff]  ;;  %v370_v18 = vld [vmem:[%s3028_s1 + $0x58] sm:$0xff]  ;;  %v369_v22 = vld [vmem:[%s3028_s1 + $0x50] sm:$0xff] }
  0x13   : > { %1527 = vmatprep.subr.mxu1 %v420_v9  ;;  %v403_v15 = vld [vmem:[%s3028_s1 + $0x160] sm:$0xff]  ;;  %1487 = vmatpush3.msra.mxu0 %v372_v10  ;;  %v402_v19 = vld [vmem:[%s3028_s1 + $0x158] sm:$0xff]  ;;  %v401_v23 = vld [vmem:[%s3028_s1 + $0x150] sm:$0xff] }
  0x14   : > { %1528 = vmatpush3.msra.mxu1 %v404_v11  ;;  %1488 = vmatprep.subr.mxu0 %v387_v12  ;;  %v384_v24 = vld [vmem:[%s3028_s1 + $0xc8] sm:$0xff]  ;;  %v383_v28 = vld [vmem:[%s3028_s1 + $0xc0] sm:$0xff]  ;;  %v382_v32 = vld [vmem:[%s3028_s1 + $0xb8] sm:$0xff] }
  0x15   : > { %1529 = vmatprep.subr.mxu1 %v419_v13  ;;  %1489 = vmatpush3.msra.mxu0 %v371_v14  ;;  %v416_v25 = vld [vmem:[%s3028_s1 + $0x1c8] sm:$0xff]  ;;  %v415_v29 = vld [vmem:[%s3028_s1 + $0x1c0] sm:$0xff]  ;;  %v414_v33 = vld [vmem:[%s3028_s1 + $0x1b8] sm:$0xff] }
  0x16   : > { %1530 = vmatpush3.msra.mxu1 %v403_v15  ;;  %1490 = vmatprep.subr.mxu0 %v386_v16  ;;  %v368_v26 = vld [vmem:[%s3028_s1 + $0x48] sm:$0xff]  ;;  %v367_v30 = vld [vmem:[%s3028_s1 + $0x40] sm:$0xff]  ;;  %v366_v34 = vld [vmem:[%s3028_s1 + $0x38] sm:$0xff] }
  0x17   : > { %1531 = vmatprep.subr.mxu1 %v418_v17  ;;  %1491 = vmatpush3.msra.mxu0 %v370_v18  ;;  %v400_v27 = vld [vmem:[%s3028_s1 + $0x148] sm:$0xff]  ;;  %v399_v31 = vld [vmem:[%s3028_s1 + $0x140] sm:$0xff]  ;;  %v398_v35 = vld [vmem:[%s3028_s1 + $0x138] sm:$0xff] }
  0x18   : > { %1532 = vmatpush3.msra.mxu1 %v402_v19  ;;  %1492 = vmatprep.subr.mxu0 %v385_v20  ;;  %v381_v36 = vld [vmem:[%s3028_s1 + $0xb0] sm:$0xff]  ;;  %v380_v40 = vld [vmem:[%s3028_s1 + $0xa8] sm:$0xff]  ;;  %v379_v44 = vld [vmem:[%s3028_s1 + $0xa0] sm:$0xff] }
  0x19   : > { %1533 = vmatprep.subr.mxu1 %v417_v21  ;;  %1493 = vmatpush3.msra.mxu0 %v369_v22  ;;  %v413_v37 = vld [vmem:[%s3028_s1 + $0x1b0] sm:$0xff]  ;;  %v412_v41 = vld [vmem:[%s3028_s1 + $0x1a8] sm:$0xff]  ;;  %v411_v45 = vld [vmem:[%s3028_s1 + $0x1a0] sm:$0xff] }
  0x1a   : > { %1534 = vmatpush3.msra.mxu1 %v401_v23  ;;  %1494 = vmatprep.subr.mxu0 %v384_v24  ;;  %v365_v38 = vld [vmem:[%s3028_s1 + $0x30] sm:$0xff]  ;;  %v364_v42 = vld [vmem:[%s3028_s1 + $0x28] sm:$0xff]  ;;  %v363_v46 = vld [vmem:[%s3028_s1 + $0x20] sm:$0xff] }
  0x1b   : > { %1535 = vmatprep.subr.mxu1 %v416_v25  ;;  %1495 = vmatpush3.msra.mxu0 %v368_v26  ;;  %v397_v39 = vld [vmem:[%s3028_s1 + $0x130] sm:$0xff]  ;;  %v396_v43 = vld [vmem:[%s3028_s1 + $0x128] sm:$0xff]  ;;  %v395_v47 = vld [vmem:[%s3028_s1 + $0x120] sm:$0xff] }
  0x1c   : > { %1536 = vmatpush3.msra.mxu1 %v400_v27  ;;  %1496 = vmatprep.subr.mxu0 %v383_v28  ;;  %v378_v48 = vld [vmem:[%s3028_s1 + $0x98] sm:$0xff]  ;;  %v377_v52 = vld [vmem:[%s3028_s1 + $0x90] sm:$0xff]  ;;  %v2145_v53 = vld [vmem:[%s2121_s19 + $0x8] sm:$0xff] }
  0x1d   : > { %1537 = vmatprep.subr.mxu1 %v415_v29  ;;  %1497 = vmatpush3.msra.mxu0 %v367_v30  ;;  %v410_v49 = vld [vmem:[%s3028_s1 + $0x198] sm:$0xff]  ;;  %v409_v55 = vld [vmem:[%s3028_s1 + $0x190] sm:$0xff]  ;;  %v2154_v56 = vld [vmem:[%s2121_s19] sm:$0xff]  ;;  %v229_v62 = vrot.slane %v2145_v53, 1 }
  0x1e   : > { %1538 = vmatpush3.msra.mxu1 %v399_v31  ;;  %1498 = vmatprep.subr.mxu0 %v382_v32  ;;  %v362_v50 = vld [vmem:[%s3028_s1 + $0x18] sm:$0xff]  ;;  %v2157_v57 = vld [vmem:[%s2121_s19 + $0x10] sm:$0xff]  ;;  %v376_v60 = vld [vmem:[%s3028_s1 + $0x88] sm:$0xff]  ;;  %v226_v2 = vrot.slane %v2154_v56, 1 }
  0x1f   : > { %1539 = vmatprep.subr.mxu1 %v414_v33  ;;  %1499 = vmatpush3.msra.mxu0 %v366_v34  ;;  %v394_v51 = vld [vmem:[%s3028_s1 + $0x118] sm:$0xff]  ;;  %v361_v58 = vld [vmem:[%s3028_s1 + $0x10] sm:$0xff]  ;;  %v408_v61 = vld [vmem:[%s3028_s1 + $0x188] sm:$0xff]  ;;  %v227_v3 = vrot.slane %v2157_v57, 1 }
  0x20   : > { %1540 = vmatpush3.msra.mxu1 %v398_v35  ;;  %1500 = vmatprep.subr.mxu0 %v381_v36  ;;  %v2148_v54 = vld [vmem:[%s2121_s19 + $0x18] sm:$0xff]  ;;  %v393_v59 = vld [vmem:[%s3028_s1 + $0x110] sm:$0xff]  ;;  %v360_v0 = vld [vmem:[%s3028_s1 + $0x8] sm:$0xff] }
  0x21   : > { %1541 = vmatprep.subr.mxu1 %v413_v37  ;;  %1501 = vmatpush3.msra.mxu0 %v365_v38  ;;  %v230_v63 = vrot.slane %v2148_v54, 1  ;;  %v392_v1 = vld [vmem:[%s3028_s1 + $0x108] sm:$0xff]  ;;  %v375_v4 = vld [vmem:[%s3028_s1 + $0x80] sm:$0xff]  ;;  %v228_v9 = vsel %vm225_vm0, %v226_v2, %v227_v3  ;;  %v454_v10 = vld [vmem:[%s3028_s1 + $0x2f8] sm:$0xff] }
  0x22   : > { %1542 = vmatpush3.msra.mxu1 %v397_v39  ;;  %1502 = vmatprep.subr.mxu0 %v380_v40  ;;  %v407_v5 = vld [vmem:[%s3028_s1 + $0x180] sm:$0xff]  ;;  %v486_v11 = vld [vmem:[%s3028_s1 + $0x3f8] sm:$0xff]  ;;  %v453_v14 = vld [vmem:[%s3028_s1 + $0x2f0] sm:$0xff] }
  0x23   : > { %1543 = vmatprep.subr.mxu1 %v412_v41  ;;  %1503 = vmatpush3.msra.mxu0 %v364_v42  ;;  %v359_v6 = vld [vmem:[%s3028_s1] sm:$0xff]  ;;  %v231_v8 = vsel %vm225_vm0, %v229_v62, %v230_v63  ;;  %v438_v12 = vld [vmem:[%s3028_s1 + $0x278] sm:$0xff]  ;;  %v485_v15 = vld [vmem:[%s3028_s1 + $0x3f0] sm:$0xff] }
  0x24   : > { %1544 = vmatpush3.msra.mxu1 %v396_v43  ;;  %1504 = vmatprep.subr.mxu0 %v379_v44  ;;  %v391_v7 = vld [vmem:[%s3028_s1 + $0x100] sm:$0xff]  ;;  %v470_v13 = vld [vmem:[%s3028_s1 + $0x378] sm:$0xff]  ;;  %v437_v16 = vld [vmem:[%s3028_s1 + $0x270] sm:$0xff] }
  0x25   : > { %1545 = vmatprep.subr.mxu1 %v411_v45  ;;  %1505 = vmatpush3.msra.mxu0 %v363_v46  ;;  %v469_v17 = vld [vmem:[%s3028_s1 + $0x370] sm:$0xff]  ;;  %v452_v18 = vld [vmem:[%s3028_s1 + $0x2e8] sm:$0xff]  ;;  %v451_v22 = vld [vmem:[%s3028_s1 + $0x2e0] sm:$0xff] }
  0x26   : > { %1546 = vmatpush3.msra.mxu1 %v395_v47  ;;  %1506 = vmatprep.subr.mxu0 %v378_v48  ;;  %v484_v19 = vld [vmem:[%s3028_s1 + $0x3e8] sm:$0xff]  ;;  %v483_v23 = vld [vmem:[%s3028_s1 + $0x3e0] sm:$0xff]  ;;  %v450_v26 = vld [vmem:[%s3028_s1 + $0x2d8] sm:$0xff] }
  0x27   : > { %1547 = vmatprep.subr.mxu1 %v410_v49  ;;  %1507 = vmatpush3.msra.mxu0 %v362_v50  ;;  %v436_v20 = vld [vmem:[%s3028_s1 + $0x268] sm:$0xff]  ;;  %v435_v24 = vld [vmem:[%s3028_s1 + $0x260] sm:$0xff]  ;;  %v482_v27 = vld [vmem:[%s3028_s1 + $0x3d8] sm:$0xff] }
  0x28   : > { %1548 = vmatpush3.msra.mxu1 %v394_v51  ;;  %1508 = vmatprep.subr.mxu0 %v377_v52  ;;  %v468_v21 = vld [vmem:[%s3028_s1 + $0x368] sm:$0xff]  ;;  %v467_v25 = vld [vmem:[%s3028_s1 + $0x360] sm:$0xff]  ;;  %v434_v28 = vld [vmem:[%s3028_s1 + $0x258] sm:$0xff] }
  0x29   : > { %1549 = vmatprep.subr.mxu1 %v409_v55  ;;  %1509 = vmatpush3.msra.mxu0 %v361_v58  ;;  %v466_v29 = vld [vmem:[%s3028_s1 + $0x358] sm:$0xff]  ;;  %v449_v30 = vld [vmem:[%s3028_s1 + $0x2d0] sm:$0xff]  ;;  %v448_v34 = vld [vmem:[%s3028_s1 + $0x2c8] sm:$0xff] }
  0x2a   : > { %1550 = vmatpush3.msra.mxu1 %v393_v59  ;;  %1510 = vmatprep.subr.mxu0 %v376_v60  ;;  %v481_v31 = vld [vmem:[%s3028_s1 + $0x3d0] sm:$0xff]  ;;  %v480_v35 = vld [vmem:[%s3028_s1 + $0x3c8] sm:$0xff]  ;;  %v447_v38 = vld [vmem:[%s3028_s1 + $0x2c0] sm:$0xff] }
  0x2b   : > { %1551 = vmatprep.subr.mxu1 %v408_v61  ;;  %1511 = vmatpush3.msra.mxu0 %v360_v0  ;;  %v433_v32 = vld [vmem:[%s3028_s1 + $0x250] sm:$0xff]  ;;  %v432_v36 = vld [vmem:[%s3028_s1 + $0x248] sm:$0xff]  ;;  %v479_v39 = vld [vmem:[%s3028_s1 + $0x3c0] sm:$0xff] }
  0x2c   : > { %1552 = vmatpush3.msra.mxu1 %v392_v1  ;;  %1512 = vmatprep.subr.mxu0 %v375_v4  ;;  %v465_v33 = vld [vmem:[%s3028_s1 + $0x350] sm:$0xff]  ;;  %v464_v37 = vld [vmem:[%s3028_s1 + $0x348] sm:$0xff]  ;;  %v431_v40 = vld [vmem:[%s3028_s1 + $0x240] sm:$0xff] }
  0x2d   : > { %1553 = vmatprep.subr.mxu1 %v407_v5  ;;  %1513 = vmatpush3.msra.mxu0 %v359_v6  ;;  %v463_v41 = vld [vmem:[%s3028_s1 + $0x340] sm:$0xff]  ;;  %v446_v42 = vld [vmem:[%s3028_s1 + $0x2b8] sm:$0xff]  ;;  %v2304_v44 = vld [vmem:[%s2121_s19 + $0x28] sm:$0xff] }
  0x2e   : > { %718 = vmatprep.mubr.f32.mxu0 %v2145_v53  ;;  %1554 = vmatpush3.msra.mxu1 %v391_v7  ;;  %v478_v43 = vld [vmem:[%s3028_s1 + $0x3b8] sm:$0xff]  ;;  %v2313_v47 = vld [vmem:[%s2121_s19 + $0x20] sm:$0xff]  ;;  %v445_v48 = vld [vmem:[%s3028_s1 + $0x2b0] sm:$0xff]  ;;  %v234_v52 = vrot.slane %v2304_v44, 1 }
  0x2f   : > { %798 = vmatprep.mubr.f32.mxu1 %v231_v8  ;;  %719 = vmatmul.mubr.f32.vlgmr.msra.gmra.mxu0 %v2154_v56  ;;  %v430_v45 = vld [vmem:[%s3028_s1 + $0x238] sm:$0xff]  ;;  %v477_v49 = vld [vmem:[%s3028_s1 + $0x3b0] sm:$0xff]  ;;  %v444_v55 = vld [vmem:[%s3028_s1 + $0x2a8] sm:$0xff]  ;;  %v232_v58 = vrot.slane %v2313_v47, 1 }
  0x30   : > { %799 = vmatmul.mubr.f32.vlgmr.msra.gmra.mxu1 %v228_v9  ;;  %1564 = vmatprep.subr.mxu0 %v454_v10  ;;  %v462_v46 = vld [vmem:[%s3028_s1 + $0x338] sm:$0xff]  ;;  %v429_v50 = vld [vmem:[%s3028_s1 + $0x230] sm:$0xff]  ;;  %v476_v59 = vld [vmem:[%s3028_s1 + $0x3a8] sm:$0xff]  ;;  %v235_v0 = vsel %vm225_vm0, %v230_v63, %v234_v52 }
  0x31   : > { %1605 = vmatprep.subr.mxu1 %v486_v11  ;;  %1565 = vmatpush3.msra.mxu0 %v438_v12  ;;  %v461_v51 = vld [vmem:[%s3028_s1 + $0x330] sm:$0xff]  ;;  %v428_v60 = vld [vmem:[%s3028_s1 + $0x228] sm:$0xff]  ;;  %v2342_v62 = vld [vmem:[%s2121_s19 + $0x38] sm:$0xff]  ;;  %v233_v5 = vsel %vm225_vm0, %v227_v3, %v232_v58 }
  0x32   : > { %1606 = vmatpush3.msra.mxu1 %v470_v13  ;;  %1566 = vmatprep.subr.mxu0 %v453_v14  ;;  %v460_v61 = vld [vmem:[%s3028_s1 + $0x328] sm:$0xff]  ;;  %v443_v1 = vld [vmem:[%s3028_s1 + $0x2a0] sm:$0xff]  ;;  %v2352_v2 = vld [vmem:[%s2121_s19 + $0x30] sm:$0xff]  ;;  %v238_v7 = vrot.slane %v2342_v62, 1 }
  0x33   : > { %1607 = vmatprep.subr.mxu1 %v485_v15  ;;  %1567 = vmatpush3.msra.mxu0 %v437_v16  ;;  %v475_v4 = vld [vmem:[%s3028_s1 + $0x3a0] sm:$0xff]  ;;  %v442_v8 = vld [vmem:[%s3028_s1 + $0x298] sm:$0xff]  ;;  %v236_v3 = vrot.slane %v2352_v2, 1  ;;  %v441_v13 = vld [vmem:[%s3028_s1 + $0x290] sm:$0xff] }
  0x34   : > { %1608 = vmatpush3.msra.mxu1 %v469_v17  ;;  %1568 = vmatprep.subr.mxu0 %v452_v18  ;;  %v427_v63 = vld [vmem:[%s3028_s1 + $0x220] sm:$0xff]  ;;  %v474_v9 = vld [vmem:[%s3028_s1 + $0x398] sm:$0xff]  ;;  %v239_v12 = vsel %vm225_vm0, %v234_v52, %v238_v7  ;;  %v473_v14 = vld [vmem:[%s3028_s1 + $0x390] sm:$0xff]  ;;  %v250_v18 = vrot.slane %v2145_v53, 2  ;;  %v280_v7 = vrot.slane %v2342_v62, 6 }
  0x35   : > { %1609 = vmatprep.subr.mxu1 %v484_v19  ;;  %1569 = vmatpush3.msra.mxu0 %v436_v20  ;;  %v459_v6 = vld [vmem:[%s3028_s1 + $0x320] sm:$0xff]  ;;  %v426_v10 = vld [vmem:[%s3028_s1 + $0x218] sm:$0xff]  ;;  %v237_v15 = vsel %vm225_vm0, %v232_v58, %v236_v3  ;;  %v425_v16 = vld [vmem:[%s3028_s1 + $0x210] sm:$0xff]  ;;  %v251_v19 = vrot.slane %v2148_v54, 2 }
  0x36   : > { %1610 = vmatpush3.msra.mxu1 %v468_v21  ;;  %1570 = vmatprep.subr.mxu0 %v451_v22  ;;  %v458_v11 = vld [vmem:[%s3028_s1 + $0x318] sm:$0xff]  ;;  %v457_v17 = vld [vmem:[%s3028_s1 + $0x310] sm:$0xff]  ;;  %v440_v20 = vld [vmem:[%s3028_s1 + $0x288] sm:$0xff]  ;;  %v271_v22 = vrot.slane %v2145_v53, 6 }
  0x37   : > { %1611 = vmatprep.subr.mxu1 %v483_v23  ;;  %1571 = vmatpush3.msra.mxu0 %v435_v24  ;;  %v472_v21 = vld [vmem:[%s3028_s1 + $0x388] sm:$0xff]  ;;  %v272_v23 = vrot.slane %v2148_v54, 6  ;;  %v499_v3 = vld [vmem:[%s3028_s1 + $0x460] sm:$0xff] }
  0x38   : > { %1612 = vmatpush3.msra.mxu1 %v467_v25  ;;  %1572 = vmatprep.subr.mxu0 %v450_v26  ;;  %v424_v24 = vld [vmem:[%s3028_s1 + $0x208] sm:$0xff]  ;;  %v247_v26 = vrot.slane %v2154_v56, 2 }
  0x39   : > { %1613 = vmatprep.subr.mxu1 %v482_v27  ;;  %1573 = vmatpush3.msra.mxu0 %v434_v28  ;;  %v456_v25 = vld [vmem:[%s3028_s1 + $0x308] sm:$0xff]  ;;  %v248_v27 = vrot.slane %v2157_v57, 2  ;;  %v268_v28 = vrot.slane %v2154_v56, 6 }
  0x3a   : > { %1614 = vmatpush3.msra.mxu1 %v466_v29  ;;  %1574 = vmatprep.subr.mxu0 %v449_v30  ;;  %v269_v29 = vrot.slane %v2157_v57, 6  ;;  %v439_v30 = vld [vmem:[%s3028_s1 + $0x280] sm:$0xff]  ;;  %v516_v58 = vld [vmem:[%s3028_s1 + $0x4e8] sm:$0xff] }
  0x3b   : > { %1615 = vmatprep.subr.mxu1 %v481_v31  ;;  %1575 = vmatpush3.msra.mxu0 %v433_v32  ;;  %v471_v31 = vld [vmem:[%s3028_s1 + $0x380] sm:$0xff] }
  0x3c   : > { %1616 = vmatpush3.msra.mxu1 %v465_v33  ;;  %1576 = vmatprep.subr.mxu0 %v448_v34  ;;  %v423_v32 = vld [vmem:[%s3028_s1 + $0x200] sm:$0xff]  ;;  %v252_v33 = vsel %vm246_vm1, %v250_v18, %v251_v19 }
  0x3d   : > { %1617 = vmatprep.subr.mxu1 %v480_v35  ;;  %1577 = vmatpush3.msra.mxu0 %v432_v36  ;;  %v455_v34 = vld [vmem:[%s3028_s1 + $0x300] sm:$0xff]  ;;  %v273_v35 = vsel %vm267_vm2, %v271_v22, %v272_v23  ;;  %v249_v36 = vsel %vm246_vm1, %v247_v26, %v248_v27  ;;  %v512_v22 = vld [vmem:[%s3028_s1 + $0x4c8] sm:$0xff] }
  0x3e   : > { %1618 = vmatpush3.msra.mxu1 %v464_v37  ;;  %1578 = vmatprep.subr.mxu0 %v447_v38  ;;  %v270_v37 = vsel %vm267_vm2, %v268_v28, %v269_v29  ;;  %v255_v38 = vrot.slane %v2304_v44, 2  ;;  %v511_v26 = vld [vmem:[%s3028_s1 + $0x4c0] sm:$0xff] }
  0x3f   : > { %1619 = vmatprep.subr.mxu1 %v479_v39  ;;  %1579 = vmatpush3.msra.mxu0 %v431_v40  ;;  %v518_v39 = vld [vmem:[%s3028_s1 + $0x4f8] sm:$0xff]  ;;  %v495_v28 = vld [vmem:[%s3028_s1 + $0x440] sm:$0xff] }
  0x40   : > { %1620 = vmatpush3.msra.mxu1 %v463_v41  ;;  %1580 = vmatprep.subr.mxu0 %v446_v42  ;;  %v550_v40 = vld [vmem:[%s3028_s1 + $0x5f8] sm:$0xff]  ;;  %v253_v41 = vrot.slane %v2313_v47, 2 }
  0x41   : > { %1621 = vmatprep.subr.mxu1 %v478_v43  ;;  %1581 = vmatpush3.msra.mxu0 %v430_v45  ;;  %v502_v42 = vld [vmem:[%s3028_s1 + $0x478] sm:$0xff]  ;;  %v517_v45 = vld [vmem:[%s3028_s1 + $0x4f0] sm:$0xff] }
  0x42   : > { %1622 = vmatpush3.msra.mxu1 %v462_v46  ;;  %1582 = vmatprep.subr.mxu0 %v445_v48  ;;  %v534_v43 = vld [vmem:[%s3028_s1 + $0x578] sm:$0xff]  ;;  %v549_v46 = vld [vmem:[%s3028_s1 + $0x5f0] sm:$0xff]  ;;  %v276_v48 = vrot.slane %v2304_v44, 6  ;;  %v254_v52 = vsel %vm246_vm1, %v248_v27, %v253_v41  ;;  %v543_v27 = vld [vmem:[%s3028_s1 + $0x5c0] sm:$0xff] }
  0x43   : > { %1623 = vmatprep.subr.mxu1 %v477_v49  ;;  %1583 = vmatpush3.msra.mxu0 %v429_v50  ;;  %v256_v49 = vsel %vm246_vm1, %v251_v19, %v255_v38  ;;  %v501_v50 = vld [vmem:[%s3028_s1 + $0x470] sm:$0xff] }
  0x44   : > { %1624 = vmatpush3.msra.mxu1 %v461_v51  ;;  %723 = vmatprep.mubr.f32.mxu0 %v2148_v54  ;;  %v533_v51 = vld [vmem:[%s3028_s1 + $0x570] sm:$0xff] }
  0x45   : > { %1584 = vmatprep.subr.mxu0 %v444_v55  ;;  %1625 = vmatprep.subr.mxu1 %v476_v59  ;;  %v274_v55 = vrot.slane %v2313_v47, 6  ;;  %v548_v59 = vld [vmem:[%s3028_s1 + $0x5e8] sm:$0xff]  ;;  %v545_v19 = vld [vmem:[%s3028_s1 + $0x5d0] sm:$0xff] }
  0x46   : > { %724 = vmatmul.mubr.f32.gmra.mxu0 %v2157_v57  ;;  %1626 = vmatpush3.msra.mxu1 %v460_v61  ;;  %v2471_v61 = vsel %vm267_vm2, %v272_v23, %v276_v48  ;;  %v544_v23 = vld [vmem:[%s3028_s1 + $0x5c8] sm:$0xff] }
  0x47   : > { %1585 = vmatpush3.msra.mxu0 %v428_v60  ;;  %803 = vmatprep.mubr.f32.mxu1 %v235_v0  ;;  %v259_v60 = vrot.slane %v2342_v62, 2  ;;  %v500_v0 = vld [vmem:[%s3028_s1 + $0x468] sm:$0xff] }
  0x48   : > { %1586 = vmatprep.subr.mxu0 %v443_v1  ;;  %1627 = vmatprep.subr.mxu1 %v475_v4  ;;  %v257_v1 = vrot.slane %v2352_v2, 2  ;;  %v532_v4 = vld [vmem:[%s3028_s1 + $0x568] sm:$0xff] }
  0x49   : > { %804 = vmatmul.mubr.f32.gmra.mxu1 %v233_v5  ;;  %1587 = vmatpush3.msra.mxu0 %v427_v63  ;;  %v515_v5 = vld [vmem:[%s3028_s1 + $0x4e0] sm:$0xff]  ;;  %v2484_v63 = vsel %vm267_vm2, %v269_v29, %v274_v55 }
  0x4a   : > { %1628 = vmatpush3.msra.mxu1 %v459_v6  ;;  %728 = vmatprep.mubr.f32.mxu0 %v2304_v44  ;;  %v547_v6 = vld [vmem:[%s3028_s1 + $0x5e0] sm:$0xff] }
  0x4b   : > { %1588 = vmatprep.subr.mxu0 %v442_v8  ;;  %1629 = vmatprep.subr.mxu1 %v474_v9  ;;  %v260_v8 = vsel %vm246_vm1, %v255_v38, %v259_v60  ;;  %v531_v9 = vld [vmem:[%s3028_s1 + $0x560] sm:$0xff]  ;;  %v508_v38 = vld [vmem:[%s3028_s1 + $0x4a8] sm:$0xff]  ;;  %v292_v60 = vrot.slane %v2145_v53, 7 }
  0x4c   : > { %729 = vmatmul.mubr.f32.gmra.mxu0 %v2313_v47  ;;  %1630 = vmatpush3.msra.mxu1 %v458_v11  ;;  %v278_v11 = vrot.slane %v2352_v2, 6  ;;  %v527_v29 = vld [vmem:[%s3028_s1 + $0x540] sm:$0xff]  ;;  %v520_v53 = vld [vmem:[%s3028_s1 + $0x508] sm:$0xff] }
  0x4d   : > { %1589 = vmatpush3.msra.mxu0 %v426_v10  ;;  %808 = vmatprep.mubr.f32.mxu1 %v239_v12  ;;  %v258_v10 = vsel %vm246_vm1, %v253_v41, %v257_v1  ;;  %v514_v12 = vld [vmem:[%s3028_s1 + $0x4d8] sm:$0xff]  ;;  %v524_v41 = vld [vmem:[%s3028_s1 + $0x528] sm:$0xff] }
  0x4e   : > { %1590 = vmatprep.subr.mxu0 %v441_v13  ;;  %1631 = vmatprep.subr.mxu1 %v473_v14  ;;  %v546_v13 = vld [vmem:[%s3028_s1 + $0x5d8] sm:$0xff]  ;;  %v2510_v14 = vsel %vm267_vm2, %v276_v48, %v280_v7  ;;  %v2524_v18 = vsel %vm267_vm2, %v274_v55, %v278_v11  ;;  %v537_v55 = vld [vmem:[%s3028_s1 + $0x590] sm:$0xff]  ;;  %v504_v1 = vld [vmem:[%s3028_s1 + $0x488] sm:$0xff] }
  0x4f   : > { %809 = vmatmul.mubr.f32.gmra.mxu1 %v237_v15  ;;  %1591 = vmatpush3.msra.mxu0 %v425_v16  ;;  %v498_v15 = vld [vmem:[%s3028_s1 + $0x458] sm:$0xff] }
  0x50   : > { %1632 = vmatpush3.msra.mxu1 %v457_v17  ;;  %1592 = vmatprep.subr.mxu0 %v440_v20  ;;  %v530_v16 = vld [vmem:[%s3028_s1 + $0x558] sm:$0xff]  ;;  %v513_v17 = vld [vmem:[%s3028_s1 + $0x4d0] sm:$0xff] }
  0x51   : > { %1633 = vmatprep.subr.mxu1 %v472_v21  ;;  %1593 = vmatpush3.msra.mxu0 %v424_v24  ;;  %v497_v20 = vld [vmem:[%s3028_s1 + $0x450] sm:$0xff]  ;;  %v496_v24 = vld [vmem:[%s3028_s1 + $0x448] sm:$0xff]  ;;  %v506_v48 = vld [vmem:[%s3028_s1 + $0x498] sm:$0xff] }
  0x52   : > { %1634 = vmatpush3.msra.mxu1 %v456_v25  ;;  %1594 = vmatprep.subr.mxu0 %v439_v30  ;;  %v529_v21 = vld [vmem:[%s3028_s1 + $0x550] sm:$0xff]  ;;  %v528_v25 = vld [vmem:[%s3028_s1 + $0x548] sm:$0xff]  ;;  %v510_v30 = vld [vmem:[%s3028_s1 + $0x4b8] sm:$0xff] }
  0x53   : > { %1635 = vmatprep.subr.mxu1 %v471_v31  ;;  %1595 = vmatpush3.msra.mxu0 %v423_v32  ;;  %v542_v31 = vld [vmem:[%s3028_s1 + $0x5b8] sm:$0xff] }
  0x54   : > { %878 = vmatprep.mubr.f32.mxu0 %v252_v33  ;;  %1636 = vmatpush3.msra.mxu1 %v455_v34  ;;  %v494_v32 = vld [vmem:[%s3028_s1 + $0x438] sm:$0xff]  ;;  %v509_v34 = vld [vmem:[%s3028_s1 + $0x4b0] sm:$0xff] }
  0x55   : > { %958 = vmatprep.mubr.f32.mxu1 %v273_v35  ;;  %879 = vmatmul.mubr.f32.vlgmr.msra.gmra.mxu0 %v249_v36  ;;  %v526_v33 = vld [vmem:[%s3028_s1 + $0x538] sm:$0xff]  ;;  %v541_v35 = vld [vmem:[%s3028_s1 + $0x5b0] sm:$0xff] }
  0x56   : > { %959 = vmatmul.mubr.f32.vlgmr.msra.gmra.mxu1 %v270_v37  ;;  %1646 = vmatprep.subr.mxu0 %v518_v39  ;;  %v493_v36 = vld [vmem:[%s3028_s1 + $0x430] sm:$0xff]  ;;  %v540_v39 = vld [vmem:[%s3028_s1 + $0x5a8] sm:$0xff] }
  0x57   : > { %1687 = vmatprep.subr.mxu1 %v550_v40  ;;  %1647 = vmatpush3.msra.mxu0 %v502_v42  ;;  %v525_v37 = vld [vmem:[%s3028_s1 + $0x530] sm:$0xff]  ;;  %v492_v40 = vld [vmem:[%s3028_s1 + $0x428] sm:$0xff]  ;;  %v507_v42 = vld [vmem:[%s3028_s1 + $0x4a0] sm:$0xff] }
  0x58   : > { %1688 = vmatpush3.msra.mxu1 %v534_v43  ;;  %1648 = vmatprep.subr.mxu0 %v517_v45  ;;  %v539_v43 = vld [vmem:[%s3028_s1 + $0x5a0] sm:$0xff] }
  0x59   : > { %1689 = vmatprep.subr.mxu1 %v549_v46  ;;  %883 = vmatprep.mubr.f32.mxu0 %v256_v49  ;;  %v491_v45 = vld [vmem:[%s3028_s1 + $0x420] sm:$0xff]  ;;  %v538_v49 = vld [vmem:[%s3028_s1 + $0x598] sm:$0xff] }
  0x5a   : > { %1649 = vmatpush3.msra.mxu0 %v501_v50  ;;  %1690 = vmatpush3.msra.mxu1 %v533_v51  ;;  %v523_v46 = vld [vmem:[%s3028_s1 + $0x520] sm:$0xff]  ;;  %v490_v50 = vld [vmem:[%s3028_s1 + $0x418] sm:$0xff] }
  0x5b   : > { %884 = vmatmul.mubr.f32.gmra.mxu0 %v254_v52  ;;  %1650 = vmatprep.subr.mxu0 %v516_v58  ;;  %v522_v51 = vld [vmem:[%s3028_s1 + $0x518] sm:$0xff]  ;;  %v505_v52 = vld [vmem:[%s3028_s1 + $0x490] sm:$0xff] }
  0x5c   : > { %1691 = vmatprep.subr.mxu1 %v548_v59  ;;  %963 = vmatprep.mubr.f32.mxu1 %v2471_v61  ;;  %v489_v58 = vld [vmem:[%s3028_s1 + $0x410] sm:$0xff] }
  0x5d   : > { %1651 = vmatpush3.msra.mxu0 %v500_v0  ;;  %1692 = vmatpush3.msra.mxu1 %v532_v4  ;;  %v521_v59 = vld [vmem:[%s3028_s1 + $0x510] sm:$0xff]  ;;  %v293_v0 = vrot.slane %v2148_v54, 7  ;;  %v536_v4 = vld [vmem:[%s3028_s1 + $0x588] sm:$0xff] }
  0x5e   : > { %1652 = vmatprep.subr.mxu0 %v515_v5  ;;  %964 = vmatmul.mubr.f32.gmra.mxu1 %v2484_v63  ;;  %v488_v5 = vld [vmem:[%s3028_s1 + $0x408] sm:$0xff] }
  0x5f   : > { %1693 = vmatprep.subr.mxu1 %v547_v6  ;;  %888 = vmatprep.mubr.f32.mxu0 %v260_v8  ;;  %v289_v6 = vrot.slane %v2154_v56, 7  ;;  %v290_v8 = vrot.slane %v2157_v57, 7  ;;  %v294_v56 = vsel %vm288_vm3, %v292_v60, %v293_v0  ;;  %v559_v60 = vld [vmem:[%s3028_s1 + $0x640] sm:$0xff] }
  0x60   : > { %1653 = vmatpush3.msra.mxu0 %v499_v3  ;;  %1694 = vmatpush3.msra.mxu1 %v531_v9  ;;  %v503_v3 = vld [vmem:[%s3028_s1 + $0x480] sm:$0xff] }
  0x61   : > { %889 = vmatmul.mubr.f32.gmra.mxu0 %v258_v10  ;;  %1654 = vmatprep.subr.mxu0 %v514_v12  ;;  %v535_v9 = vld [vmem:[%s3028_s1 + $0x580] sm:$0xff] }
  0x62   : > { %1695 = vmatprep.subr.mxu1 %v546_v13  ;;  %968 = vmatprep.mubr.f32.mxu1 %v2510_v14  ;;  %v487_v10 = vld [vmem:[%s3028_s1 + $0x400] sm:$0xff]  ;;  %v291_v13 = vsel %vm288_vm3, %v289_v6, %v290_v8  ;;  %v573_v6 = vld [vmem:[%s3028_s1 + $0x6b0] sm:$0xff] }
  0x63   : > { %1655 = vmatpush3.msra.mxu0 %v498_v15  ;;  %1696 = vmatpush3.msra.mxu1 %v530_v16  ;;  %v519_v12 = vld [vmem:[%s3028_s1 + $0x500] sm:$0xff]  ;;  %v297_v15 = vrot.slane %v2304_v44, 7  ;;  %v582_v16 = vld [vmem:[%s3028_s1 + $0x6f8] sm:$0xff] }
  0x64   : > { %1656 = vmatprep.subr.mxu0 %v513_v17  ;;  %969 = vmatmul.mubr.f32.gmra.mxu1 %v2524_v18  ;;  %v614_v17 = vld [vmem:[%s3028_s1 + $0x7f8] sm:$0xff] }
  0x65   : > { %1697 = vmatprep.subr.mxu1 %v545_v19  ;;  %1657 = vmatpush3.msra.mxu0 %v497_v20  ;;  %v295_v19 = vrot.slane %v2313_v47, 7  ;;  %v566_v20 = vld [vmem:[%s3028_s1 + $0x678] sm:$0xff] }
  0x66   : > { %1698 = vmatpush3.msra.mxu1 %v529_v21  ;;  %1658 = vmatprep.subr.mxu0 %v512_v22  ;;  %v598_v21 = vld [vmem:[%s3028_s1 + $0x778] sm:$0xff]  ;;  %v581_v22 = vld [vmem:[%s3028_s1 + $0x6f0] sm:$0xff] }
  0x67   : > { %1699 = vmatprep.subr.mxu1 %v544_v23  ;;  %1659 = vmatpush3.msra.mxu0 %v496_v24  ;;  %v613_v23 = vld [vmem:[%s3028_s1 + $0x7f0] sm:$0xff]  ;;  %v298_v24 = vsel %vm288_vm3, %v293_v0, %v297_v15  ;;  %v591_v0 = vld [vmem:[%s3028_s1 + $0x740] sm:$0xff] }
  0x68   : > { %1700 = vmatpush3.msra.mxu1 %v528_v25  ;;  %1660 = vmatprep.subr.mxu0 %v511_v26  ;;  %v565_v25 = vld [vmem:[%s3028_s1 + $0x670] sm:$0xff] }
  0x69   : > { %1701 = vmatprep.subr.mxu1 %v543_v27  ;;  %1661 = vmatpush3.msra.mxu0 %v495_v28  ;;  %v597_v26 = vld [vmem:[%s3028_s1 + $0x770] sm:$0xff]  ;;  %v296_v27 = vsel %vm288_vm3, %v290_v8, %v295_v19  ;;  %v580_v28 = vld [vmem:[%s3028_s1 + $0x6e8] sm:$0xff] }
  0x6a   : > { %1702 = vmatpush3.msra.mxu1 %v527_v29  ;;  %1662 = vmatprep.subr.mxu0 %v510_v30  ;;  %v612_v29 = vld [vmem:[%s3028_s1 + $0x7e8] sm:$0xff]  ;;  %v301_v30 = vrot.slane %v2342_v62, 7  ;;  %v605_v8 = vld [vmem:[%s3028_s1 + $0x7b0] sm:$0xff] }
  0x6b   : > { %1703 = vmatprep.subr.mxu1 %v542_v31  ;;  %1663 = vmatpush3.msra.mxu0 %v494_v32  ;;  %v564_v31 = vld [vmem:[%s3028_s1 + $0x668] sm:$0xff]  ;;  %v299_v32 = vrot.slane %v2352_v2, 7 }
  0x6c   : > { %1704 = vmatpush3.msra.mxu1 %v526_v33  ;;  %1664 = vmatprep.subr.mxu0 %v509_v34  ;;  %v596_v33 = vld [vmem:[%s3028_s1 + $0x768] sm:$0xff]  ;;  %v579_v34 = vld [vmem:[%s3028_s1 + $0x6e0] sm:$0xff] }
  0x6d   : > { %1705 = vmatprep.subr.mxu1 %v541_v35  ;;  %1665 = vmatpush3.msra.mxu0 %v493_v36  ;;  %v611_v35 = vld [vmem:[%s3028_s1 + $0x7e0] sm:$0xff]  ;;  %v302_v36 = vsel %vm288_vm3, %v297_v15, %v301_v30  ;;  %v568_v30 = vld [vmem:[%s3028_s1 + $0x688] sm:$0xff] }
  0x6e   : > { %1706 = vmatpush3.msra.mxu1 %v525_v37  ;;  %1666 = vmatprep.subr.mxu0 %v508_v38  ;;  %v563_v37 = vld [vmem:[%s3028_s1 + $0x660] sm:$0xff] }
  0x6f   : > { %1707 = vmatprep.subr.mxu1 %v540_v39  ;;  %1667 = vmatpush3.msra.mxu0 %v492_v40  ;;  %v595_v38 = vld [vmem:[%s3028_s1 + $0x760] sm:$0xff]  ;;  %v300_v39 = vsel %vm288_vm3, %v295_v19, %v299_v32  ;;  %v578_v40 = vld [vmem:[%s3028_s1 + $0x6d8] sm:$0xff]  ;;  %v336_v32 = vrot.slane %v2148_v54, 5 }
  0x70   : > { %1708 = vmatpush3.msra.mxu1 %v524_v41  ;;  %1668 = vmatprep.subr.mxu0 %v507_v42  ;;  %v610_v41 = vld [vmem:[%s3028_s1 + $0x7d8] sm:$0xff]  ;;  %v571_v15 = vld [vmem:[%s3028_s1 + $0x6a0] sm:$0xff] }
  0x71   : > { %1709 = vmatprep.subr.mxu1 %v539_v43  ;;  %1669 = vmatpush3.msra.mxu0 %v491_v45  ;;  %v562_v42 = vld [vmem:[%s3028_s1 + $0x658] sm:$0xff]  ;;  %v577_v45 = vld [vmem:[%s3028_s1 + $0x6d0] sm:$0xff]  ;;  %v587_v19 = vld [vmem:[%s3028_s1 + $0x720] sm:$0xff] }
  0x72   : > { %1710 = vmatpush3.msra.mxu1 %v523_v46  ;;  %1670 = vmatprep.subr.mxu0 %v506_v48  ;;  %v594_v43 = vld [vmem:[%s3028_s1 + $0x758] sm:$0xff]  ;;  %v609_v46 = vld [vmem:[%s3028_s1 + $0x7d0] sm:$0xff] }
  0x73   : > { %1711 = vmatprep.subr.mxu1 %v538_v49  ;;  %1671 = vmatpush3.msra.mxu0 %v490_v50  ;;  %v561_v48 = vld [vmem:[%s3028_s1 + $0x650] sm:$0xff]  ;;  %v576_v50 = vld [vmem:[%s3028_s1 + $0x6c8] sm:$0xff] }
  0x74   : > { %1712 = vmatpush3.msra.mxu1 %v522_v51  ;;  %1672 = vmatprep.subr.mxu0 %v505_v52  ;;  %v593_v49 = vld [vmem:[%s3028_s1 + $0x750] sm:$0xff]  ;;  %v608_v51 = vld [vmem:[%s3028_s1 + $0x7c8] sm:$0xff] }
  0x75   : > { %1713 = vmatprep.subr.mxu1 %v537_v55  ;;  %1673 = vmatpush3.msra.mxu0 %v489_v58  ;;  %v560_v52 = vld [vmem:[%s3028_s1 + $0x648] sm:$0xff]  ;;  %v575_v58 = vld [vmem:[%s3028_s1 + $0x6c0] sm:$0xff] }
  0x76   : > { %1714 = vmatpush3.msra.mxu1 %v521_v59  ;;  %1674 = vmatprep.subr.mxu0 %v504_v1  ;;  %v592_v55 = vld [vmem:[%s3028_s1 + $0x748] sm:$0xff]  ;;  %v607_v59 = vld [vmem:[%s3028_s1 + $0x7c0] sm:$0xff]  ;;  %v574_v1 = vld [vmem:[%s3028_s1 + $0x6b8] sm:$0xff] }
  0x77   : > { %1715 = vmatprep.subr.mxu1 %v536_v4  ;;  %1675 = vmatpush3.msra.mxu0 %v488_v5  ;;  %v606_v4 = vld [vmem:[%s3028_s1 + $0x7b8] sm:$0xff] }
  0x78   : > { %1716 = vmatpush3.msra.mxu1 %v520_v53  ;;  %1676 = vmatprep.subr.mxu0 %v503_v3  ;;  %v558_v5 = vld [vmem:[%s3028_s1 + $0x638] sm:$0xff]  ;;  %v557_v3 = vld [vmem:[%s3028_s1 + $0x630] sm:$0xff] }
  0x79   : > { %1717 = vmatprep.subr.mxu1 %v535_v9  ;;  %1677 = vmatpush3.msra.mxu0 %v487_v10  ;;  %v590_v53 = vld [vmem:[%s3028_s1 + $0x738] sm:$0xff]  ;;  %v589_v9 = vld [vmem:[%s3028_s1 + $0x730] sm:$0xff]  ;;  %v572_v10 = vld [vmem:[%s3028_s1 + $0x6a8] sm:$0xff] }
  0x7a   : > { %1038 = vmatprep.mubr.f32.mxu0 %v294_v56  ;;  %1718 = vmatpush3.msra.mxu1 %v519_v12  ;;  %v604_v56 = vld [vmem:[%s3028_s1 + $0x7a8] sm:$0xff] }
  0x7b   : > { %1118 = vmatprep.mubr.f32.mxu1 %v2148_v54  ;;  %1039 = vmatmul.mubr.f32.vlgmr.msra.gmra.mxu0 %v291_v13  ;;  %v556_v12 = vld [vmem:[%s3028_s1 + $0x628] sm:$0xff] }
  0x7c   : > { %1119 = vmatmul.mubr.f32.vlgmr.msra.gmra.mxu1 %v2157_v57  ;;  %1728 = vmatprep.subr.mxu0 %v582_v16  ;;  %v588_v13 = vld [vmem:[%s3028_s1 + $0x728] sm:$0xff]  ;;  %v603_v16 = vld [vmem:[%s3028_s1 + $0x7a0] sm:$0xff] }
  0x7d   : > { %1769 = vmatprep.subr.mxu1 %v614_v17  ;;  %1729 = vmatpush3.msra.mxu0 %v566_v20  ;;  %v555_v17 = vld [vmem:[%s3028_s1 + $0x620] sm:$0xff]  ;;  %v570_v20 = vld [vmem:[%s3028_s1 + $0x698] sm:$0xff] }
  0x7e   : > { %1770 = vmatpush3.msra.mxu1 %v598_v21  ;;  %1730 = vmatprep.subr.mxu0 %v581_v22  ;;  %v602_v21 = vld [vmem:[%s3028_s1 + $0x798] sm:$0xff] }
  0x7f   : > { %1771 = vmatprep.subr.mxu1 %v613_v23  ;;  %1043 = vmatprep.mubr.f32.mxu0 %v298_v24  ;;  %v554_v22 = vld [vmem:[%s3028_s1 + $0x618] sm:$0xff]  ;;  %v569_v24 = vld [vmem:[%s3028_s1 + $0x690] sm:$0xff] }
  0x80   : > { %1731 = vmatpush3.msra.mxu0 %v565_v25  ;;  %1772 = vmatpush3.msra.mxu1 %v597_v26  ;;  %v586_v23 = vld [vmem:[%s3028_s1 + $0x718] sm:$0xff]  ;;  %v601_v25 = vld [vmem:[%s3028_s1 + $0x790] sm:$0xff] }
  0x81   : > { %1044 = vmatmul.mubr.f32.gmra.mxu0 %v296_v27  ;;  %1732 = vmatprep.subr.mxu0 %v580_v28  ;;  %v553_v26 = vld [vmem:[%s3028_s1 + $0x610] sm:$0xff]  ;;  %v315_v28 = vrot.slane %v2148_v54, 4  ;;  %v334_v54 = vrot.slane %v2313_v47, 5 }
  0x82   : > { %1773 = vmatprep.subr.mxu1 %v612_v29  ;;  %1123 = vmatprep.mubr.f32.mxu1 %v2304_v44  ;;  %v585_v27 = vld [vmem:[%s3028_s1 + $0x710] sm:$0xff]  ;;  %v316_v29 = vrot.slane %v2304_v44, 4 }
  0x83   : > { %1733 = vmatpush3.msra.mxu0 %v564_v31  ;;  %1774 = vmatpush3.msra.mxu1 %v596_v33  ;;  %v600_v31 = vld [vmem:[%s3028_s1 + $0x788] sm:$0xff]  ;;  %v337_v33 = vrot.slane %v2304_v44, 5  ;;  %v567_v44 = vld [vmem:[%s3028_s1 + $0x680] sm:$0xff] }
  0x84   : > { %1734 = vmatprep.subr.mxu0 %v579_v34  ;;  %1124 = vmatmul.mubr.f32.gmra.mxu1 %v2313_v47  ;;  %v552_v34 = vld [vmem:[%s3028_s1 + $0x608] sm:$0xff] }
  0x85   : > { %1775 = vmatprep.subr.mxu1 %v611_v35  ;;  %1048 = vmatprep.mubr.f32.mxu0 %v302_v36  ;;  %v584_v35 = vld [vmem:[%s3028_s1 + $0x708] sm:$0xff]  ;;  %v312_v36 = vrot.slane %v2157_v57, 4 }
  0x86   : > { %1735 = vmatpush3.msra.mxu0 %v563_v37  ;;  %1776 = vmatpush3.msra.mxu1 %v595_v38  ;;  %v313_v37 = vrot.slane %v2313_v47, 4  ;;  %v333_v38 = vrot.slane %v2157_v57, 5  ;;  %v317_v57 = vsel %vm311_vm4, %v315_v28, %v316_v29  ;;  %v583_v47 = vld [vmem:[%s3028_s1 + $0x700] sm:$0xff]  ;;  %v637_v28 = vld [vmem:[%s3028_s1 + $0x8b0] sm:$0xff] }
  0x87   : > { %1049 = vmatmul.mubr.f32.gmra.mxu0 %v300_v39  ;;  %1736 = vmatprep.subr.mxu0 %v578_v40  ;;  %v599_v39 = vld [vmem:[%s3028_s1 + $0x780] sm:$0xff] }
  0x88   : > { %1777 = vmatprep.subr.mxu1 %v610_v41  ;;  %1128 = vmatprep.mubr.f32.mxu1 %v2342_v62  ;;  %v551_v40 = vld [vmem:[%s3028_s1 + $0x600] sm:$0xff]  ;;  %v338_v41 = vsel %vm332_vm5, %v336_v32, %v337_v33 }
  0x89   : > { %1737 = vmatpush3.msra.mxu0 %v562_v42  ;;  %1778 = vmatpush3.msra.mxu1 %v594_v43  ;;  %v314_v42 = vsel %vm311_vm4, %v312_v36, %v313_v37  ;;  %v335_v43 = vsel %vm332_vm5, %v333_v38, %v334_v54  ;;  %v635_v32 = vld [vmem:[%s3028_s1 + $0x8a0] sm:$0xff]  ;;  %v633_v36 = vld [vmem:[%s3028_s1 + $0x890] sm:$0xff]  ;;  %v632_v38 = vld [vmem:[%s3028_s1 + $0x888] sm:$0xff] }
  0x8a   : > { %1738 = vmatprep.subr.mxu0 %v577_v45  ;;  %1129 = vmatmul.mubr.f32.gmra.mxu1 %v2352_v2  ;;  %v320_v45 = vrot.slane %v2342_v62, 4 }
  0x8b   : > { %1779 = vmatprep.subr.mxu1 %v609_v46  ;;  %1739 = vmatpush3.msra.mxu0 %v561_v48  ;;  %v646_v46 = vld [vmem:[%s3028_s1 + $0x8f8] sm:$0xff]  ;;  %v318_v48 = vrot.slane %v2352_v2, 4 }
  0x8c   : > { %1780 = vmatpush3.msra.mxu1 %v593_v49  ;;  %1740 = vmatprep.subr.mxu0 %v576_v50  ;;  %v630_v49 = vld [vmem:[%s3028_s1 + $0x878] sm:$0xff]  ;;  %v645_v50 = vld [vmem:[%s3028_s1 + $0x8f0] sm:$0xff] }
  0x8d   : > { %1781 = vmatprep.subr.mxu1 %v608_v51  ;;  %1741 = vmatpush3.msra.mxu0 %v560_v52  ;;  %v341_v51 = vrot.slane %v2342_v62, 5  ;;  %v2894_v52 = vld [vmem:[%s2121_s19 + $0x48] sm:$0xff] }
  0x8e   : > { %1782 = vmatpush3.msra.mxu1 %v592_v55  ;;  %1742 = vmatprep.subr.mxu0 %v575_v58  ;;  %v321_v55 = vsel %vm311_vm4, %v316_v29, %v320_v45  ;;  %v629_v58 = vld [vmem:[%s3028_s1 + $0x870] sm:$0xff] }
  0x8f   : > { %1783 = vmatprep.subr.mxu1 %v607_v59  ;;  %1743 = vmatpush3.msra.mxu0 %v559_v60  ;;  %v2901_v59 = vld [vmem:[%s2121_s19 + $0x40] sm:$0xff]  ;;  %v319_v60 = vsel %vm311_vm4, %v313_v37, %v318_v48  ;;  %v621_v29 = vld [vmem:[%s3028_s1 + $0x830] sm:$0xff] }
  0x90   : > { %1784 = vmatpush3.msra.mxu1 %v591_v0  ;;  %1744 = vmatprep.subr.mxu0 %v574_v1  ;;  %v339_v0 = vrot.slane %v2352_v2, 5  ;;  %v644_v1 = vld [vmem:[%s3028_s1 + $0x8e8] sm:$0xff]  ;;  %v617_v37 = vld [vmem:[%s3028_s1 + $0x810] sm:$0xff] }
  0x91   : > { %1785 = vmatprep.subr.mxu1 %v606_v4  ;;  %1745 = vmatpush3.msra.mxu0 %v558_v5  ;;  %v324_v4 = vrot.slane %v2894_v52, 4  ;;  %v342_v5 = vsel %vm332_vm5, %v337_v33, %v341_v51  ;;  %v619_v33 = vld [vmem:[%s3028_s1 + $0x820] sm:$0xff] }
  0x92   : > { %1786 = vmatpush3.msra.mxu1 %v590_v53  ;;  %1746 = vmatprep.subr.mxu0 %v573_v6  ;;  %v628_v53 = vld [vmem:[%s3028_s1 + $0x868] sm:$0xff]  ;;  %v322_v6 = vrot.slane %v2901_v59, 4 }
  0x93   : > { %1787 = vmatprep.subr.mxu1 %v605_v8  ;;  %1747 = vmatpush3.msra.mxu0 %v557_v3  ;;  %v643_v8 = vld [vmem:[%s3028_s1 + $0x8e0] sm:$0xff]  ;;  %v340_v3 = vsel %vm332_vm5, %v334_v54, %v339_v0  ;;  %v616_v54 = vld [vmem:[%s3028_s1 + $0x808] sm:$0xff] }
  0x94   : > { %1788 = vmatpush3.msra.mxu1 %v589_v9  ;;  %1748 = vmatprep.subr.mxu0 %v572_v10  ;;  %v345_v9 = vrot.slane %v2894_v52, 5  ;;  %v325_v10 = vsel %vm311_vm4, %v320_v45, %v324_v4 }
  0x95   : > { %1789 = vmatprep.subr.mxu1 %v604_v56  ;;  %1749 = vmatpush3.msra.mxu0 %v556_v12  ;;  %v627_v56 = vld [vmem:[%s3028_s1 + $0x860] sm:$0xff]  ;;  %v323_v12 = vsel %vm311_vm4, %v318_v48, %v322_v6 }
  0x96   : > { %1790 = vmatpush3.msra.mxu1 %v588_v13  ;;  %1750 = vmatprep.subr.mxu0 %v571_v15  ;;  %v343_v13 = vrot.slane %v2901_v59, 5  ;;  %v642_v15 = vld [vmem:[%s3028_s1 + $0x8d8] sm:$0xff] }
  0x97   : > { %1791 = vmatprep.subr.mxu1 %v603_v16  ;;  %1751 = vmatpush3.msra.mxu0 %v555_v17  ;;  %v346_v16 = vsel %vm332_vm5, %v341_v51, %v345_v9  ;;  %v626_v17 = vld [vmem:[%s3028_s1 + $0x858] sm:$0xff] }
  0x98   : > { %1792 = vmatpush3.msra.mxu1 %v587_v19  ;;  %1752 = vmatprep.subr.mxu0 %v570_v20  ;;  %v641_v19 = vld [vmem:[%s3028_s1 + $0x8d0] sm:$0xff]  ;;  %v344_v20 = vsel %vm332_vm5, %v339_v0, %v343_v13 }
  0x99   : > { %1793 = vmatprep.subr.mxu1 %v602_v21  ;;  %1753 = vmatpush3.msra.mxu0 %v554_v22  ;;  %v625_v21 = vld [vmem:[%s3028_s1 + $0x850] sm:$0xff]  ;;  %v640_v22 = vld [vmem:[%s3028_s1 + $0x8c8] sm:$0xff] }
  0x9a   : > { %1794 = vmatpush3.msra.mxu1 %v586_v23  ;;  %1754 = vmatprep.subr.mxu0 %v569_v24  ;;  %v624_v23 = vld [vmem:[%s3028_s1 + $0x848] sm:$0xff]  ;;  %v639_v24 = vld [vmem:[%s3028_s1 + $0x8c0] sm:$0xff] }
  0x9b   : > { %1795 = vmatprep.subr.mxu1 %v601_v25  ;;  %1755 = vmatpush3.msra.mxu0 %v553_v26  ;;  %v623_v25 = vld [vmem:[%s3028_s1 + $0x840] sm:$0xff]  ;;  %v638_v26 = vld [vmem:[%s3028_s1 + $0x8b8] sm:$0xff] }
  0x9c   : > { %1796 = vmatpush3.msra.mxu1 %v585_v27  ;;  %1756 = vmatprep.subr.mxu0 %v568_v30  ;;  %v622_v27 = vld [vmem:[%s3028_s1 + $0x838] sm:$0xff]  ;;  %v636_v30 = vld [vmem:[%s3028_s1 + $0x8a8] sm:$0xff] }
  0x9d   : > { %1797 = vmatprep.subr.mxu1 %v600_v31  ;;  %1757 = vmatpush3.msra.mxu0 %v552_v34  ;;  %v620_v31 = vld [vmem:[%s3028_s1 + $0x828] sm:$0xff]  ;;  %v634_v34 = vld [vmem:[%s3028_s1 + $0x898] sm:$0xff] }
  0x9e   : > { %1798 = vmatpush3.msra.mxu1 %v584_v35  ;;  %1758 = vmatprep.subr.mxu0 %v567_v44  ;;  %v618_v35 = vld [vmem:[%s3028_s1 + $0x818] sm:$0xff]  ;;  %v631_v44 = vld [vmem:[%s3028_s1 + $0x880] sm:$0xff] }
  0x9f   : > { %1799 = vmatprep.subr.mxu1 %v599_v39  ;;  %1759 = vmatpush3.msra.mxu0 %v551_v40  ;;  %v355_v39 = vrot.slane %v2894_v52, 6  ;;  %v615_v40 = vld [vmem:[%s3028_s1 + $0x800] sm:$0xff] }
  0xa0   : > { %1198 = vmatprep.mubr.f32.mxu0 %v317_v57  ;;  %1800 = vmatpush3.msra.mxu1 %v583_v47  ;;  %v353_v57 = vrot.slane %v2901_v59, 6 }
  0xa1   : > { %1278 = vmatprep.mubr.f32.mxu1 %v338_v41  ;;  %1199 = vmatmul.mubr.f32.vlgmr.msra.gmra.mxu0 %v314_v42  ;;  %v356_v47 = vsel %vm267_vm2, %v280_v7, %v355_v39 }
  0xa2   : > { %1279 = vmatmul.mubr.f32.vlgmr.msra.gmra.mxu1 %v335_v43  ;;  %1810 = vmatprep.subr.mxu0 %v646_v46  ;;  %v354_v41 = vsel %vm267_vm2, %v278_v11, %v353_v57 }
  0xa3   : > { %1851 = vmatprep.subr.mxu1 %v646_v46  ;;  %1811 = vmatpush3.msra.mxu0 %v630_v49 }
  0xa4   : > { %1867 = vmatpush3.msra.mxu1 %v630_v49  ;;  %1812 = vmatprep.subr.mxu0 %v645_v50 }
  0xa5   : > { %1852 = vmatprep.subr.mxu1 %v645_v50  ;;  %1203 = vmatprep.mubr.f32.mxu0 %v321_v55 }
  0xa6   : > { %1813 = vmatpush3.msra.mxu0 %v629_v58  ;;  %1868 = vmatpush3.msra.mxu1 %v629_v58 }
  0xa7   : > { %1204 = vmatmul.mubr.f32.gmra.mxu0 %v319_v60  ;;  %1814 = vmatprep.subr.mxu0 %v644_v1 }
  0xa8   : > { %1853 = vmatprep.subr.mxu1 %v644_v1  ;;  %1283 = vmatprep.mubr.f32.mxu1 %v342_v5 }
  0xa9   : > { %1815 = vmatpush3.msra.mxu0 %v628_v53  ;;  %1869 = vmatpush3.msra.mxu1 %v628_v53 }
  0xaa   : > { %1816 = vmatprep.subr.mxu0 %v643_v8  ;;  %1284 = vmatmul.mubr.f32.gmra.mxu1 %v340_v3 }
  0xab   : > { %1854 = vmatprep.subr.mxu1 %v643_v8  ;;  %1208 = vmatprep.mubr.f32.mxu0 %v325_v10 }
  0xac   : > { %1817 = vmatpush3.msra.mxu0 %v627_v56  ;;  %1870 = vmatpush3.msra.mxu1 %v627_v56 }
  0xad   : > { %1209 = vmatmul.mubr.f32.gmra.mxu0 %v323_v12  ;;  %1818 = vmatprep.subr.mxu0 %v642_v15 }
  0xae   : > { %1855 = vmatprep.subr.mxu1 %v642_v15  ;;  %1288 = vmatprep.mubr.f32.mxu1 %v346_v16 }
  0xaf   : > { %1819 = vmatpush3.msra.mxu0 %v626_v17  ;;  %1871 = vmatpush3.msra.mxu1 %v626_v17 }
  0xb0   : > { %1820 = vmatprep.subr.mxu0 %v641_v19  ;;  %1289 = vmatmul.mubr.f32.gmra.mxu1 %v344_v20  ;;  %v1479_v20 = vld [vmem:[%s3029_s2] ss:$0 sm:$0xff] }
  0xb1   : > { %1856 = vmatprep.subr.mxu1 %v641_v19  ;;  %1821 = vmatpush3.msra.mxu0 %v625_v21 }
  0xb2   : > { %1872 = vmatpush3.msra.mxu1 %v625_v21  ;;  %1822 = vmatprep.subr.mxu0 %v640_v22 }
  0xb3   : > { %1857 = vmatprep.subr.mxu1 %v640_v22  ;;  %1823 = vmatpush3.msra.mxu0 %v624_v23 }
  0xb4   : > { %1873 = vmatpush3.msra.mxu1 %v624_v23  ;;  %1824 = vmatprep.subr.mxu0 %v639_v24 }
  0xb5   : > { %1858 = vmatprep.subr.mxu1 %v639_v24  ;;  %1825 = vmatpush3.msra.mxu0 %v623_v25 }
  0xb6   : > { %1874 = vmatpush3.msra.mxu1 %v623_v25  ;;  %1826 = vmatprep.subr.mxu0 %v638_v26 }
  0xb7   : > { %1859 = vmatprep.subr.mxu1 %v638_v26  ;;  %1827 = vmatpush3.msra.mxu0 %v622_v27 }
  0xb8   : > { %1875 = vmatpush3.msra.mxu1 %v622_v27  ;;  %1828 = vmatprep.subr.mxu0 %v637_v28 }
  0xb9   : > { %1860 = vmatprep.subr.mxu1 %v637_v28  ;;  %1829 = vmatpush3.msra.mxu0 %v621_v29 }
  0xba   : > { %1876 = vmatpush3.msra.mxu1 %v621_v29  ;;  %1830 = vmatprep.subr.mxu0 %v636_v30 }
  0xbb   : > { %1861 = vmatprep.subr.mxu1 %v636_v30  ;;  %1831 = vmatpush3.msra.mxu0 %v620_v31 }
  0xbc   : > { %1877 = vmatpush3.msra.mxu1 %v620_v31  ;;  %1832 = vmatprep.subr.mxu0 %v635_v32 }
  0xbd   : > { %1862 = vmatprep.subr.mxu1 %v635_v32  ;;  %1833 = vmatpush3.msra.mxu0 %v619_v33 }
  0xbe   : > { %1878 = vmatpush3.msra.mxu1 %v619_v33  ;;  %1834 = vmatprep.subr.mxu0 %v634_v34 }
  0xbf   : > { %1863 = vmatprep.subr.mxu1 %v634_v34  ;;  %1835 = vmatpush3.msra.mxu0 %v618_v35 }
  0xc0   : > { %1879 = vmatpush3.msra.mxu1 %v618_v35  ;;  %1836 = vmatprep.subr.mxu0 %v633_v36 }
  0xc1   : > { %1864 = vmatprep.subr.mxu1 %v633_v36  ;;  %1837 = vmatpush3.msra.mxu0 %v617_v37 }
  0xc2   : > { %1880 = vmatpush3.msra.mxu1 %v617_v37  ;;  %1838 = vmatprep.subr.mxu0 %v632_v38 }
  0xc3   : > { %1865 = vmatprep.subr.mxu1 %v632_v38  ;;  %1839 = vmatpush3.msra.mxu0 %v616_v54 }
  0xc4   : > { %1881 = vmatpush3.msra.mxu1 %v616_v54  ;;  %1840 = vmatprep.subr.mxu0 %v631_v44 }
  0xc5   : > { %1866 = vmatprep.subr.mxu1 %v631_v44  ;;  %1841 = vmatpush3.msra.mxu0 %v615_v40 }
  0xc6   : > { %1882 = vmatpush3.msra.mxu1 %v615_v40  ;;  %1358 = vmatprep.mubr.f32.mxu0 %v2471_v61 }
  0xc7   : > { %1363 = vmatprep.mubr.f32.mxu1 %v2510_v14  ;;  %1359 = vmatmul.mubr.f32.vlgmr.msra.gmra.mxu0 %v2484_v63 }
  0xc8   : > { %1364 = vmatmul.mubr.f32.vlgmr.msra.gmra.mxu1 %v2524_v18 }
  0xc9   : > { %1368 = vmatprep.mubr.f32.mxu1 %v356_v47 }
  0xcc   : > { %1369 = vmatmul.mubr.f32.gmra.mxu1 %v354_v41 }
  0xef   : > { %v1514_v42 = vpop.f32.mrf.mxu0 }
  0xf0   : > { %v1555_v45 = vpop.f32.mrf.mxu1 }
  0xf1   : > { %v1515_v43 = vpop.f32.mrf.mxu0 }
  0xf2   : > { %v1556_v46 = vpop.f32.mrf.mxu1  ;;  %v1516_v16 = vadd.f32 %v1515_v43, %v1514_v42 }
  0xf3   : > { %v1557_v28 = vadd.f32 %v1556_v46, %v1555_v45 }
  0xf4   : > { %v721_v22 = vadd.f32 %v1516_v16, %v1479_v20 }
  0xf6   : > { %v801_v31 = vadd.f32 %v1557_v28, %v721_v22 }
 0x106   : > { %v1517_v62 = vpop.f32.mrf.mxu0 }
 0x108   : > { %v1518_v7 = vpop.f32.mrf.mxu0 }
 0x109   : > { %v1558_v48 = vpop.f32.mrf.mxu1  ;;  %v1519_v17 = vadd.f32 %v1518_v7, %v1517_v62 }
 0x10b   : > { %v1559_v49 = vpop.f32.mrf.mxu1  ;;  %v726_v23 = vadd.f32 %v1519_v17, %v1479_v20 }
 0x10c   : > { %v1520_v61 = vpop.f32.mrf.mxu0  ;;  %v1560_v24 = vadd.f32 %v1559_v49, %v1558_v48 }
 0x10e   : > { %v1521_v14 = vpop.f32.mrf.mxu0  ;;  %v806_v32 = vadd.f32 %v1560_v24, %v726_v23 }
 0x10f   : > { %v1561_v50 = vpop.f32.mrf.mxu1  ;;  %v1522_v27 = vadd.f32 %v1521_v14, %v1520_v61 }
 0x111   : > { %v1562_v51 = vpop.f32.mrf.mxu1  ;;  %v731_v35 = vadd.f32 %v1522_v27, %v1479_v20 }
 0x112   : > { %v1563_v36 = vadd.f32 %v1562_v51, %v1561_v50 }
 0x114   : > { %v811_v42 = vadd.f32 %v1563_v36, %v731_v35 }
 0x115   : > { %v1596_v63 = vpop.f32.mrf.mxu0 }
 0x116   : > { %v1637_v52 = vpop.f32.mrf.mxu1 }
 0x117   : > { %v1597_v18 = vpop.f32.mrf.mxu0 }
 0x118   : > { %v1638_v2 = vpop.f32.mrf.mxu1  ;;  %v1598_v29 = vadd.f32 %v1597_v18, %v1596_v63 }
 0x119   : > { %v1639_v40 = vadd.f32 %v1638_v2, %v1637_v52 }
 0x11a   : > { %v881_v37 = vadd.f32 %v1598_v29, %v801_v31 }
 0x11b   : > { %v1599_v55 = vpop.f32.mrf.mxu0 }
 0x11c   : > { %v961_v43 = vadd.f32 %v1639_v40, %v881_v37 }
 0x11d   : > { %v1600_v58 = vpop.f32.mrf.mxu0 }
 0x11e   : > { %v1640_v11 = vpop.f32.mrf.mxu1  ;;  %v1601_v30 = vadd.f32 %v1600_v58, %v1599_v55 }
 0x120   : > { %v1641_v60 = vpop.f32.mrf.mxu1  ;;  %v886_v38 = vadd.f32 %v1601_v30, %v806_v32 }
 0x121   : > { %v1602_v59 = vpop.f32.mrf.mxu0  ;;  %v1642_v54 = vadd.f32 %v1641_v60, %v1640_v11 }
 0x123   : > { %v1603_v0 = vpop.f32.mrf.mxu0  ;;  %v966_v45 = vadd.f32 %v1642_v54, %v886_v38 }
 0x124   : > { %v1643_v1 = vpop.f32.mrf.mxu1  ;;  %v1604_v39 = vadd.f32 %v1603_v0, %v1602_v59 }
 0x126   : > { %v1644_v5 = vpop.f32.mrf.mxu1  ;;  %v891_v46 = vadd.f32 %v1604_v39, %v811_v42 }
 0x127   : > { %v1645_v7 = vadd.f32 %v1644_v5, %v1643_v1 }
 0x129   : > { %v971_v58 = vadd.f32 %v1645_v7, %v891_v46 }
 0x13b   : > { %v1678_v4 = vpop.f32.mrf.mxu0 }
 0x13c   : > { %v1719_v6 = vpop.f32.mrf.mxu1 }
 0x13d   : > { %v1679_v53 = vpop.f32.mrf.mxu0 }
 0x13e   : > { %v1720_v3 = vpop.f32.mrf.mxu1  ;;  %v1680_v57 = vadd.f32 %v1679_v53, %v1678_v4 }
 0x13f   : > { %v1721_v63 = vadd.f32 %v1720_v3, %v1719_v6 }
 0x140   : > { %v1041_v48 = vadd.f32 %v1680_v57, %v961_v43 }
 0x141   : > { %v1681_v8 = vpop.f32.mrf.mxu0 }
 0x142   : > { %v1121_v52 = vadd.f32 %v1721_v63, %v1041_v48 }
 0x143   : > { %v1682_v9 = vpop.f32.mrf.mxu0 }
 0x144   : > { %v1722_v10 = vpop.f32.mrf.mxu1  ;;  %v1683_v47 = vadd.f32 %v1682_v9, %v1681_v8 }
 0x146   : > { %v1723_v12 = vpop.f32.mrf.mxu1  ;;  %v1046_v61 = vadd.f32 %v1683_v47, %v966_v45 }
 0x147   : > { %v1684_v56 = vpop.f32.mrf.mxu0  ;;  %v1724_v49 = vadd.f32 %v1723_v12, %v1722_v10 }
 0x149   : > { %v1685_v13 = vpop.f32.mrf.mxu0  ;;  %v1126_v2 = vadd.f32 %v1724_v49, %v1046_v61 }
 0x14a   : > { %v1725_v15 = vpop.f32.mrf.mxu1  ;;  %v1686_v50 = vadd.f32 %v1685_v13, %v1684_v56 }
 0x14c   : > { %v1726_v21 = vpop.f32.mrf.mxu1  ;;  %v1051_v59 = vadd.f32 %v1686_v50, %v971_v58 }
 0x14d   : > { %v1727_v60 = vadd.f32 %v1726_v21, %v1725_v15 }
 0x14f   : > { %v1131_v56 = vadd.f32 %v1727_v60, %v1051_v59 }
 0x161   : > { %v1760_v19 = vpop.f32.mrf.mxu0 }
 0x162   : > { %v1801_v25 = vpop.f32.mrf.mxu1 }
 0x163   : > { %v1761_v26 = vpop.f32.mrf.mxu0 }
 0x164   : > { %v1802_v33 = vpop.f32.mrf.mxu1  ;;  %v1762_v51 = vadd.f32 %v1761_v26, %v1760_v19 }
 0x165   : > { %v1803_v8 = vadd.f32 %v1802_v33, %v1801_v25 }
 0x166   : > { %v1201_v0 = vadd.f32 %v1762_v51, %v1121_v52 }
 0x167   : > { %v1763_v34 = vpop.f32.mrf.mxu0 }
 0x168   : > { %v1281_v6 = vadd.f32 %v1803_v8, %v1201_v0 }
 0x169   : > { %v1764_v41 = vpop.f32.mrf.mxu0 }
 0x16a   : > { %v1804_v44 = vpop.f32.mrf.mxu1  ;;  %v1765_v18 = vadd.f32 %v1764_v41, %v1763_v34 }
 0x16c   : > { %v1805_v62 = vpop.f32.mrf.mxu1  ;;  %v1206_v4 = vadd.f32 %v1765_v18, %v1126_v2 }
 0x16d   : > { %v1766_v14 = vpop.f32.mrf.mxu0  ;;  %v1806_v53 = vadd.f32 %v1805_v62, %v1804_v44 }
 0x16f   : > { %v1767_v11 = vpop.f32.mrf.mxu0  ;;  %v1286_v3 = vadd.f32 %v1806_v53, %v1206_v4 }
 0x170   : > { %v1807_v55 = vpop.f32.mrf.mxu1  ;;  %v1768_v5 = vadd.f32 %v1767_v11, %v1766_v14 }
 0x172   : > { %v1808_v1 = vpop.f32.mrf.mxu1  ;;  %v1211_v16 = vadd.f32 %v1768_v5, %v1131_v56 }
 0x173   : > { %v1809_v17 = vadd.f32 %v1808_v1, %v1807_v55 }
 0x175   : > { %v1291_v24 = vadd.f32 %v1809_v17, %v1211_v16 }
 0x187   : > { %v1842_v9 = vpop.f32.mrf.mxu0 }
 0x188   : > { %v1845_v10 = vpop.f32.mrf.mxu1 }
 0x189   : > { %v1843_v12 = vpop.f32.mrf.mxu0 }
 0x18a   : > { %v1846_v13 = vpop.f32.mrf.mxu1  ;;  %v1844_v19 = vadd.f32 %v1843_v12, %v1842_v9 }
 0x18b   : > { %v1847_v20 = vadd.f32 %v1846_v13, %v1845_v10 }
 0x18c   : > { %v1848_v22 = vpop.f32.mrf.mxu1  ;;  %v1361_v15 = vadd.f32 %v1844_v19, %v1281_v6 }
 0x18d   : > { %v1366_v21 = vadd.f32 %v1847_v20, %v1286_v3 }
 0x18e   : > { %v1849_v23 = vpop.f32.mrf.mxu1  ;;  %v1374_v25 = vmax.f32 %v1361_v15, 0.0 }
 0x18f   : > { %v1375_v26 = vmax.f32 %v1366_v21, 0.0  ;;  %v1850_v27 = vadd.f32 %v1849_v23, %v1848_v22 }
 0x190   : > { %1377 = vst [vmem:[%s206_s22] sm:$0xff] %v1374_v25 }
 0x191   : > { %1378 = vst [vmem:[%s206_s22 + $0x8] sm:$0xff] %v1375_v26  ;;  %v1371_v28 = vadd.f32 %v1850_v27, %v1291_v24 }
 0x193   : > { %v1376_v29 = vmax.f32 %v1371_v28, 0.0 }
 0x195   : > { %1379 = vst [vmem:[%s206_s22 + $0x10] sm:$0xff] %v1376_v29 }
 0x196 PF: > { %s13_s14 = sadd.s32 1, %s1931_s14   ;;  %s3031_s12 = smov %s1927_s13 }
 0x197   : > { %p10_p5 = scmp.ge.s32.totalorder %s13_s14, 4   ;;  %s3032_s13 = smov %s3034_s15 }
 0x199   :  { %12 = sbr.rel (!%p10_p5) target bundleno = 2 (0x2), region = 62 }

// kernel: stem_block_forward.8
= control target key start
LH: loop header
LB: loop body
LE: loop exit
PB: predicated region body
PF: predicated region fallthrough
CT: control target
= control target key end

     0   :  { %s1915_s12 = smov 0   ;;  %s1917_s13 = smov 0   ;;  %s3888_s0 = inlined_call_operand.vmem [shape: f32[2,1,42,128], index: 0, kind: input, shape index: {}]   ;;  %s3889_s1 = inlined_call_operand.vmem [shape: f32[1152,512], index: 1, kind: input, shape index: {}]   ;;  %s3890_s2 = inlined_call_operand.vmem [shape: f32[1,512], index: 2, kind: input, shape index: {}]   ;;  %s3891_s3 = inlined_call_operand.vmem [shape: f32[2,1,24,512], index: 3, kind: output, shape index: {}]  }
   0x1   :  { %s1919_s14 = smov 0  }
   0x2 LB: > { %s25_s15 = sadd.s32 1, %s1888_s13  ;;  %p1834_p0 = scmp.ge.s32.totalorder %s1892_s14, 1  ;;  %s1892_s14 = sphi %s1919_s14, %s13_s14   ;;  %s1888_s13 = sphi %s1917_s13, %s3893_s13   ;;  %s1884_s12 = sphi %s1915_s12, %s3892_s12  }
   0x3   : > { %p27_p1 = scmp.ge.s32.totalorder %s25_s15, 2  ;;  %p157_p2 = scmp.lt.s32.totalorder %s1892_s14, 3 }
   0x5   : > { %s3895_s15 = smov (%p27_p1, %s25_s15), 0  ;;  %p158_p3 = pnand %p1834_p0, %p157_p2 }
   0x6   : > { %p189_p4 = scmp.lt.s32.totalorder (!%p158_p3), %s1884_s12, 1 }
   0x7   : > { %161 = sbr.rel (%p158_p3) target bundleno = 537 (0x219), region = 32 }
   0xc   : > { %v347_v0 = vld [vmem:[%s3889_s1 + $0x1e8] sm:$0xff]  ;;  %v346_v2 = vld [vmem:[%s3889_s1 + $0x1e0] sm:$0xff]  ;;  %s3897_s12 = smov (!%p189_p4, %s1884_s12), 1  ;;  %vm216_vm0 = vcmask 1046528   ;;  %vm238_vm1 = vcmask 1041408   ;;  %vm227_vm2 = vcmask 1045504  }
   0xd   : > { %v475_v1 = vld [vmem:[%s3889_s1 + $0x5e8] sm:$0xff]  ;;  %884 = vmatprep.subr.mxu0 %v347_v0  ;;  %v474_v3 = vld [vmem:[%s3889_s1 + $0x5e0] sm:$0xff]  ;;  %s1839_s5 = smul.u32 48, %s3897_s12  ;;  %vm249_vm3 = vcmask 1040384   ;;  %vm272_vm4 = vcmask 1042432   ;;  %vm261_vm5 = vcmask 1043456  }
   0xe   : > { %967 = vmatprep.subr.mxu1 %v475_v1  ;;  %v343_v4 = vld [vmem:[%s3889_s1 + $0x1c8] sm:$0xff]  ;;  %885 = vmatpush1.msra.mxu0 %v346_v2  ;;  %v342_v6 = vld [vmem:[%s3889_s1 + $0x1c0] sm:$0xff]  ;;  %s1840_s16 = smul.u32 96, %s3897_s12 }
   0xf   : > { %v471_v5 = vld [vmem:[%s3889_s1 + $0x5c8] sm:$0xff]  ;;  %968 = vmatpush1.msra.mxu1 %v474_v3  ;;  %v470_v7 = vld [vmem:[%s3889_s1 + $0x5c0] sm:$0xff]  ;;  %886 = vmatprep.subr.mxu0 %v343_v4  ;;  %s2269_s28 = scalar_lea.vmem %s3888_s0, %s1839_s5 }
  0x10   : > { %v339_v8 = vld [vmem:[%s3889_s1 + $0x1a8] sm:$0xff]  ;;  %969 = vmatprep.subr.mxu1 %v471_v5  ;;  %v338_v10 = vld [vmem:[%s3889_s1 + $0x1a0] sm:$0xff]  ;;  %887 = vmatpush1.msra.mxu0 %v342_v6  ;;  %s3861_s19 = scalar_lea.vmem %s3891_s3, %s1840_s16 }
  0x11   : > { %v467_v9 = vld [vmem:[%s3889_s1 + $0x5a8] sm:$0xff]  ;;  %v466_v11 = vld [vmem:[%s3889_s1 + $0x5a0] sm:$0xff]  ;;  %970 = vmatpush1.msra.mxu1 %v470_v7  ;;  %888 = vmatprep.subr.mxu0 %v339_v8 }
  0x12   : > { %v335_v12 = vld [vmem:[%s3889_s1 + $0x188] sm:$0xff]  ;;  %971 = vmatprep.subr.mxu1 %v467_v9  ;;  %v334_v14 = vld [vmem:[%s3889_s1 + $0x180] sm:$0xff]  ;;  %889 = vmatpush1.msra.mxu0 %v338_v10 }
  0x13   : > { %v463_v13 = vld [vmem:[%s3889_s1 + $0x588] sm:$0xff]  ;;  %v462_v15 = vld [vmem:[%s3889_s1 + $0x580] sm:$0xff]  ;;  %972 = vmatpush1.msra.mxu1 %v466_v11  ;;  %890 = vmatprep.subr.mxu0 %v335_v12 }
  0x14   : > { %v331_v16 = vld [vmem:[%s3889_s1 + $0x168] sm:$0xff]  ;;  %973 = vmatprep.subr.mxu1 %v463_v13  ;;  %v330_v18 = vld [vmem:[%s3889_s1 + $0x160] sm:$0xff]  ;;  %891 = vmatpush1.msra.mxu0 %v334_v14 }
  0x15   : > { %v459_v17 = vld [vmem:[%s3889_s1 + $0x568] sm:$0xff]  ;;  %v458_v19 = vld [vmem:[%s3889_s1 + $0x560] sm:$0xff]  ;;  %974 = vmatpush1.msra.mxu1 %v462_v15  ;;  %892 = vmatprep.subr.mxu0 %v331_v16 }
  0x16   : > { %v327_v20 = vld [vmem:[%s3889_s1 + $0x148] sm:$0xff]  ;;  %975 = vmatprep.subr.mxu1 %v459_v17  ;;  %v326_v22 = vld [vmem:[%s3889_s1 + $0x140] sm:$0xff]  ;;  %893 = vmatpush1.msra.mxu0 %v330_v18 }
  0x17   : > { %v455_v21 = vld [vmem:[%s3889_s1 + $0x548] sm:$0xff]  ;;  %v454_v23 = vld [vmem:[%s3889_s1 + $0x540] sm:$0xff]  ;;  %976 = vmatpush1.msra.mxu1 %v458_v19  ;;  %894 = vmatprep.subr.mxu0 %v327_v20 }
  0x18   : > { %v323_v24 = vld [vmem:[%s3889_s1 + $0x128] sm:$0xff]  ;;  %977 = vmatprep.subr.mxu1 %v455_v21  ;;  %v322_v26 = vld [vmem:[%s3889_s1 + $0x120] sm:$0xff]  ;;  %895 = vmatpush1.msra.mxu0 %v326_v22 }
  0x19   : > { %v451_v25 = vld [vmem:[%s3889_s1 + $0x528] sm:$0xff]  ;;  %v450_v27 = vld [vmem:[%s3889_s1 + $0x520] sm:$0xff]  ;;  %978 = vmatpush1.msra.mxu1 %v454_v23  ;;  %896 = vmatprep.subr.mxu0 %v323_v24 }
  0x1a   : > { %v319_v28 = vld [vmem:[%s3889_s1 + $0x108] sm:$0xff]  ;;  %979 = vmatprep.subr.mxu1 %v451_v25  ;;  %v318_v30 = vld [vmem:[%s3889_s1 + $0x100] sm:$0xff]  ;;  %897 = vmatpush1.msra.mxu0 %v322_v26 }
  0x1b   : > { %v447_v29 = vld [vmem:[%s3889_s1 + $0x508] sm:$0xff]  ;;  %v446_v31 = vld [vmem:[%s3889_s1 + $0x500] sm:$0xff]  ;;  %980 = vmatpush1.msra.mxu1 %v450_v27  ;;  %898 = vmatprep.subr.mxu0 %v319_v28 }
  0x1c   : > { %v315_v32 = vld [vmem:[%s3889_s1 + $0xe8] sm:$0xff]  ;;  %981 = vmatprep.subr.mxu1 %v447_v29  ;;  %v314_v34 = vld [vmem:[%s3889_s1 + $0xe0] sm:$0xff]  ;;  %899 = vmatpush1.msra.mxu0 %v318_v30 }
  0x1d   : > { %v443_v33 = vld [vmem:[%s3889_s1 + $0x4e8] sm:$0xff]  ;;  %v442_v35 = vld [vmem:[%s3889_s1 + $0x4e0] sm:$0xff]  ;;  %982 = vmatpush1.msra.mxu1 %v446_v31  ;;  %900 = vmatprep.subr.mxu0 %v315_v32 }
  0x1e   : > { %v311_v36 = vld [vmem:[%s3889_s1 + $0xc8] sm:$0xff]  ;;  %983 = vmatprep.subr.mxu1 %v443_v33  ;;  %v310_v38 = vld [vmem:[%s3889_s1 + $0xc0] sm:$0xff]  ;;  %901 = vmatpush1.msra.mxu0 %v314_v34 }
  0x1f   : > { %v439_v37 = vld [vmem:[%s3889_s1 + $0x4c8] sm:$0xff]  ;;  %v438_v39 = vld [vmem:[%s3889_s1 + $0x4c0] sm:$0xff]  ;;  %984 = vmatpush1.msra.mxu1 %v442_v35  ;;  %902 = vmatprep.subr.mxu0 %v311_v36 }
  0x20   : > { %v307_v40 = vld [vmem:[%s3889_s1 + $0xa8] sm:$0xff]  ;;  %985 = vmatprep.subr.mxu1 %v439_v37  ;;  %v306_v42 = vld [vmem:[%s3889_s1 + $0xa0] sm:$0xff]  ;;  %903 = vmatpush1.msra.mxu0 %v310_v38 }
  0x21   : > { %v435_v41 = vld [vmem:[%s3889_s1 + $0x4a8] sm:$0xff]  ;;  %v434_v43 = vld [vmem:[%s3889_s1 + $0x4a0] sm:$0xff]  ;;  %986 = vmatpush1.msra.mxu1 %v438_v39  ;;  %904 = vmatprep.subr.mxu0 %v307_v40 }
  0x22   : > { %v303_v44 = vld [vmem:[%s3889_s1 + $0x88] sm:$0xff]  ;;  %987 = vmatprep.subr.mxu1 %v435_v41  ;;  %v302_v46 = vld [vmem:[%s3889_s1 + $0x80] sm:$0xff]  ;;  %905 = vmatpush1.msra.mxu0 %v306_v42 }
  0x23   : > { %v431_v45 = vld [vmem:[%s3889_s1 + $0x488] sm:$0xff]  ;;  %v430_v47 = vld [vmem:[%s3889_s1 + $0x480] sm:$0xff]  ;;  %988 = vmatpush1.msra.mxu1 %v434_v43  ;;  %906 = vmatprep.subr.mxu0 %v303_v44 }
  0x24   : > { %v299_v48 = vld [vmem:[%s3889_s1 + $0x68] sm:$0xff]  ;;  %989 = vmatprep.subr.mxu1 %v431_v45  ;;  %v298_v50 = vld [vmem:[%s3889_s1 + $0x60] sm:$0xff]  ;;  %907 = vmatpush1.msra.mxu0 %v302_v46 }
  0x25   : > { %v427_v49 = vld [vmem:[%s3889_s1 + $0x468] sm:$0xff]  ;;  %v426_v51 = vld [vmem:[%s3889_s1 + $0x460] sm:$0xff]  ;;  %990 = vmatpush1.msra.mxu1 %v430_v47  ;;  %908 = vmatprep.subr.mxu0 %v299_v48 }
  0x26   : > { %v295_v52 = vld [vmem:[%s3889_s1 + $0x48] sm:$0xff]  ;;  %991 = vmatprep.subr.mxu1 %v427_v49  ;;  %v294_v54 = vld [vmem:[%s3889_s1 + $0x40] sm:$0xff]  ;;  %909 = vmatpush1.msra.mxu0 %v298_v50 }
  0x27   : > { %v423_v53 = vld [vmem:[%s3889_s1 + $0x448] sm:$0xff]  ;;  %v422_v55 = vld [vmem:[%s3889_s1 + $0x440] sm:$0xff]  ;;  %992 = vmatpush1.msra.mxu1 %v426_v51  ;;  %910 = vmatprep.subr.mxu0 %v295_v52 }
  0x28   : > { %v291_v56 = vld [vmem:[%s3889_s1 + $0x28] sm:$0xff]  ;;  %993 = vmatprep.subr.mxu1 %v423_v53  ;;  %v290_v58 = vld [vmem:[%s3889_s1 + $0x20] sm:$0xff]  ;;  %911 = vmatpush1.msra.mxu0 %v294_v54 }
  0x29   : > { %v419_v57 = vld [vmem:[%s3889_s1 + $0x428] sm:$0xff]  ;;  %v418_v59 = vld [vmem:[%s3889_s1 + $0x420] sm:$0xff]  ;;  %994 = vmatpush1.msra.mxu1 %v422_v55  ;;  %912 = vmatprep.subr.mxu0 %v291_v56 }
  0x2a   : > { %v287_v60 = vld [vmem:[%s3889_s1 + $0x8] sm:$0xff]  ;;  %995 = vmatprep.subr.mxu1 %v419_v57  ;;  %v286_v62 = vld [vmem:[%s3889_s1] sm:$0xff]  ;;  %913 = vmatpush1.msra.mxu0 %v290_v58 }
  0x2b   : > { %v415_v61 = vld [vmem:[%s3889_s1 + $0x408] sm:$0xff]  ;;  %v414_v63 = vld [vmem:[%s3889_s1 + $0x400] sm:$0xff]  ;;  %996 = vmatpush1.msra.mxu1 %v418_v59  ;;  %914 = vmatprep.subr.mxu0 %v287_v60 }
  0x2c   : > { %v411_v0 = vld [vmem:[%s3889_s1 + $0x3e8] sm:$0xff]  ;;  %997 = vmatprep.subr.mxu1 %v415_v61  ;;  %v410_v2 = vld [vmem:[%s3889_s1 + $0x3e0] sm:$0xff]  ;;  %915 = vmatpush1.msra.mxu0 %v286_v62 }
  0x2d   : > { %v539_v1 = vld [vmem:[%s3889_s1 + $0x7e8] sm:$0xff]  ;;  %v538_v3 = vld [vmem:[%s3889_s1 + $0x7e0] sm:$0xff]  ;;  %998 = vmatpush1.msra.mxu1 %v414_v63  ;;  %916 = vmatprep.subr.mxu0 %v411_v0 }
  0x2e   : > { %v407_v4 = vld [vmem:[%s3889_s1 + $0x3c8] sm:$0xff]  ;;  %999 = vmatprep.subr.mxu1 %v539_v1  ;;  %v406_v6 = vld [vmem:[%s3889_s1 + $0x3c0] sm:$0xff]  ;;  %917 = vmatpush2.msra.mxu0 %v410_v2 }
  0x2f   : > { %v535_v5 = vld [vmem:[%s3889_s1 + $0x7c8] sm:$0xff]  ;;  %v534_v7 = vld [vmem:[%s3889_s1 + $0x7c0] sm:$0xff]  ;;  %1000 = vmatpush2.msra.mxu1 %v538_v3  ;;  %918 = vmatprep.subr.mxu0 %v407_v4 }
  0x30   : > { %v403_v8 = vld [vmem:[%s3889_s1 + $0x3a8] sm:$0xff]  ;;  %1001 = vmatprep.subr.mxu1 %v535_v5  ;;  %v402_v10 = vld [vmem:[%s3889_s1 + $0x3a0] sm:$0xff]  ;;  %919 = vmatpush2.msra.mxu0 %v406_v6 }
  0x31   : > { %v531_v9 = vld [vmem:[%s3889_s1 + $0x7a8] sm:$0xff]  ;;  %v530_v11 = vld [vmem:[%s3889_s1 + $0x7a0] sm:$0xff]  ;;  %1002 = vmatpush2.msra.mxu1 %v534_v7  ;;  %920 = vmatprep.subr.mxu0 %v403_v8 }
  0x32   : > { %v399_v12 = vld [vmem:[%s3889_s1 + $0x388] sm:$0xff]  ;;  %1003 = vmatprep.subr.mxu1 %v531_v9  ;;  %v398_v14 = vld [vmem:[%s3889_s1 + $0x380] sm:$0xff]  ;;  %921 = vmatpush2.msra.mxu0 %v402_v10 }
  0x33   : > { %v527_v13 = vld [vmem:[%s3889_s1 + $0x788] sm:$0xff]  ;;  %v526_v15 = vld [vmem:[%s3889_s1 + $0x780] sm:$0xff]  ;;  %1004 = vmatpush2.msra.mxu1 %v530_v11  ;;  %922 = vmatprep.subr.mxu0 %v399_v12 }
  0x34   : > { %v395_v16 = vld [vmem:[%s3889_s1 + $0x368] sm:$0xff]  ;;  %1005 = vmatprep.subr.mxu1 %v527_v13  ;;  %v394_v18 = vld [vmem:[%s3889_s1 + $0x360] sm:$0xff]  ;;  %923 = vmatpush2.msra.mxu0 %v398_v14 }
  0x35   : > { %v523_v17 = vld [vmem:[%s3889_s1 + $0x768] sm:$0xff]  ;;  %v522_v19 = vld [vmem:[%s3889_s1 + $0x760] sm:$0xff]  ;;  %1006 = vmatpush2.msra.mxu1 %v526_v15  ;;  %924 = vmatprep.subr.mxu0 %v395_v16 }
  0x36   : > { %v391_v20 = vld [vmem:[%s3889_s1 + $0x348] sm:$0xff]  ;;  %1007 = vmatprep.subr.mxu1 %v523_v17  ;;  %v390_v22 = vld [vmem:[%s3889_s1 + $0x340] sm:$0xff]  ;;  %925 = vmatpush2.msra.mxu0 %v394_v18 }
  0x37   : > { %v519_v21 = vld [vmem:[%s3889_s1 + $0x748] sm:$0xff]  ;;  %v518_v23 = vld [vmem:[%s3889_s1 + $0x740] sm:$0xff]  ;;  %1008 = vmatpush2.msra.mxu1 %v522_v19  ;;  %926 = vmatprep.subr.mxu0 %v391_v20 }
  0x38   : > { %v387_v24 = vld [vmem:[%s3889_s1 + $0x328] sm:$0xff]  ;;  %1009 = vmatprep.subr.mxu1 %v519_v21  ;;  %v386_v26 = vld [vmem:[%s3889_s1 + $0x320] sm:$0xff]  ;;  %927 = vmatpush2.msra.mxu0 %v390_v22 }
  0x39   : > { %v515_v25 = vld [vmem:[%s3889_s1 + $0x728] sm:$0xff]  ;;  %v514_v27 = vld [vmem:[%s3889_s1 + $0x720] sm:$0xff]  ;;  %1010 = vmatpush2.msra.mxu1 %v518_v23  ;;  %928 = vmatprep.subr.mxu0 %v387_v24 }
  0x3a   : > { %v383_v28 = vld [vmem:[%s3889_s1 + $0x308] sm:$0xff]  ;;  %1011 = vmatprep.subr.mxu1 %v515_v25  ;;  %v382_v30 = vld [vmem:[%s3889_s1 + $0x300] sm:$0xff]  ;;  %929 = vmatpush2.msra.mxu0 %v386_v26 }
  0x3b   : > { %v511_v29 = vld [vmem:[%s3889_s1 + $0x708] sm:$0xff]  ;;  %v510_v31 = vld [vmem:[%s3889_s1 + $0x700] sm:$0xff]  ;;  %1012 = vmatpush2.msra.mxu1 %v514_v27  ;;  %930 = vmatprep.subr.mxu0 %v383_v28 }
  0x3c   : > { %v379_v32 = vld [vmem:[%s3889_s1 + $0x2e8] sm:$0xff]  ;;  %1013 = vmatprep.subr.mxu1 %v511_v29  ;;  %v378_v34 = vld [vmem:[%s3889_s1 + $0x2e0] sm:$0xff]  ;;  %931 = vmatpush2.msra.mxu0 %v382_v30 }
  0x3d   : > { %v507_v33 = vld [vmem:[%s3889_s1 + $0x6e8] sm:$0xff]  ;;  %v506_v35 = vld [vmem:[%s3889_s1 + $0x6e0] sm:$0xff]  ;;  %1014 = vmatpush2.msra.mxu1 %v510_v31  ;;  %932 = vmatprep.subr.mxu0 %v379_v32 }
  0x3e   : > { %v375_v36 = vld [vmem:[%s3889_s1 + $0x2c8] sm:$0xff]  ;;  %1015 = vmatprep.subr.mxu1 %v507_v33  ;;  %v374_v38 = vld [vmem:[%s3889_s1 + $0x2c0] sm:$0xff]  ;;  %933 = vmatpush2.msra.mxu0 %v378_v34 }
  0x3f   : > { %v503_v37 = vld [vmem:[%s3889_s1 + $0x6c8] sm:$0xff]  ;;  %v502_v39 = vld [vmem:[%s3889_s1 + $0x6c0] sm:$0xff]  ;;  %1016 = vmatpush2.msra.mxu1 %v506_v35  ;;  %934 = vmatprep.subr.mxu0 %v375_v36 }
  0x40   : > { %v371_v40 = vld [vmem:[%s3889_s1 + $0x2a8] sm:$0xff]  ;;  %1017 = vmatprep.subr.mxu1 %v503_v37  ;;  %v370_v42 = vld [vmem:[%s3889_s1 + $0x2a0] sm:$0xff]  ;;  %935 = vmatpush2.msra.mxu0 %v374_v38 }
  0x41   : > { %v499_v41 = vld [vmem:[%s3889_s1 + $0x6a8] sm:$0xff]  ;;  %v498_v43 = vld [vmem:[%s3889_s1 + $0x6a0] sm:$0xff]  ;;  %1018 = vmatpush2.msra.mxu1 %v502_v39  ;;  %936 = vmatprep.subr.mxu0 %v371_v40 }
  0x42   : > { %v367_v44 = vld [vmem:[%s3889_s1 + $0x288] sm:$0xff]  ;;  %1019 = vmatprep.subr.mxu1 %v499_v41  ;;  %v366_v46 = vld [vmem:[%s3889_s1 + $0x280] sm:$0xff]  ;;  %937 = vmatpush2.msra.mxu0 %v370_v42 }
  0x43   : > { %v495_v45 = vld [vmem:[%s3889_s1 + $0x688] sm:$0xff]  ;;  %v494_v47 = vld [vmem:[%s3889_s1 + $0x680] sm:$0xff]  ;;  %1020 = vmatpush2.msra.mxu1 %v498_v43  ;;  %938 = vmatprep.subr.mxu0 %v367_v44 }
  0x44   : > { %v363_v48 = vld [vmem:[%s3889_s1 + $0x268] sm:$0xff]  ;;  %v2290_v50 = vld [vmem:[%s2269_s28] sm:$0xff]  ;;  %1021 = vmatprep.subr.mxu1 %v495_v45  ;;  %939 = vmatpush2.msra.mxu0 %v366_v46 }
  0x45   : > { %v491_v49 = vld [vmem:[%s3889_s1 + $0x668] sm:$0xff]  ;;  %v362_v52 = vld [vmem:[%s3889_s1 + $0x260] sm:$0xff]  ;;  %1022 = vmatpush2.msra.mxu1 %v494_v47  ;;  %940 = vmatprep.subr.mxu0 %v363_v48  ;;  %v217_v58 = vrot.slane %v2290_v50, 1  ;;  %v239_v0 = vrot.slane %v2290_v50, 6  ;;  %v228_v4 = vrot.slane %v2290_v50, 2 }
  0x46   : > { %v2293_v51 = vld [vmem:[%s2269_s28 + $0x8] sm:$0xff]  ;;  %v490_v53 = vld [vmem:[%s3889_s1 + $0x660] sm:$0xff]  ;;  %1023 = vmatprep.subr.mxu1 %v491_v49  ;;  %941 = vmatpush2.msra.mxu0 %v362_v52 }
  0x47   : > { %v359_v54 = vld [vmem:[%s3889_s1 + $0x248] sm:$0xff]  ;;  %v358_v56 = vld [vmem:[%s3889_s1 + $0x240] sm:$0xff]  ;;  %v218_v59 = vrot.slane %v2293_v51, 1  ;;  %1024 = vmatpush2.msra.mxu1 %v490_v53  ;;  %v240_v1 = vrot.slane %v2293_v51, 6  ;;  %v229_v5 = vrot.slane %v2293_v51, 2 }
  0x48   : > { %v487_v55 = vld [vmem:[%s3889_s1 + $0x648] sm:$0xff]  ;;  %v486_v57 = vld [vmem:[%s3889_s1 + $0x640] sm:$0xff]  ;;  %942 = vmatprep.subr.mxu0 %v359_v54 }
  0x49   : > { %v355_v60 = vld [vmem:[%s3889_s1 + $0x228] sm:$0xff]  ;;  %1025 = vmatprep.subr.mxu1 %v487_v55  ;;  %v354_v62 = vld [vmem:[%s3889_s1 + $0x220] sm:$0xff]  ;;  %943 = vmatpush2.msra.mxu0 %v358_v56  ;;  %v2343_v7 = vsel %vm216_vm0, %v217_v58, %v218_v59  ;;  %v2351_v9 = vsel %vm238_vm1, %v239_v0, %v240_v1  ;;  %v2363_v12 = vsel %vm227_vm2, %v228_v4, %v229_v5 }
  0x4a   : > { %v483_v61 = vld [vmem:[%s3889_s1 + $0x628] sm:$0xff]  ;;  %v482_v63 = vld [vmem:[%s3889_s1 + $0x620] sm:$0xff]  ;;  %1026 = vmatpush2.msra.mxu1 %v486_v57  ;;  %944 = vmatprep.subr.mxu0 %v355_v60 }
  0x4b   : > { %v351_v2 = vld [vmem:[%s3889_s1 + $0x208] sm:$0xff]  ;;  %1027 = vmatprep.subr.mxu1 %v483_v61  ;;  %v350_v6 = vld [vmem:[%s3889_s1 + $0x200] sm:$0xff]  ;;  %945 = vmatpush2.msra.mxu0 %v354_v62 }
  0x4c   : > { %v479_v3 = vld [vmem:[%s3889_s1 + $0x608] sm:$0xff]  ;;  %1028 = vmatpush2.msra.mxu1 %v482_v63  ;;  %v478_v8 = vld [vmem:[%s3889_s1 + $0x600] sm:$0xff]  ;;  %946 = vmatprep.subr.mxu0 %v351_v2 }
  0x4d   : > { %1029 = vmatprep.subr.mxu1 %v479_v3  ;;  %v603_v10 = vld [vmem:[%s3889_s1 + $0x9e8] sm:$0xff]  ;;  %947 = vmatpush2.msra.mxu0 %v350_v6  ;;  %v602_v13 = vld [vmem:[%s3889_s1 + $0x9e0] sm:$0xff] }
  0x4e   : > { %948 = vmatprep.mubr.f32.mxu0 %v2343_v7  ;;  %v731_v11 = vld [vmem:[%s3889_s1 + $0xde8] sm:$0xff]  ;;  %1030 = vmatpush2.msra.mxu1 %v478_v8  ;;  %v730_v14 = vld [vmem:[%s3889_s1 + $0xde0] sm:$0xff] }
  0x4f   : > { %949 = vmatmul.mubr.f32.vlgmr.msra.gmra.mxu0 %v2290_v50  ;;  %1031 = vmatprep.mubr.f32.mxu1 %v2351_v9  ;;  %v599_v15 = vld [vmem:[%s3889_s1 + $0x9c8] sm:$0xff]  ;;  %v598_v17 = vld [vmem:[%s3889_s1 + $0x9c0] sm:$0xff] }
  0x50   : > { %1050 = vmatprep.subr.mxu0 %v603_v10  ;;  %v727_v16 = vld [vmem:[%s3889_s1 + $0xdc8] sm:$0xff]  ;;  %1133 = vmatprep.subr.mxu1 %v731_v11  ;;  %v726_v18 = vld [vmem:[%s3889_s1 + $0xdc0] sm:$0xff] }
  0x51   : > { %1032 = vmatmul.mubr.f32.vlgmr.msra.gmra.mxu1 %v2363_v12  ;;  %1051 = vmatpush1.msra.mxu0 %v602_v13  ;;  %v595_v19 = vld [vmem:[%s3889_s1 + $0x9a8] sm:$0xff]  ;;  %v594_v21 = vld [vmem:[%s3889_s1 + $0x9a0] sm:$0xff] }
  0x52   : > { %1134 = vmatpush1.msra.mxu1 %v730_v14  ;;  %v723_v20 = vld [vmem:[%s3889_s1 + $0xda8] sm:$0xff]  ;;  %1052 = vmatprep.subr.mxu0 %v599_v15  ;;  %v722_v22 = vld [vmem:[%s3889_s1 + $0xda0] sm:$0xff]  ;;  %v2543_v15 = vld [vmem:[%s2269_s28 + $0x18] sm:$0xff] }
  0x53   : > { %1135 = vmatprep.subr.mxu1 %v727_v16  ;;  %1053 = vmatpush1.msra.mxu0 %v598_v17  ;;  %v591_v23 = vld [vmem:[%s3889_s1 + $0x988] sm:$0xff]  ;;  %v590_v25 = vld [vmem:[%s3889_s1 + $0x980] sm:$0xff] }
  0x54   : > { %1136 = vmatpush1.msra.mxu1 %v726_v18  ;;  %v719_v24 = vld [vmem:[%s3889_s1 + $0xd88] sm:$0xff]  ;;  %1054 = vmatprep.subr.mxu0 %v595_v19  ;;  %v718_v26 = vld [vmem:[%s3889_s1 + $0xd80] sm:$0xff]  ;;  %v244_v19 = vrot.slane %v2543_v15, 6 }
  0x55   : > { %1137 = vmatprep.subr.mxu1 %v723_v20  ;;  %1055 = vmatpush1.msra.mxu0 %v594_v21  ;;  %v587_v27 = vld [vmem:[%s3889_s1 + $0x968] sm:$0xff]  ;;  %v586_v29 = vld [vmem:[%s3889_s1 + $0x960] sm:$0xff] }
  0x56   : > { %1138 = vmatpush1.msra.mxu1 %v722_v22  ;;  %v715_v28 = vld [vmem:[%s3889_s1 + $0xd68] sm:$0xff]  ;;  %1056 = vmatprep.subr.mxu0 %v591_v23  ;;  %v714_v30 = vld [vmem:[%s3889_s1 + $0xd60] sm:$0xff] }
  0x57   : > { %1139 = vmatprep.subr.mxu1 %v719_v24  ;;  %1057 = vmatpush1.msra.mxu0 %v590_v25  ;;  %v583_v31 = vld [vmem:[%s3889_s1 + $0x948] sm:$0xff]  ;;  %v582_v33 = vld [vmem:[%s3889_s1 + $0x940] sm:$0xff] }
  0x58   : > { %1140 = vmatpush1.msra.mxu1 %v718_v26  ;;  %v711_v32 = vld [vmem:[%s3889_s1 + $0xd48] sm:$0xff]  ;;  %1058 = vmatprep.subr.mxu0 %v587_v27  ;;  %v710_v34 = vld [vmem:[%s3889_s1 + $0xd40] sm:$0xff] }
  0x59   : > { %1141 = vmatprep.subr.mxu1 %v715_v28  ;;  %1059 = vmatpush1.msra.mxu0 %v586_v29  ;;  %v579_v35 = vld [vmem:[%s3889_s1 + $0x928] sm:$0xff]  ;;  %v578_v37 = vld [vmem:[%s3889_s1 + $0x920] sm:$0xff] }
  0x5a   : > { %1142 = vmatpush1.msra.mxu1 %v714_v30  ;;  %v707_v36 = vld [vmem:[%s3889_s1 + $0xd28] sm:$0xff]  ;;  %1060 = vmatprep.subr.mxu0 %v583_v31  ;;  %v706_v38 = vld [vmem:[%s3889_s1 + $0xd20] sm:$0xff] }
  0x5b   : > { %1143 = vmatprep.subr.mxu1 %v711_v32  ;;  %1061 = vmatpush1.msra.mxu0 %v582_v33  ;;  %v575_v39 = vld [vmem:[%s3889_s1 + $0x908] sm:$0xff]  ;;  %v574_v41 = vld [vmem:[%s3889_s1 + $0x900] sm:$0xff] }
  0x5c   : > { %1144 = vmatpush1.msra.mxu1 %v710_v34  ;;  %v703_v40 = vld [vmem:[%s3889_s1 + $0xd08] sm:$0xff]  ;;  %1062 = vmatprep.subr.mxu0 %v579_v35  ;;  %v702_v42 = vld [vmem:[%s3889_s1 + $0xd00] sm:$0xff] }
  0x5d   : > { %1145 = vmatprep.subr.mxu1 %v707_v36  ;;  %1063 = vmatpush1.msra.mxu0 %v578_v37  ;;  %v571_v43 = vld [vmem:[%s3889_s1 + $0x8e8] sm:$0xff]  ;;  %v570_v45 = vld [vmem:[%s3889_s1 + $0x8e0] sm:$0xff] }
  0x5e   : > { %1146 = vmatpush1.msra.mxu1 %v706_v38  ;;  %v699_v44 = vld [vmem:[%s3889_s1 + $0xce8] sm:$0xff]  ;;  %1064 = vmatprep.subr.mxu0 %v575_v39  ;;  %v698_v46 = vld [vmem:[%s3889_s1 + $0xce0] sm:$0xff] }
  0x5f   : > { %1147 = vmatprep.subr.mxu1 %v703_v40  ;;  %1065 = vmatpush1.msra.mxu0 %v574_v41  ;;  %v567_v47 = vld [vmem:[%s3889_s1 + $0x8c8] sm:$0xff]  ;;  %v566_v49 = vld [vmem:[%s3889_s1 + $0x8c0] sm:$0xff] }
  0x60   : > { %1148 = vmatpush1.msra.mxu1 %v702_v42  ;;  %v695_v48 = vld [vmem:[%s3889_s1 + $0xcc8] sm:$0xff]  ;;  %1066 = vmatprep.subr.mxu0 %v571_v43  ;;  %v694_v52 = vld [vmem:[%s3889_s1 + $0xcc0] sm:$0xff] }
  0x61   : > { %1149 = vmatprep.subr.mxu1 %v699_v44  ;;  %1067 = vmatpush1.msra.mxu0 %v570_v45  ;;  %v563_v53 = vld [vmem:[%s3889_s1 + $0x8a8] sm:$0xff]  ;;  %v562_v55 = vld [vmem:[%s3889_s1 + $0x8a0] sm:$0xff] }
  0x62   : > { %1150 = vmatpush1.msra.mxu1 %v698_v46  ;;  %v691_v54 = vld [vmem:[%s3889_s1 + $0xca8] sm:$0xff]  ;;  %1068 = vmatprep.subr.mxu0 %v567_v47  ;;  %v690_v56 = vld [vmem:[%s3889_s1 + $0xca0] sm:$0xff] }
  0x63   : > { %1151 = vmatprep.subr.mxu1 %v695_v48  ;;  %1069 = vmatpush1.msra.mxu0 %v566_v49  ;;  %v559_v57 = vld [vmem:[%s3889_s1 + $0x888] sm:$0xff]  ;;  %v558_v60 = vld [vmem:[%s3889_s1 + $0x880] sm:$0xff] }
  0x64   : > { %1152 = vmatpush1.msra.mxu1 %v694_v52  ;;  %v687_v58 = vld [vmem:[%s3889_s1 + $0xc88] sm:$0xff]  ;;  %1070 = vmatprep.subr.mxu0 %v563_v53  ;;  %v686_v61 = vld [vmem:[%s3889_s1 + $0xc80] sm:$0xff] }
  0x65   : > { %1153 = vmatprep.subr.mxu1 %v691_v54  ;;  %1071 = vmatpush1.msra.mxu0 %v562_v55  ;;  %v555_v62 = vld [vmem:[%s3889_s1 + $0x868] sm:$0xff]  ;;  %v554_v0 = vld [vmem:[%s3889_s1 + $0x860] sm:$0xff] }
  0x66   : > { %1154 = vmatpush1.msra.mxu1 %v690_v56  ;;  %v683_v63 = vld [vmem:[%s3889_s1 + $0xc68] sm:$0xff]  ;;  %1072 = vmatprep.subr.mxu0 %v559_v57  ;;  %v682_v2 = vld [vmem:[%s3889_s1 + $0xc60] sm:$0xff]  ;;  %v2658_v56 = vld [vmem:[%s2269_s28 + $0x10] sm:$0xff] }
  0x67   : > { %1155 = vmatprep.subr.mxu1 %v687_v58  ;;  %1073 = vmatpush1.msra.mxu0 %v558_v60  ;;  %v551_v3 = vld [vmem:[%s3889_s1 + $0x848] sm:$0xff]  ;;  %v550_v6 = vld [vmem:[%s3889_s1 + $0x840] sm:$0xff] }
  0x68   : > { %1156 = vmatpush1.msra.mxu1 %v686_v61  ;;  %v679_v4 = vld [vmem:[%s3889_s1 + $0xc48] sm:$0xff]  ;;  %1074 = vmatprep.subr.mxu0 %v555_v62  ;;  %v678_v8 = vld [vmem:[%s3889_s1 + $0xc40] sm:$0xff] }
  0x69   : > { %1157 = vmatprep.subr.mxu1 %v683_v63  ;;  %1075 = vmatpush1.msra.mxu0 %v554_v0  ;;  %v547_v10 = vld [vmem:[%s3889_s1 + $0x828] sm:$0xff]  ;;  %v546_v13 = vld [vmem:[%s3889_s1 + $0x820] sm:$0xff] }
  0x6a   : > { %1158 = vmatpush1.msra.mxu1 %v682_v2  ;;  %v675_v11 = vld [vmem:[%s3889_s1 + $0xc28] sm:$0xff]  ;;  %1076 = vmatprep.subr.mxu0 %v551_v3  ;;  %v674_v14 = vld [vmem:[%s3889_s1 + $0xc20] sm:$0xff]  ;;  %v220_v3 = vrot.slane %v2658_v56, 1 }
  0x6b   : > { %1159 = vmatprep.subr.mxu1 %v679_v4  ;;  %v2546_v16 = vld [vmem:[%s2269_s28 + $0x20] sm:$0xff]  ;;  %1077 = vmatpush1.msra.mxu0 %v550_v6  ;;  %v543_v17 = vld [vmem:[%s3889_s1 + $0x808] sm:$0xff] }
  0x6c   : > { %1160 = vmatpush1.msra.mxu1 %v678_v8  ;;  %v671_v18 = vld [vmem:[%s3889_s1 + $0xc08] sm:$0xff]  ;;  %v283_v20 = vrot.slane %v2546_v16, 6  ;;  %1078 = vmatprep.subr.mxu0 %v547_v10  ;;  %v542_v21 = vld [vmem:[%s3889_s1 + $0x800] sm:$0xff] }
  0x6d   : > { %1161 = vmatprep.subr.mxu1 %v675_v11  ;;  %v670_v22 = vld [vmem:[%s3889_s1 + $0xc00] sm:$0xff]  ;;  %1079 = vmatpush1.msra.mxu0 %v546_v13  ;;  %v667_v23 = vld [vmem:[%s3889_s1 + $0xbe8] sm:$0xff] }
  0x6e   : > { %1162 = vmatpush1.msra.mxu1 %v674_v14  ;;  %v795_v24 = vld [vmem:[%s3889_s1 + $0xfe8] sm:$0xff]  ;;  %v2571_v25 = vsel %vm238_vm1, %v244_v19, %v283_v20  ;;  %1080 = vmatprep.subr.mxu0 %v543_v17  ;;  %v666_v26 = vld [vmem:[%s3889_s1 + $0xbe0] sm:$0xff]  ;;  %v242_v14 = vrot.slane %v2658_v56, 6  ;;  %v2707_v17 = vsel %vm216_vm0, %v218_v59, %v220_v3  ;;  %v231_v20 = vrot.slane %v2658_v56, 2 }
  0x6f   : > { %1163 = vmatprep.subr.mxu1 %v671_v18  ;;  %v794_v27 = vld [vmem:[%s3889_s1 + $0xfe0] sm:$0xff]  ;;  %1081 = vmatpush1.msra.mxu0 %v542_v21  ;;  %v663_v28 = vld [vmem:[%s3889_s1 + $0xbc8] sm:$0xff] }
  0x70   : > { %1164 = vmatpush1.msra.mxu1 %v670_v22  ;;  %v791_v29 = vld [vmem:[%s3889_s1 + $0xfc8] sm:$0xff]  ;;  %1082 = vmatprep.subr.mxu0 %v667_v23  ;;  %v662_v30 = vld [vmem:[%s3889_s1 + $0xbc0] sm:$0xff]  ;;  %v222_v23 = vrot.slane %v2543_v15, 1 }
  0x71   : > { %1165 = vmatprep.subr.mxu1 %v795_v24  ;;  %v790_v31 = vld [vmem:[%s3889_s1 + $0xfc0] sm:$0xff]  ;;  %1083 = vmatpush2.msra.mxu0 %v666_v26  ;;  %v659_v32 = vld [vmem:[%s3889_s1 + $0xba8] sm:$0xff]  ;;  %v2727_v24 = vsel %vm238_vm1, %v240_v1, %v242_v14 }
  0x72   : > { %1166 = vmatpush2.msra.mxu1 %v794_v27  ;;  %v787_v33 = vld [vmem:[%s3889_s1 + $0xfa8] sm:$0xff]  ;;  %1084 = vmatprep.subr.mxu0 %v663_v28  ;;  %v658_v34 = vld [vmem:[%s3889_s1 + $0xba0] sm:$0xff]  ;;  %v2739_v28 = vsel %vm227_vm2, %v229_v5, %v231_v20 }
  0x73   : > { %1167 = vmatprep.subr.mxu1 %v791_v29  ;;  %v786_v35 = vld [vmem:[%s3889_s1 + $0xfa0] sm:$0xff]  ;;  %1085 = vmatpush2.msra.mxu0 %v662_v30  ;;  %v655_v36 = vld [vmem:[%s3889_s1 + $0xb88] sm:$0xff]  ;;  %v2749_v30 = vsel %vm216_vm0, %v220_v3, %v222_v23  ;;  %v265_v3 = vrot.slane %v2543_v15, 4  ;;  %v267_v23 = vrot.slane %v2546_v16, 4 }
  0x74   : > { %1168 = vmatpush2.msra.mxu1 %v790_v31  ;;  %v783_v37 = vld [vmem:[%s3889_s1 + $0xf88] sm:$0xff]  ;;  %1086 = vmatprep.subr.mxu0 %v659_v32  ;;  %v654_v38 = vld [vmem:[%s3889_s1 + $0xb80] sm:$0xff]  ;;  %v233_v31 = vrot.slane %v2543_v15, 2 }
  0x75   : > { %1169 = vmatprep.subr.mxu1 %v787_v33  ;;  %v782_v39 = vld [vmem:[%s3889_s1 + $0xf80] sm:$0xff]  ;;  %1087 = vmatpush2.msra.mxu0 %v658_v34  ;;  %v651_v40 = vld [vmem:[%s3889_s1 + $0xb68] sm:$0xff] }
  0x76   : > { %1170 = vmatpush2.msra.mxu1 %v786_v35  ;;  %v779_v41 = vld [vmem:[%s3889_s1 + $0xf68] sm:$0xff]  ;;  %1088 = vmatprep.subr.mxu0 %v655_v36  ;;  %v650_v42 = vld [vmem:[%s3889_s1 + $0xb60] sm:$0xff]  ;;  %v2769_v35 = vsel %vm238_vm1, %v242_v14, %v244_v19 }
  0x77   : > { %1171 = vmatprep.subr.mxu1 %v783_v37  ;;  %v778_v43 = vld [vmem:[%s3889_s1 + $0xf60] sm:$0xff]  ;;  %1089 = vmatpush2.msra.mxu0 %v654_v38  ;;  %v647_v44 = vld [vmem:[%s3889_s1 + $0xb48] sm:$0xff]  ;;  %v2779_v38 = vsel %vm227_vm2, %v231_v20, %v233_v31  ;;  %v278_v20 = vrot.slane %v2546_v16, 5  ;;  %v329_v31 = vld [vmem:[%s3889_s1 + $0x158] sm:$0xff] }
  0x78   : > { %1172 = vmatpush2.msra.mxu1 %v782_v39  ;;  %v775_v45 = vld [vmem:[%s3889_s1 + $0xf48] sm:$0xff]  ;;  %1090 = vmatprep.subr.mxu0 %v651_v40  ;;  %v646_v46 = vld [vmem:[%s3889_s1 + $0xb40] sm:$0xff]  ;;  %v250_v39 = vrot.slane %v2290_v50, 7  ;;  %v251_v40 = vrot.slane %v2293_v51, 7 }
  0x79   : > { %1173 = vmatprep.subr.mxu1 %v779_v41  ;;  %v774_v47 = vld [vmem:[%s3889_s1 + $0xf40] sm:$0xff]  ;;  %1091 = vmatpush2.msra.mxu0 %v650_v42  ;;  %v643_v48 = vld [vmem:[%s3889_s1 + $0xb28] sm:$0xff]  ;;  %v273_v42 = vrot.slane %v2293_v51, 5 }
  0x7a   : > { %1174 = vmatpush2.msra.mxu1 %v778_v43  ;;  %v771_v49 = vld [vmem:[%s3889_s1 + $0xf28] sm:$0xff]  ;;  %1092 = vmatprep.subr.mxu0 %v647_v44  ;;  %v642_v52 = vld [vmem:[%s3889_s1 + $0xb20] sm:$0xff]  ;;  %v274_v43 = vrot.slane %v2658_v56, 5 }
  0x7b   : > { %1175 = vmatprep.subr.mxu1 %v775_v45  ;;  %v770_v53 = vld [vmem:[%s3889_s1 + $0xf20] sm:$0xff]  ;;  %1093 = vmatpush2.msra.mxu0 %v646_v46  ;;  %v639_v54 = vld [vmem:[%s3889_s1 + $0xb08] sm:$0xff]  ;;  %v262_v45 = vrot.slane %v2293_v51, 4  ;;  %v263_v46 = vrot.slane %v2658_v56, 4 }
  0x7c   : > { %1176 = vmatpush2.msra.mxu1 %v774_v47  ;;  %v767_v55 = vld [vmem:[%s3889_s1 + $0xf08] sm:$0xff]  ;;  %1094 = vmatprep.subr.mxu0 %v643_v48  ;;  %v638_v57 = vld [vmem:[%s3889_s1 + $0xb00] sm:$0xff] }
  0x7d   : > { %1177 = vmatprep.subr.mxu1 %v771_v49  ;;  %v766_v58 = vld [vmem:[%s3889_s1 + $0xf00] sm:$0xff]  ;;  %1095 = vmatpush2.msra.mxu0 %v642_v52  ;;  %v635_v60 = vld [vmem:[%s3889_s1 + $0xae8] sm:$0xff]  ;;  %v2808_v49 = vsel %vm249_vm3, %v250_v39, %v251_v40  ;;  %v2811_v52 = vsel %vm272_vm4, %v273_v42, %v274_v43  ;;  %v2872_v14 = vsel %vm261_vm5, %v263_v46, %v265_v3  ;;  %v324_v39 = vld [vmem:[%s3889_s1 + $0x130] sm:$0xff] }
  0x7e   : > { %1178 = vmatpush2.msra.mxu1 %v770_v53  ;;  %v763_v61 = vld [vmem:[%s3889_s1 + $0xee8] sm:$0xff]  ;;  %1096 = vmatprep.subr.mxu0 %v639_v54  ;;  %v634_v62 = vld [vmem:[%s3889_s1 + $0xae0] sm:$0xff]  ;;  %v349_v54 = vld [vmem:[%s3889_s1 + $0x1f8] sm:$0xff] }
  0x7f   : > { %1179 = vmatprep.subr.mxu1 %v767_v55  ;;  %v762_v63 = vld [vmem:[%s3889_s1 + $0xee0] sm:$0xff]  ;;  %1097 = vmatpush2.msra.mxu0 %v638_v57  ;;  %v631_v0 = vld [vmem:[%s3889_s1 + $0xac8] sm:$0xff]  ;;  %v2821_v55 = vsel %vm261_vm5, %v262_v45, %v263_v46  ;;  %v253_v57 = vrot.slane %v2658_v56, 7  ;;  %v320_v42 = vld [vmem:[%s3889_s1 + $0x110] sm:$0xff] }
  0x80   : > { %1180 = vmatpush2.msra.mxu1 %v766_v58  ;;  %v759_v2 = vld [vmem:[%s3889_s1 + $0xec8] sm:$0xff]  ;;  %1098 = vmatprep.subr.mxu0 %v635_v60  ;;  %v630_v4 = vld [vmem:[%s3889_s1 + $0xac0] sm:$0xff]  ;;  %v316_v45 = vld [vmem:[%s3889_s1 + $0xf0] sm:$0xff] }
  0x81   : > { %1181 = vmatprep.subr.mxu1 %v763_v61  ;;  %v758_v6 = vld [vmem:[%s3889_s1 + $0xec0] sm:$0xff]  ;;  %1099 = vmatpush2.msra.mxu0 %v634_v62  ;;  %v627_v8 = vld [vmem:[%s3889_s1 + $0xaa8] sm:$0xff]  ;;  %v345_v61 = vld [vmem:[%s3889_s1 + $0x1d8] sm:$0xff]  ;;  %v276_v62 = vrot.slane %v2543_v15, 5 }
  0x82   : > { %1182 = vmatpush2.msra.mxu1 %v762_v63  ;;  %v755_v10 = vld [vmem:[%s3889_s1 + $0xea8] sm:$0xff]  ;;  %1100 = vmatprep.subr.mxu0 %v631_v0  ;;  %v626_v11 = vld [vmem:[%s3889_s1 + $0xaa0] sm:$0xff]  ;;  %v344_v0 = vld [vmem:[%s3889_s1 + $0x1d0] sm:$0xff] }
  0x83   : > { %1183 = vmatprep.subr.mxu1 %v759_v2  ;;  %v754_v13 = vld [vmem:[%s3889_s1 + $0xea0] sm:$0xff]  ;;  %1101 = vmatpush2.msra.mxu0 %v630_v4  ;;  %v623_v18 = vld [vmem:[%s3889_s1 + $0xa88] sm:$0xff]  ;;  %v2847_v2 = vsel %vm249_vm3, %v251_v40, %v253_v57 }
  0x84   : > { %1184 = vmatpush2.msra.mxu1 %v758_v6  ;;  %1102 = vmatprep.subr.mxu0 %v627_v8  ;;  %v751_v21 = vld [vmem:[%s3889_s1 + $0xe88] sm:$0xff]  ;;  %v622_v22 = vld [vmem:[%s3889_s1 + $0xa80] sm:$0xff]  ;;  %v341_v6 = vld [vmem:[%s3889_s1 + $0x1b8] sm:$0xff]  ;;  %v2858_v8 = vsel %vm272_vm4, %v274_v43, %v276_v62 }
  0x85   : > { %1185 = vmatprep.subr.mxu1 %v755_v10  ;;  %1103 = vmatpush2.msra.mxu0 %v626_v11  ;;  %v750_v59 = vld [vmem:[%s3889_s1 + $0xe80] sm:$0xff]  ;;  %v619_v26 = vld [vmem:[%s3889_s1 + $0xa68] sm:$0xff]  ;;  %v255_v11 = vrot.slane %v2543_v15, 7 }
  0x86   : > { %1186 = vmatpush2.msra.mxu1 %v754_v13  ;;  %954 = vmatprep.mubr.f32.mxu0 %v2707_v17  ;;  %v747_v27 = vld [vmem:[%s3889_s1 + $0xe68] sm:$0xff]  ;;  %v618_v1 = vld [vmem:[%s3889_s1 + $0xa60] sm:$0xff]  ;;  %v340_v13 = vld [vmem:[%s3889_s1 + $0x1b0] sm:$0xff] }
  0x87   : > { %1104 = vmatprep.subr.mxu0 %v623_v18  ;;  %1187 = vmatprep.subr.mxu1 %v751_v21  ;;  %v746_v29 = vld [vmem:[%s3889_s1 + $0xe60] sm:$0xff]  ;;  %v615_v5 = vld [vmem:[%s3889_s1 + $0xa48] sm:$0xff]  ;;  %v337_v18 = vld [vmem:[%s3889_s1 + $0x198] sm:$0xff] }
  0x88   : > { %955 = vmatmul.mubr.f32.gmra.mxu0 %v2293_v51  ;;  %1188 = vmatpush2.msra.mxu1 %v750_v59  ;;  %v743_v32 = vld [vmem:[%s3889_s1 + $0xe48] sm:$0xff]  ;;  %v614_v33 = vld [vmem:[%s3889_s1 + $0xa40] sm:$0xff]  ;;  %v2886_v59 = vsel %vm249_vm3, %v253_v57, %v255_v11  ;;  %v309_v57 = vld [vmem:[%s3889_s1 + $0xb8] sm:$0xff] }
  0x89   : > { %1105 = vmatpush2.msra.mxu0 %v622_v22  ;;  %1037 = vmatprep.mubr.f32.mxu1 %v2727_v24  ;;  %v742_v34 = vld [vmem:[%s3889_s1 + $0xe40] sm:$0xff]  ;;  %v611_v36 = vld [vmem:[%s3889_s1 + $0xa28] sm:$0xff]  ;;  %v336_v22 = vld [vmem:[%s3889_s1 + $0x190] sm:$0xff] }
  0x8a   : > { %1106 = vmatprep.subr.mxu0 %v619_v26  ;;  %1189 = vmatprep.subr.mxu1 %v747_v27  ;;  %v739_v37 = vld [vmem:[%s3889_s1 + $0xe28] sm:$0xff]  ;;  %v610_v19 = vld [vmem:[%s3889_s1 + $0xa20] sm:$0xff]  ;;  %v333_v27 = vld [vmem:[%s3889_s1 + $0x178] sm:$0xff] }
  0x8b   : > { %1038 = vmatmul.mubr.f32.gmra.mxu1 %v2739_v28  ;;  %1107 = vmatpush2.msra.mxu0 %v618_v1  ;;  %v738_v41 = vld [vmem:[%s3889_s1 + $0xe20] sm:$0xff]  ;;  %v607_v50 = vld [vmem:[%s3889_s1 + $0xa08] sm:$0xff]  ;;  %v2898_v1 = vsel %vm272_vm4, %v276_v62, %v278_v20  ;;  %v297_v11 = vld [vmem:[%s3889_s1 + $0x58] sm:$0xff] }
  0x8c   : > { %1190 = vmatpush2.msra.mxu1 %v746_v29  ;;  %960 = vmatprep.mubr.f32.mxu0 %v2749_v30  ;;  %v735_v44 = vld [vmem:[%s3889_s1 + $0xe08] sm:$0xff]  ;;  %v606_v47 = vld [vmem:[%s3889_s1 + $0xa00] sm:$0xff]  ;;  %v332_v29 = vld [vmem:[%s3889_s1 + $0x170] sm:$0xff] }
  0x8d   : > { %1108 = vmatprep.subr.mxu0 %v615_v5  ;;  %1191 = vmatprep.subr.mxu1 %v743_v32  ;;  %v734_v48 = vld [vmem:[%s3889_s1 + $0xe00] sm:$0xff]  ;;  %v859_v53 = vld [vmem:[%s3889_s1 + $0x11e8] sm:$0xff]  ;;  %v293_v20 = vld [vmem:[%s3889_s1 + $0x38] sm:$0xff] }
  0x8e   : > { %961 = vmatmul.mubr.f32.gmra.mxu0 %v2658_v56  ;;  %1192 = vmatpush2.msra.mxu1 %v742_v34  ;;  %v858_v58 = vld [vmem:[%s3889_s1 + $0x11e0] sm:$0xff]  ;;  %v855_v60 = vld [vmem:[%s3889_s1 + $0x11c8] sm:$0xff] }
  0x8f   : > { %1109 = vmatpush2.msra.mxu0 %v614_v33  ;;  %1043 = vmatprep.mubr.f32.mxu1 %v2769_v35  ;;  %v854_v63 = vld [vmem:[%s3889_s1 + $0x11c0] sm:$0xff]  ;;  %v851_v4 = vld [vmem:[%s3889_s1 + $0x11a8] sm:$0xff]  ;;  %v328_v33 = vld [vmem:[%s3889_s1 + $0x150] sm:$0xff] }
  0x90   : > { %1110 = vmatprep.subr.mxu0 %v611_v36  ;;  %1193 = vmatprep.subr.mxu1 %v739_v37  ;;  %v850_v10 = vld [vmem:[%s3889_s1 + $0x11a0] sm:$0xff]  ;;  %v843_v26 = vld [vmem:[%s3889_s1 + $0x1168] sm:$0xff]  ;;  %v325_v36 = vld [vmem:[%s3889_s1 + $0x138] sm:$0xff] }
  0x91   : > { %1044 = vmatmul.mubr.f32.gmra.mxu1 %v2779_v38  ;;  %1111 = vmatpush2.msra.mxu0 %v610_v19  ;;  %v846_v21 = vld [vmem:[%s3889_s1 + $0x1180] sm:$0xff]  ;;  %v839_v5 = vld [vmem:[%s3889_s1 + $0x1148] sm:$0xff]  ;;  %v321_v19 = vld [vmem:[%s3889_s1 + $0x118] sm:$0xff] }
  0x92   : > { %1194 = vmatpush2.msra.mxu1 %v738_v41  ;;  %1112 = vmatprep.subr.mxu0 %v607_v50  ;;  %v842_v16 = vld [vmem:[%s3889_s1 + $0x1160] sm:$0xff]  ;;  %v835_v34 = vld [vmem:[%s3889_s1 + $0x1128] sm:$0xff]  ;;  %v317_v50 = vld [vmem:[%s3889_s1 + $0xf8] sm:$0xff] }
  0x93   : > { %1195 = vmatprep.subr.mxu1 %v735_v44  ;;  %1113 = vmatpush2.msra.mxu0 %v606_v47  ;;  %v838_v32 = vld [vmem:[%s3889_s1 + $0x1140] sm:$0xff]  ;;  %v831_v40 = vld [vmem:[%s3889_s1 + $0x1108] sm:$0xff]  ;;  %v313_v47 = vld [vmem:[%s3889_s1 + $0xd8] sm:$0xff] }
  0x94   : > { %1114 = vmatprep.mubr.f32.mxu0 %v2293_v51  ;;  %1196 = vmatpush2.msra.mxu1 %v734_v48  ;;  %v348_v51 = vld [vmem:[%s3889_s1 + $0x1f0] sm:$0xff]  ;;  %v834_v37 = vld [vmem:[%s3889_s1 + $0x1120] sm:$0xff]  ;;  %v827_v43 = vld [vmem:[%s3889_s1 + $0x10e8] sm:$0xff] }
  0x95   : > { %1115 = vmatmul.mubr.f32.vlgmr.msra.gmra.mxu0 %v2808_v49  ;;  %1197 = vmatprep.mubr.f32.mxu1 %v2811_v52  ;;  %v830_v41 = vld [vmem:[%s3889_s1 + $0x1100] sm:$0xff]  ;;  %v823_v46 = vld [vmem:[%s3889_s1 + $0x10c8] sm:$0xff] }
  0x96   : > { %1216 = vmatprep.subr.mxu0 %v859_v53  ;;  %1299 = vmatprep.subr.mxu1 %v349_v54  ;;  %v826_v44 = vld [vmem:[%s3889_s1 + $0x10e0] sm:$0xff]  ;;  %v312_v53 = vld [vmem:[%s3889_s1 + $0xd0] sm:$0xff]  ;;  %v819_v54 = vld [vmem:[%s3889_s1 + $0x10a8] sm:$0xff] }
  0x97   : > { %1198 = vmatmul.mubr.f32.vlgmr.msra.gmra.mxu1 %v2821_v55  ;;  %1217 = vmatpush1.msra.mxu0 %v858_v58  ;;  %v822_v48 = vld [vmem:[%s3889_s1 + $0x10c0] sm:$0xff] }
  0x98   : > { %1300 = vmatpush1.msra.mxu1 %v348_v51  ;;  %1218 = vmatprep.subr.mxu0 %v855_v60  ;;  %v818_v58 = vld [vmem:[%s3889_s1 + $0x10a0] sm:$0xff]  ;;  %v308_v51 = vld [vmem:[%s3889_s1 + $0xb0] sm:$0xff]  ;;  %v815_v60 = vld [vmem:[%s3889_s1 + $0x1088] sm:$0xff] }
  0x99   : > { %1301 = vmatprep.subr.mxu1 %v345_v61  ;;  %1120 = vmatprep.mubr.f32.mxu0 %v2658_v56  ;;  %v847_v56 = vld [vmem:[%s3889_s1 + $0x1188] sm:$0xff]  ;;  %v305_v61 = vld [vmem:[%s3889_s1 + $0x98] sm:$0xff]  ;;  %v814_v62 = vld [vmem:[%s3889_s1 + $0x1080] sm:$0xff] }
  0x9a   : > { %1219 = vmatpush1.msra.mxu0 %v854_v63  ;;  %1302 = vmatpush1.msra.mxu1 %v344_v0  ;;  %v304_v63 = vld [vmem:[%s3889_s1 + $0x90] sm:$0xff]  ;;  %v811_v0 = vld [vmem:[%s3889_s1 + $0x1068] sm:$0xff] }
  0x9b   : > { %1121 = vmatmul.mubr.f32.gmra.mxu0 %v2847_v2  ;;  %1220 = vmatprep.subr.mxu0 %v851_v4  ;;  %v810_v4 = vld [vmem:[%s3889_s1 + $0x1060] sm:$0xff] }
  0x9c   : > { %1303 = vmatprep.subr.mxu1 %v341_v6  ;;  %1203 = vmatprep.mubr.f32.mxu1 %v2858_v8  ;;  %v300_v6 = vld [vmem:[%s3889_s1 + $0x70] sm:$0xff] }
  0x9d   : > { %1221 = vmatpush1.msra.mxu0 %v850_v10  ;;  %1304 = vmatpush1.msra.mxu1 %v340_v13  ;;  %v807_v10 = vld [vmem:[%s3889_s1 + $0x1048] sm:$0xff]  ;;  %v806_v13 = vld [vmem:[%s3889_s1 + $0x1040] sm:$0xff] }
  0x9e   : > { %1222 = vmatprep.subr.mxu0 %v847_v56  ;;  %1204 = vmatmul.mubr.f32.gmra.mxu1 %v2872_v14  ;;  %v296_v56 = vld [vmem:[%s3889_s1 + $0x50] sm:$0xff] }
  0x9f   : > { %1305 = vmatprep.subr.mxu1 %v337_v18  ;;  %1126 = vmatprep.mubr.f32.mxu0 %v2543_v15  ;;  %v2911_v15 = vsel %vm261_vm5, %v265_v3, %v267_v23  ;;  %v301_v3 = vld [vmem:[%s3889_s1 + $0x78] sm:$0xff]  ;;  %v803_v18 = vld [vmem:[%s3889_s1 + $0x1028] sm:$0xff] }
  0xa0   : > { %1223 = vmatpush1.msra.mxu0 %v846_v21  ;;  %1306 = vmatpush1.msra.mxu1 %v336_v22  ;;  %v802_v21 = vld [vmem:[%s3889_s1 + $0x1020] sm:$0xff]  ;;  %v292_v22 = vld [vmem:[%s3889_s1 + $0x30] sm:$0xff]  ;;  %v799_v23 = vld [vmem:[%s3889_s1 + $0x1008] sm:$0xff] }
  0xa1   : > { %1127 = vmatmul.mubr.f32.gmra.mxu0 %v2886_v59  ;;  %1224 = vmatprep.subr.mxu0 %v843_v26  ;;  %v289_v26 = vld [vmem:[%s3889_s1 + $0x18] sm:$0xff] }
  0xa2   : > { %1307 = vmatprep.subr.mxu1 %v333_v27  ;;  %1209 = vmatprep.mubr.f32.mxu1 %v2898_v1  ;;  %v798_v27 = vld [vmem:[%s3889_s1 + $0x1000] sm:$0xff] }
  0xa3   : > { %1225 = vmatpush1.msra.mxu0 %v842_v16  ;;  %1308 = vmatpush1.msra.mxu1 %v332_v29  ;;  %v288_v16 = vld [vmem:[%s3889_s1 + $0x10] sm:$0xff]  ;;  %v413_v29 = vld [vmem:[%s3889_s1 + $0x3f8] sm:$0xff] }
  0xa4   : > { %1226 = vmatprep.subr.mxu0 %v839_v5  ;;  %1210 = vmatmul.mubr.f32.gmra.mxu1 %v2911_v15  ;;  %v477_v5 = vld [vmem:[%s3889_s1 + $0x5f8] sm:$0xff] }
  0xa5   : > { %1309 = vmatprep.subr.mxu1 %v329_v31  ;;  %1227 = vmatpush1.msra.mxu0 %v838_v32  ;;  %v1894_v31 = vmov 0.0   ;;  %v412_v32 = vld [vmem:[%s3889_s1 + $0x3f0] sm:$0xff] }
  0xa6   : > { %1310 = vmatpush1.msra.mxu1 %v328_v33  ;;  %1228 = vmatprep.subr.mxu0 %v835_v34  ;;  %v476_v33 = vld [vmem:[%s3889_s1 + $0x5f0] sm:$0xff]  ;;  %v409_v34 = vld [vmem:[%s3889_s1 + $0x3d8] sm:$0xff] }
  0xa7   : > { %1311 = vmatprep.subr.mxu1 %v325_v36  ;;  %1229 = vmatpush1.msra.mxu0 %v834_v37  ;;  %v473_v36 = vld [vmem:[%s3889_s1 + $0x5d8] sm:$0xff]  ;;  %v408_v37 = vld [vmem:[%s3889_s1 + $0x3d0] sm:$0xff] }
  0xa8   : > { %1312 = vmatpush1.msra.mxu1 %v324_v39  ;;  %1230 = vmatprep.subr.mxu0 %v831_v40  ;;  %v472_v39 = vld [vmem:[%s3889_s1 + $0x5d0] sm:$0xff]  ;;  %v405_v40 = vld [vmem:[%s3889_s1 + $0x3b8] sm:$0xff] }
  0xa9   : > { %1313 = vmatprep.subr.mxu1 %v321_v19  ;;  %1231 = vmatpush1.msra.mxu0 %v830_v41  ;;  %v469_v19 = vld [vmem:[%s3889_s1 + $0x5b8] sm:$0xff]  ;;  %v404_v41 = vld [vmem:[%s3889_s1 + $0x3b0] sm:$0xff] }
  0xaa   : > { %1314 = vmatpush1.msra.mxu1 %v320_v42  ;;  %1232 = vmatprep.subr.mxu0 %v827_v43  ;;  %v468_v42 = vld [vmem:[%s3889_s1 + $0x5b0] sm:$0xff]  ;;  %v401_v43 = vld [vmem:[%s3889_s1 + $0x398] sm:$0xff] }
  0xab   : > { %1315 = vmatprep.subr.mxu1 %v317_v50  ;;  %1233 = vmatpush1.msra.mxu0 %v826_v44  ;;  %v465_v50 = vld [vmem:[%s3889_s1 + $0x598] sm:$0xff]  ;;  %v400_v44 = vld [vmem:[%s3889_s1 + $0x390] sm:$0xff] }
  0xac   : > { %1316 = vmatpush1.msra.mxu1 %v316_v45  ;;  %1234 = vmatprep.subr.mxu0 %v823_v46  ;;  %v464_v45 = vld [vmem:[%s3889_s1 + $0x590] sm:$0xff]  ;;  %v397_v46 = vld [vmem:[%s3889_s1 + $0x378] sm:$0xff] }
  0xad   : > { %1317 = vmatprep.subr.mxu1 %v313_v47  ;;  %1235 = vmatpush1.msra.mxu0 %v822_v48  ;;  %v461_v47 = vld [vmem:[%s3889_s1 + $0x578] sm:$0xff]  ;;  %v396_v48 = vld [vmem:[%s3889_s1 + $0x370] sm:$0xff] }
  0xae   : > { %1318 = vmatpush1.msra.mxu1 %v312_v53  ;;  %1236 = vmatprep.subr.mxu0 %v819_v54  ;;  %v460_v53 = vld [vmem:[%s3889_s1 + $0x570] sm:$0xff]  ;;  %v393_v54 = vld [vmem:[%s3889_s1 + $0x358] sm:$0xff] }
  0xaf   : > { %1319 = vmatprep.subr.mxu1 %v309_v57  ;;  %1237 = vmatpush1.msra.mxu0 %v818_v58  ;;  %v457_v57 = vld [vmem:[%s3889_s1 + $0x558] sm:$0xff]  ;;  %v392_v58 = vld [vmem:[%s3889_s1 + $0x350] sm:$0xff] }
  0xb0   : > { %1320 = vmatpush1.msra.mxu1 %v308_v51  ;;  %1238 = vmatprep.subr.mxu0 %v815_v60  ;;  %v456_v51 = vld [vmem:[%s3889_s1 + $0x550] sm:$0xff]  ;;  %v389_v60 = vld [vmem:[%s3889_s1 + $0x338] sm:$0xff] }
  0xb1   : > { %1321 = vmatprep.subr.mxu1 %v305_v61  ;;  %1239 = vmatpush1.msra.mxu0 %v814_v62  ;;  %v453_v61 = vld [vmem:[%s3889_s1 + $0x538] sm:$0xff]  ;;  %v388_v62 = vld [vmem:[%s3889_s1 + $0x330] sm:$0xff] }
  0xb2   : > { %1322 = vmatpush1.msra.mxu1 %v304_v63  ;;  %1240 = vmatprep.subr.mxu0 %v811_v0  ;;  %v452_v63 = vld [vmem:[%s3889_s1 + $0x530] sm:$0xff]  ;;  %v385_v0 = vld [vmem:[%s3889_s1 + $0x318] sm:$0xff] }
  0xb3   : > { %1323 = vmatprep.subr.mxu1 %v301_v3  ;;  %1241 = vmatpush1.msra.mxu0 %v810_v4  ;;  %v449_v3 = vld [vmem:[%s3889_s1 + $0x518] sm:$0xff]  ;;  %v384_v4 = vld [vmem:[%s3889_s1 + $0x310] sm:$0xff] }
  0xb4   : > { %1324 = vmatpush1.msra.mxu1 %v300_v6  ;;  %1242 = vmatprep.subr.mxu0 %v807_v10  ;;  %v448_v6 = vld [vmem:[%s3889_s1 + $0x510] sm:$0xff]  ;;  %v381_v10 = vld [vmem:[%s3889_s1 + $0x2f8] sm:$0xff] }
  0xb5   : > { %1325 = vmatprep.subr.mxu1 %v297_v11  ;;  %1243 = vmatpush1.msra.mxu0 %v806_v13  ;;  %v445_v11 = vld [vmem:[%s3889_s1 + $0x4f8] sm:$0xff]  ;;  %v380_v13 = vld [vmem:[%s3889_s1 + $0x2f0] sm:$0xff] }
  0xb6   : > { %1326 = vmatpush1.msra.mxu1 %v296_v56  ;;  %1244 = vmatprep.subr.mxu0 %v803_v18  ;;  %v444_v56 = vld [vmem:[%s3889_s1 + $0x4f0] sm:$0xff]  ;;  %v377_v18 = vld [vmem:[%s3889_s1 + $0x2d8] sm:$0xff] }
  0xb7   : > { %1327 = vmatprep.subr.mxu1 %v293_v20  ;;  %1245 = vmatpush1.msra.mxu0 %v802_v21  ;;  %v441_v20 = vld [vmem:[%s3889_s1 + $0x4d8] sm:$0xff]  ;;  %v376_v21 = vld [vmem:[%s3889_s1 + $0x2d0] sm:$0xff] }
  0xb8   : > { %1328 = vmatpush1.msra.mxu1 %v292_v22  ;;  %1246 = vmatprep.subr.mxu0 %v799_v23  ;;  %v440_v22 = vld [vmem:[%s3889_s1 + $0x4d0] sm:$0xff]  ;;  %v373_v23 = vld [vmem:[%s3889_s1 + $0x2b8] sm:$0xff] }
  0xb9   : > { %1329 = vmatprep.subr.mxu1 %v289_v26  ;;  %1247 = vmatpush1.msra.mxu0 %v798_v27  ;;  %v437_v26 = vld [vmem:[%s3889_s1 + $0x4b8] sm:$0xff]  ;;  %v372_v27 = vld [vmem:[%s3889_s1 + $0x2b0] sm:$0xff] }
  0xba   : > { %1280 = vmatprep.mubr.f32.mxu0 %v1894_v31  ;;  %1330 = vmatpush1.msra.mxu1 %v288_v16  ;;  %v436_v16 = vld [vmem:[%s3889_s1 + $0x4b0] sm:$0xff] }
  0xbb   : > { %1281 = vmatmul.mubr.f32.vlgmr.msra.gmra.mxu0 %v2727_v24  ;;  %1331 = vmatprep.subr.mxu1 %v413_v29  ;;  %v369_v29 = vld [vmem:[%s3889_s1 + $0x298] sm:$0xff] }
  0xbc   : > { %1382 = vmatprep.subr.mxu0 %v477_v5  ;;  %1332 = vmatpush2.msra.mxu1 %v412_v32  ;;  %v433_v5 = vld [vmem:[%s3889_s1 + $0x498] sm:$0xff]  ;;  %v368_v32 = vld [vmem:[%s3889_s1 + $0x290] sm:$0xff] }
  0xbd   : > { %1383 = vmatpush1.msra.mxu0 %v476_v33  ;;  %1333 = vmatprep.subr.mxu1 %v409_v34  ;;  %v432_v33 = vld [vmem:[%s3889_s1 + $0x490] sm:$0xff]  ;;  %v365_v34 = vld [vmem:[%s3889_s1 + $0x278] sm:$0xff] }
  0xbe   : > { %1384 = vmatprep.subr.mxu0 %v473_v36  ;;  %1286 = vmatprep.mubr.f32.mxu0 %v1894_v31  ;;  %v429_v36 = vld [vmem:[%s3889_s1 + $0x478] sm:$0xff] }
  0xbf   : > { %1334 = vmatpush2.msra.mxu1 %v408_v37  ;;  %1385 = vmatpush1.msra.mxu0 %v472_v39  ;;  %v364_v37 = vld [vmem:[%s3889_s1 + $0x270] sm:$0xff] }
  0xc0   : > { %1335 = vmatprep.subr.mxu1 %v405_v40  ;;  %1287 = vmatmul.mubr.f32.gmra.mxu0 %v2769_v35  ;;  %v428_v39 = vld [vmem:[%s3889_s1 + $0x470] sm:$0xff]  ;;  %v361_v40 = vld [vmem:[%s3889_s1 + $0x258] sm:$0xff] }
  0xc1   : > { %1386 = vmatprep.subr.mxu0 %v469_v19  ;;  %1336 = vmatpush2.msra.mxu1 %v404_v41  ;;  %v425_v19 = vld [vmem:[%s3889_s1 + $0x458] sm:$0xff]  ;;  %v360_v41 = vld [vmem:[%s3889_s1 + $0x250] sm:$0xff] }
  0xc2   : > { %1387 = vmatpush1.msra.mxu0 %v468_v42  ;;  %1337 = vmatprep.subr.mxu1 %v401_v43  ;;  %v424_v42 = vld [vmem:[%s3889_s1 + $0x450] sm:$0xff]  ;;  %v357_v43 = vld [vmem:[%s3889_s1 + $0x238] sm:$0xff] }
  0xc3   : > { %1388 = vmatprep.subr.mxu0 %v465_v50  ;;  %1292 = vmatprep.mubr.f32.mxu0 %v1894_v31  ;;  %v421_v50 = vld [vmem:[%s3889_s1 + $0x438] sm:$0xff] }
  0xc4   : > { %1338 = vmatpush2.msra.mxu1 %v400_v44  ;;  %1389 = vmatpush1.msra.mxu0 %v464_v45  ;;  %v356_v44 = vld [vmem:[%s3889_s1 + $0x230] sm:$0xff] }
  0xc5   : > { %1339 = vmatprep.subr.mxu1 %v397_v46  ;;  %1293 = vmatmul.mubr.f32.gmra.mxu0 %v2571_v25  ;;  %v420_v45 = vld [vmem:[%s3889_s1 + $0x430] sm:$0xff]  ;;  %v353_v46 = vld [vmem:[%s3889_s1 + $0x218] sm:$0xff] }
  0xc6   : > { %1390 = vmatprep.subr.mxu0 %v461_v47  ;;  %1340 = vmatpush2.msra.mxu1 %v396_v48  ;;  %v417_v47 = vld [vmem:[%s3889_s1 + $0x418] sm:$0xff]  ;;  %v352_v48 = vld [vmem:[%s3889_s1 + $0x210] sm:$0xff] }
  0xc7   : > { %1391 = vmatpush1.msra.mxu0 %v460_v53  ;;  %1341 = vmatprep.subr.mxu1 %v393_v54  ;;  %v416_v53 = vld [vmem:[%s3889_s1 + $0x410] sm:$0xff]  ;;  %v541_v54 = vld [vmem:[%s3889_s1 + $0x7f8] sm:$0xff] }
  0xc8   : > { %1392 = vmatprep.subr.mxu0 %v457_v57  ;;  %1342 = vmatpush2.msra.mxu1 %v392_v58  ;;  %v605_v57 = vld [vmem:[%s3889_s1 + $0x9f8] sm:$0xff]  ;;  %v540_v58 = vld [vmem:[%s3889_s1 + $0x7f0] sm:$0xff] }
  0xc9   : > { %1393 = vmatpush1.msra.mxu0 %v456_v51  ;;  %1343 = vmatprep.subr.mxu1 %v389_v60  ;;  %v604_v51 = vld [vmem:[%s3889_s1 + $0x9f0] sm:$0xff]  ;;  %v537_v60 = vld [vmem:[%s3889_s1 + $0x7d8] sm:$0xff] }
  0xca   : > { %1394 = vmatprep.subr.mxu0 %v453_v61  ;;  %1344 = vmatpush2.msra.mxu1 %v388_v62  ;;  %v601_v61 = vld [vmem:[%s3889_s1 + $0x9d8] sm:$0xff]  ;;  %v1866_v62 = vld [vmem:[%s2269_s28] sm:$0xff] }
  0xcb   : > { %1395 = vmatpush1.msra.mxu0 %v452_v63  ;;  %1345 = vmatprep.subr.mxu1 %v385_v0  ;;  %v536_v63 = vld [vmem:[%s3889_s1 + $0x7d0] sm:$0xff]  ;;  %v533_v0 = vld [vmem:[%s3889_s1 + $0x7b8] sm:$0xff] }
  0xcc   : > { %1396 = vmatprep.subr.mxu0 %v449_v3  ;;  %1346 = vmatpush2.msra.mxu1 %v384_v4  ;;  %v597_v3 = vld [vmem:[%s3889_s1 + $0x9b8] sm:$0xff]  ;;  %v532_v4 = vld [vmem:[%s3889_s1 + $0x7b0] sm:$0xff] }
  0xcd   : > { %1397 = vmatpush1.msra.mxu0 %v448_v6  ;;  %1347 = vmatprep.subr.mxu1 %v381_v10  ;;  %v596_v6 = vld [vmem:[%s3889_s1 + $0x9b0] sm:$0xff]  ;;  %v529_v10 = vld [vmem:[%s3889_s1 + $0x798] sm:$0xff] }
  0xce   : > { %1398 = vmatprep.subr.mxu0 %v445_v11  ;;  %1348 = vmatpush2.msra.mxu1 %v380_v13  ;;  %v593_v11 = vld [vmem:[%s3889_s1 + $0x998] sm:$0xff]  ;;  %v528_v13 = vld [vmem:[%s3889_s1 + $0x790] sm:$0xff] }
  0xcf   : > { %1399 = vmatpush1.msra.mxu0 %v444_v56  ;;  %1349 = vmatprep.subr.mxu1 %v377_v18  ;;  %v592_v56 = vld [vmem:[%s3889_s1 + $0x990] sm:$0xff]  ;;  %v525_v18 = vld [vmem:[%s3889_s1 + $0x778] sm:$0xff] }
  0xd0   : > { %1400 = vmatprep.subr.mxu0 %v441_v20  ;;  %1350 = vmatpush2.msra.mxu1 %v376_v21  ;;  %v589_v20 = vld [vmem:[%s3889_s1 + $0x978] sm:$0xff]  ;;  %v524_v21 = vld [vmem:[%s3889_s1 + $0x770] sm:$0xff] }
  0xd1   : > { %1401 = vmatpush1.msra.mxu0 %v440_v22  ;;  %1351 = vmatprep.subr.mxu1 %v373_v23  ;;  %v588_v22 = vld [vmem:[%s3889_s1 + $0x970] sm:$0xff]  ;;  %v521_v23 = vld [vmem:[%s3889_s1 + $0x758] sm:$0xff] }
  0xd2   : > { %1402 = vmatprep.subr.mxu0 %v437_v26  ;;  %1352 = vmatpush2.msra.mxu1 %v372_v27  ;;  %v585_v26 = vld [vmem:[%s3889_s1 + $0x958] sm:$0xff]  ;;  %v520_v27 = vld [vmem:[%s3889_s1 + $0x750] sm:$0xff] }
  0xd3   : > { %1403 = vmatpush1.msra.mxu0 %v436_v16  ;;  %1353 = vmatprep.subr.mxu1 %v369_v29  ;;  %v584_v16 = vld [vmem:[%s3889_s1 + $0x950] sm:$0xff]  ;;  %v517_v29 = vld [vmem:[%s3889_s1 + $0x738] sm:$0xff] }
  0xd4   : > { %1404 = vmatprep.subr.mxu0 %v433_v5  ;;  %1354 = vmatpush2.msra.mxu1 %v368_v32  ;;  %v581_v5 = vld [vmem:[%s3889_s1 + $0x938] sm:$0xff]  ;;  %v516_v32 = vld [vmem:[%s3889_s1 + $0x730] sm:$0xff] }
  0xd5   : > { %1405 = vmatpush1.msra.mxu0 %v432_v33  ;;  %1355 = vmatprep.subr.mxu1 %v365_v34  ;;  %v580_v33 = vld [vmem:[%s3889_s1 + $0x930] sm:$0xff]  ;;  %v513_v34 = vld [vmem:[%s3889_s1 + $0x718] sm:$0xff] }
  0xd6   : > { %1406 = vmatprep.subr.mxu0 %v429_v36  ;;  %1356 = vmatpush2.msra.mxu1 %v364_v37  ;;  %v577_v36 = vld [vmem:[%s3889_s1 + $0x918] sm:$0xff]  ;;  %v512_v37 = vld [vmem:[%s3889_s1 + $0x710] sm:$0xff] }
  0xd7   : > { %1407 = vmatpush1.msra.mxu0 %v428_v39  ;;  %1357 = vmatprep.subr.mxu1 %v361_v40  ;;  %v576_v39 = vld [vmem:[%s3889_s1 + $0x910] sm:$0xff]  ;;  %v509_v40 = vld [vmem:[%s3889_s1 + $0x6f8] sm:$0xff] }
  0xd8   : > { %1408 = vmatprep.subr.mxu0 %v425_v19  ;;  %1358 = vmatpush2.msra.mxu1 %v360_v41  ;;  %v573_v19 = vld [vmem:[%s3889_s1 + $0x8f8] sm:$0xff]  ;;  %v508_v41 = vld [vmem:[%s3889_s1 + $0x6f0] sm:$0xff] }
  0xd9   : > { %1409 = vmatpush1.msra.mxu0 %v424_v42  ;;  %1359 = vmatprep.subr.mxu1 %v357_v43  ;;  %v572_v42 = vld [vmem:[%s3889_s1 + $0x8f0] sm:$0xff]  ;;  %v505_v43 = vld [vmem:[%s3889_s1 + $0x6d8] sm:$0xff] }
  0xda   : > { %1410 = vmatprep.subr.mxu0 %v421_v50  ;;  %1360 = vmatpush2.msra.mxu1 %v356_v44  ;;  %v569_v50 = vld [vmem:[%s3889_s1 + $0x8d8] sm:$0xff]  ;;  %v504_v44 = vld [vmem:[%s3889_s1 + $0x6d0] sm:$0xff] }
  0xdb   : > { %1411 = vmatpush1.msra.mxu0 %v420_v45  ;;  %1361 = vmatprep.subr.mxu1 %v353_v46  ;;  %v568_v45 = vld [vmem:[%s3889_s1 + $0x8d0] sm:$0xff]  ;;  %v501_v46 = vld [vmem:[%s3889_s1 + $0x6b8] sm:$0xff] }
  0xdc   : > { %1412 = vmatprep.subr.mxu0 %v417_v47  ;;  %1362 = vmatpush2.msra.mxu1 %v352_v48  ;;  %v565_v47 = vld [vmem:[%s3889_s1 + $0x8b8] sm:$0xff]  ;;  %v500_v48 = vld [vmem:[%s3889_s1 + $0x6b0] sm:$0xff] }
  0xdd   : > { %1413 = vmatpush1.msra.mxu0 %v416_v53  ;;  %1363 = vmatprep.mubr.f32.mxu1 %v2343_v7  ;;  %v600_v7 = vld [vmem:[%s3889_s1 + $0x9d0] sm:$0xff] }
  0xde   : > { %1414 = vmatprep.subr.mxu0 %v541_v54  ;;  %1465 = vmatprep.subr.mxu1 %v605_v57  ;;  %v564_v53 = vld [vmem:[%s3889_s1 + $0x8b0] sm:$0xff]  ;;  %v497_v54 = vld [vmem:[%s3889_s1 + $0x698] sm:$0xff] }
  0xdf   : > { %1364 = vmatmul.mubr.f32.vlgmr.msra.gmra.mxu1 %v1866_v62  ;;  %1415 = vmatpush2.msra.mxu0 %v540_v58  ;;  %v561_v57 = vld [vmem:[%s3889_s1 + $0x898] sm:$0xff]  ;;  %v496_v58 = vld [vmem:[%s3889_s1 + $0x690] sm:$0xff] }
  0xe0   : > { %1466 = vmatpush1.msra.mxu1 %v604_v51  ;;  %1416 = vmatprep.subr.mxu0 %v537_v60  ;;  %v560_v51 = vld [vmem:[%s3889_s1 + $0x890] sm:$0xff]  ;;  %v493_v60 = vld [vmem:[%s3889_s1 + $0x678] sm:$0xff] }
  0xe1   : > { %1467 = vmatprep.subr.mxu1 %v601_v61  ;;  %1417 = vmatpush2.msra.mxu0 %v536_v63  ;;  %v557_v61 = vld [vmem:[%s3889_s1 + $0x878] sm:$0xff]  ;;  %v492_v62 = vld [vmem:[%s3889_s1 + $0x670] sm:$0xff] }
  0xe2   : > { %1468 = vmatpush1.msra.mxu1 %v600_v7  ;;  %1418 = vmatprep.subr.mxu0 %v533_v0  ;;  %v556_v63 = vld [vmem:[%s3889_s1 + $0x870] sm:$0xff]  ;;  %v489_v7 = vld [vmem:[%s3889_s1 + $0x658] sm:$0xff] }
  0xe3   : > { %1469 = vmatprep.subr.mxu1 %v597_v3  ;;  %1419 = vmatpush2.msra.mxu0 %v532_v4  ;;  %v553_v0 = vld [vmem:[%s3889_s1 + $0x858] sm:$0xff]  ;;  %v488_v3 = vld [vmem:[%s3889_s1 + $0x650] sm:$0xff] }
  0xe4   : > { %1470 = vmatpush1.msra.mxu1 %v596_v6  ;;  %1420 = vmatprep.subr.mxu0 %v529_v10  ;;  %v552_v4 = vld [vmem:[%s3889_s1 + $0x850] sm:$0xff]  ;;  %v485_v6 = vld [vmem:[%s3889_s1 + $0x638] sm:$0xff] }
  0xe5   : > { %1471 = vmatprep.subr.mxu1 %v593_v11  ;;  %1421 = vmatpush2.msra.mxu0 %v528_v13  ;;  %v549_v10 = vld [vmem:[%s3889_s1 + $0x838] sm:$0xff]  ;;  %v484_v11 = vld [vmem:[%s3889_s1 + $0x630] sm:$0xff] }
  0xe6   : > { %1472 = vmatpush1.msra.mxu1 %v592_v56  ;;  %1422 = vmatprep.subr.mxu0 %v525_v18  ;;  %v548_v13 = vld [vmem:[%s3889_s1 + $0x830] sm:$0xff]  ;;  %v481_v56 = vld [vmem:[%s3889_s1 + $0x618] sm:$0xff] }
  0xe7   : > { %1473 = vmatprep.subr.mxu1 %v589_v20  ;;  %1423 = vmatpush2.msra.mxu0 %v524_v21  ;;  %v545_v18 = vld [vmem:[%s3889_s1 + $0x818] sm:$0xff]  ;;  %v480_v20 = vld [vmem:[%s3889_s1 + $0x610] sm:$0xff] }
  0xe8   : > { %1474 = vmatpush1.msra.mxu1 %v588_v22  ;;  %1424 = vmatprep.subr.mxu0 %v521_v23  ;;  %v544_v21 = vld [vmem:[%s3889_s1 + $0x810] sm:$0xff]  ;;  %v669_v22 = vld [vmem:[%s3889_s1 + $0xbf8] sm:$0xff] }
  0xe9   : > { %1475 = vmatprep.subr.mxu1 %v585_v26  ;;  %1425 = vmatpush2.msra.mxu0 %v520_v27  ;;  %v733_v23 = vld [vmem:[%s3889_s1 + $0xdf8] sm:$0xff]  ;;  %v668_v26 = vld [vmem:[%s3889_s1 + $0xbf0] sm:$0xff] }
  0xea   : > { %1476 = vmatpush1.msra.mxu1 %v584_v16  ;;  %1426 = vmatprep.subr.mxu0 %v517_v29  ;;  %v732_v27 = vld [vmem:[%s3889_s1 + $0xdf0] sm:$0xff]  ;;  %v665_v16 = vld [vmem:[%s3889_s1 + $0xbd8] sm:$0xff] }
  0xeb   : > { %1477 = vmatprep.subr.mxu1 %v581_v5  ;;  %1427 = vmatpush2.msra.mxu0 %v516_v32  ;;  %v729_v29 = vld [vmem:[%s3889_s1 + $0xdd8] sm:$0xff]  ;;  %v728_v5 = vld [vmem:[%s3889_s1 + $0xdd0] sm:$0xff] }
  0xec   : > { %1478 = vmatpush1.msra.mxu1 %v580_v33  ;;  %1428 = vmatprep.subr.mxu0 %v513_v34  ;;  %v725_v32 = vld [vmem:[%s3889_s1 + $0xdb8] sm:$0xff]  ;;  %v660_v33 = vld [vmem:[%s3889_s1 + $0xbb0] sm:$0xff] }
  0xed   : > { %1479 = vmatprep.subr.mxu1 %v577_v36  ;;  %1429 = vmatpush2.msra.mxu0 %v512_v37  ;;  %v724_v34 = vld [vmem:[%s3889_s1 + $0xdb0] sm:$0xff]  ;;  %v657_v36 = vld [vmem:[%s3889_s1 + $0xb98] sm:$0xff] }
  0xee   : > { %1480 = vmatpush1.msra.mxu1 %v576_v39  ;;  %1430 = vmatprep.subr.mxu0 %v509_v40  ;;  %v721_v37 = vld [vmem:[%s3889_s1 + $0xd98] sm:$0xff]  ;;  %v656_v39 = vld [vmem:[%s3889_s1 + $0xb90] sm:$0xff] }
  0xef   : > { %1481 = vmatprep.subr.mxu1 %v573_v19  ;;  %1431 = vmatpush2.msra.mxu0 %v508_v41  ;;  %v720_v40 = vld [vmem:[%s3889_s1 + $0xd90] sm:$0xff]  ;;  %v653_v19 = vld [vmem:[%s3889_s1 + $0xb78] sm:$0xff] }
  0xf0   : > { %1482 = vmatpush1.msra.mxu1 %v572_v42  ;;  %1432 = vmatprep.subr.mxu0 %v505_v43  ;;  %v717_v41 = vld [vmem:[%s3889_s1 + $0xd78] sm:$0xff]  ;;  %v652_v42 = vld [vmem:[%s3889_s1 + $0xb70] sm:$0xff] }
  0xf1   : > { %1483 = vmatprep.subr.mxu1 %v569_v50  ;;  %1433 = vmatpush2.msra.mxu0 %v504_v44  ;;  %v716_v43 = vld [vmem:[%s3889_s1 + $0xd70] sm:$0xff]  ;;  %v649_v50 = vld [vmem:[%s3889_s1 + $0xb58] sm:$0xff] }
  0xf2   : > { %1484 = vmatpush1.msra.mxu1 %v568_v45  ;;  %1434 = vmatprep.subr.mxu0 %v501_v46  ;;  %v713_v44 = vld [vmem:[%s3889_s1 + $0xd58] sm:$0xff]  ;;  %v648_v45 = vld [vmem:[%s3889_s1 + $0xb50] sm:$0xff] }
  0xf3   : > { %1485 = vmatprep.subr.mxu1 %v565_v47  ;;  %1435 = vmatpush2.msra.mxu0 %v500_v48  ;;  %v712_v46 = vld [vmem:[%s3889_s1 + $0xd50] sm:$0xff]  ;;  %v645_v47 = vld [vmem:[%s3889_s1 + $0xb38] sm:$0xff] }
  0xf4   : > { %1486 = vmatpush1.msra.mxu1 %v564_v53  ;;  %1436 = vmatprep.subr.mxu0 %v497_v54  ;;  %v709_v48 = vld [vmem:[%s3889_s1 + $0xd38] sm:$0xff]  ;;  %v644_v53 = vld [vmem:[%s3889_s1 + $0xb30] sm:$0xff] }
  0xf5   : > { %1487 = vmatprep.subr.mxu1 %v561_v57  ;;  %1437 = vmatpush2.msra.mxu0 %v496_v58  ;;  %v708_v54 = vld [vmem:[%s3889_s1 + $0xd30] sm:$0xff]  ;;  %v641_v57 = vld [vmem:[%s3889_s1 + $0xb18] sm:$0xff] }
  0xf6   : > { %1488 = vmatpush1.msra.mxu1 %v560_v51  ;;  %1438 = vmatprep.subr.mxu0 %v493_v60  ;;  %v705_v58 = vld [vmem:[%s3889_s1 + $0xd18] sm:$0xff]  ;;  %v640_v51 = vld [vmem:[%s3889_s1 + $0xb10] sm:$0xff] }
  0xf7   : > { %1489 = vmatprep.subr.mxu1 %v557_v61  ;;  %1439 = vmatpush2.msra.mxu0 %v492_v62  ;;  %v704_v60 = vld [vmem:[%s3889_s1 + $0xd10] sm:$0xff]  ;;  %v637_v61 = vld [vmem:[%s3889_s1 + $0xaf8] sm:$0xff] }
  0xf8   : > { %1490 = vmatpush1.msra.mxu1 %v556_v63  ;;  %1440 = vmatprep.subr.mxu0 %v489_v7  ;;  %v701_v62 = vld [vmem:[%s3889_s1 + $0xcf8] sm:$0xff]  ;;  %v636_v63 = vld [vmem:[%s3889_s1 + $0xaf0] sm:$0xff] }
  0xf9   : > { %1491 = vmatprep.subr.mxu1 %v553_v0  ;;  %1441 = vmatpush2.msra.mxu0 %v488_v3  ;;  %v700_v7 = vld [vmem:[%s3889_s1 + $0xcf0] sm:$0xff]  ;;  %v633_v0 = vld [vmem:[%s3889_s1 + $0xad8] sm:$0xff] }
  0xfa   : > { %1492 = vmatpush1.msra.mxu1 %v552_v4  ;;  %1442 = vmatprep.subr.mxu0 %v485_v6  ;;  %v697_v3 = vld [vmem:[%s3889_s1 + $0xcd8] sm:$0xff]  ;;  %v632_v4 = vld [vmem:[%s3889_s1 + $0xad0] sm:$0xff] }
  0xfb   : > { %1493 = vmatprep.subr.mxu1 %v549_v10  ;;  %1443 = vmatpush2.msra.mxu0 %v484_v11  ;;  %v696_v6 = vld [vmem:[%s3889_s1 + $0xcd0] sm:$0xff]  ;;  %v629_v10 = vld [vmem:[%s3889_s1 + $0xab8] sm:$0xff] }
  0xfc   : > { %1494 = vmatpush1.msra.mxu1 %v548_v13  ;;  %1444 = vmatprep.subr.mxu0 %v481_v56  ;;  %v693_v11 = vld [vmem:[%s3889_s1 + $0xcb8] sm:$0xff]  ;;  %v628_v13 = vld [vmem:[%s3889_s1 + $0xab0] sm:$0xff] }
  0xfd   : > { %1495 = vmatprep.subr.mxu1 %v545_v18  ;;  %1445 = vmatpush2.msra.mxu0 %v480_v20  ;;  %v692_v56 = vld [vmem:[%s3889_s1 + $0xcb0] sm:$0xff]  ;;  %v625_v18 = vld [vmem:[%s3889_s1 + $0xa98] sm:$0xff] }
  0xfe   : > { %1446 = vmatprep.mubr.f32.mxu0 %v2351_v9  ;;  %1496 = vmatpush1.msra.mxu1 %v544_v21  ;;  %v664_v9 = vld [vmem:[%s3889_s1 + $0xbd0] sm:$0xff]  ;;  %v689_v20 = vld [vmem:[%s3889_s1 + $0xc98] sm:$0xff] }
  0xff   : > { %1447 = vmatmul.mubr.f32.vlgmr.msra.gmra.mxu0 %v2363_v12  ;;  %1497 = vmatprep.subr.mxu1 %v669_v22  ;;  %v661_v12 = vld [vmem:[%s3889_s1 + $0xbb8] sm:$0xff]  ;;  %v624_v21 = vld [vmem:[%s3889_s1 + $0xa90] sm:$0xff] }
 0x100   : > { %1548 = vmatprep.subr.mxu0 %v733_v23  ;;  %1498 = vmatpush2.msra.mxu1 %v668_v26  ;;  %v688_v22 = vld [vmem:[%s3889_s1 + $0xc90] sm:$0xff]  ;;  %v621_v23 = vld [vmem:[%s3889_s1 + $0xa78] sm:$0xff] }
 0x101   : > { %1549 = vmatpush1.msra.mxu0 %v732_v27  ;;  %1499 = vmatprep.subr.mxu1 %v665_v16  ;;  %v685_v26 = vld [vmem:[%s3889_s1 + $0xc78] sm:$0xff]  ;;  %v620_v27 = vld [vmem:[%s3889_s1 + $0xa70] sm:$0xff] }
 0x102   : > { %1550 = vmatprep.subr.mxu0 %v729_v29  ;;  %1500 = vmatpush2.msra.mxu1 %v664_v9  ;;  %v684_v16 = vld [vmem:[%s3889_s1 + $0xc70] sm:$0xff]  ;;  %v1867_v29 = vld [vmem:[%s2269_s28 + $0x8] sm:$0xff]  ;;  %v617_v9 = vld [vmem:[%s3889_s1 + $0xa58] sm:$0xff] }
 0x103   : > { %1551 = vmatpush1.msra.mxu0 %v728_v5  ;;  %1501 = vmatprep.subr.mxu1 %v661_v12  ;;  %v616_v5 = vld [vmem:[%s3889_s1 + $0xa50] sm:$0xff] }
 0x104   : > { %1552 = vmatprep.subr.mxu0 %v725_v32  ;;  %1502 = vmatpush2.msra.mxu1 %v660_v33  ;;  %v680_v12 = vld [vmem:[%s3889_s1 + $0xc50] sm:$0xff]  ;;  %v613_v32 = vld [vmem:[%s3889_s1 + $0xa38] sm:$0xff] }
 0x105   : > { %1553 = vmatpush1.msra.mxu0 %v724_v34  ;;  %1503 = vmatprep.subr.mxu1 %v657_v36  ;;  %v677_v33 = vld [vmem:[%s3889_s1 + $0xc38] sm:$0xff]  ;;  %v612_v34 = vld [vmem:[%s3889_s1 + $0xa30] sm:$0xff] }
 0x106   : > { %1554 = vmatprep.subr.mxu0 %v721_v37  ;;  %1504 = vmatpush2.msra.mxu1 %v656_v39  ;;  %v676_v36 = vld [vmem:[%s3889_s1 + $0xc30] sm:$0xff]  ;;  %v609_v37 = vld [vmem:[%s3889_s1 + $0xa18] sm:$0xff] }
 0x107   : > { %1555 = vmatpush1.msra.mxu0 %v720_v40  ;;  %1505 = vmatprep.subr.mxu1 %v653_v19  ;;  %v608_v39 = vld [vmem:[%s3889_s1 + $0xa10] sm:$0xff]  ;;  %v797_v19 = vld [vmem:[%s3889_s1 + $0xff8] sm:$0xff] }
 0x108   : > { %1556 = vmatprep.subr.mxu0 %v717_v41  ;;  %1506 = vmatpush2.msra.mxu1 %v652_v42  ;;  %v672_v40 = vld [vmem:[%s3889_s1 + $0xc10] sm:$0xff]  ;;  %v861_v41 = vld [vmem:[%s3889_s1 + $0x11f8] sm:$0xff] }
 0x109   : > { %1557 = vmatpush1.msra.mxu0 %v716_v43  ;;  %1507 = vmatprep.subr.mxu1 %v649_v50  ;;  %v796_v42 = vld [vmem:[%s3889_s1 + $0xff0] sm:$0xff]  ;;  %v857_v50 = vld [vmem:[%s3889_s1 + $0x11d8] sm:$0xff] }
 0x10a   : > { %1558 = vmatprep.subr.mxu0 %v713_v44  ;;  %1508 = vmatpush2.msra.mxu1 %v648_v45  ;;  %v860_v43 = vld [vmem:[%s3889_s1 + $0x11f0] sm:$0xff]  ;;  %v789_v45 = vld [vmem:[%s3889_s1 + $0xfb8] sm:$0xff] }
 0x10b   : > { %1559 = vmatpush1.msra.mxu0 %v712_v46  ;;  %1509 = vmatprep.subr.mxu1 %v645_v47  ;;  %v792_v44 = vld [vmem:[%s3889_s1 + $0xfd0] sm:$0xff]  ;;  %v853_v46 = vld [vmem:[%s3889_s1 + $0x11b8] sm:$0xff] }
 0x10c   : > { %1560 = vmatprep.subr.mxu0 %v709_v48  ;;  %1510 = vmatpush2.msra.mxu1 %v644_v53  ;;  %v788_v47 = vld [vmem:[%s3889_s1 + $0xfb0] sm:$0xff]  ;;  %v785_v53 = vld [vmem:[%s3889_s1 + $0xf98] sm:$0xff] }
 0x10d   : > { %1561 = vmatpush1.msra.mxu0 %v708_v54  ;;  %1511 = vmatprep.subr.mxu1 %v641_v57  ;;  %v852_v48 = vld [vmem:[%s3889_s1 + $0x11b0] sm:$0xff]  ;;  %v849_v54 = vld [vmem:[%s3889_s1 + $0x1198] sm:$0xff] }
 0x10e   : > { %1562 = vmatprep.subr.mxu0 %v705_v58  ;;  %1512 = vmatpush2.msra.mxu1 %v640_v51  ;;  %v784_v57 = vld [vmem:[%s3889_s1 + $0xf90] sm:$0xff]  ;;  %v781_v51 = vld [vmem:[%s3889_s1 + $0xf78] sm:$0xff] }
 0x10f   : > { %1563 = vmatpush1.msra.mxu0 %v704_v60  ;;  %1513 = vmatprep.subr.mxu1 %v637_v61  ;;  %v848_v58 = vld [vmem:[%s3889_s1 + $0x1190] sm:$0xff]  ;;  %v1869_v60 = vld [vmem:[%s2269_s28 + $0x18] sm:$0xff] }
 0x110   : > { %1564 = vmatprep.subr.mxu0 %v701_v62  ;;  %1514 = vmatpush2.msra.mxu1 %v636_v63  ;;  %v780_v61 = vld [vmem:[%s3889_s1 + $0xf70] sm:$0xff]  ;;  %v777_v63 = vld [vmem:[%s3889_s1 + $0xf58] sm:$0xff] }
 0x111   : > { %1565 = vmatpush1.msra.mxu0 %v700_v7  ;;  %1515 = vmatprep.subr.mxu1 %v633_v0  ;;  %v844_v62 = vld [vmem:[%s3889_s1 + $0x1170] sm:$0xff]  ;;  %v841_v7 = vld [vmem:[%s3889_s1 + $0x1158] sm:$0xff] }
 0x112   : > { %1566 = vmatprep.subr.mxu0 %v697_v3  ;;  %1516 = vmatpush2.msra.mxu1 %v632_v4  ;;  %v776_v0 = vld [vmem:[%s3889_s1 + $0xf50] sm:$0xff]  ;;  %v773_v4 = vld [vmem:[%s3889_s1 + $0xf38] sm:$0xff] }
 0x113   : > { %1567 = vmatpush1.msra.mxu0 %v696_v6  ;;  %1517 = vmatprep.subr.mxu1 %v629_v10  ;;  %v840_v3 = vld [vmem:[%s3889_s1 + $0x1150] sm:$0xff]  ;;  %v837_v6 = vld [vmem:[%s3889_s1 + $0x1138] sm:$0xff] }
 0x114   : > { %1568 = vmatprep.subr.mxu0 %v693_v11  ;;  %1518 = vmatpush2.msra.mxu1 %v628_v13  ;;  %v836_v10 = vld [vmem:[%s3889_s1 + $0x1130] sm:$0xff]  ;;  %v769_v11 = vld [vmem:[%s3889_s1 + $0xf18] sm:$0xff] }
 0x115   : > { %1569 = vmatpush1.msra.mxu0 %v692_v56  ;;  %1519 = vmatprep.subr.mxu1 %v625_v18  ;;  %v833_v13 = vld [vmem:[%s3889_s1 + $0x1118] sm:$0xff]  ;;  %v768_v56 = vld [vmem:[%s3889_s1 + $0xf10] sm:$0xff] }
 0x116   : > { %1570 = vmatprep.subr.mxu0 %v689_v20  ;;  %1369 = vmatprep.mubr.f32.mxu1 %v2707_v17  ;;  %v681_v17 = vld [vmem:[%s3889_s1 + $0xc58] sm:$0xff]  ;;  %v832_v18 = vld [vmem:[%s3889_s1 + $0x1110] sm:$0xff] }
 0x117   : > { %1520 = vmatpush2.msra.mxu1 %v624_v21  ;;  %1571 = vmatpush1.msra.mxu0 %v688_v22  ;;  %v765_v20 = vld [vmem:[%s3889_s1 + $0xef8] sm:$0xff]  ;;  %v764_v22 = vld [vmem:[%s3889_s1 + $0xef0] sm:$0xff] }
 0x118   : > { %1370 = vmatmul.mubr.f32.gmra.mxu1 %v1867_v29  ;;  %1521 = vmatprep.subr.mxu1 %v621_v23  ;;  %v829_v21 = vld [vmem:[%s3889_s1 + $0x10f8] sm:$0xff]  ;;  %v828_v23 = vld [vmem:[%s3889_s1 + $0x10f0] sm:$0xff] }
 0x119   : > { %1572 = vmatprep.subr.mxu0 %v685_v26  ;;  %1522 = vmatpush2.msra.mxu1 %v620_v27  ;;  %v761_v26 = vld [vmem:[%s3889_s1 + $0xed8] sm:$0xff] }
 0x11a   : > { %1573 = vmatpush1.msra.mxu0 %v684_v16  ;;  %1452 = vmatprep.mubr.f32.mxu0 %v2727_v24  ;;  %v825_v27 = vld [vmem:[%s3889_s1 + $0x10d8] sm:$0xff]  ;;  %v760_v16 = vld [vmem:[%s3889_s1 + $0xed0] sm:$0xff] }
 0x11b   : > { %1523 = vmatprep.subr.mxu1 %v617_v9  ;;  %1574 = vmatprep.subr.mxu0 %v681_v17  ;;  %v757_v9 = vld [vmem:[%s3889_s1 + $0xeb8] sm:$0xff] }
 0x11c   : > { %1375 = vmatprep.mubr.f32.mxu1 %v2749_v30  ;;  %1453 = vmatmul.mubr.f32.gmra.mxu0 %v2739_v28  ;;  %v1868_v30 = vld [vmem:[%s2269_s28 + $0x10] sm:$0xff]  ;;  %v673_v28 = vld [vmem:[%s3889_s1 + $0xc18] sm:$0xff] }
 0x11d   : > { %1524 = vmatpush2.msra.mxu1 %v616_v5  ;;  %1575 = vmatpush1.msra.mxu0 %v680_v12  ;;  %v821_v17 = vld [vmem:[%s3889_s1 + $0x10b8] sm:$0xff]  ;;  %v756_v5 = vld [vmem:[%s3889_s1 + $0xeb0] sm:$0xff] }
 0x11e   : > { %1376 = vmatmul.mubr.f32.gmra.mxu1 %v1868_v30  ;;  %1525 = vmatprep.subr.mxu1 %v613_v32  ;;  %v820_v12 = vld [vmem:[%s3889_s1 + $0x10b0] sm:$0xff]  ;;  %v753_v32 = vld [vmem:[%s3889_s1 + $0xe98] sm:$0xff] }
 0x11f   : > { %1576 = vmatprep.subr.mxu0 %v677_v33  ;;  %1526 = vmatpush2.msra.mxu1 %v612_v34  ;;  %v817_v33 = vld [vmem:[%s3889_s1 + $0x1098] sm:$0xff]  ;;  %v752_v34 = vld [vmem:[%s3889_s1 + $0xe90] sm:$0xff] }
 0x120   : > { %1577 = vmatpush1.msra.mxu0 %v676_v36  ;;  %1458 = vmatprep.mubr.f32.mxu0 %v2769_v35  ;;  %v816_v36 = vld [vmem:[%s3889_s1 + $0x1090] sm:$0xff] }
 0x121   : > { %1527 = vmatprep.subr.mxu1 %v609_v37  ;;  %1578 = vmatprep.subr.mxu0 %v673_v28  ;;  %v813_v37 = vld [vmem:[%s3889_s1 + $0x1078] sm:$0xff]  ;;  %v748_v28 = vld [vmem:[%s3889_s1 + $0xe70] sm:$0xff] }
 0x122   : > { %1459 = vmatmul.mubr.f32.gmra.mxu0 %v2779_v38  ;;  %1528 = vmatpush2.msra.mxu1 %v608_v39  ;;  %v793_v38 = vld [vmem:[%s3889_s1 + $0xfd8] sm:$0xff]  ;;  %v812_v39 = vld [vmem:[%s3889_s1 + $0x1070] sm:$0xff] }
 0x123   : > { %1529 = vmatprep.mubr.f32.mxu1 %v1867_v29  ;;  %1579 = vmatpush1.msra.mxu0 %v672_v40  ;;  %v824_v29 = vld [vmem:[%s3889_s1 + $0x10d0] sm:$0xff]  ;;  %v745_v40 = vld [vmem:[%s3889_s1 + $0xe58] sm:$0xff] }
 0x124   : > { %1530 = vmatmul.mubr.f32.vlgmr.msra.gmra.mxu1 %v2808_v49  ;;  %1580 = vmatprep.subr.mxu0 %v797_v19  ;;  %v856_v49 = vld [vmem:[%s3889_s1 + $0x11d0] sm:$0xff]  ;;  %v809_v19 = vld [vmem:[%s3889_s1 + $0x1058] sm:$0xff] }
 0x125   : > { %1631 = vmatprep.subr.mxu1 %v861_v41  ;;  %1581 = vmatpush2.msra.mxu0 %v796_v42  ;;  %v744_v41 = vld [vmem:[%s3889_s1 + $0xe50] sm:$0xff] }
 0x126   : > { %1632 = vmatpush1.msra.mxu1 %v860_v43  ;;  %1582 = vmatprep.subr.mxu0 %v793_v38  ;;  %v808_v42 = vld [vmem:[%s3889_s1 + $0x1050] sm:$0xff]  ;;  %v741_v43 = vld [vmem:[%s3889_s1 + $0xe38] sm:$0xff] }
 0x127   : > { %1633 = vmatprep.subr.mxu1 %v857_v50  ;;  %1535 = vmatprep.mubr.f32.mxu1 %v1868_v30  ;;  %v749_v30 = vld [vmem:[%s3889_s1 + $0xe78] sm:$0xff]  ;;  %v740_v50 = vld [vmem:[%s3889_s1 + $0xe30] sm:$0xff] }
 0x128   : > { %1583 = vmatpush2.msra.mxu0 %v792_v44  ;;  %1634 = vmatpush1.msra.mxu1 %v856_v49  ;;  %v805_v38 = vld [vmem:[%s3889_s1 + $0x1038] sm:$0xff]  ;;  %v804_v44 = vld [vmem:[%s3889_s1 + $0x1030] sm:$0xff] }
 0x129   : > { %1584 = vmatprep.subr.mxu0 %v789_v45  ;;  %1536 = vmatmul.mubr.f32.gmra.mxu1 %v2847_v2  ;;  %v845_v2 = vld [vmem:[%s3889_s1 + $0x1178] sm:$0xff] }
 0x12a   : > { %1635 = vmatprep.subr.mxu1 %v853_v46  ;;  %1585 = vmatpush2.msra.mxu0 %v788_v47  ;;  %v737_v49 = vld [vmem:[%s3889_s1 + $0xe18] sm:$0xff]  ;;  %v736_v46 = vld [vmem:[%s3889_s1 + $0xe10] sm:$0xff] }
 0x12b   : > { %1636 = vmatpush1.msra.mxu1 %v852_v48  ;;  %1586 = vmatprep.subr.mxu0 %v785_v53  ;;  %v801_v45 = vld [vmem:[%s3889_s1 + $0x1018] sm:$0xff]  ;;  %v800_v47 = vld [vmem:[%s3889_s1 + $0x1010] sm:$0xff]  ;;  %v1033_v53 = vpop.f32.mrf.mxu1 }
 0x12c   : > { %1637 = vmatprep.subr.mxu1 %v849_v54  ;;  %1541 = vmatprep.mubr.f32.mxu1 %v1869_v60 }
 0x12d   : > { %1587 = vmatpush2.msra.mxu0 %v784_v57  ;;  %1638 = vmatpush1.msra.mxu1 %v848_v58  ;;  %v1035_v54 = vpop.f32.mrf.mxu1  ;;  %v864_v57 = vlaneseq }
 0x12e   : > { %1588 = vmatprep.subr.mxu0 %v781_v51  ;;  %1542 = vmatmul.mubr.f32.gmra.mxu1 %v2886_v59  ;;  %v772_v59 = vld [vmem:[%s3889_s1 + $0xf30] sm:$0xff] }
 0x12f   : > { %1639 = vmatprep.subr.mxu1 %v845_v2  ;;  %1589 = vmatpush2.msra.mxu0 %v780_v61  ;;  %v3846_v51 = vshrl.u32 %v864_v57, 7 }
 0x130   : > { %1640 = vmatpush1.msra.mxu1 %v844_v62  ;;  %1590 = vmatprep.subr.mxu0 %v777_v63 }
 0x131   : > { %1641 = vmatprep.subr.mxu1 %v841_v7  ;;  %1591 = vmatpush2.msra.mxu0 %v776_v0  ;;  %v870_v60 = vsub.s32 1, %v3846_v51 }
 0x132   : > { %1642 = vmatpush1.msra.mxu1 %v840_v3  ;;  %1592 = vmatprep.subr.mxu0 %v773_v4 }
 0x133   : > { %1643 = vmatprep.subr.mxu1 %v837_v6  ;;  %1593 = vmatpush2.msra.mxu0 %v772_v59 }
 0x134   : > { %1644 = vmatpush1.msra.mxu1 %v836_v10  ;;  %1594 = vmatprep.subr.mxu0 %v769_v11 }
 0x135   : > { %1645 = vmatprep.subr.mxu1 %v833_v13  ;;  %1595 = vmatpush2.msra.mxu0 %v768_v56 }
 0x136   : > { %1646 = vmatpush1.msra.mxu1 %v832_v18  ;;  %1596 = vmatprep.subr.mxu0 %v765_v20 }
 0x137   : > { %1647 = vmatprep.subr.mxu1 %v829_v21  ;;  %1597 = vmatpush2.msra.mxu0 %v764_v22 }
 0x138   : > { %1648 = vmatpush1.msra.mxu1 %v828_v23  ;;  %1598 = vmatprep.subr.mxu0 %v761_v26 }
 0x139   : > { %1649 = vmatprep.subr.mxu1 %v825_v27  ;;  %1599 = vmatpush2.msra.mxu0 %v760_v16 }
 0x13a   : > { %1650 = vmatpush1.msra.mxu1 %v824_v29  ;;  %1600 = vmatprep.subr.mxu0 %v757_v9 }
 0x13b   : > { %1651 = vmatprep.subr.mxu1 %v821_v17  ;;  %1601 = vmatpush2.msra.mxu0 %v756_v5 }
 0x13c   : > { %1652 = vmatpush1.msra.mxu1 %v820_v12  ;;  %1602 = vmatprep.subr.mxu0 %v753_v32 }
 0x13d   : > { %1653 = vmatprep.subr.mxu1 %v817_v33  ;;  %1603 = vmatpush2.msra.mxu0 %v752_v34 }
 0x13e   : > { %1654 = vmatpush1.msra.mxu1 %v816_v36  ;;  %1604 = vmatprep.subr.mxu0 %v749_v30 }
 0x13f   : > { %1655 = vmatprep.subr.mxu1 %v813_v37  ;;  %1605 = vmatpush2.msra.mxu0 %v748_v28 }
 0x140   : > { %1656 = vmatpush1.msra.mxu1 %v812_v39  ;;  %1606 = vmatprep.subr.mxu0 %v745_v40 }
 0x141   : > { %1657 = vmatprep.subr.mxu1 %v809_v19  ;;  %1607 = vmatpush2.msra.mxu0 %v744_v41 }
 0x142   : > { %1658 = vmatpush1.msra.mxu1 %v808_v42  ;;  %1608 = vmatprep.subr.mxu0 %v741_v43 }
 0x143   : > { %1659 = vmatprep.subr.mxu1 %v805_v38  ;;  %1609 = vmatpush2.msra.mxu0 %v740_v50 }
 0x144   : > { %1660 = vmatpush1.msra.mxu1 %v804_v44  ;;  %1610 = vmatprep.subr.mxu0 %v737_v49 }
 0x145   : > { %1661 = vmatprep.subr.mxu1 %v801_v45  ;;  %1611 = vmatpush2.msra.mxu0 %v736_v46 }
 0x146   : > { %1612 = vmatprep.mubr.f32.mxu0 %v2811_v52  ;;  %1662 = vmatpush1.msra.mxu1 %v800_v47  ;;  %v950_v52 = vpop.f32.mrf.mxu0 }
 0x147   : > { %1695 = vmatprep.mubr.f32.mxu1 %v1894_v31  ;;  %1613 = vmatmul.mubr.f32.vlgmr.msra.gmra.mxu0 %v2821_v55 }
 0x148   : > { %1696 = vmatmul.mubr.f32.vlgmr.msra.gmra.mxu1 %v2727_v24  ;;  %1618 = vmatprep.mubr.f32.mxu0 %v2858_v8  ;;  %v952_v55 = vpop.f32.mrf.mxu0 }
 0x149   : > { %1701 = vmatprep.mubr.f32.mxu1 %v1894_v31 }
 0x14a   : > { %v956_v48 = vpop.f32.mrf.mxu0 }
 0x14b   : > { %1619 = vmatmul.mubr.f32.gmra.mxu0 %v2872_v14  ;;  %v1039_v58 = vpop.f32.mrf.mxu1 }
 0x14c   : > { %1702 = vmatmul.mubr.f32.gmra.mxu1 %v2769_v35  ;;  %1624 = vmatprep.mubr.f32.mxu0 %v2898_v1  ;;  %v958_v24 = vpop.f32.mrf.mxu0 }
 0x14d   : > { %1707 = vmatprep.mubr.f32.mxu1 %v1894_v31  ;;  %v1041_v35 = vpop.f32.mrf.mxu1  ;;  %v866_v31 = vsub.s32 0, %v3846_v51 }
 0x14e   : > { %v962_v8 = vpop.f32.mrf.mxu0 }
 0x14f   : > { %1625 = vmatmul.mubr.f32.gmra.mxu0 %v2911_v15 }
 0x150   : > { %1708 = vmatmul.mubr.f32.gmra.mxu1 %v2571_v25  ;;  %v964_v14 = vpop.f32.mrf.mxu0  ;;  %v3852_v25 = vld [vmem:[%s3890_s2] sm:$0xf] }
 0x151   : > { %v1045_v2 = vpop.f32.mrf.mxu1  ;;  %v867_v61 = vrot.slane %v3852_v25, %v866_v31  ;;  %v871_v7 = vrot.slane %v3852_v25, %v870_v60 }
 0x153   : > { %v1047_v62 = vpop.f32.mrf.mxu1  ;;  %v951_v0 = vadd.f32 %v950_v52, %v867_v61  ;;  %v953_v6 = vadd.f32 %v952_v55, %v871_v7  ;;  %v957_v56 = vadd.f32 %v956_v48, %v867_v61  ;;  %v959_v20 = vadd.f32 %v958_v24, %v871_v7 }
 0x154   : > { %v963_v16 = vadd.f32 %v962_v8, %v867_v61  ;;  %v965_v33 = vadd.f32 %v964_v14, %v871_v7 }
 0x155   : > { %v1116_v1 = vpop.f32.mrf.mxu0  ;;  %v1034_v59 = vadd.f32 %v1033_v53, %v951_v0  ;;  %v1036_v13 = vadd.f32 %v1035_v54, %v953_v6  ;;  %v1040_v26 = vadd.f32 %v1039_v58, %v957_v56  ;;  %v1042_v9 = vadd.f32 %v1041_v35, %v959_v20 }
 0x156   : > { %v1046_v28 = vadd.f32 %v1045_v2, %v963_v16  ;;  %v1048_v41 = vadd.f32 %v1047_v62, %v965_v33 }
 0x157   : > { %v1118_v15 = vpop.f32.mrf.mxu0  ;;  %v1199_v3 = vpop.f32.mrf.mxu1  ;;  %v1117_v18 = vadd.f32 %v1116_v1, %v1034_v59 }
 0x158   : > { %v1119_v21 = vadd.f32 %v1118_v15, %v1036_v13 }
 0x159   : > { %v1201_v10 = vpop.f32.mrf.mxu1  ;;  %v1200_v27 = vadd.f32 %v1199_v3, %v1117_v18  ;;  %v874_v3 = vsub.s32 2, %v3846_v51 }
 0x15a   : > { %v1202_v17 = vadd.f32 %v1201_v10, %v1119_v21 }
 0x15b   : > { %v1122_v63 = vpop.f32.mrf.mxu0  ;;  %v875_v10 = vrot.slane %v3852_v25, %v874_v3 }
 0x15c   : > { %v1123_v5 = vadd.f32 %v1122_v63, %v1040_v26 }
 0x15d   : > { %v1124_v4 = vpop.f32.mrf.mxu0 }
 0x15e   : > { %v1205_v22 = vpop.f32.mrf.mxu1  ;;  %v1125_v36 = vadd.f32 %v1124_v4, %v1042_v9  ;;  %v878_v4 = vsub.s32 3, %v3846_v51 }
 0x15f   : > { %v1206_v39 = vadd.f32 %v1205_v22, %v1123_v5 }
 0x160   : > { %v1207_v12 = vpop.f32.mrf.mxu1 }
 0x161   : > { %v1128_v11 = vpop.f32.mrf.mxu0  ;;  %v1208_v38 = vadd.f32 %v1207_v12, %v1125_v36 }
 0x162   : > { %v1129_v42 = vadd.f32 %v1128_v11, %v1046_v28  ;;  %v879_v11 = vrot.slane %v3852_v25, %v878_v4 }
 0x163   : > { %v1130_v23 = vpop.f32.mrf.mxu0 }
 0x164   : > { %v1211_v40 = vpop.f32.mrf.mxu1  ;;  %v1131_v44 = vadd.f32 %v1130_v23, %v1048_v41 }
 0x165   : > { %v1212_v52 = vadd.f32 %v1211_v40, %v1129_v42 }
 0x166   : > { %v1213_v45 = vpop.f32.mrf.mxu1 }
 0x167   : > { %v1214_v24 = vadd.f32 %v1213_v45, %v1131_v44 }
 0x17b   : > { %v1282_v29 = vpop.f32.mrf.mxu0 }
 0x17c   : > { %v1283_v32 = vadd.f32 %v1282_v29, %v1200_v27 }
 0x17d   : > { %v1284_v34 = vpop.f32.mrf.mxu0 }
 0x17e   : > { %v1714_v30 = vmax.f32 %v1283_v32, 0.0  ;;  %v1285_v37 = vadd.f32 %v1284_v34, %v1202_v17 }
 0x180   : > { %1726 = vst [vmem:[%s3861_s19] sm:$0xff] %v1714_v30  ;;  %v1715_v19 = vmax.f32 %v1285_v37, 0.0  ;;  %v1288_v43 = vpop.f32.mrf.mxu0 }
 0x181   : > { %v1289_v50 = vadd.f32 %v1288_v43, %v1206_v39 }
 0x182   : > { %1727 = vst [vmem:[%s3861_s19 + $0x8] sm:$0xff] %v1715_v19  ;;  %v1290_v49 = vpop.f32.mrf.mxu0 }
 0x183   : > { %v1718_v46 = vmax.f32 %v1289_v50, 0.0  ;;  %v1291_v47 = vadd.f32 %v1290_v49, %v1208_v38 }
 0x185   : > { %1730 = vst [vmem:[%s3861_s19 + $0x20] sm:$0xff] %v1718_v46  ;;  %v1719_v55 = vmax.f32 %v1291_v47, 0.0  ;;  %v1294_v48 = vpop.f32.mrf.mxu0 }
 0x186   : > { %v1295_v53 = vadd.f32 %v1294_v48, %v1212_v52 }
 0x187   : > { %1731 = vst [vmem:[%s3861_s19 + $0x28] sm:$0xff] %v1719_v55  ;;  %v1296_v8 = vpop.f32.mrf.mxu0 }
 0x188   : > { %v1722_v54 = vmax.f32 %v1295_v53, 0.0  ;;  %v1297_v57 = vadd.f32 %v1296_v8, %v1214_v24 }
 0x18a   : > { %1734 = vst [vmem:[%s3861_s19 + $0x40] sm:$0xff] %v1722_v54  ;;  %v1723_v58 = vmax.f32 %v1297_v57, 0.0 }
 0x18c   : > { %1735 = vst [vmem:[%s3861_s19 + $0x48] sm:$0xff] %v1723_v58 }
 0x19f   : > { %v1365_v14 = vpop.f32.mrf.mxu1 }
 0x1a0   : > { %v1366_v18 = vadd.f32 %v1365_v14, %v875_v10 }
 0x1a1   : > { %v1367_v35 = vpop.f32.mrf.mxu1 }
 0x1a2   : > { %v1368_v20 = vadd.f32 %v1367_v35, %v879_v11 }
 0x1bf   : > { %v1448_v61 = vpop.f32.mrf.mxu0 }
 0x1c0   : > { %v1449_v21 = vadd.f32 %v1448_v61, %v1366_v18 }
 0x1c1   : > { %v1450_v63 = vpop.f32.mrf.mxu0 }
 0x1c2   : > { %v1451_v27 = vadd.f32 %v1450_v63, %v1368_v20 }
 0x1d8   : > { %v1371_v1 = vpop.f32.mrf.mxu1 }
 0x1d9   : > { %v1372_v22 = vadd.f32 %v1371_v1, %v875_v10 }
 0x1da   : > { %v1373_v31 = vpop.f32.mrf.mxu1 }
 0x1db   : > { %v1374_v16 = vadd.f32 %v1373_v31, %v879_v11 }
 0x1dc   : > { %v1454_v7 = vpop.f32.mrf.mxu0 }
 0x1dd   : > { %v1455_v5 = vadd.f32 %v1454_v7, %v1372_v22 }
 0x1de   : > { %v1377_v2 = vpop.f32.mrf.mxu1  ;;  %v1456_v6 = vpop.f32.mrf.mxu0 }
 0x1df   : > { %v1378_v9 = vadd.f32 %v1377_v2, %v875_v10  ;;  %v1457_v36 = vadd.f32 %v1456_v6, %v1374_v16 }
 0x1e0   : > { %v1379_v15 = vpop.f32.mrf.mxu1 }
 0x1e1   : > { %v1380_v33 = vadd.f32 %v1379_v15, %v879_v11 }
 0x1e2   : > { %v1460_v13 = vpop.f32.mrf.mxu0 }
 0x1e3   : > { %v1461_v39 = vadd.f32 %v1460_v13, %v1378_v9 }
 0x1e4   : > { %v1531_v60 = vpop.f32.mrf.mxu1  ;;  %v1462_v23 = vpop.f32.mrf.mxu0 }
 0x1e5   : > { %v1532_v29 = vadd.f32 %v1531_v60, %v1449_v21  ;;  %v1463_v50 = vadd.f32 %v1462_v23, %v1380_v33 }
 0x1e6   : > { %v1533_v62 = vpop.f32.mrf.mxu1 }
 0x1e7   : > { %v1534_v12 = vadd.f32 %v1533_v62, %v1451_v27 }
 0x1e9   : > { %v1537_v0 = vpop.f32.mrf.mxu1 }
 0x1ea   : > { %v1538_v30 = vadd.f32 %v1537_v0, %v1455_v5 }
 0x1eb   : > { %v1539_v59 = vpop.f32.mrf.mxu1 }
 0x1ec   : > { %v1540_v41 = vadd.f32 %v1539_v59, %v1457_v36 }
 0x1ee   : > { %v1543_v56 = vpop.f32.mrf.mxu1 }
 0x1ef   : > { %v1544_v45 = vadd.f32 %v1543_v56, %v1461_v39 }
 0x1f0   : > { %v1545_v26 = vpop.f32.mrf.mxu1 }
 0x1f1   : > { %v1546_v24 = vadd.f32 %v1545_v26, %v1463_v50 }
 0x207   : > { %v1614_v17 = vpop.f32.mrf.mxu0 }
 0x208   : > { %v1697_v51 = vpop.f32.mrf.mxu1  ;;  %v1615_v32 = vadd.f32 %v1614_v17, %v1532_v29 }
 0x209   : > { %v1616_v34 = vpop.f32.mrf.mxu0 }
 0x20a   : > { %v1699_v25 = vpop.f32.mrf.mxu1  ;;  %v1698_v37 = vadd.f32 %v1697_v51, %v1615_v32  ;;  %v1617_v28 = vadd.f32 %v1616_v34, %v1534_v12 }
 0x20b   : > { %v1620_v40 = vpop.f32.mrf.mxu0 }
 0x20c   : > { %v1703_v19 = vpop.f32.mrf.mxu1  ;;  %v1716_v42 = vmax.f32 %v1698_v37, 0.0  ;;  %v1700_v43 = vadd.f32 %v1699_v25, %v1617_v28  ;;  %v1621_v38 = vadd.f32 %v1620_v40, %v1538_v30 }
 0x20d   : > { %v1622_v44 = vpop.f32.mrf.mxu0 }
 0x20e   : > { %v1705_v49 = vpop.f32.mrf.mxu1  ;;  %1728 = vst [vmem:[%s3861_s19 + $0x10] sm:$0xff] %v1716_v42  ;;  %v1717_v46 = vmax.f32 %v1700_v43, 0.0  ;;  %v1704_v47 = vadd.f32 %v1703_v19, %v1621_v38  ;;  %v1623_v52 = vadd.f32 %v1622_v44, %v1540_v41 }
 0x20f   : > { %v1626_v55 = vpop.f32.mrf.mxu0 }
 0x210   : > { %v1709_v48 = vpop.f32.mrf.mxu1  ;;  %1729 = vst [vmem:[%s3861_s19 + $0x18] sm:$0xff] %v1717_v46  ;;  %v1720_v53 = vmax.f32 %v1704_v47, 0.0  ;;  %v1706_v8 = vadd.f32 %v1705_v49, %v1623_v52  ;;  %v1627_v54 = vadd.f32 %v1626_v55, %v1544_v45 }
 0x211   : > { %v1628_v57 = vpop.f32.mrf.mxu0 }
 0x212   : > { %1732 = vst [vmem:[%s3861_s19 + $0x30] sm:$0xff] %v1720_v53  ;;  %v1721_v58 = vmax.f32 %v1706_v8, 0.0  ;;  %v1710_v14 = vadd.f32 %v1709_v48, %v1627_v54  ;;  %v1629_v35 = vadd.f32 %v1628_v57, %v1546_v24  ;;  %v1711_v1 = vpop.f32.mrf.mxu1 }
 0x214   : > { %1733 = vst [vmem:[%s3861_s19 + $0x38] sm:$0xff] %v1721_v58  ;;  %v1724_v31 = vmax.f32 %v1710_v14, 0.0  ;;  %v1712_v2 = vadd.f32 %v1711_v1, %v1629_v35 }
 0x216   : > { %1736 = vst [vmem:[%s3861_s19 + $0x50] sm:$0xff] %v1724_v31  ;;  %v1725_v15 = vmax.f32 %v1712_v2, 0.0 }
 0x218   : > { %1737 = vst [vmem:[%s3861_s19 + $0x58] sm:$0xff] %v1725_v15 }
 0x219 PF: > { %s13_s14 = sadd.s32 1, %s1892_s14   ;;  %s3892_s12 = smov %s1888_s13 }
 0x21a   : > { %p10_p5 = scmp.ge.s32.totalorder %s13_s14, 4   ;;  %s3893_s13 = smov %s3895_s15 }
 0x21c   :  { %12 = sbr.rel (!%p10_p5) target bundleno = 2 (0x2), region = 62 }

// kernel: stem_block_forward.6
= control target key start
LH: loop header
LB: loop body
LE: loop exit
PB: predicated region body
PF: predicated region fallthrough
CT: control target
= control target key end

     0   :  { %s1497_s12 = smov 0   ;;  %s1499_s13 = smov 0   ;;  %s2121_s0 = inlined_call_operand.vmem [shape: f32[2,1,110,64], index: 0, kind: input, shape index: {}]   ;;  %s2122_s1 = inlined_call_operand.vmem [shape: f32[576,128], index: 1, kind: input, shape index: {}]   ;;  %s2123_s2 = inlined_call_operand.vmem [shape: f32[1,128], index: 2, kind: input, shape index: {}]   ;;  %s2124_s3 = inlined_call_operand.vmem [shape: f32[2,1,80,128], index: 3, kind: output, shape index: {}]  }
   0x1   :  { %s1501_s14 = smov 0  }
   0x2 LB: > { %s25_s15 = sadd.s32 1, %s1470_s13  ;;  %p1120_p0 = scmp.ge.s32.totalorder %s1474_s14, 1  ;;  %s1474_s14 = sphi %s1501_s14, %s13_s14   ;;  %s1470_s13 = sphi %s1499_s13, %s2126_s13   ;;  %s1466_s12 = sphi %s1497_s12, %s2125_s12  }
   0x3   : > { %p27_p1 = scmp.ge.s32.totalorder %s25_s15, 2  ;;  %p157_p2 = scmp.lt.s32.totalorder %s1474_s14, 3 }
   0x5   : > { %s2128_s15 = smov (%p27_p1, %s25_s15), 0  ;;  %p158_p3 = pnand %p1120_p0, %p157_p2 }
   0x6   : > { %p189_p4 = scmp.lt.s32.totalorder (!%p158_p3), %s1466_s12, 1  ;;  %s1476_s16 = smov (!%p158_p3), 64  }
   0x7   : > { %161 = sbr.rel (%p158_p3) target bundleno = 391 (0x187), region = 32 }
   0xc   : > { %v591_v0 = vld [vmem:[%s2122_s1 + $0xf8] sm:$0xff]  ;;  %v590_v2 = vld [vmem:[%s2122_s1 + $0xf0] sm:$0xff]  ;;  %s2130_s12 = smov (!%p189_p4, %s1466_s12), 1  ;;  %v589_v5 = vld [vmem:[%s2122_s1 + $0xe8] sm:$0xff]  ;;  %vm231_vm0 = vcmask 1046528   ;;  %vm283_vm1 = vcmask 1045504  }
   0xd   : > { %v575_v1 = vld [vmem:[%s2122_s1 + $0x78] sm:$0xff]  ;;  %1136 = vmatprep.subr.mxu0 %v591_v0  ;;  %v574_v3 = vld [vmem:[%s2122_s1 + $0x70] sm:$0xff]  ;;  %s1325_s30 = smul.u32 112, %s2130_s12  ;;  %v573_v7 = vld [vmem:[%s2122_s1 + $0x68] sm:$0xff]  ;;  %vm380_vm2 = vcmask 1043456   ;;  %vm445_vm3 = vcmask 1042432  }
   0xe   : > { %v623_v4 = vld [vmem:[%s2122_s1 + $0x1f8] sm:$0xff]  ;;  %1137 = vmatpush3.msra.mxu0 %v575_v1  ;;  %v622_v8 = vld [vmem:[%s2122_s1 + $0x1f0] sm:$0xff]  ;;  %v588_v10 = vld [vmem:[%s2122_s1 + $0xe0] sm:$0xff]  ;;  %vm348_vm4 = vcmask 1044480   ;;  %vm497_vm5 = vcmask 1041408   ;;  %vm519_vm6 = vcmask 523264  }
   0xf   : > { %1198 = vmatprep.subr.mxu1 %v623_v4  ;;  %v607_v6 = vld [vmem:[%s2122_s1 + $0x178] sm:$0xff]  ;;  %1138 = vmatprep.subr.mxu0 %v590_v2  ;;  %v606_v9 = vld [vmem:[%s2122_s1 + $0x170] sm:$0xff]  ;;  %v572_v11 = vld [vmem:[%s2122_s1 + $0x60] sm:$0xff]  ;;  %s1560_s22 = scalar_lea.vmem %s2121_s0, %s1325_s30  ;;  %s1326_s8 = smul.u32 80, %s2130_s12 }
  0x10   : > { %1199 = vmatpush3.msra.mxu1 %v607_v6  ;;  %1139 = vmatpush3.msra.mxu0 %v574_v3  ;;  %v621_v12 = vld [vmem:[%s2122_s1 + $0x1e8] sm:$0xff]  ;;  %v587_v13 = vld [vmem:[%s2122_s1 + $0xd8] sm:$0xff]  ;;  %v620_v15 = vld [vmem:[%s2122_s1 + $0x1e0] sm:$0xff] }
  0x11   : > { %1200 = vmatprep.subr.mxu1 %v622_v8  ;;  %1140 = vmatprep.subr.mxu0 %v589_v5  ;;  %v605_v14 = vld [vmem:[%s2122_s1 + $0x168] sm:$0xff]  ;;  %v1572_v16 = vld [vmem:[%s1560_s22] sm:$0xff]  ;;  %v1578_v18 = vld [vmem:[%s1560_s22 + $0x10] sm:$0xff]  ;;  %s2100_s12 = scalar_lea.vmem %s2124_s3, %s1326_s8 }
  0x12   : > { %1201 = vmatpush3.msra.mxu1 %v606_v9  ;;  %v1575_v17 = vld [vmem:[%s1560_s22 + $0x8] sm:$0xff]  ;;  %1141 = vmatpush3.msra.mxu0 %v573_v7  ;;  %v232_v19 = vrot.slane %v1572_v16, 1  ;;  %v287_v22 = vrot.slane %v1578_v18, 2  ;;  %v1585_v23 = vld [vmem:[%s1560_s22 + $0x18] sm:$0xff]  ;;  %v235_v25 = vrot.slane %v1578_v18, 1  ;;  %v382_v27 = vrot.slane %v1578_v18, 4 }
  0x13   : > { %1202 = vmatprep.subr.mxu1 %v621_v12  ;;  %v233_v20 = vrot.slane %v1575_v17, 1  ;;  %v285_v21 = vrot.slane %v1575_v17, 2  ;;  %1142 = vmatprep.subr.mxu0 %v588_v10  ;;  %v571_v24 = vld [vmem:[%s2122_s1 + $0x58] sm:$0xff]  ;;  %v381_v26 = vrot.slane %v1575_v17, 4  ;;  %v289_v28 = vrot.slane %v1585_v23, 2  ;;  %v1595_v29 = vld [vmem:[%s1560_s22 + $0x20] sm:$0xff] }
  0x14   : > { %1203 = vmatpush3.msra.mxu1 %v605_v14  ;;  %1143 = vmatpush3.msra.mxu0 %v572_v11  ;;  %v586_v30 = vld [vmem:[%s2122_s1 + $0xd0] sm:$0xff]  ;;  %v446_v33 = vrot.slane %v1578_v18, 5  ;;  %v447_v34 = vrot.slane %v1585_v23, 5  ;;  %v1609_v35 = vld [vmem:[%s1560_s22 + $0x28] sm:$0xff]  ;;  %v291_v42 = vrot.slane %v1595_v29, 2  ;;  %v449_v43 = vrot.slane %v1595_v29, 5 }
  0x15   : > { %1204 = vmatprep.subr.mxu1 %v620_v15  ;;  %v234_v31 = vsel %vm231_vm0, %v232_v19, %v233_v20  ;;  %v1604_v32 = vsel %vm283_vm1, %v285_v21, %v287_v22  ;;  %1144 = vmatprep.subr.mxu0 %v587_v13  ;;  %v236_v37 = vsel %vm231_vm0, %v233_v20, %v235_v25  ;;  %v570_v44 = vld [vmem:[%s2122_s1 + $0x50] sm:$0xff]  ;;  %v604_v45 = vld [vmem:[%s2122_s1 + $0x160] sm:$0xff]  ;;  %v585_v46 = vld [vmem:[%s2122_s1 + $0xc8] sm:$0xff]  ;;  %v237_v48 = vrot.slane %v1585_v23, 1 }
  0x16   : > { %v1352_v36 = vpack.i.bf16 %v234_v31, %v1604_v32  ;;  %v383_v38 = vsel %vm380_vm2, %v381_v26, %v382_v27  ;;  %v1615_v39 = vsel %vm283_vm1, %v287_v22, %v289_v28  ;;  %1145 = vmatpush3.msra.mxu0 %v571_v24  ;;  %v448_v41 = vsel %vm445_vm3, %v446_v33, %v447_v34  ;;  %v619_v51 = vld [vmem:[%s2122_s1 + $0x1d8] sm:$0xff]  ;;  %v569_v52 = vld [vmem:[%s2122_s1 + $0x48] sm:$0xff]  ;;  %v1648_v57 = vld [vmem:[%s1560_s22 + $0x30] sm:$0xff] }
  0x17   : > { %v1362_v40 = vpack.i.bf16 %v383_v38, %v236_v37  ;;  %1146 = vmatprep.subr.mxu0 %v586_v30  ;;  %v1357_v47 = vpack.i.bf16 %v448_v41, %v1615_v39  ;;  %v384_v49 = vrot.slane %v1585_v23, 4  ;;  %v293_v50 = vrot.slane %v1609_v35, 2  ;;  %1205 = vmatpush3.msra.mxu1 %v604_v45  ;;  %v603_v58 = vld [vmem:[%s2122_s1 + $0x158] sm:$0xff]  ;;  %v584_v63 = vld [vmem:[%s2122_s1 + $0xc0] sm:$0xff]  ;;  %v618_v4 = vld [vmem:[%s2122_s1 + $0x1d0] sm:$0xff] }
  0x18   : > { %1353 = vrot.lane.b32.xlu0 %v1352_v36, %s1476_s16  ;;  %1147 = vmatpush3.msra.mxu0 %v570_v44  ;;  %v1642_v53 = vsel %vm283_vm1, %v289_v28, %v291_v42  ;;  %v450_v54 = vsel %vm445_vm3, %v447_v34, %v449_v43  ;;  %v451_v55 = vrot.slane %v1609_v35, 5  ;;  %v239_v56 = vrot.slane %v1595_v29, 1  ;;  %v1668_v3 = vld [vmem:[%s1560_s22 + $0x38] sm:$0xff]  ;;  %v568_v9 = vld [vmem:[%s2122_s1 + $0x40] sm:$0xff]  ;;  %v602_v13 = vld [vmem:[%s2122_s1 + $0x150] sm:$0xff] }
  0x19   : > { %1363 = vrot.lane.b32.xlu1 %v1362_v40, %s1476_s16  ;;  %v1367_v59 = vpack.i.bf16 %v450_v54, %v1642_v53  ;;  %v238_v60 = vsel %vm231_vm0, %v235_v25, %v237_v48  ;;  %v1656_v61 = vsel %vm380_vm2, %v382_v27, %v384_v49  ;;  %v1659_v62 = vsel %vm283_vm1, %v291_v42, %v293_v50  ;;  %v583_v22 = vld [vmem:[%s2122_s1 + $0xb8] sm:$0xff]  ;;  %v1701_v25 = vld [vmem:[%s1560_s22 + $0x40] sm:$0xff]  ;;  %v617_v26 = vld [vmem:[%s2122_s1 + $0x1c8] sm:$0xff] }
  0x1a   : > { %1148 = vmatprep.subr.mxu0 %v585_v46  ;;  %v1372_v0 = vpack.i.bf16 %v1656_v61, %v238_v60  ;;  %v452_v1 = vsel %vm445_vm3, %v449_v43, %v451_v55  ;;  %v386_v2 = vrot.slane %v1595_v29, 4  ;;  %1206 = vmatprep.subr.mxu1 %v619_v51  ;;  %v240_v5 = vsel %vm231_vm0, %v237_v48, %v239_v56  ;;  %v567_v27 = vld [vmem:[%s2122_s1 + $0x38] sm:$0xff]  ;;  %v601_v34 = vld [vmem:[%s2122_s1 + $0x148] sm:$0xff]  ;;  %v582_v43 = vld [vmem:[%s2122_s1 + $0xb0] sm:$0xff] }
  0x1b   : > { %1149 = vmatpush3.msra.mxu0 %v569_v52  ;;  %v295_v6 = vrot.slane %v1648_v57, 2  ;;  %v453_v7 = vrot.slane %v1648_v57, 5  ;;  %v241_v8 = vrot.slane %v1609_v35, 1  ;;  %1207 = vmatpush3.msra.mxu1 %v603_v58  ;;  %v1377_v10 = vpack.i.bf16 %v452_v1, %v1659_v62  ;;  %v1722_v37 = vld [vmem:[%s1560_s22 + $0x48] sm:$0xff]  ;;  %v566_v48 = vld [vmem:[%s2122_s1 + $0x30] sm:$0xff]  ;;  %v600_v54 = vld [vmem:[%s2122_s1 + $0x140] sm:$0xff] }
  0x1c   : > { %1358 = vrot.lane.b32.xlu0 %v1357_v47, %s1476_s16  ;;  %v1684_v11 = vsel %vm380_vm2, %v384_v49, %v386_v2  ;;  %v388_v12 = vrot.slane %v1609_v35, 4  ;;  %1150 = vmatprep.subr.mxu0 %v584_v63  ;;  %v297_v19 = vrot.slane %v1668_v3, 2  ;;  %v455_v20 = vrot.slane %v1668_v3, 5  ;;  %v616_v47 = vld [vmem:[%s2122_s1 + $0x1c0] sm:$0xff]  ;;  %v1762_v60 = vld [vmem:[%s1560_s22 + $0x50] sm:$0xff] }
  0x1d   : > { %1368 = vrot.lane.b32.xlu1 %v1367_v59, %s1476_s16  ;;  %v1691_v14 = vsel %vm283_vm1, %v293_v50, %v295_v6  ;;  %v454_v15 = vsel %vm445_vm3, %v451_v55, %v453_v7  ;;  %1208 = vmatprep.subr.mxu1 %v618_v4  ;;  %v1382_v24 = vpack.i.bf16 %v1684_v11, %v240_v5  ;;  %v243_v31 = vrot.slane %v1648_v57, 1  ;;  %v581_v55 = vld [vmem:[%s2122_s1 + $0xa8] sm:$0xff] }
  0x1e   : > { %1151 = vmatpush3.msra.mxu0 %v568_v9  ;;  %v242_v28 = vsel %vm231_vm0, %v239_v56, %v241_v8  ;;  %v1712_v30 = vsel %vm380_vm2, %v386_v2, %v388_v12  ;;  %v390_v33 = vrot.slane %v1648_v57, 4  ;;  %1209 = vmatpush3.msra.mxu1 %v602_v13  ;;  %v1387_v36 = vpack.i.bf16 %v454_v15, %v1691_v14  ;;  %v615_v2 = vld [vmem:[%s2122_s1 + $0x1b8] sm:$0xff]  ;;  %v565_v4 = vld [vmem:[%s2122_s1 + $0x28] sm:$0xff] }
  0x1f   : > { %1152 = vmatprep.subr.mxu0 %v583_v22  ;;  %v1725_v38 = vsel %vm283_vm1, %v295_v6, %v297_v19  ;;  %v456_v40 = vsel %vm445_vm3, %v453_v7, %v455_v20  ;;  %v299_v41 = vrot.slane %v1701_v25, 2  ;;  %v457_v42 = vrot.slane %v1701_v25, 5  ;;  %1210 = vmatprep.subr.mxu1 %v617_v26  ;;  %v599_v9 = vld [vmem:[%s2122_s1 + $0x138] sm:$0xff]  ;;  %v564_v22 = vld [vmem:[%s2122_s1 + $0x20] sm:$0xff] }
  0x20   : > { %1373 = vrot.lane.b32.xlu0 %v1372_v0, %s1476_s16  ;;  %1153 = vmatpush3.msra.mxu0 %v567_v27  ;;  %v1392_v44 = vpack.i.bf16 %v1712_v30, %v242_v28  ;;  %v245_v45 = vrot.slane %v1668_v3, 1  ;;  %v392_v46 = vrot.slane %v1668_v3, 4  ;;  %v244_v49 = vsel %vm231_vm0, %v241_v8, %v243_v31  ;;  %v598_v27 = vld [vmem:[%s2122_s1 + $0x130] sm:$0xff]  ;;  %v579_v28 = vld [vmem:[%s2122_s1 + $0x98] sm:$0xff] }
  0x21   : > { %1378 = vrot.lane.b32.xlu1 %v1377_v10, %s1476_s16  ;;  %1211 = vmatpush3.msra.mxu1 %v601_v34  ;;  %v1745_v50 = vsel %vm380_vm2, %v388_v12, %v390_v33  ;;  %v301_v51 = vrot.slane %v1722_v37, 2  ;;  %v459_v52 = vrot.slane %v1722_v37, 5  ;;  %v1397_v56 = vpack.i.bf16 %v456_v40, %v1725_v38  ;;  %v580_v10 = vld [vmem:[%s2122_s1 + $0xa0] sm:$0xff] }
  0x22   : > { %1154 = vmatprep.subr.mxu0 %v582_v43  ;;  %v1758_v58 = vsel %vm283_vm1, %v297_v19, %v299_v41  ;;  %v458_v59 = vsel %vm445_vm3, %v455_v20, %v457_v42  ;;  %1212 = vmatprep.subr.mxu1 %v616_v47  ;;  %v1402_v63 = vpack.i.bf16 %v1745_v50, %v244_v49  ;;  %v247_v7 = vrot.slane %v1701_v25, 1  ;;  %v614_v19 = vld [vmem:[%s2122_s1 + $0x1b0] sm:$0xff]  ;;  %v1796_v20 = vld [vmem:[%s1560_s22 + $0x58] sm:$0xff]  ;;  %v597_v47 = vld [vmem:[%s2122_s1 + $0x128] sm:$0xff] }
  0x23   : > { %1155 = vmatpush3.msra.mxu0 %v566_v48  ;;  %v246_v0 = vsel %vm231_vm0, %v243_v31, %v245_v45  ;;  %v1767_v1 = vsel %vm380_vm2, %v390_v33, %v392_v46  ;;  %1213 = vmatpush3.msra.mxu1 %v600_v54  ;;  %v1777_v5 = vsel %vm283_vm1, %v299_v41, %v301_v51  ;;  %v394_v8 = vrot.slane %v1701_v25, 4  ;;  %v613_v41 = vld [vmem:[%s2122_s1 + $0x1a8] sm:$0xff]  ;;  %v578_v48 = vld [vmem:[%s2122_s1 + $0x90] sm:$0xff]  ;;  %v612_v54 = vld [vmem:[%s2122_s1 + $0x1a0] sm:$0xff] }
  0x24   : > { %1383 = vrot.lane.b32.xlu0 %v1382_v24, %s1476_s16  ;;  %1156 = vmatprep.subr.mxu0 %v581_v55  ;;  %v460_v6 = vsel %vm445_vm3, %v457_v42, %v459_v52  ;;  %v1407_v12 = vpack.i.bf16 %v458_v59, %v1758_v58  ;;  %v303_v13 = vrot.slane %v1762_v60, 2  ;;  %v461_v15 = vrot.slane %v1762_v60, 5  ;;  %v563_v42 = vld [vmem:[%s2122_s1 + $0x18] sm:$0xff]  ;;  %v562_v55 = vld [vmem:[%s2122_s1 + $0x10] sm:$0xff] }
  0x25   : > { %1388 = vrot.lane.b32.xlu1 %v1387_v36, %s1476_s16  ;;  %1214 = vmatprep.subr.mxu1 %v615_v2  ;;  %v1412_v24 = vpack.i.bf16 %v1767_v1, %v246_v0  ;;  %v1417_v26 = vpack.i.bf16 %v460_v6, %v1777_v5  ;;  %v284_v31 = vrot.slane %v1572_v16, 2  ;;  %v248_v33 = vsel %vm231_vm0, %v245_v45, %v247_v7  ;;  %v577_v0 = vld [vmem:[%s2122_s1 + $0x88] sm:$0xff] }
  0x26   : > { %1157 = vmatpush3.msra.mxu0 %v565_v4  ;;  %1215 = vmatpush3.msra.mxu1 %v599_v9  ;;  %v1813_v34 = vsel %vm380_vm2, %v392_v46, %v394_v8  ;;  %v249_v36 = vrot.slane %v1722_v37, 1  ;;  %v396_v40 = vrot.slane %v1722_v37, 4  ;;  %v1825_v43 = vsel %vm283_vm1, %v301_v51, %v303_v13 }
  0x27   : > { %1158 = vmatprep.subr.mxu0 %v580_v10  ;;  %1216 = vmatprep.subr.mxu1 %v614_v19  ;;  %v316_v45 = vrot.slane %v1796_v20, 2  ;;  %v463_v46 = vrot.slane %v1796_v20, 5  ;;  %v1839_v49 = vsel %vm283_vm1, %v284_v31, %v285_v21  ;;  %v1422_v51 = vpack.i.bf16 %v1813_v34, %v248_v33  ;;  %v576_v19 = vld [vmem:[%s2122_s1 + $0x80] sm:$0xff] }
  0x28   : > { %1393 = vrot.lane.b32.xlu0 %v1392_v44, %s1476_s16  ;;  %v462_v44 = vsel %vm445_vm3, %v459_v52, %v461_v15  ;;  %1159 = vmatpush3.msra.mxu0 %v564_v22  ;;  %v1843_v52 = vld [vmem:[%s1560_s22 + $0x60] sm:$0xff]  ;;  %v250_v21 = vsel %vm231_vm0, %v247_v7, %v249_v36  ;;  %v1855_v59 = vsel %vm380_vm2, %v394_v8, %v396_v40  ;;  %v251_v6 = vrot.slane %v1762_v60, 1  ;;  %v611_v8 = vld [vmem:[%s2122_s1 + $0x198] sm:$0xff] }
  0x29   : > { %1398 = vrot.lane.b32.xlu1 %v1397_v56, %s1476_s16  ;;  %1217 = vmatpush3.msra.mxu1 %v598_v27  ;;  %v1427_v56 = vpack.i.bf16 %v462_v44, %v1825_v43  ;;  %v317_v2 = vsel %vm283_vm1, %v303_v13, %v316_v45  ;;  %v464_v4 = vsel %vm445_vm3, %v461_v15, %v463_v46  ;;  %v398_v7 = vrot.slane %v1762_v60, 4  ;;  %v595_v15 = vld [vmem:[%s2122_s1 + $0x118] sm:$0xff]  ;;  %v560_v31 = vld [vmem:[%s2122_s1] sm:$0xff]  ;;  %v594_v44 = vld [vmem:[%s2122_s1 + $0x110] sm:$0xff] }
  0x2a   : > { %1160 = vmatprep.subr.mxu0 %v579_v28  ;;  %1218 = vmatprep.subr.mxu1 %v613_v41  ;;  %v400_v9 = vrot.slane %v1796_v20, 4  ;;  %v465_v10 = vrot.slane %v1843_v52, 5  ;;  %v433_v13 = vrot.slane %v1843_v52, 4  ;;  %v366_v22 = vrot.slane %v1762_v60, 3  ;;  %v610_v28 = vld [vmem:[%s2122_s1 + $0x190] sm:$0xff] }
  0x2b   : > { %1161 = vmatpush3.msra.mxu0 %v563_v42  ;;  %1219 = vmatpush3.msra.mxu1 %v597_v47  ;;  %v1437_v27 = vpack.i.bf16 %v464_v4, %v317_v2  ;;  %v252_v41 = vsel %vm231_vm0, %v249_v36, %v251_v6  ;;  %v1899_v42 = vsel %vm380_vm2, %v396_v40, %v398_v7  ;;  %v609_v36 = vld [vmem:[%s2122_s1 + $0x188] sm:$0xff]  ;;  %v1919_v40 = vld [vmem:[%s2122_s1 + $0x238] sm:$0xff]  ;;  %v350_v6 = vrot.slane %v1578_v18, 3 }
  0x2c   : > { %1403 = vrot.lane.b32.xlu0 %v1402_v63, %s1476_s16  ;;  %v596_v63 = vld [vmem:[%s2122_s1 + $0x120] sm:$0xff]  ;;  %1162 = vmatprep.subr.mxu0 %v578_v48  ;;  %v1894_v33 = vsel %vm380_vm2, %v400_v9, %v433_v13  ;;  %v1910_v47 = vsel %vm380_vm2, %v398_v7, %v400_v9  ;;  %v466_v48 = vsel %vm445_vm3, %v463_v46, %v465_v10 }
  0x2d   : > { %1408 = vrot.lane.b32.xlu1 %v1407_v12, %s1476_s16  ;;  %1220 = vmatprep.subr.mxu1 %v612_v54  ;;  %v561_v12 = vld [vmem:[%s2122_s1 + $0x8] sm:$0xff]  ;;  %v1442_v46 = vpack.i.bf16 %v1899_v42, %v252_v41  ;;  %v608_v54 = vld [vmem:[%s2122_s1 + $0x180] sm:$0xff] }
  0x2e   : > { %1163 = vmatpush3.msra.mxu0 %v562_v55  ;;  %1221 = vmatpush3.msra.mxu1 %v596_v63  ;;  %v1447_v55 = vpack.i.bf16 %v1910_v47, %v466_v48  ;;  %v515_v63 = vrot.slane %v1796_v20, 6 }
  0x2f   : > { %1164 = vmatprep.subr.mxu0 %v577_v0  ;;  %1222 = vmatprep.subr.mxu1 %v611_v8  ;;  %v517_v0 = vrot.slane %v1843_v52, 6 }
  0x30   : > { %1413 = vrot.lane.b32.xlu0 %v1412_v24, %s1476_s16  ;;  %v368_v24 = vrot.slane %v1796_v20, 3  ;;  %1165 = vmatpush3.msra.mxu0 %v561_v12  ;;  %v349_v20 = vrot.slane %v1575_v17, 3 }
  0x31   : > { %1418 = vrot.lane.b32.xlu1 %v1417_v26, %s1476_s16  ;;  %v1432_v26 = vpack.i.bf16 %v1855_v59, %v250_v21  ;;  %1223 = vmatpush3.msra.mxu1 %v595_v15  ;;  %v513_v21 = vrot.slane %v1762_v60, 6  ;;  %v1947_v4 = vsel %vm497_vm5, %v515_v63, %v517_v0 }
  0x32   : > { %v1907_v45 = vsel %vm348_vm4, %v366_v22, %v368_v24  ;;  %1166 = vmatprep.subr.mxu0 %v576_v19  ;;  %1224 = vmatprep.subr.mxu1 %v610_v28  ;;  %v351_v19 = vsel %vm348_vm4, %v349_v20, %v350_v6 }
  0x33   : > { %1167 = vmatpush3.msra.mxu0 %v560_v31  ;;  %1225 = vmatpush3.msra.mxu1 %v594_v44  ;;  %v1944_v2 = vsel %vm497_vm5, %v513_v21, %v515_v63 }
  0x34   : > { %1423 = vrot.lane.b32.xlu0 %v1422_v51, %s1476_s16  ;;  %v593_v51 = vld [vmem:[%s2122_s1 + $0x108] sm:$0xff]  ;;  %1226 = vmatprep.subr.mxu1 %v609_v36 }
  0x35   : > { %1428 = vrot.lane.b32.xlu1 %v1427_v56, %s1476_s16  ;;  %v592_v56 = vld [vmem:[%s2122_s1 + $0x100] sm:$0xff]  ;;  %1278 = vmatprep.subr.mxu0 %v1919_v40 }
  0x36   : > { %1227 = vmatpush3.msra.mxu1 %v593_v51 }
  0x37   : > { %1228 = vmatprep.subr.mxu1 %v608_v54 }
  0x38   : > { %1433 = vrot.lane.b32.xlu0 %v1432_v26, %s1476_s16  ;;  %1229 = vmatpush3.msra.mxu1 %v592_v56  ;;  %v630_v26 = vld [vmem:[%s2122_s1 + $0x230] sm:$0xff]  ;;  %v354_v56 = vrot.slane %v1595_v29, 3 }
  0x39   : > { %1438 = vrot.lane.b32.xlu1 %v1437_v27, %s1476_s16  ;;  %1309 = vmatprep.subr.mxu1 %v1919_v40  ;;  %v352_v27 = vrot.slane %v1585_v23, 3 }
  0x3c   : > { %1443 = vrot.lane.b32.xlu0 %v1442_v46, %s1476_s16 }
  0x3d   : > { %1448 = vrot.lane.b32.xlu1 %v1447_v55, %s1476_s16 }
  0x8a   : > { %v1354_v7 = vpop.permute.xlu0 %1353 }
  0x8b   : > { %v1356_v8 = vunpack.i.h.bf16 %v1354_v7  ;;  %v1355_v52 = vunpack.i.l.bf16 %v1354_v7  ;;  %v1364_v9 = vpop.permute.xlu1 %1363 }
  0x8c   : > { %v1366_v10 = vunpack.i.h.bf16 %v1364_v9  ;;  %v1365_v12 = vunpack.i.l.bf16 %v1364_v9  ;;  %v356_v9 = vrot.slane %v1609_v35, 3 }
  0x8d   : > { %v530_v13 = vsel %vm519_vm6, %v1839_v49, %v1355_v52  ;;  %v520_v15 = vsel %vm519_vm6, %v1572_v16, %v1356_v8 }
  0x8e   : > { %v1359_v24 = vpop.permute.xlu0 %1358  ;;  %723 = vmatprep.mubr.f32.mxu0 %v530_v13  ;;  %v521_v16 = vsel %vm519_vm6, %v1575_v17, %v1365_v12  ;;  %v540_v48 = vsel %vm519_vm6, %v351_v19, %v1366_v10  ;;  %v353_v17 = vsel %vm348_vm4, %v350_v6, %v352_v27 }
  0x8f   : > { %v1361_v28 = vunpack.i.h.bf16 %v1359_v24  ;;  %v1360_v31 = vunpack.i.l.bf16 %v1359_v24  ;;  %724 = vmatmul.mubr.f32.vlgmr.msra.gmra.mxu0 %v520_v15  ;;  %v1369_v41 = vpop.permute.xlu1 %1368  ;;  %v628_v15 = vld [vmem:[%s2122_s1 + $0x220] sm:$0xff] }
  0x90   : > { %1279 = vmatpush3.msra.mxu0 %v1919_v40  ;;  %v1371_v49 = vunpack.i.h.bf16 %v1369_v41  ;;  %v1370_v44 = vunpack.i.l.bf16 %v1369_v41  ;;  %v358_v41 = vrot.slane %v1648_v57, 3 }
  0x91   : > { %v531_v36 = vsel %vm519_vm6, %v1604_v32, %v1360_v31  ;;  %v550_v51 = vsel %vm519_vm6, %v1656_v61, %v1361_v28  ;;  %1280 = vmatprep.subr.mxu0 %v630_v26  ;;  %v629_v61 = vld [vmem:[%s2122_s1 + $0x228] sm:$0xff] }
  0x92   : > { %728 = vmatprep.mubr.f32.mxu0 %v531_v36  ;;  %838 = vmatprep.mubr.f32.mxu1 %v550_v51  ;;  %v1374_v46 = vpop.permute.xlu0 %1373  ;;  %v532_v54 = vsel %vm519_vm6, %v1615_v39, %v1370_v44  ;;  %v551_v55 = vsel %vm519_vm6, %v1684_v11, %v1371_v49 }
  0x93   : > { %v1376_v63 = vunpack.i.h.bf16 %v1374_v46  ;;  %v1375_v0 = vunpack.i.l.bf16 %v1374_v46  ;;  %729 = vmatmul.mubr.f32.gmra.mxu0 %v521_v16  ;;  %839 = vmatmul.mubr.f32.vlgmr.msra.gmra.mxu1 %v540_v48  ;;  %v1379_v32 = vpop.permute.xlu1 %1378  ;;  %v627_v48 = vld [vmem:[%s2122_s1 + $0x218] sm:$0xff] }
  0x94   : > { %1317 = vmatpush3.msra.mxu1 %v1919_v40  ;;  %1281 = vmatpush3.msra.mxu0 %v630_v26  ;;  %v1381_v39 = vunpack.i.h.bf16 %v1379_v32  ;;  %v1380_v20 = vunpack.i.l.bf16 %v1379_v32  ;;  %v355_v40 = vsel %vm348_vm4, %v352_v27, %v354_v56 }
  0x95   : > { %733 = vmatprep.mubr.f32.mxu0 %v532_v54  ;;  %843 = vmatprep.mubr.f32.mxu1 %v551_v55  ;;  %v522_v11 = vsel %vm519_vm6, %v1578_v18, %v1375_v0  ;;  %v541_v6 = vsel %vm519_vm6, %v353_v17, %v1376_v63  ;;  %v359_v17 = vsel %vm348_vm4, %v356_v9, %v358_v41 }
  0x96   : > { %v1384_v7 = vpop.permute.xlu0 %1383  ;;  %1310 = vmatprep.subr.mxu1 %v630_v26  ;;  %1282 = vmatprep.subr.mxu0 %v629_v61  ;;  %v533_v8 = vsel %vm519_vm6, %v1642_v53, %v1380_v20  ;;  %v552_v52 = vsel %vm519_vm6, %v1712_v30, %v1381_v39 }
  0x97   : > { %v1386_v10 = vunpack.i.h.bf16 %v1384_v7  ;;  %v1385_v12 = vunpack.i.l.bf16 %v1384_v7  ;;  %734 = vmatmul.mubr.f32.gmra.mxu0 %v522_v11  ;;  %844 = vmatmul.mubr.f32.gmra.mxu1 %v541_v6  ;;  %v1389_v13 = vpop.permute.xlu1 %1388 }
  0x98   : > { %1318 = vmatpush3.msra.mxu1 %v630_v26  ;;  %1283 = vmatpush3.msra.mxu0 %v629_v61  ;;  %v1391_v19 = vunpack.i.h.bf16 %v1389_v13  ;;  %v1390_v53 = vunpack.i.l.bf16 %v1389_v13  ;;  %v357_v26 = vsel %vm348_vm4, %v354_v56, %v356_v9  ;;  %v360_v56 = vrot.slane %v1668_v3, 3 }
  0x99   : > { %738 = vmatprep.mubr.f32.mxu0 %v533_v8  ;;  %848 = vmatprep.mubr.f32.mxu1 %v552_v52  ;;  %v523_v30 = vsel %vm519_vm6, %v1585_v23, %v1385_v12  ;;  %v542_v24 = vsel %vm519_vm6, %v355_v40, %v1386_v10  ;;  %v362_v52 = vrot.slane %v1701_v25, 3  ;;  %v625_v12 = vld [vmem:[%s2122_s1 + $0x208] sm:$0xff] }
  0x9a   : > { %v1394_v27 = vpop.permute.xlu0 %1393  ;;  %1311 = vmatprep.subr.mxu1 %v629_v61  ;;  %1284 = vmatprep.subr.mxu0 %v628_v15  ;;  %v534_v28 = vsel %vm519_vm6, %v1659_v62, %v1390_v53  ;;  %v553_v31 = vsel %vm519_vm6, %v1745_v50, %v1391_v19  ;;  %v361_v8 = vsel %vm348_vm4, %v358_v41, %v360_v56  ;;  %v624_v41 = vld [vmem:[%s2122_s1 + $0x200] sm:$0xff] }
  0x9b   : > { %v1396_v49 = vunpack.i.h.bf16 %v1394_v27  ;;  %v1395_v44 = vunpack.i.l.bf16 %v1394_v27  ;;  %739 = vmatmul.mubr.f32.gmra.mxu0 %v523_v30  ;;  %849 = vmatmul.mubr.f32.gmra.mxu1 %v542_v24  ;;  %v1399_v16 = vpop.permute.xlu1 %1398  ;;  %v363_v24 = vsel %vm348_vm4, %v360_v56, %v362_v52  ;;  %v364_v27 = vrot.slane %v1722_v37, 3 }
  0x9c   : > { %1319 = vmatpush3.msra.mxu1 %v629_v61  ;;  %v1401_v36 = vunpack.i.h.bf16 %v1399_v16  ;;  %v1400_v51 = vunpack.i.l.bf16 %v1399_v16  ;;  %743 = vmatprep.mubr.f32.mxu0 %v534_v28  ;;  %v626_v61 = vld [vmem:[%s2122_s1 + $0x210] sm:$0xff] }
  0x9d   : > { %853 = vmatprep.mubr.f32.mxu1 %v553_v31  ;;  %1285 = vmatpush3.msra.mxu0 %v628_v15  ;;  %v524_v62 = vsel %vm519_vm6, %v1595_v29, %v1395_v44  ;;  %v543_v50 = vsel %vm519_vm6, %v357_v26, %v1396_v49 }
  0x9e   : > { %v1404_v46 = vpop.permute.xlu0 %1403  ;;  %1312 = vmatprep.subr.mxu1 %v628_v15  ;;  %v535_v54 = vsel %vm519_vm6, %v1691_v14, %v1400_v51  ;;  %v554_v55 = vsel %vm519_vm6, %v1767_v1, %v1401_v36  ;;  %1286 = vmatprep.subr.mxu0 %v627_v48  ;;  %v365_v51 = vsel %vm348_vm4, %v362_v52, %v364_v27  ;;  %v505_v52 = vrot.slane %v1648_v57, 6 }
  0x9f   : > { %v1406_v63 = vunpack.i.h.bf16 %v1404_v46  ;;  %v1405_v0 = vunpack.i.l.bf16 %v1404_v46  ;;  %744 = vmatmul.mubr.f32.gmra.mxu0 %v524_v62  ;;  %854 = vmatmul.mubr.f32.gmra.mxu1 %v543_v50  ;;  %v1409_v32 = vpop.permute.xlu1 %1408 }
  0xa0   : > { %v1411_v39 = vunpack.i.h.bf16 %v1409_v32  ;;  %v1410_v20 = vunpack.i.l.bf16 %v1409_v32  ;;  %748 = vmatprep.mubr.f32.mxu0 %v535_v54  ;;  %858 = vmatprep.mubr.f32.mxu1 %v554_v55 }
  0xa1   : > { %1320 = vmatpush3.msra.mxu1 %v628_v15  ;;  %v525_v14 = vsel %vm519_vm6, %v1609_v35, %v1405_v0  ;;  %v544_v1 = vsel %vm519_vm6, %v359_v17, %v1406_v63  ;;  %1287 = vmatpush3.msra.mxu0 %v627_v48  ;;  %v498_v17 = vrot.slane %v1578_v18, 6  ;;  %v367_v18 = vsel %vm348_vm4, %v364_v27, %v366_v22 }
  0xa2   : > { %v1414_v11 = vpop.permute.xlu0 %1413  ;;  %v536_v6 = vsel %vm519_vm6, %v1725_v38, %v1410_v20  ;;  %v555_v7 = vsel %vm519_vm6, %v1813_v34, %v1411_v39  ;;  %1313 = vmatprep.subr.mxu1 %v627_v48  ;;  %1288 = vmatprep.subr.mxu0 %v626_v61  ;;  %v501_v20 = vrot.slane %v1595_v29, 6 }
  0xa3   : > { %v1416_v40 = vunpack.i.h.bf16 %v1414_v11  ;;  %v1415_v9 = vunpack.i.l.bf16 %v1414_v11  ;;  %749 = vmatmul.mubr.f32.gmra.mxu0 %v525_v14  ;;  %859 = vmatmul.mubr.f32.gmra.mxu1 %v544_v1  ;;  %v1419_v10 = vpop.permute.xlu1 %1418 }
  0xa4   : > { %v1421_v13 = vunpack.i.h.bf16 %v1419_v10  ;;  %v1420_v38 = vunpack.i.l.bf16 %v1419_v10  ;;  %753 = vmatprep.mubr.f32.mxu0 %v536_v6  ;;  %863 = vmatprep.mubr.f32.mxu1 %v555_v7  ;;  %v509_v6 = vrot.slane %v1701_v25, 6  ;;  %v511_v7 = vrot.slane %v1722_v37, 6 }
  0xa5   : > { %v526_v34 = vsel %vm519_vm6, %v1648_v57, %v1415_v9  ;;  %v545_v15 = vsel %vm519_vm6, %v361_v8, %v1416_v40  ;;  %1321 = vmatpush3.msra.mxu1 %v627_v48  ;;  %1289 = vmatpush3.msra.mxu0 %v626_v61 }
  0xa6   : > { %v1424_v19 = vpop.permute.xlu0 %1423  ;;  %v537_v53 = vsel %vm519_vm6, %v1758_v58, %v1420_v38  ;;  %v556_v30 = vsel %vm519_vm6, %v1855_v59, %v1421_v13  ;;  %1314 = vmatprep.subr.mxu1 %v626_v61  ;;  %1290 = vmatprep.subr.mxu0 %v625_v12 }
  0xa7   : > { %v1426_v28 = vunpack.i.h.bf16 %v1424_v19  ;;  %v1425_v31 = vunpack.i.l.bf16 %v1424_v19  ;;  %754 = vmatmul.mubr.f32.gmra.mxu0 %v526_v34  ;;  %864 = vmatmul.mubr.f32.gmra.mxu1 %v545_v15  ;;  %v1429_v26 = vpop.permute.xlu1 %1428 }
  0xa8   : > { %v1431_v49 = vunpack.i.h.bf16 %v1429_v26  ;;  %v1430_v58 = vunpack.i.l.bf16 %v1429_v26  ;;  %758 = vmatprep.mubr.f32.mxu0 %v537_v53  ;;  %868 = vmatprep.mubr.f32.mxu1 %v556_v30 }
  0xa9   : > { %v527_v59 = vsel %vm519_vm6, %v1668_v3, %v1425_v31  ;;  %v546_v44 = vsel %vm519_vm6, %v363_v24, %v1426_v28  ;;  %1322 = vmatpush3.msra.mxu1 %v626_v61  ;;  %1291 = vmatpush3.msra.mxu0 %v625_v12 }
  0xaa   : > { %v1434_v16 = vpop.permute.xlu0 %1433  ;;  %v538_v48 = vsel %vm519_vm6, %v1777_v5, %v1430_v58  ;;  %v557_v36 = vsel %vm519_vm6, %v1899_v42, %v1431_v49  ;;  %1315 = vmatprep.subr.mxu1 %v625_v12  ;;  %1292 = vmatprep.subr.mxu0 %v624_v41  ;;  %v499_v5 = vrot.slane %v1585_v23, 6 }
  0xab   : > { %v1436_v62 = vunpack.i.h.bf16 %v1434_v16  ;;  %v1435_v50 = vunpack.i.l.bf16 %v1434_v16  ;;  %759 = vmatmul.mubr.f32.gmra.mxu0 %v527_v59  ;;  %869 = vmatmul.mubr.f32.gmra.mxu1 %v546_v44  ;;  %v1439_v46 = vpop.permute.xlu1 %1438 }
  0xac   : > { %v1441_v54 = vunpack.i.h.bf16 %v1439_v46  ;;  %v1440_v55 = vunpack.i.l.bf16 %v1439_v46  ;;  %763 = vmatprep.mubr.f32.mxu0 %v538_v48  ;;  %873 = vmatprep.mubr.f32.mxu1 %v557_v36  ;;  %v502_v8 = vsel %vm497_vm5, %v499_v5, %v501_v20 }
  0xad   : > { %v528_v42 = vsel %vm519_vm6, %v1701_v25, %v1435_v50  ;;  %v547_v56 = vsel %vm519_vm6, %v365_v51, %v1436_v62  ;;  %1323 = vmatpush3.msra.mxu1 %v625_v12  ;;  %1293 = vmatpush3.msra.mxu0 %v624_v41  ;;  %v512_v25 = vsel %vm497_vm5, %v509_v6, %v511_v7 }
  0xae   : > { %v1444_v63 = vpop.permute.xlu0 %1443  ;;  %v539_v0 = vsel %vm519_vm6, %v1825_v43, %v1440_v55  ;;  %v558_v32 = vsel %vm519_vm6, %v1910_v47, %v1441_v54  ;;  %1316 = vmatprep.subr.mxu1 %v624_v41  ;;  %v500_v43 = vsel %vm497_vm5, %v498_v17, %v499_v5  ;;  %v503_v47 = vrot.slane %v1609_v35, 6  ;;  %v1123_v5 = vld [vmem:[%s2123_s2] ss:$0 sm:$0xff] }
  0xaf   : > { %v1446_v23 = vunpack.i.h.bf16 %v1444_v63  ;;  %v1445_v61 = vunpack.i.l.bf16 %v1444_v63  ;;  %764 = vmatmul.mubr.f32.gmra.mxu0 %v528_v42  ;;  %874 = vmatmul.mubr.f32.gmra.mxu1 %v547_v56  ;;  %v1449_v39 = vpop.permute.xlu1 %1448 }
  0xb0   : > { %v1451_v14 = vunpack.i.h.bf16 %v1449_v39  ;;  %v1450_v1 = vunpack.i.l.bf16 %v1449_v39  ;;  %768 = vmatprep.mubr.f32.mxu0 %v539_v0  ;;  %878 = vmatprep.mubr.f32.mxu1 %v558_v32  ;;  %v504_v40 = vsel %vm497_vm5, %v501_v20, %v503_v47 }
  0xb1   : > { %v529_v11 = vsel %vm519_vm6, %v1722_v37, %v1445_v61  ;;  %v548_v22 = vsel %vm519_vm6, %v367_v18, %v1446_v23  ;;  %1324 = vmatpush3.msra.mxu1 %v624_v41  ;;  %v507_v37 = vrot.slane %v1668_v3, 6 }
  0xb2   : > { %v559_v29 = vsel %vm519_vm6, %v1894_v33, %v1450_v1  ;;  %v549_v35 = vsel %vm519_vm6, %v1907_v45, %v1451_v14  ;;  %v506_v33 = vsel %vm497_vm5, %v503_v47, %v505_v52  ;;  %v514_v45 = vsel %vm497_vm5, %v511_v7, %v513_v21 }
  0xb3   : > { %769 = vmatmul.mubr.f32.gmra.mxu0 %v529_v11  ;;  %879 = vmatmul.mubr.f32.gmra.mxu1 %v548_v22  ;;  %v508_v57 = vsel %vm497_vm5, %v505_v52, %v507_v37  ;;  %v510_v3 = vsel %vm497_vm5, %v507_v37, %v509_v6 }
  0xb4   : > { %883 = vmatprep.mubr.f32.mxu1 %v559_v29  ;;  %1294 = vmatprep.mubr.msk.f32.mxu0 %vm519_vm6, %v500_v43 }
  0xb7   : > { %884 = vmatmul.mubr.f32.gmra.mxu1 %v549_v35  ;;  %1295 = vmatmul.mubr.msk.f32.vlgmr.msra.gmra.mxu0 %vm519_vm6, %v502_v8 }
  0xb8   : > { %1297 = vmatprep.mubr.msk.f32.mxu0 %vm519_vm6, %v504_v40  ;;  %1303 = vmatprep.mubr.msk.f32.mxu1 %vm519_vm6, %v512_v25 }
  0xbb   : > { %1298 = vmatmul.mubr.msk.f32.gmra.mxu0 %vm519_vm6, %v506_v33  ;;  %1304 = vmatmul.mubr.msk.f32.vlgmr.msra.gmra.mxu1 %vm519_vm6, %v514_v45 }
  0xbc   : > { %1300 = vmatprep.mubr.msk.f32.mxu0 %vm519_vm6, %v508_v57  ;;  %1306 = vmatprep.mubr.msk.f32.mxu1 %vm519_vm6, %v1944_v2 }
  0xbf   : > { %1301 = vmatmul.mubr.msk.f32.gmra.mxu0 %vm519_vm6, %v510_v3  ;;  %1307 = vmatmul.mubr.msk.f32.gmra.mxu1 %vm519_vm6, %v1947_v4 }
 0x14f   : > { %v1168_v60 = vpop.f32.mrf.mxu0 }
 0x151   : > { %v1169_v21 = vpop.f32.mrf.mxu0 }
 0x152   : > { %v1170_v55 = vadd.f32 %v1169_v21, %v1168_v60 }
 0x153   : > { %v1171_v9 = vpop.f32.mrf.mxu0  ;;  %v1230_v10 = vpop.f32.mrf.mxu1 }
 0x154   : > { %v726_v20 = vadd.f32 %v1170_v55, %v1123_v5 }
 0x155   : > { %v1172_v12 = vpop.f32.mrf.mxu0  ;;  %v1231_v13 = vpop.f32.mrf.mxu1 }
 0x156   : > { %v1173_v17 = vadd.f32 %v1172_v12, %v1171_v9  ;;  %v1232_v0 = vadd.f32 %v1231_v13, %v1230_v10 }
 0x157   : > { %v1174_v38 = vpop.f32.mrf.mxu0  ;;  %v1233_v34 = vpop.f32.mrf.mxu1 }
 0x158   : > { %v731_v14 = vadd.f32 %v1173_v17, %v1123_v5  ;;  %v841_v35 = vadd.f32 %v1232_v0, %v726_v20 }
 0x159   : > { %v1175_v15 = vpop.f32.mrf.mxu0  ;;  %v1234_v19 = vpop.f32.mrf.mxu1 }
 0x15a   : > { %v1176_v42 = vadd.f32 %v1175_v15, %v1174_v38  ;;  %v1235_v32 = vadd.f32 %v1234_v19, %v1233_v34 }
 0x15b   : > { %v1177_v53 = vpop.f32.mrf.mxu0  ;;  %v1236_v30 = vpop.f32.mrf.mxu1 }
 0x15c   : > { %v736_v43 = vadd.f32 %v1176_v42, %v1123_v5  ;;  %v846_v29 = vadd.f32 %v1235_v32, %v731_v14 }
 0x15d   : > { %v1178_v2 = vpop.f32.mrf.mxu0  ;;  %v1237_v24 = vpop.f32.mrf.mxu1 }
 0x15e   : > { %v1179_v18 = vadd.f32 %v1178_v2, %v1177_v53  ;;  %v1238_v23 = vadd.f32 %v1237_v24, %v1236_v30 }
 0x15f   : > { %v1180_v27 = vpop.f32.mrf.mxu0  ;;  %v1239_v28 = vpop.f32.mrf.mxu1 }
 0x160   : > { %v741_v8 = vadd.f32 %v1179_v18, %v1123_v5  ;;  %v851_v33 = vadd.f32 %v1238_v23, %v736_v43 }
 0x161   : > { %v1181_v31 = vpop.f32.mrf.mxu0  ;;  %v1240_v26 = vpop.f32.mrf.mxu1 }
 0x162   : > { %v1241_v47 = vadd.f32 %v1240_v26, %v1239_v28  ;;  %v1182_v45 = vadd.f32 %v1181_v31, %v1180_v27 }
 0x163   : > { %v1183_v41 = vpop.f32.mrf.mxu0  ;;  %v1242_v4 = vpop.f32.mrf.mxu1 }
 0x164   : > { %v856_v38 = vadd.f32 %v1241_v47, %v741_v8 }
 0x165   : > { %v1184_v49 = vpop.f32.mrf.mxu0  ;;  %v1243_v58 = vpop.f32.mrf.mxu1 }
 0x166   : > { %v1185_v52 = vadd.f32 %v1184_v49, %v1183_v41  ;;  %v1244_v2 = vadd.f32 %v1243_v58, %v1242_v4 }
 0x167   : > { %v1186_v59 = vpop.f32.mrf.mxu0  ;;  %v1245_v44 = vpop.f32.mrf.mxu1 }
 0x168   : > { %v751_v30 = vadd.f32 %v1185_v52, %v1123_v5 }
 0x169   : > { %v1187_v16 = vpop.f32.mrf.mxu0  ;;  %v1246_v48 = vpop.f32.mrf.mxu1 }
 0x16a   : > { %v1188_v11 = vadd.f32 %v1187_v16, %v1186_v59  ;;  %v1247_v9 = vadd.f32 %v1246_v48, %v1245_v44  ;;  %v746_v44 = vadd.f32 %v1182_v45, %v1123_v5 }
 0x16b   : > { %v1189_v36 = vpop.f32.mrf.mxu0  ;;  %v1248_v51 = vpop.f32.mrf.mxu1 }
 0x16c   : > { %v756_v21 = vadd.f32 %v1188_v11, %v1123_v5  ;;  %v861_v17 = vadd.f32 %v1244_v2, %v746_v44 }
 0x16d   : > { %v1190_v62 = vpop.f32.mrf.mxu0  ;;  %v1249_v50 = vpop.f32.mrf.mxu1 }
 0x16e   : > { %v1191_v1 = vadd.f32 %v1190_v62, %v1189_v36  ;;  %v1250_v3 = vadd.f32 %v1249_v50, %v1248_v51  ;;  %v866_v51 = vadd.f32 %v1247_v9, %v751_v30 }
 0x16f   : > { %v1192_v46 = vpop.f32.mrf.mxu0  ;;  %v1251_v54 = vpop.f32.mrf.mxu1 }
 0x170   : > { %v761_v57 = vadd.f32 %v1191_v1, %v1123_v5  ;;  %v871_v59 = vadd.f32 %v1250_v3, %v756_v21 }
 0x171   : > { %v1193_v56 = vpop.f32.mrf.mxu0  ;;  %v1252_v63 = vpop.f32.mrf.mxu1 }
 0x172   : > { %v1253_v7 = vadd.f32 %v1252_v63, %v1251_v54  ;;  %v1194_v10 = vadd.f32 %v1193_v56, %v1192_v46 }
 0x173   : > { %v1195_v61 = vpop.f32.mrf.mxu0  ;;  %v1254_v39 = vpop.f32.mrf.mxu1 }
 0x174   : > { %v876_v53 = vadd.f32 %v1253_v7, %v761_v57  ;;  %v766_v16 = vadd.f32 %v1194_v10, %v1123_v5 }
 0x175   : > { %v1196_v22 = vpop.f32.mrf.mxu0  ;;  %v1255_v6 = vpop.f32.mrf.mxu1 }
 0x176   : > { %v1197_v40 = vadd.f32 %v1196_v22, %v1195_v61  ;;  %v1256_v27 = vadd.f32 %v1255_v6, %v1254_v39 }
 0x177   : > { %v1257_v25 = vpop.f32.mrf.mxu1  ;;  %v1296_v37 = vpop.f32.mrf.mxu0 }
 0x178   : > { %v961_v60 = vadd.f32 %v1296_v37, %v846_v29  ;;  %v771_v24 = vadd.f32 %v1197_v40, %v1123_v5  ;;  %v881_v42 = vadd.f32 %v1256_v27, %v766_v16 }
 0x179   : > { %v1258_v12 = vpop.f32.mrf.mxu1  ;;  %v955_v13 = vpop.f32.mrf.mxu0 }
 0x17a   : > { %v1005_v34 = vmax.f32 %v961_v60, 0.0  ;;  %v1259_v15 = vadd.f32 %v1258_v12, %v1257_v25  ;;  %v956_v19 = vadd.f32 %v955_v13, %v841_v35 }
 0x17b   : > { %v1299_v28 = vpop.f32.mrf.mxu0  ;;  %v1305_v31 = vpop.f32.mrf.mxu1 }
 0x17c   : > { %1015 = vst [vmem:[%s2100_s12 + $0x8] sm:$0xff] %v1005_v34  ;;  %v1004_v26 = vmax.f32 %v956_v19, 0.0  ;;  %v971_v41 = vadd.f32 %v1299_v28, %v856_v38  ;;  %v991_v49 = vadd.f32 %v1305_v31, %v876_v53  ;;  %v886_v62 = vadd.f32 %v1259_v15, %v771_v24 }
 0x17d   : > { %v965_v48 = vpop.f32.mrf.mxu0  ;;  %v985_v36 = vpop.f32.mrf.mxu1 }
 0x17e   : > { %1014 = vst [vmem:[%s2100_s12] sm:$0xff] %v1004_v26  ;;  %v1007_v4 = vmax.f32 %v971_v41, 0.0  ;;  %v1011_v58 = vmax.f32 %v991_v49, 0.0  ;;  %v966_v50 = vadd.f32 %v965_v48, %v851_v33  ;;  %v986_v46 = vadd.f32 %v985_v36, %v871_v59 }
 0x17f   : > { %v1302_v54 = vpop.f32.mrf.mxu0  ;;  %v1308_v55 = vpop.f32.mrf.mxu1 }
 0x180   : > { %1017 = vst [vmem:[%s2100_s12 + $0x18] sm:$0xff] %v1007_v4  ;;  %1021 = vst [vmem:[%s2100_s12 + $0x38] sm:$0xff] %v1011_v58  ;;  %v1006_v5 = vmax.f32 %v966_v50, 0.0  ;;  %v1010_v56 = vmax.f32 %v986_v46, 0.0  ;;  %v981_v63 = vadd.f32 %v1302_v54, %v866_v51  ;;  %v1001_v0 = vadd.f32 %v1308_v55, %v886_v62 }
 0x181   : > { %v975_v32 = vpop.f32.mrf.mxu0  ;;  %v995_v18 = vpop.f32.mrf.mxu1 }
 0x182   : > { %1016 = vst [vmem:[%s2100_s12 + $0x10] sm:$0xff] %v1006_v5  ;;  %1020 = vst [vmem:[%s2100_s12 + $0x30] sm:$0xff] %v1010_v56  ;;  %v1009_v23 = vmax.f32 %v981_v63, 0.0  ;;  %v1013_v61 = vmax.f32 %v1001_v0, 0.0  ;;  %v976_v39 = vadd.f32 %v975_v32, %v861_v17  ;;  %v996_v20 = vadd.f32 %v995_v18, %v881_v42 }
 0x184   : > { %1019 = vst [vmem:[%s2100_s12 + $0x28] sm:$0xff] %v1009_v23  ;;  %1023 = vst [vmem:[%s2100_s12 + $0x48] sm:$0xff] %v1013_v61  ;;  %v1008_v14 = vmax.f32 %v976_v39, 0.0  ;;  %v1012_v1 = vmax.f32 %v996_v20, 0.0 }
 0x186   : > { %1018 = vst [vmem:[%s2100_s12 + $0x20] sm:$0xff] %v1008_v14  ;;  %1022 = vst [vmem:[%s2100_s12 + $0x40] sm:$0xff] %v1012_v1 }
 0x187 PF: > { %s13_s14 = sadd.s32 1, %s1474_s14   ;;  %s2125_s12 = smov %s1470_s13 }
 0x188   : > { %p10_p5 = scmp.ge.s32.totalorder %s13_s14, 4   ;;  %s2126_s13 = smov %s2128_s15 }
 0x18a   :  { %12 = sbr.rel (!%p10_p5) target bundleno = 2 (0x2), region = 62 }

// kernel: stem_block_forward.9
= control target key start
LH: loop header
LB: loop body
LE: loop exit
PB: predicated region body
PF: predicated region fallthrough
CT: control target
= control target key end

     0   :  { %s788_s18 = smov 0   ;;  %s790_s19 = smov 0   ;;  %s891_s0 = inlined_call_operand.vmem [shape: f32[2,32,256], index: 0, kind: input, shape index: {}]   ;;  %s892_s1 = inlined_call_operand.vmem [shape: f32[2,32,256], index: 1, kind: input, shape index: {}]   ;;  %s893_s2 = inlined_call_operand.vmem [shape: f32[32,32], index: 2, kind: input, shape index: {}]   ;;  %s894_s3 = inlined_call_operand.vmem [shape: f32[32,32], index: 3, kind: input, shape index: {}]   ;;  %s895_s4 = inlined_call_operand.vmem [shape: f32[32,1], index: 4, kind: input, shape index: {}]   ;;  %s896_s5 = inlined_call_operand.vmem [shape: f32[2,32,256], index: 5, kind: output, shape index: {}]  }
   0x1   :  { %s792_s20 = smov 0  }
   0x2 LB: > { %s27_s21 = sadd.s32 1, %s750_s19  ;;  %p684_p0 = scmp.ge.s32.totalorder %s754_s20, 1  ;;  %s754_s20 = sphi %s792_s20, %s15_s20   ;;  %s750_s19 = sphi %s790_s19, %s898_s19   ;;  %s746_s18 = sphi %s788_s18, %s897_s18  }
   0x3   : > { %p29_p1 = scmp.ge.s32.totalorder %s27_s21, 2  ;;  %p225_p2 = scmp.lt.s32.totalorder %s754_s20, 3 }
   0x5   : > { %s900_s21 = smov (%p29_p1, %s27_s21), 0  ;;  %p226_p3 = pnand %p684_p0, %p225_p2 }
   0x6   : > { %p271_p4 = scmp.lt.s32.totalorder (!%p226_p3), %s746_s18, 1 }
   0x7   : > { %229 = sbr.rel (%p226_p3) target bundleno = 239 (0xef), region = 40 }
   0xc   : > { %v756_v0 = vmov 0.0   ;;  %s902_s18 = smov (!%p271_p4, %s746_s18), 1  ;;  %v757_v1 = vmov 0   ;;  %v527_v2 = vld [vmem:[%s895_s4] sm:$0xff]  ;;  %v529_v3 = vld [vmem:[%s895_s4 + $0x10] sm:$0xff]  ;;  %vm324_vm0 = vcmask 261120  }
   0xd   : > { %401 = vmatprep.mubr.f32.mxu0 %v756_v0  ;;  %502 = vmatprep.mubr.f32.mxu1 %v756_v0  ;;  %s814_s26 = sshll.u32 %s902_s18, 6  ;;  %v312_v20 = vld [vmem:[%s894_s3] sm:$0xff]  ;;  %v528_v22 = vld [vmem:[%s895_s4 + $0x8] sm:$0xff]  ;;  %v530_v23 = vld [vmem:[%s895_s4 + $0x18] sm:$0xff] }
   0xe   : > { %730 = vset.pattern.permute.xlu0 %v757_v1  ;;  %731 = vset.pattern.permute.xlu1 %v757_v1  ;;  %s288_s29 = scalar_lea.vmem %s892_s1, %s814_s26  ;;  %s278_s7 = scalar_lea.vmem %s891_s0, %s814_s26  ;;  %v300_v21 = vld [vmem:[%s893_s2] sm:$0xff]  ;;  %v313_v24 = vld [vmem:[%s894_s3 + $0x8] sm:$0xff]  ;;  %v314_v26 = vld [vmem:[%s894_s3 + $0x10] sm:$0xff] }
   0xf   : > { %533 = vperm.xlu0 %730, %v527_v2   ;;  %543 = vperm.xlu1 %731, %v529_v3   ;;  %v323_v4 = vld [vmem:[%s288_s29 + $0x38] sm:$0xff]  ;;  %v322_v6 = vld [vmem:[%s288_s29 + $0x30] sm:$0xff]  ;;  %v321_v8 = vld [vmem:[%s288_s29 + $0x28] sm:$0xff]  ;;  %s872_s9 = scalar_lea.vmem %s896_s5, %s814_s26 }
  0x10   : > { %v311_v5 = vld [vmem:[%s278_s7 + $0x38] sm:$0xff]  ;;  %361 = vmatprep.subr.mxu0 %v323_v4  ;;  %v310_v7 = vld [vmem:[%s278_s7 + $0x30] sm:$0xff]  ;;  %v309_v9 = vld [vmem:[%s278_s7 + $0x28] sm:$0xff] }
  0x11   : > { %462 = vmatprep.subr.mxu1 %v311_v5  ;;  %362 = vmatpush1.msra.mxu0 %v322_v6  ;;  %v320_v10 = vld [vmem:[%s288_s29 + $0x20] sm:$0xff]  ;;  %v319_v12 = vld [vmem:[%s288_s29 + $0x18] sm:$0xff]  ;;  %v318_v14 = vld [vmem:[%s288_s29 + $0x10] sm:$0xff] }
  0x12   : > { %463 = vmatpush1.msra.mxu1 %v310_v7  ;;  %v308_v11 = vld [vmem:[%s278_s7 + $0x20] sm:$0xff]  ;;  %363 = vmatprep.subr.mxu0 %v321_v8  ;;  %v307_v13 = vld [vmem:[%s278_s7 + $0x18] sm:$0xff]  ;;  %v306_v15 = vld [vmem:[%s278_s7 + $0x10] sm:$0xff] }
  0x13   : > { %464 = vmatprep.subr.mxu1 %v309_v9  ;;  %364 = vmatpush1.msra.mxu0 %v320_v10  ;;  %v317_v16 = vld [vmem:[%s288_s29 + $0x8] sm:$0xff]  ;;  %v316_v18 = vld [vmem:[%s288_s29] sm:$0xff]  ;;  %v302_v27 = vld [vmem:[%s893_s2 + $0x10] sm:$0xff] }
  0x14   : > { %465 = vmatpush1.msra.mxu1 %v308_v11  ;;  %v305_v17 = vld [vmem:[%s278_s7 + $0x8] sm:$0xff]  ;;  %365 = vmatprep.subr.mxu0 %v319_v12  ;;  %v304_v19 = vld [vmem:[%s278_s7] sm:$0xff]  ;;  %v315_v28 = vld [vmem:[%s894_s3 + $0x18] sm:$0xff] }
  0x15   : > { %466 = vmatprep.subr.mxu1 %v307_v13  ;;  %366 = vmatpush1.msra.mxu0 %v318_v14  ;;  %v301_v25 = vld [vmem:[%s893_s2 + $0x8] sm:$0xff]  ;;  %v303_v29 = vld [vmem:[%s893_s2 + $0x18] sm:$0xff] }
  0x16   : > { %467 = vmatpush1.msra.mxu1 %v306_v15  ;;  %367 = vmatprep.subr.mxu0 %v317_v16 }
  0x17   : > { %468 = vmatprep.subr.mxu1 %v305_v17  ;;  %368 = vmatpush1.msra.mxu0 %v316_v18 }
  0x18   : > { %469 = vmatpush1.msra.mxu1 %v304_v19  ;;  %691 = vmatmul.mubr.msk.f32.vlgmr.msra.gmra.mxu0 %vm324_vm0, %v312_v20 }
  0x19   : > { %695 = vmatmul.mubr.msk.f32.vlgmr.msra.gmra.mxu1 %vm324_vm0, %v300_v21  ;;  %407 = vmatprep.mubr.f32.mxu0 %v756_v0 }
  0x1a   : > { %508 = vmatprep.mubr.f32.mxu1 %v756_v0  ;;  %538 = vperm.xlu0 %730, %v528_v22  }
  0x1b   : > { %548 = vperm.xlu1 %731, %v530_v23  }
  0x1c   : > { %692 = vmatmul.mubr.msk.f32.gmra.mxu0 %vm324_vm0, %v313_v24 }
  0x1d   : > { %696 = vmatmul.mubr.msk.f32.gmra.mxu1 %vm324_vm0, %v301_v25  ;;  %413 = vmatprep.mubr.f32.mxu0 %v756_v0 }
  0x1e   : > { %514 = vmatprep.mubr.f32.mxu1 %v756_v0 }
  0x20   : > { %693 = vmatmul.mubr.msk.f32.gmra.mxu0 %vm324_vm0, %v314_v26 }
  0x21   : > { %697 = vmatmul.mubr.msk.f32.gmra.mxu1 %vm324_vm0, %v302_v27  ;;  %419 = vmatprep.mubr.f32.mxu0 %v756_v0 }
  0x22   : > { %520 = vmatprep.mubr.f32.mxu1 %v756_v0 }
  0x24   : > { %694 = vmatmul.mubr.msk.f32.gmra.mxu0 %vm324_vm0, %v315_v28 }
  0x25   : > { %698 = vmatmul.mubr.msk.f32.gmra.mxu1 %vm324_vm0, %v303_v29 }
  0x8a   : > { %v534_v30 = vpop.permute.xlu0 %533  ;;  %v544_v49 = vpop.permute.xlu1 %543 }
  0x95   : > { %v539_v38 = vpop.permute.xlu0 %538 }
  0x96   : > { %v549_v0 = vpop.permute.xlu1 %548 }
  0xd8   : > { %v403_v31 = vpop.f32.mrf.mxu0 }
  0xd9   : > { %v504_v32 = vpop.f32.mrf.mxu1 }
  0xda   : > { %v505_v33 = vadd.f32 %v504_v32, %v403_v31  ;;  %v405_v34 = vpop.f32.mrf.mxu0 }
  0xdb   : > { %v506_v35 = vpop.f32.mrf.mxu1 }
  0xdc   : > { %v551_v36 = vadd.f32 %v534_v30, %v505_v33  ;;  %v507_v37 = vadd.f32 %v506_v35, %v405_v34  ;;  %v409_v39 = vpop.f32.mrf.mxu0 }
  0xdd   : > { %v510_v40 = vpop.f32.mrf.mxu1 }
  0xde   : > { %v559_v41 = vmax.f32 %v551_v36, 0.0  ;;  %v552_v42 = vadd.f32 %v534_v30, %v507_v37  ;;  %v511_v43 = vadd.f32 %v510_v40, %v409_v39  ;;  %v411_v44 = vpop.f32.mrf.mxu0 }
  0xdf   : > { %v512_v45 = vpop.f32.mrf.mxu1 }
  0xe0   : > { %567 = vst [vmem:[%s872_s9] sm:$0xff] %v559_v41  ;;  %v560_v46 = vmax.f32 %v552_v42, 0.0  ;;  %v553_v47 = vadd.f32 %v539_v38, %v511_v43  ;;  %v513_v48 = vadd.f32 %v512_v45, %v411_v44  ;;  %v415_v50 = vpop.f32.mrf.mxu0 }
  0xe1   : > { %v516_v51 = vpop.f32.mrf.mxu1 }
  0xe2   : > { %568 = vst [vmem:[%s872_s9 + $0x8] sm:$0xff] %v560_v46  ;;  %v561_v52 = vmax.f32 %v553_v47, 0.0  ;;  %v554_v53 = vadd.f32 %v539_v38, %v513_v48  ;;  %v517_v54 = vadd.f32 %v516_v51, %v415_v50  ;;  %v417_v55 = vpop.f32.mrf.mxu0 }
  0xe3   : > { %v518_v56 = vpop.f32.mrf.mxu1 }
  0xe4   : > { %569 = vst [vmem:[%s872_s9 + $0x10] sm:$0xff] %v561_v52  ;;  %v562_v57 = vmax.f32 %v554_v53, 0.0  ;;  %v555_v58 = vadd.f32 %v544_v49, %v517_v54  ;;  %v519_v59 = vadd.f32 %v518_v56, %v417_v55  ;;  %v421_v60 = vpop.f32.mrf.mxu0 }
  0xe5   : > { %v522_v61 = vpop.f32.mrf.mxu1 }
  0xe6   : > { %570 = vst [vmem:[%s872_s9 + $0x18] sm:$0xff] %v562_v57  ;;  %v563_v62 = vmax.f32 %v555_v58, 0.0  ;;  %v556_v63 = vadd.f32 %v544_v49, %v519_v59  ;;  %v523_v1 = vadd.f32 %v522_v61, %v421_v60  ;;  %v423_v2 = vpop.f32.mrf.mxu0 }
  0xe7   : > { %v524_v3 = vpop.f32.mrf.mxu1 }
  0xe8   : > { %571 = vst [vmem:[%s872_s9 + $0x20] sm:$0xff] %v563_v62  ;;  %v564_v4 = vmax.f32 %v556_v63, 0.0  ;;  %v557_v5 = vadd.f32 %v549_v0, %v523_v1  ;;  %v525_v6 = vadd.f32 %v524_v3, %v423_v2 }
  0xea   : > { %572 = vst [vmem:[%s872_s9 + $0x28] sm:$0xff] %v564_v4  ;;  %v565_v7 = vmax.f32 %v557_v5, 0.0  ;;  %v558_v8 = vadd.f32 %v549_v0, %v525_v6 }
  0xec   : > { %573 = vst [vmem:[%s872_s9 + $0x30] sm:$0xff] %v565_v7  ;;  %v566_v9 = vmax.f32 %v558_v8, 0.0 }
  0xee   : > { %574 = vst [vmem:[%s872_s9 + $0x38] sm:$0xff] %v566_v9 }
  0xef PF: > { %s15_s20 = sadd.s32 1, %s754_s20   ;;  %s897_s18 = smov %s750_s19 }
  0xf0   : > { %p12_p5 = scmp.ge.s32.totalorder %s15_s20, 4   ;;  %s898_s19 = smov %s900_s21 }
  0xf2   :  { %14 = sbr.rel (!%p12_p5) target bundleno = 2 (0x2), region = 73 }

</bundles_post_ra>
